<compile_context>
chip_gen: v7x
topology: tpu7x:2x2x1
jax: 0.10.0
libtpu: 0.0.40
codegen_flags: <defaults>
</compile_context>

<pallas_src>
import jax
import jax.numpy as jnp
from jax.experimental import pallas as pl
from jax.experimental.pallas import tpu as pltpu

K_FC = 7 * 7 * 64        # 3136: fc1 in_features (matches the PyTorch module)
K_PAD = 3200             # 25 * 128: lane-aligned K for the fused fc1 matmul
H_FC = 1024              # fused fc1 width: [adv 512 | val 512] = 8 * 128 lanes

_VMEM = pl.BlockSpec(memory_space=pltpu.MemorySpace.VMEM)


# ----------------------------- Pallas kernels ------------------------------

def _matmul_bias_relu_kernel(x_ref, w_ref, b_ref, o_ref):
    """o = relu(x @ w + b); bf16 in / bf16 out, f32 accumulation on the MXU."""
    acc = jnp.dot(x_ref[...], w_ref[...], preferred_element_type=jnp.float32)
    o_ref[...] = jnp.maximum(acc + b_ref[...], 0.0).astype(o_ref.dtype)


def _fused_fc_head_kernel(x_ref, w1_ref, b1_ref, wh_ref, bh_ref, o_ref):
    """Entire FC + dueling-head path in one single-step kernel.

      h = relu(x @ W1 + b1)       W1 = [fc1_adv | fc1_val], K zero-padded
      r = h @ W_head + b_head     W_head block-diagonal -> r = [adv | val]
      q = val + adv - mean(adv)

    Everything after the fc1 matmul lives in vregs/VMEM; no HBM round trips
    for the [B, 1024] hidden activations.
    """
    h = jnp.maximum(
        jnp.dot(x_ref[...], w1_ref[...], preferred_element_type=jnp.float32)
        + b1_ref[...], 0.0)
    r = jnp.dot(h.astype(jnp.bfloat16), wh_ref[...],
                preferred_element_type=jnp.float32) + bh_ref[...]
    a = o_ref.shape[1]                       # num_actions
    adv = r[:, :a]
    val = r[:, a:a + 1]                      # broadcasts over actions (.expand)
    o_ref[...] = val + adv - jnp.mean(adv, axis=1, keepdims=True)


# ------------------------------ kernel wrappers -----------------------------

def matmul_bias_relu(x, w, b):
    """Single-block fused matmul+bias+ReLU (conv operands are small; all in VMEM)."""
    M = x.shape[0]
    N = w.shape[1]
    return pl.pallas_call(
        _matmul_bias_relu_kernel,
        out_shape=jax.ShapeDtypeStruct((M, N), jnp.bfloat16),
        in_specs=[_VMEM, _VMEM, _VMEM],
        out_specs=_VMEM,
    )(x, w, b)


def fused_fc_head(x, w_fc1, b_fc1, w_head, b_head):
    """Single-step fused fc1(adv|val) + ReLU + block-diag head + dueling combine."""
    B, K = x.shape
    assert K == K_PAD and K == w_fc1.shape[0]
    a1 = w_head.shape[1]                     # num_actions + 1
    num_actions = a1 - 1
    flops = 2 * B * K * H_FC + 2 * B * H_FC * a1
    bytes_accessed = (w_fc1.size * 2 + w_head.size * 2 + x.size * 2
                      + b_fc1.size * 4 + b_head.size * 4 + B * num_actions * 4)
    return pl.pallas_call(
        _fused_fc_head_kernel,
        out_shape=jax.ShapeDtypeStruct((B, num_actions), jnp.float32),
        in_specs=[_VMEM, _VMEM, _VMEM, _VMEM, _VMEM],
        out_specs=_VMEM,
        compiler_params=pltpu.CompilerParams(
            vmem_limit_bytes=32 * 1024 * 1024),
        cost_estimate=pl.CostEstimate(flops=flops, transcendentals=0,
                                      bytes_accessed=bytes_accessed),
    )(x, w_fc1, b_fc1, w_head, b_head)


# ------------------------------ conv via im2col ----------------------------

def conv2d_relu(x_nhwc, w_mat, b, *, kh, kw, stride):
    """Valid conv + bias + ReLU: host-side im2col feeding the Pallas matmul.

    Patch matrices are small (<= 0.5 MB bf16 at B=2) so the extraction is pure
    XLA layout plumbing; the matmul/bias/ReLU hot path runs in Pallas with
    lane-dense K (kh*kw*C = 256 / 512 / 576).
    """
    # TODO(synk): move the patch extraction inside a gridded, K-accumulating
    # Pallas conv kernel (feature map resident in VMEM) — required for large
    # batch (B>=128 blows the patch matrix past v7x's 64 MiB VMEM) and to
    # overlap the fc1 weight DMA with the conv phase (review items 1/4).
    B, H, W, C = x_nhwc.shape
    Co = w_mat.shape[1]
    Ho = (H - kh) // stride + 1
    Wo = (W - kw) // stride + 1
    patches = []
    for i in range(kh):
        for j in range(kw):
            patches.append(
                x_nhwc[:, i:i + stride * (Ho - 1) + 1:stride,
                          j:j + stride * (Wo - 1) + 1:stride, :])
    pat = jnp.stack(patches, axis=3).reshape(B * Ho * Wo, kh * kw * C)
    out = matmul_bias_relu(pat, w_mat, b)
    return out.reshape(B, Ho, Wo, Co)


# ------------------------------- full forward ------------------------------

@jax.jit
def dueling_dqn_forward(params, x_nchw):
    B = x_nchw.shape[0]
    x = jnp.transpose(x_nchw, (0, 2, 3, 1)).astype(jnp.bfloat16)   # NCHW -> NHWC

    # Conv stack runs at the true batch (keeps im2col patch matrices small).
    x = conv2d_relu(x, params["w1"], params["b1"], kh=8, kw=8, stride=4)  # [B,20,20,32]
    x = conv2d_relu(x, params["w2"], params["b2"], kh=4, kw=4, stride=2)  # [B, 9, 9,64]
    x = conv2d_relu(x, params["w3"], params["b3"], kh=3, kw=3, stride=1)  # [B, 7, 7,64]

    # Flatten directly in NHWC order -- fc1 weight rows were permuted at prep
    # time so this matches torch's x.view(B, -1) on the NCHW tensor exactly.
    x = x.reshape(B, K_FC)

    # One pad op aligns both the batch (full 8-row sublane for the FC kernel)
    # and K (3136 -> 3200 = 25*128 lanes); the old standalone K-pad is gone.
    B_pad = ((B + 7) // 8) * 8
    x = jnp.pad(x, ((0, B_pad - B), (0, K_PAD - K_FC)))

    q = fused_fc_head(x, params["w_fc1"], params["b_fc1"],
                      params["w_head"], params["b_head"])
    return q[:B]


# ------------------------------ parameter prep ------------------------------

def init_params(key, in_channels, num_actions):
    """Raw params in PyTorch-equivalent layout (convs OIHW, linears [in, out])."""
    ks = jax.random.split(key, 14)
    s = 0.05
    return {
        "w1": s * jax.random.normal(ks[0], (32, in_channels, 8, 8), jnp.float32),
        "b1": s * jax.random.normal(ks[1], (32,), jnp.float32),
        "w2": s * jax.random.normal(ks[2], (64, 32, 4, 4), jnp.float32),
        "b2": s * jax.random.normal(ks[3], (64,), jnp.float32),
        "w3": s * jax.random.normal(ks[4], (64, 64, 3, 3), jnp.float32),
        "b3": s * jax.random.normal(ks[5], (64,), jnp.float32),
        "w_fc1_adv": s * jax.random.normal(ks[6], (K_FC, 512), jnp.float32),
        "b_fc1_adv": s * jax.random.normal(ks[7], (512,), jnp.float32),
        "w_fc1_val": s * jax.random.normal(ks[8], (K_FC, 512), jnp.float32),
        "b_fc1_val": s * jax.random.normal(ks[9], (512,), jnp.float32),
        "w_fc2_adv": s * jax.random.normal(ks[10], (512, num_actions), jnp.float32),
        "b_fc2_adv": s * jax.random.normal(ks[11], (num_actions,), jnp.float32),
        "w_fc2_val": s * jax.random.normal(ks[12], (512, 1), jnp.float32),
        "b_fc2_val": s * jax.random.normal(ks[13], (1,), jnp.float32),
    }


def prepare_params(raw, num_actions):
    """One-time weight plumbing: fuse / permute / pad / cast to bf16."""
    def conv_w(w):                               # OIHW -> [kh*kw*Ci, Co], bf16
        co, ci, kh, kw = w.shape
        return (jnp.transpose(w, (2, 3, 1, 0))
                .reshape(kh * kw * ci, co).astype(jnp.bfloat16))

    def permute_rows(w):                         # NCHW-flatten order -> NHWC order
        return w.reshape(64, 7, 7, -1).transpose(1, 2, 0, 3).reshape(K_FC, -1)

    # fc1_adv | fc1_val fused into one lane-dense [K_PAD, 1024] weight.
    w_fc1 = jnp.concatenate([permute_rows(raw["w_fc1_adv"]),
                             permute_rows(raw["w_fc1_val"])], axis=1)
    w_fc1 = jnp.pad(w_fc1, ((0, K_PAD - K_FC), (0, 0)))
    b_fc1 = jnp.concatenate([raw["b_fc1_adv"], raw["b_fc1_val"]]).reshape(1, H_FC)

    # fc2_adv / fc2_val fused into one block-diagonal [1024, A+1] head weight:
    # h @ W_head = [h_adv @ W2_adv | h_val @ W2_val].
    a = num_actions
    w_head = jnp.zeros((H_FC, a + 1), jnp.float32)
    w_head = w_head.at[:512, :a].set(raw["w_fc2_adv"])
    w_head = w_head.at[512:, a:].set(raw["w_fc2_val"])
    b_head = jnp.concatenate([raw["b_fc2_adv"], raw["b_fc2_val"]]).reshape(1, a + 1)

    return {
        "w1": conv_w(raw["w1"]), "b1": raw["b1"].reshape(1, -1),
        "w2": conv_w(raw["w2"]), "b2": raw["b2"].reshape(1, -1),
        "w3": conv_w(raw["w3"]), "b3": raw["b3"].reshape(1, -1),
        "w_fc1": w_fc1.astype(jnp.bfloat16),
        "b_fc1": b_fc1,                              # f32, added to f32 accumulator
        "w_head": w_head.astype(jnp.bfloat16),
        "b_head": b_head,                            # f32
    }


# ------------------------------ f32 reference -------------------------------

def reference_forward(raw, x_nchw):
    """Pure-JAX f32 reference matching the PyTorch module semantics exactly."""
    hp = jax.lax.Precision.HIGHEST

    def conv(x, w, b, stride):
        y = jax.lax.conv_general_dilated(
            x, w, window_strides=(stride, stride), padding="VALID",
            dimension_numbers=("NCHW", "OIHW", "NCHW"), precision=hp)
        return jnp.maximum(y + b.reshape(1, -1, 1, 1), 0.0)

    x = conv(x_nchw, raw["w1"], raw["b1"], 4)
    x = conv(x, raw["w2"], raw["b2"], 2)
    x = conv(x, raw["w3"], raw["b3"], 1)
    x = x.reshape(x.shape[0], -1)                       # torch x.view(B, -1) on NCHW
    adv = jnp.maximum(jnp.dot(x, raw["w_fc1_adv"], precision=hp) + raw["b_fc1_adv"], 0.0)
    val = jnp.maximum(jnp.dot(x, raw["w_fc1_val"], precision=hp) + raw["b_fc1_val"], 0.0)
    adv = jnp.dot(adv, raw["w_fc2_adv"], precision=hp) + raw["b_fc2_adv"]
    val = jnp.dot(val, raw["w_fc2_val"], precision=hp) + raw["b_fc2_val"]
    return val + adv - jnp.mean(adv, axis=1, keepdims=True)


# ----------------------------------- main -----------------------------------

if __name__ == "__main__":
    batch, in_channels, num_actions = 2, 4, 6
    # Spatial size must be 84x84 so the conv stack yields 7x7x64, matching the
    # fc1 in_features = 7*7*64 of the PyTorch module.
    x = jax.random.normal(jax.random.PRNGKey(0),
                          (batch, in_channels, 84, 84), jnp.float32)
    raw = init_params(jax.random.PRNGKey(42), in_channels, num_actions)
    params = prepare_params(raw, num_actions)

    q = jax.block_until_ready(dueling_dqn_forward(params, x))
    assert q.shape == (batch, num_actions), q.shape
    assert q.dtype == jnp.float32
    assert bool(jnp.all(jnp.isfinite(q)))

    # bf16 storage / f32 accumulation vs the f32 reference: expect ~1e-2-level
    # absolute differences (q components are O(0.5)); 0.1 still catches any
    # plumbing bug (permutation / fusion / padding errors are O(1)).
    q_ref = jax.block_until_ready(reference_forward(raw, x))
    max_err = float(jnp.max(jnp.abs(q - q_ref.astype(jnp.float32))))
    assert max_err < 0.1, f"max abs err vs f32 reference: {max_err}"

    print("KERNEL_OK")
</pallas_src>

<mosaic_0001>
module attributes {stable_mosaic.version = 11 : i64} {
  func.func @_matmul_bias_relu_kernel(%arg0: memref<800x256xbf16, #tpu.memory_space<vmem>>, %arg1: memref<256x32xbf16, #tpu.memory_space<vmem>>, %arg2: memref<1x32xf32, #tpu.memory_space<vmem>>, %arg3: memref<800x32xbf16, #tpu.memory_space<vmem>>) attributes {dimension_semantics = [], scalar_prefetch = 0 : i64, scratch_operands = 0 : i64, tpu.core_type = #tpu.core_type<tc>} {
    %c0 = arith.constant 0 : index
    %c0_0 = arith.constant 0 : index
    %0 = vector.load %arg0[%c0, %c0_0] : memref<800x256xbf16, #tpu.memory_space<vmem>>, vector<800x256xbf16>
    %c0_1 = arith.constant 0 : index
    %c0_2 = arith.constant 0 : index
    %1 = vector.load %arg1[%c0_1, %c0_2] : memref<256x32xbf16, #tpu.memory_space<vmem>>, vector<256x32xbf16>
    %cst = arith.constant dense<0.000000e+00> : vector<800x32xf32>
    %2 = tpu.matmul %0, %1, %cst {dimension_numbers = #tpu.dot_dimension_numbers<[1], [0], [0], [1], [0, 0, 1, 1], [], []>} : vector<800x256xbf16>, vector<256x32xbf16>, vector<800x32xf32> -> vector<800x32xf32>
    %c0_3 = arith.constant 0 : index
    %c0_4 = arith.constant 0 : index
    %3 = vector.load %arg2[%c0_3, %c0_4] : memref<1x32xf32, #tpu.memory_space<vmem>>, vector<1x32xf32>
    %4 = vector.broadcast %3 : vector<1x32xf32> to vector<800x32xf32>
    %5 = arith.addf %2, %4 : vector<800x32xf32>
    %cst_5 = arith.constant 0.000000e+00 : f32
    %6 = vector.broadcast %cst_5 : f32 to vector<800x32xf32>
    %7 = arith.maximumf %5, %6 : vector<800x32xf32>
    %8 = arith.truncf %7 : vector<800x32xf32> to vector<800x32xbf16>
    %c0_6 = arith.constant 0 : index
    %c0_7 = arith.constant 0 : index
    %9 = vector.load %arg3[%c0_6, %c0_7] : memref<800x32xbf16, #tpu.memory_space<vmem>>, vector<800x32xbf16>
    tpu.vector_store %arg3[%c0_6, %c0_7], %8 {strides = array<i32>} : memref<800x32xbf16, #tpu.memory_space<vmem>>, vector<800x32xbf16>,
    return
  }
}

module attributes {stable_mosaic.version = 11 : i64} {
  func.func @_matmul_bias_relu_kernel(%arg0: memref<162x512xbf16, #tpu.memory_space<vmem>>, %arg1: memref<512x64xbf16, #tpu.memory_space<vmem>>, %arg2: memref<1x64xf32, #tpu.memory_space<vmem>>, %arg3: memref<162x64xbf16, #tpu.memory_space<vmem>>) attributes {dimension_semantics = [], scalar_prefetch = 0 : i64, scratch_operands = 0 : i64, tpu.core_type = #tpu.core_type<tc>} {
    %c0 = arith.constant 0 : index
    %c0_0 = arith.constant 0 : index
    %0 = vector.load %arg0[%c0, %c0_0] : memref<162x512xbf16, #tpu.memory_space<vmem>>, vector<162x512xbf16>
    %c0_1 = arith.constant 0 : index
    %c0_2 = arith.constant 0 : index
    %1 = vector.load %arg1[%c0_1, %c0_2] : memref<512x64xbf16, #tpu.memory_space<vmem>>, vector<512x64xbf16>
    %cst = arith.constant dense<0.000000e+00> : vector<162x64xf32>
    %2 = tpu.matmul %0, %1, %cst {dimension_numbers = #tpu.dot_dimension_numbers<[1], [0], [0], [1], [0, 0, 1, 1], [], []>} : vector<162x512xbf16>, vector<512x64xbf16>, vector<162x64xf32> -> vector<162x64xf32>
    %c0_3 = arith.constant 0 : index
    %c0_4 = arith.constant 0 : index
    %3 = vector.load %arg2[%c0_3, %c0_4] : memref<1x64xf32, #tpu.memory_space<vmem>>, vector<1x64xf32>
    %4 = vector.broadcast %3 : vector<1x64xf32> to vector<162x64xf32>
    %5 = arith.addf %2, %4 : vector<162x64xf32>
    %cst_5 = arith.constant 0.000000e+00 : f32
    %6 = vector.broadcast %cst_5 : f32 to vector<162x64xf32>
    %7 = arith.maximumf %5, %6 : vector<162x64xf32>
    %8 = arith.truncf %7 : vector<162x64xf32> to vector<162x64xbf16>
    %c0_6 = arith.constant 0 : index
    %c0_7 = arith.constant 0 : index
    %9 = vector.load %arg3[%c0_6, %c0_7] : memref<162x64xbf16, #tpu.memory_space<vmem>>, vector<162x64xbf16>
    tpu.vector_store %arg3[%c0_6, %c0_7], %8 {strides = array<i32>} : memref<162x64xbf16, #tpu.memory_space<vmem>>, vector<162x64xbf16>,
    return
  }
}

module attributes {stable_mosaic.version = 11 : i64} {
  func.func @_matmul_bias_relu_kernel(%arg0: memref<98x576xbf16, #tpu.memory_space<vmem>>, %arg1: memref<576x64xbf16, #tpu.memory_space<vmem>>, %arg2: memref<1x64xf32, #tpu.memory_space<vmem>>, %arg3: memref<98x64xbf16, #tpu.memory_space<vmem>>) attributes {dimension_semantics = [], scalar_prefetch = 0 : i64, scratch_operands = 0 : i64, tpu.core_type = #tpu.core_type<tc>} {
    %c0 = arith.constant 0 : index
    %c0_0 = arith.constant 0 : index
    %0 = vector.load %arg0[%c0, %c0_0] : memref<98x576xbf16, #tpu.memory_space<vmem>>, vector<98x576xbf16>
    %c0_1 = arith.constant 0 : index
    %c0_2 = arith.constant 0 : index
    %1 = vector.load %arg1[%c0_1, %c0_2] : memref<576x64xbf16, #tpu.memory_space<vmem>>, vector<576x64xbf16>
    %cst = arith.constant dense<0.000000e+00> : vector<98x64xf32>
    %2 = tpu.matmul %0, %1, %cst {dimension_numbers = #tpu.dot_dimension_numbers<[1], [0], [0], [1], [0, 0, 1, 1], [], []>} : vector<98x576xbf16>, vector<576x64xbf16>, vector<98x64xf32> -> vector<98x64xf32>
    %c0_3 = arith.constant 0 : index
    %c0_4 = arith.constant 0 : index
    %3 = vector.load %arg2[%c0_3, %c0_4] : memref<1x64xf32, #tpu.memory_space<vmem>>, vector<1x64xf32>
    %4 = vector.broadcast %3 : vector<1x64xf32> to vector<98x64xf32>
    %5 = arith.addf %2, %4 : vector<98x64xf32>
    %cst_5 = arith.constant 0.000000e+00 : f32
    %6 = vector.broadcast %cst_5 : f32 to vector<98x64xf32>
    %7 = arith.maximumf %5, %6 : vector<98x64xf32>
    %8 = arith.truncf %7 : vector<98x64xf32> to vector<98x64xbf16>
    %c0_6 = arith.constant 0 : index
    %c0_7 = arith.constant 0 : index
    %9 = vector.load %arg3[%c0_6, %c0_7] : memref<98x64xbf16, #tpu.memory_space<vmem>>, vector<98x64xbf16>
    tpu.vector_store %arg3[%c0_6, %c0_7], %8 {strides = array<i32>} : memref<98x64xbf16, #tpu.memory_space<vmem>>, vector<98x64xbf16>,
    return
  }
}

module attributes {stable_mosaic.version = 11 : i64} {
  func.func @_fused_fc_head_kernel(%arg0: memref<8x3200xbf16, #tpu.memory_space<vmem>>, %arg1: memref<3200x1024xbf16, #tpu.memory_space<vmem>>, %arg2: memref<1x1024xf32, #tpu.memory_space<vmem>>, %arg3: memref<1024x7xbf16, #tpu.memory_space<vmem>>, %arg4: memref<1x7xf32, #tpu.memory_space<vmem>>, %arg5: memref<8x6xf32, #tpu.memory_space<vmem>>) attributes {dimension_semantics = [], scalar_prefetch = 0 : i64, scratch_operands = 0 : i64, tpu.core_type = #tpu.core_type<tc>} {
    %c0 = arith.constant 0 : index
    %c0_0 = arith.constant 0 : index
    %0 = vector.load %arg0[%c0, %c0_0] : memref<8x3200xbf16, #tpu.memory_space<vmem>>, vector<8x3200xbf16>
    %c0_1 = arith.constant 0 : index
    %c0_2 = arith.constant 0 : index
    %1 = vector.load %arg1[%c0_1, %c0_2] : memref<3200x1024xbf16, #tpu.memory_space<vmem>>, vector<3200x1024xbf16>
    %cst = arith.constant dense<0.000000e+00> : vector<8x1024xf32>
    %2 = tpu.matmul %0, %1, %cst {dimension_numbers = #tpu.dot_dimension_numbers<[1], [0], [0], [1], [0, 0, 1, 1], [], []>} : vector<8x3200xbf16>, vector<3200x1024xbf16>, vector<8x1024xf32> -> vector<8x1024xf32>
    %c0_3 = arith.constant 0 : index
    %c0_4 = arith.constant 0 : index
    %3 = vector.load %arg2[%c0_3, %c0_4] : memref<1x1024xf32, #tpu.memory_space<vmem>>, vector<1x1024xf32>
    %4 = vector.broadcast %3 : vector<1x1024xf32> to vector<8x1024xf32>
    %5 = arith.addf %2, %4 : vector<8x1024xf32>
    %cst_5 = arith.constant 0.000000e+00 : f32
    %6 = vector.broadcast %cst_5 : f32 to vector<8x1024xf32>
    %7 = arith.maximumf %5, %6 : vector<8x1024xf32>
    %8 = arith.truncf %7 : vector<8x1024xf32> to vector<8x1024xbf16>
    %c0_6 = arith.constant 0 : index
    %c0_7 = arith.constant 0 : index
    %9 = vector.load %arg3[%c0_6, %c0_7] : memref<1024x7xbf16, #tpu.memory_space<vmem>>, vector<1024x7xbf16>
    %cst_8 = arith.constant dense<0.000000e+00> : vector<8x7xf32>
    %10 = tpu.matmul %8, %9, %cst_8 {dimension_numbers = #tpu.dot_dimension_numbers<[1], [0], [0], [1], [0, 0, 1, 1], [], []>} : vector<8x1024xbf16>, vector<1024x7xbf16>, vector<8x7xf32> -> vector<8x7xf32>
    %c0_9 = arith.constant 0 : index
    %c0_10 = arith.constant 0 : index
    %11 = vector.load %arg4[%c0_9, %c0_10] : memref<1x7xf32, #tpu.memory_space<vmem>>, vector<1x7xf32>
    %12 = vector.broadcast %11 : vector<1x7xf32> to vector<8x7xf32>
    %13 = arith.addf %10, %12 : vector<8x7xf32>
    %14 = vector.extract_strided_slice %13 {offsets = [0, 0], sizes = [8, 6], strides = [1, 1]} : vector<8x7xf32> to vector<8x6xf32>
    %15 = vector.extract_strided_slice %13 {offsets = [0, 6], sizes = [8, 1], strides = [1, 1]} : vector<8x7xf32> to vector<8x1xf32>
    %16 = vector.broadcast %15 : vector<8x1xf32> to vector<8x6xf32>
    %17 = arith.addf %16, %14 : vector<8x6xf32>
    %cst_11 = arith.constant dense<0.000000e+00> : vector<8xf32>
    %18 = vector.multi_reduction <add>, %14, %cst_11 [1] : vector<8x6xf32> to vector<8xf32>
    %19 = vector.shape_cast %18 : vector<8xf32> to vector<8x1xf32>
    %cst_12 = arith.constant 6.000000e+00 : f32
    %20 = vector.broadcast %cst_12 : f32 to vector<8x1xf32>
    %21 = arith.divf %19, %20 : vector<8x1xf32>
    %22 = vector.broadcast %21 : vector<8x1xf32> to vector<8x6xf32>
    %23 = arith.subf %17, %22 : vector<8x6xf32>
    %c0_13 = arith.constant 0 : index
    %c0_14 = arith.constant 0 : index
    %24 = vector.load %arg5[%c0_13, %c0_14] : memref<8x6xf32, #tpu.memory_space<vmem>>, vector<8x6xf32>
    tpu.vector_store %arg5[%c0_13, %c0_14], %23 {strides = array<i32>} : memref<8x6xf32, #tpu.memory_space<vmem>>, vector<8x6xf32>,
    return
  }
}

</mosaic_0001>

<bundles_post_ra>
// kernel: dueling_dqn_forward.4
= control target key start
LH: loop header
LB: loop body
LE: loop exit
PB: predicated region body
PF: predicated region fallthrough
CT: control target
= control target key end

     0   :  { %v2305_v0 = vmov 0   ;;  %vm1683_vm0 = vcmask 257024   ;;  %s3216_s1 = inlined_call_operand.vmem [shape: bf16[256,32], index: 1, kind: input, shape index: {}]   ;;  %s3217_s0 = inlined_call_operand.vmem [shape: bf16[800,256], index: 0, kind: input, shape index: {}]   ;;  %s3218_s2 = inlined_call_operand.vmem [shape: f32[1,32], index: 2, kind: input, shape index: {}]   ;;  %s3219_s3 = inlined_call_operand.vmem [shape: bf16[800,32], index: 3, kind: output, shape index: {}]  }
   0x1   :  { %750 = vmatprep.subr.bf16.mxu0 %v2305_v0  ;;  %2105 = vmatprep.subr.bf16.mxu1 %v2305_v0  ;;  %v2138_v1 = vld [vmem:[%s3216_s1] sm:$0xff]   ;;  %v2139_v2 = vld [vmem:[%s3216_s1 + $0x8] sm:$0xff]   ;;  %v2140_v3 = vld [vmem:[%s3216_s1 + $0x10] sm:$0xff]  }
   0x2   :  { %751 = vmatpush1.bf16.msra.mxu0 %v2138_v1  ;;  %2121 = vmatpush1.bf16.msra.mxu1 %v2138_v1  ;;  %v2141_v4 = vld [vmem:[%s3216_s1 + $0x18] sm:$0xff]   ;;  %v2142_v5 = vld [vmem:[%s3216_s1 + $0x20] sm:$0xff]   ;;  %v2143_v7 = vld [vmem:[%s3216_s1 + $0x28] sm:$0xff]  }
   0x3   :  { %752 = vmatprep.subr.bf16.mxu0 %v2305_v0  ;;  %2106 = vmatprep.subr.bf16.mxu1 %v2305_v0  ;;  %v2156_v6 = vld [vmem:[%s3217_s0 + $0x4] ss:$8 sps:$4 sm:$0xff]   ;;  %v2159_v8 = vld [vmem:[%s3217_s0 + $0x194] ss:$8 sps:$4 sm:$0xff]   ;;  %v2154_v19 = vld [vmem:[%s3217_s0] ss:$8 sps:$4 sm:$0xff]  }
   0x4   :  { %782 = vmatprep.mubr.bf16.mxu0 %v2156_v6  ;;  %982 = vmatprep.mubr.bf16.mxu1 %v2159_v8  ;;  %v2144_v9 = vld [vmem:[%s3216_s1 + $0x30] sm:$0xff]   ;;  %v2145_v10 = vld [vmem:[%s3216_s1 + $0x38] sm:$0xff]   ;;  %v2146_v11 = vld [vmem:[%s3216_s1 + $0x40] sm:$0xff]  }
   0x5   :  { %v2147_v12 = vld [vmem:[%s3216_s1 + $0x48] sm:$0xff]   ;;  %v2148_v13 = vld [vmem:[%s3216_s1 + $0x50] sm:$0xff]   ;;  %v2149_v14 = vld [vmem:[%s3216_s1 + $0x58] sm:$0xff]  }
   0x6   :  { %753 = vmatpush1.bf16.msra.mxu0 %v2139_v2  ;;  %2122 = vmatpush1.bf16.msra.mxu1 %v2139_v2  ;;  %v2150_v15 = vld [vmem:[%s3216_s1 + $0x60] sm:$0xff]   ;;  %v2151_v16 = vld [vmem:[%s3216_s1 + $0x68] sm:$0xff]   ;;  %v2152_v17 = vld [vmem:[%s3216_s1 + $0x70] sm:$0xff]  }
   0x7   :  { %754 = vmatprep.subr.bf16.mxu0 %v2305_v0  ;;  %2107 = vmatprep.subr.bf16.mxu1 %v2305_v0  ;;  %v2153_v18 = vld [vmem:[%s3216_s1 + $0x78] sm:$0xff]   ;;  %v2162_v22 = vld [vmem:[%s3217_s0 + $0x1a4] ss:$8 sps:$4 sm:$0xff]   ;;  %v2165_v24 = vld [vmem:[%s3217_s0 + $0x1a0] ss:$8 sps:$4 sm:$0xff]  }
   0x8   :  { %v2157_v20 = vld [vmem:[%s3217_s0 + $0x190] ss:$8 sps:$4 sm:$0xff]   ;;  %v2160_v21 = vld [vmem:[%s3217_s0 + $0x14] ss:$8 sps:$4 sm:$0xff]   ;;  %v2166_v25 = vld [vmem:[%s3217_s0 + $0x24] ss:$8 sps:$4 sm:$0xff]  }
   0x9   :  { %v2164_v23 = vld [vmem:[%s3217_s0 + $0x10] ss:$8 sps:$4 sm:$0xff]   ;;  %v2168_v26 = vld [vmem:[%s3217_s0 + $0x1b4] ss:$8 sps:$4 sm:$0xff]   ;;  %v2170_v27 = vld [vmem:[%s3217_s0 + $0x20] ss:$8 sps:$4 sm:$0xff]  }
   0xa   :  { %755 = vmatpush1.bf16.msra.mxu0 %v2140_v3  ;;  %2123 = vmatpush1.bf16.msra.mxu1 %v2140_v3  ;;  %v2171_v28 = vld [vmem:[%s3217_s0 + $0x1b0] ss:$8 sps:$4 sm:$0xff]   ;;  %v2172_v29 = vld [vmem:[%s3217_s0 + $0x34] ss:$8 sps:$4 sm:$0xff]   ;;  %v2174_v30 = vld [vmem:[%s3217_s0 + $0x1c4] ss:$8 sps:$4 sm:$0xff]  }
   0xb   :  { %756 = vmatprep.subr.bf16.mxu0 %v2305_v0  ;;  %2108 = vmatprep.subr.bf16.mxu1 %v2305_v0  ;;  %v2176_v31 = vld [vmem:[%s3217_s0 + $0x30] ss:$8 sps:$4 sm:$0xff]   ;;  %v2177_v32 = vld [vmem:[%s3217_s0 + $0x1c0] ss:$8 sps:$4 sm:$0xff]   ;;  %v2178_v33 = vld [vmem:[%s3217_s0 + $0x44] ss:$8 sps:$4 sm:$0xff]  }
   0xc   :  { %v2180_v34 = vld [vmem:[%s3217_s0 + $0x1d4] ss:$8 sps:$4 sm:$0xff]   ;;  %v2182_v35 = vld [vmem:[%s3217_s0 + $0x40] ss:$8 sps:$4 sm:$0xff]   ;;  %v2183_v36 = vld [vmem:[%s3217_s0 + $0x1d0] ss:$8 sps:$4 sm:$0xff]  }
   0xd   :  { %v2184_v37 = vld [vmem:[%s3217_s0 + $0x54] ss:$8 sps:$4 sm:$0xff]   ;;  %v2186_v38 = vld [vmem:[%s3217_s0 + $0x1e4] ss:$8 sps:$4 sm:$0xff]   ;;  %v2188_v39 = vld [vmem:[%s3217_s0 + $0x50] ss:$8 sps:$4 sm:$0xff]  }
   0xe   :  { %757 = vmatpush1.bf16.msra.mxu0 %v2141_v4  ;;  %2124 = vmatpush1.bf16.msra.mxu1 %v2141_v4  ;;  %v2189_v40 = vld [vmem:[%s3217_s0 + $0x1e0] ss:$8 sps:$4 sm:$0xff]   ;;  %v2190_v41 = vld [vmem:[%s3217_s0 + $0x64] ss:$8 sps:$4 sm:$0xff]   ;;  %v2192_v42 = vld [vmem:[%s3217_s0 + $0x1f4] ss:$8 sps:$4 sm:$0xff]  }
   0xf   :  { %758 = vmatprep.subr.bf16.mxu0 %v2305_v0  ;;  %2109 = vmatprep.subr.bf16.mxu1 %v2305_v0  ;;  %v2194_v43 = vld [vmem:[%s3217_s0 + $0x60] ss:$8 sps:$4 sm:$0xff]   ;;  %v2195_v44 = vld [vmem:[%s3217_s0 + $0x1f0] ss:$8 sps:$4 sm:$0xff]   ;;  %v2196_v45 = vld [vmem:[%s3217_s0 + $0x74] ss:$8 sps:$4 sm:$0xff]  }
  0x10   :  { %v2198_v46 = vld [vmem:[%s3217_s0 + $0x204] ss:$8 sps:$4 sm:$0xff]   ;;  %v2200_v47 = vld [vmem:[%s3217_s0 + $0x70] ss:$8 sps:$4 sm:$0xff]   ;;  %v2201_v48 = vld [vmem:[%s3217_s0 + $0x200] ss:$8 sps:$4 sm:$0xff]  }
  0x11   :  { %v2202_v49 = vld [vmem:[%s3217_s0 + $0x84] ss:$8 sps:$4 sm:$0xff]   ;;  %v2204_v50 = vld [vmem:[%s3217_s0 + $0x214] ss:$8 sps:$4 sm:$0xff]   ;;  %v2206_v51 = vld [vmem:[%s3217_s0 + $0x80] ss:$8 sps:$4 sm:$0xff]  }
  0x12   :  { %759 = vmatpush1.bf16.msra.mxu0 %v2142_v5  ;;  %2125 = vmatpush1.bf16.msra.mxu1 %v2142_v5  ;;  %v2207_v52 = vld [vmem:[%s3217_s0 + $0x210] ss:$8 sps:$4 sm:$0xff]   ;;  %v2208_v53 = vld [vmem:[%s3217_s0 + $0x94] ss:$8 sps:$4 sm:$0xff]   ;;  %v2210_v54 = vld [vmem:[%s3217_s0 + $0x224] ss:$8 sps:$4 sm:$0xff]  }
  0x13   :  { %760 = vmatprep.subr.bf16.mxu0 %v2305_v0  ;;  %2110 = vmatprep.subr.bf16.mxu1 %v2305_v0  ;;  %v2212_v55 = vld [vmem:[%s3217_s0 + $0x90] ss:$8 sps:$4 sm:$0xff]   ;;  %v2213_v56 = vld [vmem:[%s3217_s0 + $0x220] ss:$8 sps:$4 sm:$0xff]   ;;  %v2214_v57 = vld [vmem:[%s3217_s0 + $0xa4] ss:$8 sps:$4 sm:$0xff]  }
  0x14   :  { %v2216_v58 = vld [vmem:[%s3217_s0 + $0x234] ss:$8 sps:$4 sm:$0xff]   ;;  %v2218_v59 = vld [vmem:[%s3217_s0 + $0xa0] ss:$8 sps:$4 sm:$0xff]   ;;  %v2219_v60 = vld [vmem:[%s3217_s0 + $0x230] ss:$8 sps:$4 sm:$0xff]  }
  0x15   :  { %v2220_v61 = vld [vmem:[%s3217_s0 + $0xb4] ss:$8 sps:$4 sm:$0xff]   ;;  %v2222_v62 = vld [vmem:[%s3217_s0 + $0x244] ss:$8 sps:$4 sm:$0xff]   ;;  %v2224_v63 = vld [vmem:[%s3217_s0 + $0xb0] ss:$8 sps:$4 sm:$0xff]  }
  0x16   :  { %761 = vmatpush1.bf16.msra.mxu0 %v2143_v7  ;;  %2126 = vmatpush1.bf16.msra.mxu1 %v2143_v7  ;;  %v2226_v1 = vld [vmem:[%s3217_s0 + $0xc4] ss:$8 sps:$4 sm:$0xff]   ;;  %v2228_v2 = vld [vmem:[%s3217_s0 + $0x254] ss:$8 sps:$4 sm:$0xff]   ;;  %v2230_v3 = vld [vmem:[%s3217_s0 + $0xc0] ss:$8 sps:$4 sm:$0xff]  }
  0x17   :  { %762 = vmatprep.subr.bf16.mxu0 %v2305_v0  ;;  %2111 = vmatprep.subr.bf16.mxu1 %v2305_v0  ;;  %v2231_v4 = vld [vmem:[%s3217_s0 + $0x250] ss:$8 sps:$4 sm:$0xff]   ;;  %v2232_v5 = vld [vmem:[%s3217_s0 + $0xd4] ss:$8 sps:$4 sm:$0xff]   ;;  %v2234_v6 = vld [vmem:[%s3217_s0 + $0x264] ss:$8 sps:$4 sm:$0xff]  }
  0x18   :  { %v2236_v7 = vld [vmem:[%s3217_s0 + $0xd0] ss:$8 sps:$4 sm:$0xff]   ;;  %v2237_v8 = vld [vmem:[%s3217_s0 + $0x260] ss:$8 sps:$4 sm:$0xff]  }
  0x1a   :  { %763 = vmatpush1.bf16.msra.mxu0 %v2144_v9  ;;  %2127 = vmatpush1.bf16.msra.mxu1 %v2144_v9  ;;  %v2238_v9 = vld [vmem:[%s3217_s0 + $0xe4] ss:$8 sps:$4 sm:$0xff]  }
  0x1b   :  { %764 = vmatprep.subr.bf16.mxu0 %v2305_v0  ;;  %2112 = vmatprep.subr.bf16.mxu1 %v2305_v0 }
  0x1e   :  { %765 = vmatpush1.bf16.msra.mxu0 %v2145_v10  ;;  %2128 = vmatpush1.bf16.msra.mxu1 %v2145_v10  ;;  %v2240_v10 = vld [vmem:[%s3217_s0 + $0x274] ss:$8 sps:$4 sm:$0xff]  }
  0x1f   :  { %766 = vmatprep.subr.bf16.mxu0 %v2305_v0  ;;  %2113 = vmatprep.subr.bf16.mxu1 %v2305_v0 }
  0x22   :  { %767 = vmatpush1.bf16.msra.mxu0 %v2146_v11  ;;  %2129 = vmatpush1.bf16.msra.mxu1 %v2146_v11  ;;  %v2242_v11 = vld [vmem:[%s3217_s0 + $0xe0] ss:$8 sps:$4 sm:$0xff]  }
  0x23   :  { %768 = vmatprep.subr.bf16.mxu0 %v2305_v0  ;;  %2114 = vmatprep.subr.bf16.mxu1 %v2305_v0 }
  0x26   :  { %769 = vmatpush1.bf16.msra.mxu0 %v2147_v12  ;;  %2130 = vmatpush1.bf16.msra.mxu1 %v2147_v12  ;;  %v2243_v12 = vld [vmem:[%s3217_s0 + $0x270] ss:$8 sps:$4 sm:$0xff]  }
  0x27   :  { %770 = vmatprep.subr.bf16.mxu0 %v2305_v0  ;;  %2115 = vmatprep.subr.bf16.mxu1 %v2305_v0 }
  0x2a   :  { %771 = vmatpush1.bf16.msra.mxu0 %v2148_v13  ;;  %2131 = vmatpush1.bf16.msra.mxu1 %v2148_v13  ;;  %v2244_v13 = vld [vmem:[%s3217_s0 + $0xf4] ss:$8 sps:$4 sm:$0xff]  }
  0x2b   :  { %772 = vmatprep.subr.bf16.mxu0 %v2305_v0  ;;  %2116 = vmatprep.subr.bf16.mxu1 %v2305_v0 }
  0x2e   :  { %773 = vmatpush1.bf16.msra.mxu0 %v2149_v14  ;;  %2132 = vmatpush1.bf16.msra.mxu1 %v2149_v14  ;;  %v2246_v14 = vld [vmem:[%s3217_s0 + $0x284] ss:$8 sps:$4 sm:$0xff]  }
  0x2f   :  { %774 = vmatprep.subr.bf16.mxu0 %v2305_v0  ;;  %2117 = vmatprep.subr.bf16.mxu1 %v2305_v0 }
  0x32   :  { %775 = vmatpush1.bf16.msra.mxu0 %v2150_v15  ;;  %2133 = vmatpush1.bf16.msra.mxu1 %v2150_v15  ;;  %v2248_v15 = vld [vmem:[%s3217_s0 + $0xf0] ss:$8 sps:$4 sm:$0xff]  }
  0x33   :  { %776 = vmatprep.subr.bf16.mxu0 %v2305_v0  ;;  %2118 = vmatprep.subr.bf16.mxu1 %v2305_v0 }
  0x36   :  { %777 = vmatpush1.bf16.msra.mxu0 %v2151_v16  ;;  %2134 = vmatpush1.bf16.msra.mxu1 %v2151_v16  ;;  %v2249_v16 = vld [vmem:[%s3217_s0 + $0x280] ss:$8 sps:$4 sm:$0xff]  }
  0x37   :  { %778 = vmatprep.subr.bf16.mxu0 %v2305_v0  ;;  %2119 = vmatprep.subr.bf16.mxu1 %v2305_v0 }
  0x3a   :  { %779 = vmatpush1.bf16.msra.mxu0 %v2152_v17  ;;  %2135 = vmatpush1.bf16.msra.mxu1 %v2152_v17  ;;  %v2250_v17 = vld [vmem:[%s3217_s0 + $0x104] ss:$8 sps:$4 sm:$0xff]  }
  0x3b   :  { %780 = vmatprep.subr.bf16.mxu0 %v2305_v0  ;;  %2120 = vmatprep.subr.bf16.mxu1 %v2305_v0  ;;  %v2225_v0 = vld [vmem:[%s3217_s0 + $0x240] ss:$8 sps:$4 sm:$0xff]  }
  0x3e   :  { %781 = vmatpush1.bf16.msra.mxu0 %v2153_v18  ;;  %2136 = vmatpush1.bf16.msra.mxu1 %v2153_v18  ;;  %v2252_v18 = vld [vmem:[%s3217_s0 + $0x294] ss:$8 sps:$4 sm:$0xff]  }
  0x41   :  { %783 = vmatmul.mubr.bf16.vlgmr.msra.gmra.mrb[0].mxu0 %v2154_v19  ;;  %983 = vmatmul.mubr.bf16.vlgmr.msra.gmra.mrb[0].mxu1 %v2157_v20  ;;  %v2254_v19 = vld [vmem:[%s3217_s0 + $0x100] ss:$8 sps:$4 sm:$0xff]   ;;  %v2255_v20 = vld [vmem:[%s3217_s0 + $0x290] ss:$8 sps:$4 sm:$0xff]  }
  0x42   :  { %790 = vmatprep.mubr.bf16.mxu0 %v2160_v21  ;;  %990 = vmatprep.mubr.bf16.mxu1 %v2162_v22  ;;  %v2256_v21 = vld [vmem:[%s3217_s0 + $0x114] ss:$8 sps:$4 sm:$0xff]   ;;  %v2258_v22 = vld [vmem:[%s3217_s0 + $0x2a4] ss:$8 sps:$4 sm:$0xff]  }
  0x49   :  { %791 = vmatmul.mubr.bf16.gmra.mrb[4].mxu0 %v2164_v23  ;;  %991 = vmatmul.mubr.bf16.gmra.mrb[4].mxu1 %v2165_v24  ;;  %v2260_v23 = vld [vmem:[%s3217_s0 + $0x110] ss:$8 sps:$4 sm:$0xff]   ;;  %v2261_v24 = vld [vmem:[%s3217_s0 + $0x2a0] ss:$8 sps:$4 sm:$0xff]  }
  0x4a   :  { %798 = vmatprep.mubr.bf16.mxu0 %v2166_v25  ;;  %998 = vmatprep.mubr.bf16.mxu1 %v2168_v26  ;;  %v2262_v25 = vld [vmem:[%s3217_s0 + $0x124] ss:$8 sps:$4 sm:$0xff]   ;;  %v2264_v26 = vld [vmem:[%s3217_s0 + $0x2b4] ss:$8 sps:$4 sm:$0xff]  }
  0x51   :  { %799 = vmatmul.mubr.bf16.gmra.mrb[8].mxu0 %v2170_v27  ;;  %999 = vmatmul.mubr.bf16.gmra.mrb[8].mxu1 %v2171_v28  ;;  %v2266_v27 = vld [vmem:[%s3217_s0 + $0x120] ss:$8 sps:$4 sm:$0xff]   ;;  %v2267_v28 = vld [vmem:[%s3217_s0 + $0x2b0] ss:$8 sps:$4 sm:$0xff]  }
  0x52   :  { %806 = vmatprep.mubr.bf16.mxu0 %v2172_v29  ;;  %1006 = vmatprep.mubr.bf16.mxu1 %v2174_v30  ;;  %v2268_v29 = vld [vmem:[%s3217_s0 + $0x134] ss:$8 sps:$4 sm:$0xff]   ;;  %v2270_v30 = vld [vmem:[%s3217_s0 + $0x2c4] ss:$8 sps:$4 sm:$0xff]  }
  0x59   :  { %807 = vmatmul.mubr.bf16.gmra.mrb[12].mxu0 %v2176_v31  ;;  %1007 = vmatmul.mubr.bf16.gmra.mrb[12].mxu1 %v2177_v32  ;;  %v2272_v31 = vld [vmem:[%s3217_s0 + $0x130] ss:$8 sps:$4 sm:$0xff]   ;;  %v2273_v32 = vld [vmem:[%s3217_s0 + $0x2c0] ss:$8 sps:$4 sm:$0xff]  }
  0x5a   :  { %814 = vmatprep.mubr.bf16.mxu0 %v2178_v33  ;;  %1014 = vmatprep.mubr.bf16.mxu1 %v2180_v34  ;;  %v2274_v33 = vld [vmem:[%s3217_s0 + $0x144] ss:$8 sps:$4 sm:$0xff]   ;;  %v2276_v34 = vld [vmem:[%s3217_s0 + $0x2d4] ss:$8 sps:$4 sm:$0xff]  }
  0x61   :  { %815 = vmatmul.mubr.bf16.gmra.mrb[16].mxu0 %v2182_v35  ;;  %1015 = vmatmul.mubr.bf16.gmra.mrb[16].mxu1 %v2183_v36  ;;  %v2278_v35 = vld [vmem:[%s3217_s0 + $0x140] ss:$8 sps:$4 sm:$0xff]   ;;  %v2279_v36 = vld [vmem:[%s3217_s0 + $0x2d0] ss:$8 sps:$4 sm:$0xff]  }
  0x62   :  { %822 = vmatprep.mubr.bf16.mxu0 %v2184_v37  ;;  %1022 = vmatprep.mubr.bf16.mxu1 %v2186_v38  ;;  %v2280_v37 = vld [vmem:[%s3217_s0 + $0x154] ss:$8 sps:$4 sm:$0xff]   ;;  %v2282_v38 = vld [vmem:[%s3217_s0 + $0x2e4] ss:$8 sps:$4 sm:$0xff]  }
  0x69   :  { %823 = vmatmul.mubr.bf16.gmra.mrb[20].mxu0 %v2188_v39  ;;  %1023 = vmatmul.mubr.bf16.gmra.mrb[20].mxu1 %v2189_v40  ;;  %v2284_v39 = vld [vmem:[%s3217_s0 + $0x150] ss:$8 sps:$4 sm:$0xff]   ;;  %v2285_v40 = vld [vmem:[%s3217_s0 + $0x2e0] ss:$8 sps:$4 sm:$0xff]  }
  0x6a   :  { %830 = vmatprep.mubr.bf16.mxu0 %v2190_v41  ;;  %1030 = vmatprep.mubr.bf16.mxu1 %v2192_v42  ;;  %v2286_v41 = vld [vmem:[%s3217_s0 + $0x164] ss:$8 sps:$4 sm:$0xff]   ;;  %v2288_v42 = vld [vmem:[%s3217_s0 + $0x2f4] ss:$8 sps:$4 sm:$0xff]  }
  0x71   :  { %831 = vmatmul.mubr.bf16.gmra.mrb[24].mxu0 %v2194_v43  ;;  %1031 = vmatmul.mubr.bf16.gmra.mrb[24].mxu1 %v2195_v44  ;;  %v2290_v43 = vld [vmem:[%s3217_s0 + $0x160] ss:$8 sps:$4 sm:$0xff]   ;;  %v2291_v44 = vld [vmem:[%s3217_s0 + $0x2f0] ss:$8 sps:$4 sm:$0xff]  }
  0x72   :  { %838 = vmatprep.mubr.bf16.mxu0 %v2196_v45  ;;  %1038 = vmatprep.mubr.bf16.mxu1 %v2198_v46  ;;  %v2292_v45 = vld [vmem:[%s3217_s0 + $0x174] ss:$8 sps:$4 sm:$0xff]   ;;  %v2294_v46 = vld [vmem:[%s3217_s0 + $0x304] ss:$8 sps:$4 sm:$0xff]  }
  0x79   :  { %839 = vmatmul.mubr.bf16.gmra.mrb[28].mxu0 %v2200_v47  ;;  %1039 = vmatmul.mubr.bf16.gmra.mrb[28].mxu1 %v2201_v48  ;;  %v2296_v47 = vld [vmem:[%s3217_s0 + $0x170] ss:$8 sps:$4 sm:$0xff]   ;;  %v2297_v48 = vld [vmem:[%s3217_s0 + $0x300] ss:$8 sps:$4 sm:$0xff]  }
  0x7a   :  { %846 = vmatprep.mubr.bf16.mxu0 %v2202_v49  ;;  %1046 = vmatprep.mubr.bf16.mxu1 %v2204_v50  ;;  %v2298_v49 = vld [vmem:[%s3217_s0 + $0x184] ss:$8 sps:$4 sm:$0xff]   ;;  %v2300_v50 = vld [vmem:[%s3217_s0 + $0x314] ss:$8 sps:$4 sm:$0xff]  }
  0x81   :  { %847 = vmatmul.mubr.bf16.gmra.mrb[32].mxu0 %v2206_v51  ;;  %1047 = vmatmul.mubr.bf16.gmra.mrb[32].mxu1 %v2207_v52  ;;  %v2302_v51 = vld [vmem:[%s3217_s0 + $0x180] ss:$8 sps:$4 sm:$0xff]   ;;  %v2303_v52 = vld [vmem:[%s3217_s0 + $0x310] ss:$8 sps:$4 sm:$0xff]  }
  0x82   :  { %854 = vmatprep.mubr.bf16.mxu0 %v2208_v53  ;;  %1054 = vmatprep.mubr.bf16.mxu1 %v2210_v54  ;;  %v2709_v53 = vld [vmem:[%s3218_s2] ss:$0 sm:$0xff] }
  0x89   :  { %855 = vmatmul.mubr.bf16.gmra.mrb[36].mxu0 %v2212_v55  ;;  %1055 = vmatmul.mubr.bf16.gmra.mrb[36].mxu1 %v2213_v56 }
  0x8a   :  { %862 = vmatprep.mubr.bf16.mxu0 %v2214_v57  ;;  %1062 = vmatprep.mubr.bf16.mxu1 %v2216_v58 }
  0x91   :  { %863 = vmatmul.mubr.bf16.gmra.mrb[40].mxu0 %v2218_v59  ;;  %1063 = vmatmul.mubr.bf16.gmra.mrb[40].mxu1 %v2219_v60 }
  0x92   :  { %870 = vmatprep.mubr.bf16.mxu0 %v2220_v61  ;;  %1070 = vmatprep.mubr.bf16.mxu1 %v2222_v62 }
  0x99   :  { %871 = vmatmul.mubr.bf16.gmra.mrb[44].mxu0 %v2224_v63  ;;  %1071 = vmatmul.mubr.bf16.gmra.mrb[44].mxu1 %v2225_v0 }
  0x9a   :  { %878 = vmatprep.mubr.bf16.mxu0 %v2226_v1  ;;  %1078 = vmatprep.mubr.bf16.mxu1 %v2228_v2 }
  0xa1   :  { %879 = vmatmul.mubr.bf16.gmra.mrb[48].mxu0 %v2230_v3  ;;  %1079 = vmatmul.mubr.bf16.gmra.mrb[48].mxu1 %v2231_v4 }
  0xa2   :  { %886 = vmatprep.mubr.bf16.mxu0 %v2232_v5  ;;  %1086 = vmatprep.mubr.bf16.mxu1 %v2234_v6 }
  0xa9   :  { %887 = vmatmul.mubr.bf16.gmra.mrb[52].mxu0 %v2236_v7  ;;  %1087 = vmatmul.mubr.bf16.gmra.mrb[52].mxu1 %v2237_v8 }
  0xaa   :  { %894 = vmatprep.mubr.bf16.mxu0 %v2238_v9  ;;  %1094 = vmatprep.mubr.bf16.mxu1 %v2240_v10 }
  0xb1   :  { %895 = vmatmul.mubr.bf16.gmra.mrb[56].mxu0 %v2242_v11  ;;  %1095 = vmatmul.mubr.bf16.gmra.mrb[56].mxu1 %v2243_v12 }
  0xb2   :  { %902 = vmatprep.mubr.bf16.mxu0 %v2244_v13  ;;  %1102 = vmatprep.mubr.bf16.mxu1 %v2246_v14 }
  0xb9   :  { %903 = vmatmul.mubr.bf16.gmra.mrb[60].mxu0 %v2248_v15  ;;  %1103 = vmatmul.mubr.bf16.gmra.mrb[60].mxu1 %v2249_v16 }
  0xba   :  { %910 = vmatprep.mubr.bf16.mxu0 %v2250_v17  ;;  %1110 = vmatprep.mubr.bf16.mxu1 %v2252_v18 }
  0xc1   :  { %911 = vmatmul.mubr.bf16.gmra.mrb[64].mxu0 %v2254_v19  ;;  %1111 = vmatmul.mubr.bf16.gmra.mrb[64].mxu1 %v2255_v20 }
  0xc2   :  { %918 = vmatprep.mubr.bf16.mxu0 %v2256_v21  ;;  %1118 = vmatprep.mubr.bf16.mxu1 %v2258_v22 }
  0xc9   :  { %919 = vmatmul.mubr.bf16.gmra.mrb[68].mxu0 %v2260_v23  ;;  %1119 = vmatmul.mubr.bf16.gmra.mrb[68].mxu1 %v2261_v24 }
  0xca   :  { %926 = vmatprep.mubr.bf16.mxu0 %v2262_v25  ;;  %1126 = vmatprep.mubr.bf16.mxu1 %v2264_v26 }
  0xd1   :  { %927 = vmatmul.mubr.bf16.gmra.mrb[72].mxu0 %v2266_v27  ;;  %1127 = vmatmul.mubr.bf16.gmra.mrb[72].mxu1 %v2267_v28 }
  0xd2   :  { %934 = vmatprep.mubr.bf16.mxu0 %v2268_v29  ;;  %1134 = vmatprep.mubr.bf16.mxu1 %v2270_v30 }
  0xd9   :  { %935 = vmatmul.mubr.bf16.gmra.mrb[76].mxu0 %v2272_v31  ;;  %1135 = vmatmul.mubr.bf16.gmra.mrb[76].mxu1 %v2273_v32 }
  0xda   :  { %942 = vmatprep.mubr.bf16.mxu0 %v2274_v33  ;;  %1142 = vmatprep.mubr.bf16.mxu1 %v2276_v34 }
  0xe1   :  { %943 = vmatmul.mubr.bf16.gmra.mrb[80].mxu0 %v2278_v35  ;;  %1143 = vmatmul.mubr.bf16.gmra.mrb[80].mxu1 %v2279_v36 }
  0xe2   :  { %950 = vmatprep.mubr.bf16.mxu0 %v2280_v37  ;;  %1150 = vmatprep.mubr.bf16.mxu1 %v2282_v38 }
  0xe9   :  { %951 = vmatmul.mubr.bf16.gmra.mrb[84].mxu0 %v2284_v39  ;;  %1151 = vmatmul.mubr.bf16.gmra.mrb[84].mxu1 %v2285_v40 }
  0xea   :  { %958 = vmatprep.mubr.bf16.mxu0 %v2286_v41  ;;  %1158 = vmatprep.mubr.bf16.mxu1 %v2288_v42 }
  0xf1   :  { %959 = vmatmul.mubr.bf16.gmra.mrb[88].mxu0 %v2290_v43  ;;  %1159 = vmatmul.mubr.bf16.gmra.mrb[88].mxu1 %v2291_v44 }
  0xf2   :  { %966 = vmatprep.mubr.bf16.mxu0 %v2292_v45  ;;  %1166 = vmatprep.mubr.bf16.mxu1 %v2294_v46 }
  0xf9   :  { %967 = vmatmul.mubr.bf16.gmra.mrb[92].mxu0 %v2296_v47  ;;  %1167 = vmatmul.mubr.bf16.gmra.mrb[92].mxu1 %v2297_v48 }
  0xfa   :  { %974 = vmatprep.mubr.bf16.mxu0 %v2298_v49  ;;  %1174 = vmatprep.mubr.bf16.mxu1 %v2300_v50 }
 0x101   :  { %975 = vmatmul.mubr.bf16.gmra.mrb[96].mxu0 %v2302_v51  ;;  %1175 = vmatmul.mubr.bf16.gmra.mrb[96].mxu1 %v2303_v52 }
 0x114   :  { %v784_v54 = vpop.f32.mrb[0].mxu0  ;;  %v984_v55 = vpop.f32.mrb[0].mxu1 }
 0x115   :  { %v785_v56 = vadd.f32 %v2709_v53, %v784_v54  ;;  %v985_v57 = vadd.f32 %v2709_v53, %v984_v55  ;;  %v786_v58 = vpop.f32.mrb[1].mxu0  ;;  %v986_v59 = vpop.f32.mrb[1].mxu1 }
 0x116   :  { %v787_v60 = vpop.f32.mrb[2].mxu0  ;;  %v987_v61 = vpop.f32.mrb[2].mxu1 }
 0x117   :  { %v1183_v62 = vmax.f32 %v785_v56, 0.0  ;;  %v1233_v63 = vmax.f32 %v985_v57, 0.0  ;;  %v788_v0 = vadd.f32 %v2709_v53, %v787_v60  ;;  %v988_v1 = vadd.f32 %v2709_v53, %v987_v61  ;;  %v789_v2 = vpop.f32.mrb[3].mxu0  ;;  %v989_v3 = vpop.f32.mrb[3].mxu1 }
 0x119   :  { %v2005_v4 = vpack.c.bf16 %v1183_v62, %v1183_v62  ;;  %v2055_v5 = vpack.c.bf16 %v1233_v63, %v1233_v63  ;;  %v1184_v6 = vmax.f32 %v788_v0, 0.0  ;;  %v1234_v7 = vmax.f32 %v988_v1, 0.0 }
 0x11b   :  { %1684 = vst.msk [vmem:[%s3219_s3] sm:$0xf] %vm1683_vm0, %v2005_v4  ;;  %1734 = vst.msk [vmem:[%s3219_s3 + $0xc8] sm:$0xf] %vm1683_vm0, %v2055_v5  ;;  %v2006_v8 = vpack.c.bf16 %v1184_v6, %v1184_v6  ;;  %v2056_v9 = vpack.c.bf16 %v1234_v7, %v1234_v7 }
 0x11c   :  { %v792_v10 = vpop.f32.mrb[4].mxu0  ;;  %v992_v11 = vpop.f32.mrb[4].mxu1 }
 0x11d   :  { %1685 = vst.msk [vmem:[%s3219_s3 + $0x4] sm:$0xf] %vm1683_vm0, %v2006_v8  ;;  %1735 = vst.msk [vmem:[%s3219_s3 + $0xcc] sm:$0xf] %vm1683_vm0, %v2056_v9  ;;  %v793_v12 = vadd.f32 %v2709_v53, %v792_v10  ;;  %v993_v13 = vadd.f32 %v2709_v53, %v992_v11  ;;  %v794_v14 = vpop.f32.mrb[5].mxu0  ;;  %v994_v15 = vpop.f32.mrb[5].mxu1 }
 0x11e   :  { %v795_v16 = vpop.f32.mrb[6].mxu0  ;;  %v995_v17 = vpop.f32.mrb[6].mxu1 }
 0x11f   :  { %v1185_v18 = vmax.f32 %v793_v12, 0.0  ;;  %v1235_v19 = vmax.f32 %v993_v13, 0.0  ;;  %v796_v20 = vadd.f32 %v2709_v53, %v795_v16  ;;  %v996_v21 = vadd.f32 %v2709_v53, %v995_v17  ;;  %v797_v22 = vpop.f32.mrb[7].mxu0  ;;  %v997_v23 = vpop.f32.mrb[7].mxu1 }
 0x121   :  { %v2007_v24 = vpack.c.bf16 %v1185_v18, %v1185_v18  ;;  %v2057_v25 = vpack.c.bf16 %v1235_v19, %v1235_v19  ;;  %v1186_v26 = vmax.f32 %v796_v20, 0.0  ;;  %v1236_v27 = vmax.f32 %v996_v21, 0.0 }
 0x123   :  { %1686 = vst.msk [vmem:[%s3219_s3 + $0x8] sm:$0xf] %vm1683_vm0, %v2007_v24  ;;  %1736 = vst.msk [vmem:[%s3219_s3 + $0xd0] sm:$0xf] %vm1683_vm0, %v2057_v25  ;;  %v2008_v28 = vpack.c.bf16 %v1186_v26, %v1186_v26  ;;  %v2058_v29 = vpack.c.bf16 %v1236_v27, %v1236_v27 }
 0x124   :  { %v800_v30 = vpop.f32.mrb[8].mxu0  ;;  %v1000_v31 = vpop.f32.mrb[8].mxu1 }
 0x125   :  { %1687 = vst.msk [vmem:[%s3219_s3 + $0xc] sm:$0xf] %vm1683_vm0, %v2008_v28  ;;  %1737 = vst.msk [vmem:[%s3219_s3 + $0xd4] sm:$0xf] %vm1683_vm0, %v2058_v29  ;;  %v801_v32 = vadd.f32 %v2709_v53, %v800_v30  ;;  %v1001_v33 = vadd.f32 %v2709_v53, %v1000_v31  ;;  %v802_v34 = vpop.f32.mrb[9].mxu0  ;;  %v1002_v35 = vpop.f32.mrb[9].mxu1 }
 0x126   :  { %v803_v36 = vpop.f32.mrb[10].mxu0  ;;  %v1003_v37 = vpop.f32.mrb[10].mxu1 }
 0x127   :  { %v1187_v38 = vmax.f32 %v801_v32, 0.0  ;;  %v1237_v39 = vmax.f32 %v1001_v33, 0.0  ;;  %v804_v40 = vadd.f32 %v2709_v53, %v803_v36  ;;  %v1004_v41 = vadd.f32 %v2709_v53, %v1003_v37  ;;  %v805_v42 = vpop.f32.mrb[11].mxu0  ;;  %v1005_v43 = vpop.f32.mrb[11].mxu1 }
 0x129   :  { %v2009_v44 = vpack.c.bf16 %v1187_v38, %v1187_v38  ;;  %v2059_v45 = vpack.c.bf16 %v1237_v39, %v1237_v39  ;;  %v1188_v46 = vmax.f32 %v804_v40, 0.0  ;;  %v1238_v47 = vmax.f32 %v1004_v41, 0.0 }
 0x12b   :  { %1688 = vst.msk [vmem:[%s3219_s3 + $0x10] sm:$0xf] %vm1683_vm0, %v2009_v44  ;;  %1738 = vst.msk [vmem:[%s3219_s3 + $0xd8] sm:$0xf] %vm1683_vm0, %v2059_v45  ;;  %v2010_v48 = vpack.c.bf16 %v1188_v46, %v1188_v46  ;;  %v2060_v49 = vpack.c.bf16 %v1238_v47, %v1238_v47 }
 0x12c   :  { %v808_v50 = vpop.f32.mrb[12].mxu0  ;;  %v1008_v51 = vpop.f32.mrb[12].mxu1 }
 0x12d   :  { %1689 = vst.msk [vmem:[%s3219_s3 + $0x14] sm:$0xf] %vm1683_vm0, %v2010_v48  ;;  %1739 = vst.msk [vmem:[%s3219_s3 + $0xdc] sm:$0xf] %vm1683_vm0, %v2060_v49  ;;  %v809_v52 = vadd.f32 %v2709_v53, %v808_v50  ;;  %v1009_v54 = vadd.f32 %v2709_v53, %v1008_v51  ;;  %v810_v55 = vpop.f32.mrb[13].mxu0  ;;  %v1010_v56 = vpop.f32.mrb[13].mxu1 }
 0x12e   :  { %v811_v57 = vpop.f32.mrb[14].mxu0  ;;  %v1011_v58 = vpop.f32.mrb[14].mxu1 }
 0x12f   :  { %v1189_v59 = vmax.f32 %v809_v52, 0.0  ;;  %v1239_v60 = vmax.f32 %v1009_v54, 0.0  ;;  %v812_v61 = vadd.f32 %v2709_v53, %v811_v57  ;;  %v1012_v62 = vadd.f32 %v2709_v53, %v1011_v58  ;;  %v813_v63 = vpop.f32.mrb[15].mxu0  ;;  %v1013_v0 = vpop.f32.mrb[15].mxu1 }
 0x131   :  { %v2011_v1 = vpack.c.bf16 %v1189_v59, %v1189_v59  ;;  %v2061_v2 = vpack.c.bf16 %v1239_v60, %v1239_v60  ;;  %v1190_v3 = vmax.f32 %v812_v61, 0.0  ;;  %v1240_v4 = vmax.f32 %v1012_v62, 0.0 }
 0x133   :  { %1690 = vst.msk [vmem:[%s3219_s3 + $0x18] sm:$0xf] %vm1683_vm0, %v2011_v1  ;;  %1740 = vst.msk [vmem:[%s3219_s3 + $0xe0] sm:$0xf] %vm1683_vm0, %v2061_v2  ;;  %v2012_v5 = vpack.c.bf16 %v1190_v3, %v1190_v3  ;;  %v2062_v6 = vpack.c.bf16 %v1240_v4, %v1240_v4 }
 0x134   :  { %v816_v7 = vpop.f32.mrb[16].mxu0  ;;  %v1016_v8 = vpop.f32.mrb[16].mxu1 }
 0x135   :  { %1691 = vst.msk [vmem:[%s3219_s3 + $0x1c] sm:$0xf] %vm1683_vm0, %v2012_v5  ;;  %1741 = vst.msk [vmem:[%s3219_s3 + $0xe4] sm:$0xf] %vm1683_vm0, %v2062_v6  ;;  %v817_v9 = vadd.f32 %v2709_v53, %v816_v7  ;;  %v1017_v10 = vadd.f32 %v2709_v53, %v1016_v8  ;;  %v818_v11 = vpop.f32.mrb[17].mxu0  ;;  %v1018_v12 = vpop.f32.mrb[17].mxu1 }
 0x136   :  { %v819_v13 = vpop.f32.mrb[18].mxu0  ;;  %v1019_v14 = vpop.f32.mrb[18].mxu1 }
 0x137   :  { %v1191_v15 = vmax.f32 %v817_v9, 0.0  ;;  %v1241_v16 = vmax.f32 %v1017_v10, 0.0  ;;  %v820_v17 = vadd.f32 %v2709_v53, %v819_v13  ;;  %v1020_v18 = vadd.f32 %v2709_v53, %v1019_v14  ;;  %v821_v19 = vpop.f32.mrb[19].mxu0  ;;  %v1021_v20 = vpop.f32.mrb[19].mxu1 }
 0x139   :  { %v2013_v21 = vpack.c.bf16 %v1191_v15, %v1191_v15  ;;  %v2063_v22 = vpack.c.bf16 %v1241_v16, %v1241_v16  ;;  %v1192_v23 = vmax.f32 %v820_v17, 0.0  ;;  %v1242_v24 = vmax.f32 %v1020_v18, 0.0 }
 0x13b   :  { %1692 = vst.msk [vmem:[%s3219_s3 + $0x20] sm:$0xf] %vm1683_vm0, %v2013_v21  ;;  %1742 = vst.msk [vmem:[%s3219_s3 + $0xe8] sm:$0xf] %vm1683_vm0, %v2063_v22  ;;  %v2014_v25 = vpack.c.bf16 %v1192_v23, %v1192_v23  ;;  %v2064_v26 = vpack.c.bf16 %v1242_v24, %v1242_v24 }
 0x13c   :  { %v824_v27 = vpop.f32.mrb[20].mxu0  ;;  %v1024_v28 = vpop.f32.mrb[20].mxu1 }
 0x13d   :  { %1693 = vst.msk [vmem:[%s3219_s3 + $0x24] sm:$0xf] %vm1683_vm0, %v2014_v25  ;;  %1743 = vst.msk [vmem:[%s3219_s3 + $0xec] sm:$0xf] %vm1683_vm0, %v2064_v26  ;;  %v825_v29 = vadd.f32 %v2709_v53, %v824_v27  ;;  %v1025_v30 = vadd.f32 %v2709_v53, %v1024_v28  ;;  %v826_v31 = vpop.f32.mrb[21].mxu0  ;;  %v1026_v32 = vpop.f32.mrb[21].mxu1 }
 0x13e   :  { %v827_v33 = vpop.f32.mrb[22].mxu0  ;;  %v1027_v34 = vpop.f32.mrb[22].mxu1 }
 0x13f   :  { %v1193_v35 = vmax.f32 %v825_v29, 0.0  ;;  %v1243_v36 = vmax.f32 %v1025_v30, 0.0  ;;  %v828_v37 = vadd.f32 %v2709_v53, %v827_v33  ;;  %v1028_v38 = vadd.f32 %v2709_v53, %v1027_v34  ;;  %v829_v39 = vpop.f32.mrb[23].mxu0  ;;  %v1029_v40 = vpop.f32.mrb[23].mxu1 }
 0x141   :  { %v2015_v41 = vpack.c.bf16 %v1193_v35, %v1193_v35  ;;  %v2065_v42 = vpack.c.bf16 %v1243_v36, %v1243_v36  ;;  %v1194_v43 = vmax.f32 %v828_v37, 0.0  ;;  %v1244_v44 = vmax.f32 %v1028_v38, 0.0 }
 0x143   :  { %1694 = vst.msk [vmem:[%s3219_s3 + $0x28] sm:$0xf] %vm1683_vm0, %v2015_v41  ;;  %1744 = vst.msk [vmem:[%s3219_s3 + $0xf0] sm:$0xf] %vm1683_vm0, %v2065_v42  ;;  %v2016_v45 = vpack.c.bf16 %v1194_v43, %v1194_v43  ;;  %v2066_v46 = vpack.c.bf16 %v1244_v44, %v1244_v44 }
 0x144   :  { %v832_v47 = vpop.f32.mrb[24].mxu0  ;;  %v1032_v48 = vpop.f32.mrb[24].mxu1 }
 0x145   :  { %1695 = vst.msk [vmem:[%s3219_s3 + $0x2c] sm:$0xf] %vm1683_vm0, %v2016_v45  ;;  %1745 = vst.msk [vmem:[%s3219_s3 + $0xf4] sm:$0xf] %vm1683_vm0, %v2066_v46  ;;  %v833_v49 = vadd.f32 %v2709_v53, %v832_v47  ;;  %v1033_v50 = vadd.f32 %v2709_v53, %v1032_v48  ;;  %v834_v51 = vpop.f32.mrb[25].mxu0  ;;  %v1034_v52 = vpop.f32.mrb[25].mxu1 }
 0x146   :  { %v835_v54 = vpop.f32.mrb[26].mxu0  ;;  %v1035_v55 = vpop.f32.mrb[26].mxu1 }
 0x147   :  { %v1195_v56 = vmax.f32 %v833_v49, 0.0  ;;  %v1245_v57 = vmax.f32 %v1033_v50, 0.0  ;;  %v836_v58 = vadd.f32 %v2709_v53, %v835_v54  ;;  %v1036_v59 = vadd.f32 %v2709_v53, %v1035_v55  ;;  %v837_v60 = vpop.f32.mrb[27].mxu0  ;;  %v1037_v61 = vpop.f32.mrb[27].mxu1 }
 0x149   :  { %v2017_v62 = vpack.c.bf16 %v1195_v56, %v1195_v56  ;;  %v2067_v63 = vpack.c.bf16 %v1245_v57, %v1245_v57  ;;  %v1196_v0 = vmax.f32 %v836_v58, 0.0  ;;  %v1246_v1 = vmax.f32 %v1036_v59, 0.0 }
 0x14b   :  { %1696 = vst.msk [vmem:[%s3219_s3 + $0x30] sm:$0xf] %vm1683_vm0, %v2017_v62  ;;  %1746 = vst.msk [vmem:[%s3219_s3 + $0xf8] sm:$0xf] %vm1683_vm0, %v2067_v63  ;;  %v2018_v2 = vpack.c.bf16 %v1196_v0, %v1196_v0  ;;  %v2068_v3 = vpack.c.bf16 %v1246_v1, %v1246_v1 }
 0x14c   :  { %v840_v4 = vpop.f32.mrb[28].mxu0  ;;  %v1040_v5 = vpop.f32.mrb[28].mxu1 }
 0x14d   :  { %1697 = vst.msk [vmem:[%s3219_s3 + $0x34] sm:$0xf] %vm1683_vm0, %v2018_v2  ;;  %1747 = vst.msk [vmem:[%s3219_s3 + $0xfc] sm:$0xf] %vm1683_vm0, %v2068_v3  ;;  %v841_v6 = vadd.f32 %v2709_v53, %v840_v4  ;;  %v1041_v7 = vadd.f32 %v2709_v53, %v1040_v5  ;;  %v842_v8 = vpop.f32.mrb[29].mxu0  ;;  %v1042_v9 = vpop.f32.mrb[29].mxu1 }
 0x14e   :  { %v843_v10 = vpop.f32.mrb[30].mxu0  ;;  %v1043_v11 = vpop.f32.mrb[30].mxu1 }
 0x14f   :  { %v1197_v12 = vmax.f32 %v841_v6, 0.0  ;;  %v1247_v13 = vmax.f32 %v1041_v7, 0.0  ;;  %v844_v14 = vadd.f32 %v2709_v53, %v843_v10  ;;  %v1044_v15 = vadd.f32 %v2709_v53, %v1043_v11  ;;  %v845_v16 = vpop.f32.mrb[31].mxu0  ;;  %v1045_v17 = vpop.f32.mrb[31].mxu1 }
 0x151   :  { %v2019_v18 = vpack.c.bf16 %v1197_v12, %v1197_v12  ;;  %v2069_v19 = vpack.c.bf16 %v1247_v13, %v1247_v13  ;;  %v1198_v20 = vmax.f32 %v844_v14, 0.0  ;;  %v1248_v21 = vmax.f32 %v1044_v15, 0.0 }
 0x153   :  { %1698 = vst.msk [vmem:[%s3219_s3 + $0x38] sm:$0xf] %vm1683_vm0, %v2019_v18  ;;  %1748 = vst.msk [vmem:[%s3219_s3 + $0x100] sm:$0xf] %vm1683_vm0, %v2069_v19  ;;  %v2020_v22 = vpack.c.bf16 %v1198_v20, %v1198_v20  ;;  %v2070_v23 = vpack.c.bf16 %v1248_v21, %v1248_v21 }
 0x154   :  { %v848_v24 = vpop.f32.mrb[32].mxu0  ;;  %v1048_v25 = vpop.f32.mrb[32].mxu1 }
 0x155   :  { %1699 = vst.msk [vmem:[%s3219_s3 + $0x3c] sm:$0xf] %vm1683_vm0, %v2020_v22  ;;  %1749 = vst.msk [vmem:[%s3219_s3 + $0x104] sm:$0xf] %vm1683_vm0, %v2070_v23  ;;  %v849_v26 = vadd.f32 %v2709_v53, %v848_v24  ;;  %v1049_v27 = vadd.f32 %v2709_v53, %v1048_v25  ;;  %v850_v28 = vpop.f32.mrb[33].mxu0  ;;  %v1050_v29 = vpop.f32.mrb[33].mxu1 }
 0x156   :  { %v851_v30 = vpop.f32.mrb[34].mxu0  ;;  %v1051_v31 = vpop.f32.mrb[34].mxu1 }
 0x157   :  { %v1199_v32 = vmax.f32 %v849_v26, 0.0  ;;  %v1249_v33 = vmax.f32 %v1049_v27, 0.0  ;;  %v852_v34 = vadd.f32 %v2709_v53, %v851_v30  ;;  %v1052_v35 = vadd.f32 %v2709_v53, %v1051_v31  ;;  %v853_v36 = vpop.f32.mrb[35].mxu0  ;;  %v1053_v37 = vpop.f32.mrb[35].mxu1 }
 0x159   :  { %v2021_v38 = vpack.c.bf16 %v1199_v32, %v1199_v32  ;;  %v2071_v39 = vpack.c.bf16 %v1249_v33, %v1249_v33  ;;  %v1200_v40 = vmax.f32 %v852_v34, 0.0  ;;  %v1250_v41 = vmax.f32 %v1052_v35, 0.0 }
 0x15b   :  { %1700 = vst.msk [vmem:[%s3219_s3 + $0x40] sm:$0xf] %vm1683_vm0, %v2021_v38  ;;  %1750 = vst.msk [vmem:[%s3219_s3 + $0x108] sm:$0xf] %vm1683_vm0, %v2071_v39  ;;  %v2022_v42 = vpack.c.bf16 %v1200_v40, %v1200_v40  ;;  %v2072_v43 = vpack.c.bf16 %v1250_v41, %v1250_v41 }
 0x15c   :  { %v856_v44 = vpop.f32.mrb[36].mxu0  ;;  %v1056_v45 = vpop.f32.mrb[36].mxu1 }
 0x15d   :  { %1701 = vst.msk [vmem:[%s3219_s3 + $0x44] sm:$0xf] %vm1683_vm0, %v2022_v42  ;;  %1751 = vst.msk [vmem:[%s3219_s3 + $0x10c] sm:$0xf] %vm1683_vm0, %v2072_v43  ;;  %v857_v46 = vadd.f32 %v2709_v53, %v856_v44  ;;  %v1057_v47 = vadd.f32 %v2709_v53, %v1056_v45  ;;  %v858_v48 = vpop.f32.mrb[37].mxu0  ;;  %v1058_v49 = vpop.f32.mrb[37].mxu1 }
 0x15e   :  { %v859_v50 = vpop.f32.mrb[38].mxu0  ;;  %v1059_v51 = vpop.f32.mrb[38].mxu1 }
 0x15f   :  { %v1201_v52 = vmax.f32 %v857_v46, 0.0  ;;  %v1251_v54 = vmax.f32 %v1057_v47, 0.0  ;;  %v860_v55 = vadd.f32 %v2709_v53, %v859_v50  ;;  %v1060_v56 = vadd.f32 %v2709_v53, %v1059_v51  ;;  %v861_v57 = vpop.f32.mrb[39].mxu0  ;;  %v1061_v58 = vpop.f32.mrb[39].mxu1 }
 0x161   :  { %v2023_v59 = vpack.c.bf16 %v1201_v52, %v1201_v52  ;;  %v2073_v60 = vpack.c.bf16 %v1251_v54, %v1251_v54  ;;  %v1202_v61 = vmax.f32 %v860_v55, 0.0  ;;  %v1252_v62 = vmax.f32 %v1060_v56, 0.0 }
 0x163   :  { %1702 = vst.msk [vmem:[%s3219_s3 + $0x48] sm:$0xf] %vm1683_vm0, %v2023_v59  ;;  %1752 = vst.msk [vmem:[%s3219_s3 + $0x110] sm:$0xf] %vm1683_vm0, %v2073_v60  ;;  %v2024_v63 = vpack.c.bf16 %v1202_v61, %v1202_v61  ;;  %v2074_v0 = vpack.c.bf16 %v1252_v62, %v1252_v62 }
 0x164   :  { %v864_v1 = vpop.f32.mrb[40].mxu0  ;;  %v1064_v2 = vpop.f32.mrb[40].mxu1 }
 0x165   :  { %1703 = vst.msk [vmem:[%s3219_s3 + $0x4c] sm:$0xf] %vm1683_vm0, %v2024_v63  ;;  %1753 = vst.msk [vmem:[%s3219_s3 + $0x114] sm:$0xf] %vm1683_vm0, %v2074_v0  ;;  %v865_v3 = vadd.f32 %v2709_v53, %v864_v1  ;;  %v1065_v4 = vadd.f32 %v2709_v53, %v1064_v2  ;;  %v866_v5 = vpop.f32.mrb[41].mxu0  ;;  %v1066_v6 = vpop.f32.mrb[41].mxu1 }
 0x166   :  { %v867_v7 = vpop.f32.mrb[42].mxu0  ;;  %v1067_v8 = vpop.f32.mrb[42].mxu1 }
 0x167   :  { %v1203_v9 = vmax.f32 %v865_v3, 0.0  ;;  %v1253_v10 = vmax.f32 %v1065_v4, 0.0  ;;  %v868_v11 = vadd.f32 %v2709_v53, %v867_v7  ;;  %v1068_v12 = vadd.f32 %v2709_v53, %v1067_v8  ;;  %v869_v13 = vpop.f32.mrb[43].mxu0  ;;  %v1069_v14 = vpop.f32.mrb[43].mxu1 }
 0x169   :  { %v2025_v15 = vpack.c.bf16 %v1203_v9, %v1203_v9  ;;  %v2075_v16 = vpack.c.bf16 %v1253_v10, %v1253_v10  ;;  %v1204_v17 = vmax.f32 %v868_v11, 0.0  ;;  %v1254_v18 = vmax.f32 %v1068_v12, 0.0 }
 0x16b   :  { %1704 = vst.msk [vmem:[%s3219_s3 + $0x50] sm:$0xf] %vm1683_vm0, %v2025_v15  ;;  %1754 = vst.msk [vmem:[%s3219_s3 + $0x118] sm:$0xf] %vm1683_vm0, %v2075_v16  ;;  %v2026_v19 = vpack.c.bf16 %v1204_v17, %v1204_v17  ;;  %v2076_v20 = vpack.c.bf16 %v1254_v18, %v1254_v18 }
 0x16c   :  { %v872_v21 = vpop.f32.mrb[44].mxu0  ;;  %v1072_v22 = vpop.f32.mrb[44].mxu1 }
 0x16d   :  { %1705 = vst.msk [vmem:[%s3219_s3 + $0x54] sm:$0xf] %vm1683_vm0, %v2026_v19  ;;  %1755 = vst.msk [vmem:[%s3219_s3 + $0x11c] sm:$0xf] %vm1683_vm0, %v2076_v20  ;;  %v873_v23 = vadd.f32 %v2709_v53, %v872_v21  ;;  %v1073_v24 = vadd.f32 %v2709_v53, %v1072_v22  ;;  %v874_v25 = vpop.f32.mrb[45].mxu0  ;;  %v1074_v26 = vpop.f32.mrb[45].mxu1 }
 0x16e   :  { %v875_v27 = vpop.f32.mrb[46].mxu0  ;;  %v1075_v28 = vpop.f32.mrb[46].mxu1 }
 0x16f   :  { %v1205_v29 = vmax.f32 %v873_v23, 0.0  ;;  %v1255_v30 = vmax.f32 %v1073_v24, 0.0  ;;  %v876_v31 = vadd.f32 %v2709_v53, %v875_v27  ;;  %v1076_v32 = vadd.f32 %v2709_v53, %v1075_v28  ;;  %v877_v33 = vpop.f32.mrb[47].mxu0  ;;  %v1077_v34 = vpop.f32.mrb[47].mxu1 }
 0x171   :  { %v2027_v35 = vpack.c.bf16 %v1205_v29, %v1205_v29  ;;  %v2077_v36 = vpack.c.bf16 %v1255_v30, %v1255_v30  ;;  %v1206_v37 = vmax.f32 %v876_v31, 0.0  ;;  %v1256_v38 = vmax.f32 %v1076_v32, 0.0 }
 0x173   :  { %1706 = vst.msk [vmem:[%s3219_s3 + $0x58] sm:$0xf] %vm1683_vm0, %v2027_v35  ;;  %1756 = vst.msk [vmem:[%s3219_s3 + $0x120] sm:$0xf] %vm1683_vm0, %v2077_v36  ;;  %v2028_v39 = vpack.c.bf16 %v1206_v37, %v1206_v37  ;;  %v2078_v40 = vpack.c.bf16 %v1256_v38, %v1256_v38 }
 0x174   :  { %v880_v41 = vpop.f32.mrb[48].mxu0  ;;  %v1080_v42 = vpop.f32.mrb[48].mxu1 }
 0x175   :  { %1707 = vst.msk [vmem:[%s3219_s3 + $0x5c] sm:$0xf] %vm1683_vm0, %v2028_v39  ;;  %1757 = vst.msk [vmem:[%s3219_s3 + $0x124] sm:$0xf] %vm1683_vm0, %v2078_v40  ;;  %v881_v43 = vadd.f32 %v2709_v53, %v880_v41  ;;  %v1081_v44 = vadd.f32 %v2709_v53, %v1080_v42  ;;  %v882_v45 = vpop.f32.mrb[49].mxu0  ;;  %v1082_v46 = vpop.f32.mrb[49].mxu1 }
 0x176   :  { %v883_v47 = vpop.f32.mrb[50].mxu0  ;;  %v1083_v48 = vpop.f32.mrb[50].mxu1 }
 0x177   :  { %v1207_v49 = vmax.f32 %v881_v43, 0.0  ;;  %v1257_v50 = vmax.f32 %v1081_v44, 0.0  ;;  %v884_v51 = vadd.f32 %v2709_v53, %v883_v47  ;;  %v1084_v52 = vadd.f32 %v2709_v53, %v1083_v48  ;;  %v885_v54 = vpop.f32.mrb[51].mxu0  ;;  %v1085_v55 = vpop.f32.mrb[51].mxu1 }
 0x179   :  { %v2029_v56 = vpack.c.bf16 %v1207_v49, %v1207_v49  ;;  %v2079_v57 = vpack.c.bf16 %v1257_v50, %v1257_v50  ;;  %v1208_v58 = vmax.f32 %v884_v51, 0.0  ;;  %v1258_v59 = vmax.f32 %v1084_v52, 0.0 }
 0x17b   :  { %1708 = vst.msk [vmem:[%s3219_s3 + $0x60] sm:$0xf] %vm1683_vm0, %v2029_v56  ;;  %1758 = vst.msk [vmem:[%s3219_s3 + $0x128] sm:$0xf] %vm1683_vm0, %v2079_v57  ;;  %v2030_v60 = vpack.c.bf16 %v1208_v58, %v1208_v58  ;;  %v2080_v61 = vpack.c.bf16 %v1258_v59, %v1258_v59 }
 0x17c   :  { %v888_v62 = vpop.f32.mrb[52].mxu0  ;;  %v1088_v63 = vpop.f32.mrb[52].mxu1 }
 0x17d   :  { %1709 = vst.msk [vmem:[%s3219_s3 + $0x64] sm:$0xf] %vm1683_vm0, %v2030_v60  ;;  %1759 = vst.msk [vmem:[%s3219_s3 + $0x12c] sm:$0xf] %vm1683_vm0, %v2080_v61  ;;  %v889_v0 = vadd.f32 %v2709_v53, %v888_v62  ;;  %v1089_v1 = vadd.f32 %v2709_v53, %v1088_v63  ;;  %v890_v2 = vpop.f32.mrb[53].mxu0  ;;  %v1090_v3 = vpop.f32.mrb[53].mxu1 }
 0x17e   :  { %v891_v4 = vpop.f32.mrb[54].mxu0  ;;  %v1091_v5 = vpop.f32.mrb[54].mxu1 }
 0x17f   :  { %v1209_v6 = vmax.f32 %v889_v0, 0.0  ;;  %v1259_v7 = vmax.f32 %v1089_v1, 0.0  ;;  %v892_v8 = vadd.f32 %v2709_v53, %v891_v4  ;;  %v1092_v9 = vadd.f32 %v2709_v53, %v1091_v5  ;;  %v893_v10 = vpop.f32.mrb[55].mxu0  ;;  %v1093_v11 = vpop.f32.mrb[55].mxu1 }
 0x181   :  { %v2031_v12 = vpack.c.bf16 %v1209_v6, %v1209_v6  ;;  %v2081_v13 = vpack.c.bf16 %v1259_v7, %v1259_v7  ;;  %v1210_v14 = vmax.f32 %v892_v8, 0.0  ;;  %v1260_v15 = vmax.f32 %v1092_v9, 0.0 }
 0x183   :  { %1710 = vst.msk [vmem:[%s3219_s3 + $0x68] sm:$0xf] %vm1683_vm0, %v2031_v12  ;;  %1760 = vst.msk [vmem:[%s3219_s3 + $0x130] sm:$0xf] %vm1683_vm0, %v2081_v13  ;;  %v2032_v16 = vpack.c.bf16 %v1210_v14, %v1210_v14  ;;  %v2082_v17 = vpack.c.bf16 %v1260_v15, %v1260_v15 }
 0x184   :  { %v896_v18 = vpop.f32.mrb[56].mxu0  ;;  %v1096_v19 = vpop.f32.mrb[56].mxu1 }
 0x185   :  { %1711 = vst.msk [vmem:[%s3219_s3 + $0x6c] sm:$0xf] %vm1683_vm0, %v2032_v16  ;;  %1761 = vst.msk [vmem:[%s3219_s3 + $0x134] sm:$0xf] %vm1683_vm0, %v2082_v17  ;;  %v897_v20 = vadd.f32 %v2709_v53, %v896_v18  ;;  %v1097_v21 = vadd.f32 %v2709_v53, %v1096_v19  ;;  %v898_v22 = vpop.f32.mrb[57].mxu0  ;;  %v1098_v23 = vpop.f32.mrb[57].mxu1 }
 0x186   :  { %v899_v24 = vpop.f32.mrb[58].mxu0  ;;  %v1099_v25 = vpop.f32.mrb[58].mxu1 }
 0x187   :  { %v1211_v26 = vmax.f32 %v897_v20, 0.0  ;;  %v1261_v27 = vmax.f32 %v1097_v21, 0.0  ;;  %v900_v28 = vadd.f32 %v2709_v53, %v899_v24  ;;  %v1100_v29 = vadd.f32 %v2709_v53, %v1099_v25  ;;  %v901_v30 = vpop.f32.mrb[59].mxu0  ;;  %v1101_v31 = vpop.f32.mrb[59].mxu1 }
 0x189   :  { %v2033_v32 = vpack.c.bf16 %v1211_v26, %v1211_v26  ;;  %v2083_v33 = vpack.c.bf16 %v1261_v27, %v1261_v27  ;;  %v1212_v34 = vmax.f32 %v900_v28, 0.0  ;;  %v1262_v35 = vmax.f32 %v1100_v29, 0.0 }
 0x18b   :  { %1712 = vst.msk [vmem:[%s3219_s3 + $0x70] sm:$0xf] %vm1683_vm0, %v2033_v32  ;;  %1762 = vst.msk [vmem:[%s3219_s3 + $0x138] sm:$0xf] %vm1683_vm0, %v2083_v33  ;;  %v2034_v36 = vpack.c.bf16 %v1212_v34, %v1212_v34  ;;  %v2084_v37 = vpack.c.bf16 %v1262_v35, %v1262_v35 }
 0x18c   :  { %v904_v38 = vpop.f32.mrb[60].mxu0  ;;  %v1104_v39 = vpop.f32.mrb[60].mxu1 }
 0x18d   :  { %1713 = vst.msk [vmem:[%s3219_s3 + $0x74] sm:$0xf] %vm1683_vm0, %v2034_v36  ;;  %1763 = vst.msk [vmem:[%s3219_s3 + $0x13c] sm:$0xf] %vm1683_vm0, %v2084_v37  ;;  %v905_v40 = vadd.f32 %v2709_v53, %v904_v38  ;;  %v1105_v41 = vadd.f32 %v2709_v53, %v1104_v39  ;;  %v906_v42 = vpop.f32.mrb[61].mxu0  ;;  %v1106_v43 = vpop.f32.mrb[61].mxu1 }
 0x18e   :  { %v907_v44 = vpop.f32.mrb[62].mxu0  ;;  %v1107_v45 = vpop.f32.mrb[62].mxu1 }
 0x18f   :  { %v1213_v46 = vmax.f32 %v905_v40, 0.0  ;;  %v1263_v47 = vmax.f32 %v1105_v41, 0.0  ;;  %v908_v48 = vadd.f32 %v2709_v53, %v907_v44  ;;  %v1108_v49 = vadd.f32 %v2709_v53, %v1107_v45  ;;  %v909_v50 = vpop.f32.mrb[63].mxu0  ;;  %v1109_v51 = vpop.f32.mrb[63].mxu1 }
 0x191   :  { %v2035_v52 = vpack.c.bf16 %v1213_v46, %v1213_v46  ;;  %v2085_v54 = vpack.c.bf16 %v1263_v47, %v1263_v47  ;;  %v1214_v55 = vmax.f32 %v908_v48, 0.0  ;;  %v1264_v56 = vmax.f32 %v1108_v49, 0.0 }
 0x193   :  { %1714 = vst.msk [vmem:[%s3219_s3 + $0x78] sm:$0xf] %vm1683_vm0, %v2035_v52  ;;  %1764 = vst.msk [vmem:[%s3219_s3 + $0x140] sm:$0xf] %vm1683_vm0, %v2085_v54  ;;  %v2036_v57 = vpack.c.bf16 %v1214_v55, %v1214_v55  ;;  %v2086_v58 = vpack.c.bf16 %v1264_v56, %v1264_v56 }
 0x194   :  { %v912_v59 = vpop.f32.mrb[64].mxu0  ;;  %v1112_v60 = vpop.f32.mrb[64].mxu1 }
 0x195   :  { %1715 = vst.msk [vmem:[%s3219_s3 + $0x7c] sm:$0xf] %vm1683_vm0, %v2036_v57  ;;  %1765 = vst.msk [vmem:[%s3219_s3 + $0x144] sm:$0xf] %vm1683_vm0, %v2086_v58  ;;  %v913_v61 = vadd.f32 %v2709_v53, %v912_v59  ;;  %v1113_v62 = vadd.f32 %v2709_v53, %v1112_v60  ;;  %v914_v63 = vpop.f32.mrb[65].mxu0  ;;  %v1114_v0 = vpop.f32.mrb[65].mxu1 }
 0x196   :  { %v915_v1 = vpop.f32.mrb[66].mxu0  ;;  %v1115_v2 = vpop.f32.mrb[66].mxu1 }
 0x197   :  { %v1215_v3 = vmax.f32 %v913_v61, 0.0  ;;  %v1265_v4 = vmax.f32 %v1113_v62, 0.0  ;;  %v916_v5 = vadd.f32 %v2709_v53, %v915_v1  ;;  %v1116_v6 = vadd.f32 %v2709_v53, %v1115_v2  ;;  %v917_v7 = vpop.f32.mrb[67].mxu0  ;;  %v1117_v8 = vpop.f32.mrb[67].mxu1 }
 0x199   :  { %v2037_v9 = vpack.c.bf16 %v1215_v3, %v1215_v3  ;;  %v2087_v10 = vpack.c.bf16 %v1265_v4, %v1265_v4  ;;  %v1216_v11 = vmax.f32 %v916_v5, 0.0  ;;  %v1266_v12 = vmax.f32 %v1116_v6, 0.0 }
 0x19b   :  { %1716 = vst.msk [vmem:[%s3219_s3 + $0x80] sm:$0xf] %vm1683_vm0, %v2037_v9  ;;  %1766 = vst.msk [vmem:[%s3219_s3 + $0x148] sm:$0xf] %vm1683_vm0, %v2087_v10  ;;  %v2038_v13 = vpack.c.bf16 %v1216_v11, %v1216_v11  ;;  %v2088_v14 = vpack.c.bf16 %v1266_v12, %v1266_v12 }
 0x19c   :  { %v920_v15 = vpop.f32.mrb[68].mxu0  ;;  %v1120_v16 = vpop.f32.mrb[68].mxu1 }
 0x19d   :  { %1717 = vst.msk [vmem:[%s3219_s3 + $0x84] sm:$0xf] %vm1683_vm0, %v2038_v13  ;;  %1767 = vst.msk [vmem:[%s3219_s3 + $0x14c] sm:$0xf] %vm1683_vm0, %v2088_v14  ;;  %v921_v17 = vadd.f32 %v2709_v53, %v920_v15  ;;  %v1121_v18 = vadd.f32 %v2709_v53, %v1120_v16  ;;  %v922_v19 = vpop.f32.mrb[69].mxu0  ;;  %v1122_v20 = vpop.f32.mrb[69].mxu1 }
 0x19e   :  { %v923_v21 = vpop.f32.mrb[70].mxu0  ;;  %v1123_v22 = vpop.f32.mrb[70].mxu1 }
 0x19f   :  { %v1217_v23 = vmax.f32 %v921_v17, 0.0  ;;  %v1267_v24 = vmax.f32 %v1121_v18, 0.0  ;;  %v924_v25 = vadd.f32 %v2709_v53, %v923_v21  ;;  %v1124_v26 = vadd.f32 %v2709_v53, %v1123_v22  ;;  %v925_v27 = vpop.f32.mrb[71].mxu0  ;;  %v1125_v28 = vpop.f32.mrb[71].mxu1 }
 0x1a1   :  { %v2039_v29 = vpack.c.bf16 %v1217_v23, %v1217_v23  ;;  %v2089_v30 = vpack.c.bf16 %v1267_v24, %v1267_v24  ;;  %v1218_v31 = vmax.f32 %v924_v25, 0.0  ;;  %v1268_v32 = vmax.f32 %v1124_v26, 0.0 }
 0x1a3   :  { %1718 = vst.msk [vmem:[%s3219_s3 + $0x88] sm:$0xf] %vm1683_vm0, %v2039_v29  ;;  %1768 = vst.msk [vmem:[%s3219_s3 + $0x150] sm:$0xf] %vm1683_vm0, %v2089_v30  ;;  %v2040_v33 = vpack.c.bf16 %v1218_v31, %v1218_v31  ;;  %v2090_v34 = vpack.c.bf16 %v1268_v32, %v1268_v32 }
 0x1a4   :  { %v928_v35 = vpop.f32.mrb[72].mxu0  ;;  %v1128_v36 = vpop.f32.mrb[72].mxu1 }
 0x1a5   :  { %1719 = vst.msk [vmem:[%s3219_s3 + $0x8c] sm:$0xf] %vm1683_vm0, %v2040_v33  ;;  %1769 = vst.msk [vmem:[%s3219_s3 + $0x154] sm:$0xf] %vm1683_vm0, %v2090_v34  ;;  %v929_v37 = vadd.f32 %v2709_v53, %v928_v35  ;;  %v1129_v38 = vadd.f32 %v2709_v53, %v1128_v36  ;;  %v930_v39 = vpop.f32.mrb[73].mxu0  ;;  %v1130_v40 = vpop.f32.mrb[73].mxu1 }
 0x1a6   :  { %v931_v41 = vpop.f32.mrb[74].mxu0  ;;  %v1131_v42 = vpop.f32.mrb[74].mxu1 }
 0x1a7   :  { %v1219_v43 = vmax.f32 %v929_v37, 0.0  ;;  %v1269_v44 = vmax.f32 %v1129_v38, 0.0  ;;  %v932_v45 = vadd.f32 %v2709_v53, %v931_v41  ;;  %v1132_v46 = vadd.f32 %v2709_v53, %v1131_v42  ;;  %v933_v47 = vpop.f32.mrb[75].mxu0  ;;  %v1133_v48 = vpop.f32.mrb[75].mxu1  ;;  %v3136_v42 = vld [vmem:[%s3218_s2] ss:$0 sm:$0xff] }
 0x1a9   :  { %v2041_v49 = vpack.c.bf16 %v1219_v43, %v1219_v43  ;;  %v2091_v50 = vpack.c.bf16 %v1269_v44, %v1269_v44  ;;  %v1220_v51 = vmax.f32 %v932_v45, 0.0  ;;  %v1270_v52 = vmax.f32 %v1132_v46, 0.0 }
 0x1ab   :  { %1720 = vst.msk [vmem:[%s3219_s3 + $0x90] sm:$0xf] %vm1683_vm0, %v2041_v49  ;;  %1770 = vst.msk [vmem:[%s3219_s3 + $0x158] sm:$0xf] %vm1683_vm0, %v2091_v50  ;;  %v2042_v54 = vpack.c.bf16 %v1220_v51, %v1220_v51  ;;  %v2092_v55 = vpack.c.bf16 %v1270_v52, %v1270_v52 }
 0x1ac   :  { %v936_v56 = vpop.f32.mrb[76].mxu0  ;;  %v1136_v57 = vpop.f32.mrb[76].mxu1 }
 0x1ad   :  { %1721 = vst.msk [vmem:[%s3219_s3 + $0x94] sm:$0xf] %vm1683_vm0, %v2042_v54  ;;  %1771 = vst.msk [vmem:[%s3219_s3 + $0x15c] sm:$0xf] %vm1683_vm0, %v2092_v55  ;;  %v937_v58 = vadd.f32 %v2709_v53, %v936_v56  ;;  %v1137_v59 = vadd.f32 %v2709_v53, %v1136_v57  ;;  %v938_v60 = vpop.f32.mrb[77].mxu0  ;;  %v1138_v61 = vpop.f32.mrb[77].mxu1 }
 0x1ae   :  { %v939_v62 = vpop.f32.mrb[78].mxu0  ;;  %v1139_v63 = vpop.f32.mrb[78].mxu1 }
 0x1af   :  { %v1221_v0 = vmax.f32 %v937_v58, 0.0  ;;  %v1271_v1 = vmax.f32 %v1137_v59, 0.0  ;;  %v940_v2 = vadd.f32 %v2709_v53, %v939_v62  ;;  %v1140_v3 = vadd.f32 %v2709_v53, %v1139_v63  ;;  %v941_v4 = vpop.f32.mrb[79].mxu0  ;;  %v1141_v5 = vpop.f32.mrb[79].mxu1 }
 0x1b1   :  { %v2043_v6 = vpack.c.bf16 %v1221_v0, %v1221_v0  ;;  %v2093_v7 = vpack.c.bf16 %v1271_v1, %v1271_v1  ;;  %v1222_v8 = vmax.f32 %v940_v2, 0.0  ;;  %v1272_v9 = vmax.f32 %v1140_v3, 0.0 }
 0x1b3   :  { %1722 = vst.msk [vmem:[%s3219_s3 + $0x98] sm:$0xf] %vm1683_vm0, %v2043_v6  ;;  %1772 = vst.msk [vmem:[%s3219_s3 + $0x160] sm:$0xf] %vm1683_vm0, %v2093_v7  ;;  %v2044_v10 = vpack.c.bf16 %v1222_v8, %v1222_v8  ;;  %v2094_v11 = vpack.c.bf16 %v1272_v9, %v1272_v9 }
 0x1b4   :  { %v944_v12 = vpop.f32.mrb[80].mxu0  ;;  %v1144_v13 = vpop.f32.mrb[80].mxu1 }
 0x1b5   :  { %1723 = vst.msk [vmem:[%s3219_s3 + $0x9c] sm:$0xf] %vm1683_vm0, %v2044_v10  ;;  %1773 = vst.msk [vmem:[%s3219_s3 + $0x164] sm:$0xf] %vm1683_vm0, %v2094_v11  ;;  %v945_v14 = vadd.f32 %v2709_v53, %v944_v12  ;;  %v1145_v15 = vadd.f32 %v2709_v53, %v1144_v13  ;;  %v946_v16 = vpop.f32.mrb[81].mxu0  ;;  %v1146_v17 = vpop.f32.mrb[81].mxu1 }
 0x1b6   :  { %v947_v18 = vpop.f32.mrb[82].mxu0  ;;  %v1147_v19 = vpop.f32.mrb[82].mxu1 }
 0x1b7   :  { %v1223_v20 = vmax.f32 %v945_v14, 0.0  ;;  %v1273_v21 = vmax.f32 %v1145_v15, 0.0  ;;  %v948_v22 = vadd.f32 %v2709_v53, %v947_v18  ;;  %v1148_v23 = vadd.f32 %v2709_v53, %v1147_v19  ;;  %v949_v24 = vpop.f32.mrb[83].mxu0  ;;  %v1149_v25 = vpop.f32.mrb[83].mxu1 }
 0x1b9   :  { %v2045_v26 = vpack.c.bf16 %v1223_v20, %v1223_v20  ;;  %v2095_v27 = vpack.c.bf16 %v1273_v21, %v1273_v21  ;;  %v1224_v28 = vmax.f32 %v948_v22, 0.0  ;;  %v1274_v29 = vmax.f32 %v1148_v23, 0.0 }
 0x1bb   :  { %1724 = vst.msk [vmem:[%s3219_s3 + $0xa0] sm:$0xf] %vm1683_vm0, %v2045_v26  ;;  %1774 = vst.msk [vmem:[%s3219_s3 + $0x168] sm:$0xf] %vm1683_vm0, %v2095_v27  ;;  %v2046_v30 = vpack.c.bf16 %v1224_v28, %v1224_v28  ;;  %v2096_v31 = vpack.c.bf16 %v1274_v29, %v1274_v29 }
 0x1bc   :  { %v952_v32 = vpop.f32.mrb[84].mxu0  ;;  %v1152_v33 = vpop.f32.mrb[84].mxu1 }
 0x1bd   :  { %1725 = vst.msk [vmem:[%s3219_s3 + $0xa4] sm:$0xf] %vm1683_vm0, %v2046_v30  ;;  %1775 = vst.msk [vmem:[%s3219_s3 + $0x16c] sm:$0xf] %vm1683_vm0, %v2096_v31  ;;  %v953_v34 = vadd.f32 %v2709_v53, %v952_v32  ;;  %v1153_v35 = vadd.f32 %v2709_v53, %v1152_v33  ;;  %v954_v36 = vpop.f32.mrb[85].mxu0  ;;  %v1154_v37 = vpop.f32.mrb[85].mxu1 }
 0x1be   :  { %v955_v38 = vpop.f32.mrb[86].mxu0  ;;  %v1155_v39 = vpop.f32.mrb[86].mxu1 }
 0x1bf   :  { %v1225_v40 = vmax.f32 %v953_v34, 0.0  ;;  %v1275_v41 = vmax.f32 %v1153_v35, 0.0  ;;  %v956_v43 = vadd.f32 %v3136_v42, %v955_v38  ;;  %v1156_v44 = vadd.f32 %v3136_v42, %v1155_v39  ;;  %v957_v45 = vpop.f32.mrb[87].mxu0  ;;  %v1157_v46 = vpop.f32.mrb[87].mxu1 }
 0x1c1   :  { %v2047_v47 = vpack.c.bf16 %v1225_v40, %v1225_v40  ;;  %v2097_v48 = vpack.c.bf16 %v1275_v41, %v1275_v41  ;;  %v1226_v53 = vmax.f32 %v956_v43, 0.0  ;;  %v1276_v49 = vmax.f32 %v1156_v44, 0.0 }
 0x1c3   :  { %1726 = vst.msk [vmem:[%s3219_s3 + $0xa8] sm:$0xf] %vm1683_vm0, %v2047_v47  ;;  %1776 = vst.msk [vmem:[%s3219_s3 + $0x170] sm:$0xf] %vm1683_vm0, %v2097_v48  ;;  %v2048_v50 = vpack.c.bf16 %v1226_v53, %v1226_v53  ;;  %v2098_v51 = vpack.c.bf16 %v1276_v49, %v1276_v49 }
 0x1c4   :  { %v960_v52 = vpop.f32.mrb[88].mxu0  ;;  %v1160_v54 = vpop.f32.mrb[88].mxu1 }
 0x1c5   :  { %1727 = vst.msk [vmem:[%s3219_s3 + $0xac] sm:$0xf] %vm1683_vm0, %v2048_v50  ;;  %1777 = vst.msk [vmem:[%s3219_s3 + $0x174] sm:$0xf] %vm1683_vm0, %v2098_v51  ;;  %v961_v55 = vadd.f32 %v3136_v42, %v960_v52  ;;  %v1161_v56 = vadd.f32 %v3136_v42, %v1160_v54  ;;  %v962_v57 = vpop.f32.mrb[89].mxu0  ;;  %v1162_v58 = vpop.f32.mrb[89].mxu1 }
 0x1c6   :  { %v963_v59 = vpop.f32.mrb[90].mxu0  ;;  %v1163_v60 = vpop.f32.mrb[90].mxu1 }
 0x1c7   :  { %v1227_v61 = vmax.f32 %v961_v55, 0.0  ;;  %v1277_v62 = vmax.f32 %v1161_v56, 0.0  ;;  %v964_v63 = vadd.f32 %v3136_v42, %v963_v59  ;;  %v1164_v0 = vadd.f32 %v3136_v42, %v1163_v60  ;;  %v965_v1 = vpop.f32.mrb[91].mxu0  ;;  %v1165_v2 = vpop.f32.mrb[91].mxu1 }
 0x1c9   :  { %v2049_v3 = vpack.c.bf16 %v1227_v61, %v1227_v61  ;;  %v2099_v4 = vpack.c.bf16 %v1277_v62, %v1277_v62  ;;  %v1228_v5 = vmax.f32 %v964_v63, 0.0  ;;  %v1278_v6 = vmax.f32 %v1164_v0, 0.0 }
 0x1cb   :  { %1728 = vst.msk [vmem:[%s3219_s3 + $0xb0] sm:$0xf] %vm1683_vm0, %v2049_v3  ;;  %1778 = vst.msk [vmem:[%s3219_s3 + $0x178] sm:$0xf] %vm1683_vm0, %v2099_v4  ;;  %v2050_v7 = vpack.c.bf16 %v1228_v5, %v1228_v5  ;;  %v2100_v8 = vpack.c.bf16 %v1278_v6, %v1278_v6 }
 0x1cc   :  { %v968_v9 = vpop.f32.mrb[92].mxu0  ;;  %v1168_v10 = vpop.f32.mrb[92].mxu1 }
 0x1cd   :  { %1729 = vst.msk [vmem:[%s3219_s3 + $0xb4] sm:$0xf] %vm1683_vm0, %v2050_v7  ;;  %1779 = vst.msk [vmem:[%s3219_s3 + $0x17c] sm:$0xf] %vm1683_vm0, %v2100_v8  ;;  %v969_v11 = vadd.f32 %v3136_v42, %v968_v9  ;;  %v1169_v12 = vadd.f32 %v3136_v42, %v1168_v10  ;;  %v970_v13 = vpop.f32.mrb[93].mxu0  ;;  %v1170_v14 = vpop.f32.mrb[93].mxu1 }
 0x1ce   :  { %v971_v15 = vpop.f32.mrb[94].mxu0  ;;  %v1171_v16 = vpop.f32.mrb[94].mxu1 }
 0x1cf   :  { %v1229_v17 = vmax.f32 %v969_v11, 0.0  ;;  %v1279_v18 = vmax.f32 %v1169_v12, 0.0  ;;  %v972_v19 = vadd.f32 %v3136_v42, %v971_v15  ;;  %v1172_v20 = vadd.f32 %v3136_v42, %v1171_v16  ;;  %v973_v21 = vpop.f32.mrb[95].mxu0  ;;  %v1173_v22 = vpop.f32.mrb[95].mxu1 }
 0x1d1   :  { %v2051_v23 = vpack.c.bf16 %v1229_v17, %v1229_v17  ;;  %v2101_v24 = vpack.c.bf16 %v1279_v18, %v1279_v18  ;;  %v1230_v25 = vmax.f32 %v972_v19, 0.0  ;;  %v1280_v26 = vmax.f32 %v1172_v20, 0.0 }
 0x1d3   :  { %1730 = vst.msk [vmem:[%s3219_s3 + $0xb8] sm:$0xf] %vm1683_vm0, %v2051_v23  ;;  %1780 = vst.msk [vmem:[%s3219_s3 + $0x180] sm:$0xf] %vm1683_vm0, %v2101_v24  ;;  %v2052_v27 = vpack.c.bf16 %v1230_v25, %v1230_v25  ;;  %v2102_v28 = vpack.c.bf16 %v1280_v26, %v1280_v26 }
 0x1d4   :  { %v976_v29 = vpop.f32.mrb[96].mxu0  ;;  %v1176_v30 = vpop.f32.mrb[96].mxu1 }
 0x1d5   :  { %1731 = vst.msk [vmem:[%s3219_s3 + $0xbc] sm:$0xf] %vm1683_vm0, %v2052_v27  ;;  %1781 = vst.msk [vmem:[%s3219_s3 + $0x184] sm:$0xf] %vm1683_vm0, %v2102_v28  ;;  %v977_v31 = vadd.f32 %v3136_v42, %v976_v29  ;;  %v1177_v32 = vadd.f32 %v3136_v42, %v1176_v30  ;;  %v978_v33 = vpop.f32.mrb[97].mxu0  ;;  %v1178_v34 = vpop.f32.mrb[97].mxu1 }
 0x1d6   :  { %v979_v35 = vpop.f32.mrb[98].mxu0  ;;  %v1179_v36 = vpop.f32.mrb[98].mxu1 }
 0x1d7   :  { %v1231_v37 = vmax.f32 %v977_v31, 0.0  ;;  %v1281_v38 = vmax.f32 %v1177_v32, 0.0  ;;  %v980_v39 = vadd.f32 %v3136_v42, %v979_v35  ;;  %v1180_v40 = vadd.f32 %v3136_v42, %v1179_v36  ;;  %v981_v41 = vpop.f32.mrb[99].mxu0  ;;  %v1181_v43 = vpop.f32.mrb[99].mxu1 }
 0x1d9   :  { %v2053_v44 = vpack.c.bf16 %v1231_v37, %v1231_v37  ;;  %v2103_v45 = vpack.c.bf16 %v1281_v38, %v1281_v38  ;;  %v1232_v46 = vmax.f32 %v980_v39, 0.0  ;;  %v1282_v47 = vmax.f32 %v1180_v40, 0.0 }
 0x1db   :  { %1732 = vst.msk [vmem:[%s3219_s3 + $0xc0] sm:$0xf] %vm1683_vm0, %v2053_v44  ;;  %1782 = vst.msk [vmem:[%s3219_s3 + $0x188] sm:$0xf] %vm1683_vm0, %v2103_v45  ;;  %v2054_v48 = vpack.c.bf16 %v1232_v46, %v1232_v46  ;;  %v2104_v53 = vpack.c.bf16 %v1282_v47, %v1282_v47 }
 0x1dd   :  { %1733 = vst.msk [vmem:[%s3219_s3 + $0xc4] sm:$0xf] %vm1683_vm0, %v2054_v48  ;;  %1783 = vst.msk [vmem:[%s3219_s3 + $0x18c] sm:$0xf] %vm1683_vm0, %v2104_v53 }

// kernel: dueling_dqn_forward.5
= control target key start
LH: loop header
LB: loop body
LE: loop exit
PB: predicated region body
PF: predicated region fallthrough
CT: control target
= control target key end

     0   :  { %vm880_vm0 = vcmask 519168   ;;  %vm901_vm1 = vcmask 516096   ;;  %s1637_s1 = inlined_call_operand.vmem [shape: bf16[512,64], index: 1, kind: input, shape index: {}]   ;;  %s1638_s0 = inlined_call_operand.vmem [shape: bf16[162,512], index: 0, kind: input, shape index: {}]   ;;  %s1639_s2 = inlined_call_operand.vmem [shape: f32[1,64], index: 2, kind: input, shape index: {}]   ;;  %s1640_s3 = inlined_call_operand.vmem [shape: bf16[162,64], index: 3, kind: output, shape index: {}]  }
   0x1   :  { %v1190_v0 = vld [vmem:[%s1637_s1 + $0x40] sm:$0xff]   ;;  %v1194_v4 = vld [vmem:[%s1637_s1 + $0x48] sm:$0xff]   ;;  %v1198_v8 = vld [vmem:[%s1637_s1 + $0x50] sm:$0xff]  }
   0x2   :  { %v1191_v1 = vld [vmem:[%s1637_s1 + $0xc0] sm:$0xff]   ;;  %1026 = vmatprep.subr.bf16.mxu0 %v1190_v0  ;;  %v1195_v5 = vld [vmem:[%s1637_s1 + $0xc8] sm:$0xff]   ;;  %v1199_v9 = vld [vmem:[%s1637_s1 + $0xd0] sm:$0xff]  }
   0x3   :  { %v1192_v2 = vld [vmem:[%s1637_s1] sm:$0xff]   ;;  %1108 = vmatprep.subr.bf16.mxu1 %v1191_v1  ;;  %v1196_v6 = vld [vmem:[%s1637_s1 + $0x8] sm:$0xff]   ;;  %v1200_v10 = vld [vmem:[%s1637_s1 + $0x10] sm:$0xff]  }
   0x4   :  { %v1193_v3 = vld [vmem:[%s1637_s1 + $0x80] sm:$0xff]   ;;  %1027 = vmatpush3.bf16.msra.mxu0 %v1192_v2  ;;  %v1197_v7 = vld [vmem:[%s1637_s1 + $0x88] sm:$0xff]   ;;  %v1201_v11 = vld [vmem:[%s1637_s1 + $0x90] sm:$0xff]  }
   0x5   :  { %1109 = vmatpush3.bf16.msra.mxu1 %v1193_v3  ;;  %1028 = vmatprep.subr.bf16.mxu0 %v1194_v4  ;;  %v1202_v12 = vld [vmem:[%s1637_s1 + $0x58] sm:$0xff]   ;;  %v1206_v16 = vld [vmem:[%s1637_s1 + $0x60] sm:$0xff]   ;;  %v1210_v20 = vld [vmem:[%s1637_s1 + $0x68] sm:$0xff]  }
   0x6   :  { %1110 = vmatprep.subr.bf16.mxu1 %v1195_v5  ;;  %v1203_v13 = vld [vmem:[%s1637_s1 + $0xd8] sm:$0xff]   ;;  %v1207_v17 = vld [vmem:[%s1637_s1 + $0xe0] sm:$0xff]   ;;  %v1211_v21 = vld [vmem:[%s1637_s1 + $0xe8] sm:$0xff]  }
   0x7   :  { %v1204_v14 = vld [vmem:[%s1637_s1 + $0x18] sm:$0xff]   ;;  %v1208_v18 = vld [vmem:[%s1637_s1 + $0x20] sm:$0xff]   ;;  %v1212_v22 = vld [vmem:[%s1637_s1 + $0x28] sm:$0xff]  }
   0x8   :  { %1029 = vmatpush3.bf16.msra.mxu0 %v1196_v6  ;;  %v1205_v15 = vld [vmem:[%s1637_s1 + $0x98] sm:$0xff]   ;;  %v1209_v19 = vld [vmem:[%s1637_s1 + $0xa0] sm:$0xff]   ;;  %v1213_v23 = vld [vmem:[%s1637_s1 + $0xa8] sm:$0xff]  }
   0x9   :  { %1111 = vmatpush3.bf16.msra.mxu1 %v1197_v7  ;;  %1030 = vmatprep.subr.bf16.mxu0 %v1198_v8  ;;  %v1214_v24 = vld [vmem:[%s1637_s1 + $0x70] sm:$0xff]   ;;  %v1218_v28 = vld [vmem:[%s1637_s1 + $0x78] sm:$0xff]   ;;  %v55_v6 = vld [vmem:[%s1638_s0 + $0x140] sm:$0x11] }
   0xa   :  { %1112 = vmatprep.subr.bf16.mxu1 %v1199_v9  ;;  %v1215_v25 = vld [vmem:[%s1637_s1 + $0xf0] sm:$0xff]   ;;  %v1219_v29 = vld [vmem:[%s1637_s1 + $0xf8] sm:$0xff]   ;;  %v56_v7 = vld [vmem:[%s1638_s0 + $0x148] sm:$0x11] }
   0xb   :  { %v1216_v26 = vld [vmem:[%s1637_s1 + $0x30] sm:$0xff]   ;;  %v1220_v30 = vld [vmem:[%s1637_s1 + $0x38] sm:$0xff]  }
   0xc   :  { %1031 = vmatpush3.bf16.msra.mxu0 %v1200_v10  ;;  %v1217_v27 = vld [vmem:[%s1637_s1 + $0xb0] sm:$0xff]   ;;  %v1221_v31 = vld [vmem:[%s1637_s1 + $0xb8] sm:$0xff]   ;;  %v949_v10 = vcombine.high %v55_v6, %v55_v6 }
   0xd   :  { %1113 = vmatpush3.bf16.msra.mxu1 %v1201_v11  ;;  %1032 = vmatprep.subr.bf16.mxu0 %v1202_v12  ;;  %v1222_v32 = vld [vmem:[%s1638_s0] ss:$16 sps:$4 sm:$0xff]   ;;  %v1224_v33 = vld [vmem:[%s1638_s0 + $0x4] ss:$16 sps:$4 sm:$0xff]   ;;  %v1225_v34 = vld [vmem:[%s1638_s0 + $0x8] ss:$16 sps:$4 sm:$0xff]   ;;  %v951_v11 = vcombine.high %v56_v7, %v56_v7  ;;  %v948_v12 = vcombine.low %v55_v6, %v55_v6 }
   0xe   :  { %1114 = vmatprep.subr.bf16.mxu1 %v1203_v13  ;;  %v1227_v35 = vld [vmem:[%s1638_s0 + $0xc] ss:$16 sps:$4 sm:$0xff]   ;;  %566 = vmatprep.mubr.bf16.mxu0 %v1224_v33  ;;  %v1228_v36 = vld [vmem:[%s1638_s0 + $0x24] ss:$16 sps:$4 sm:$0xff]   ;;  %v1232_v38 = vld [vmem:[%s1638_s0 + $0x20] ss:$16 sps:$4 sm:$0xff]   ;;  %v950_v13 = vcombine.low %v56_v7, %v56_v7 }
   0xf   :  { %686 = vmatprep.mubr.bf16.mxu1 %v1227_v35  ;;  %v1230_v37 = vld [vmem:[%s1638_s0 + $0x2c] ss:$16 sps:$4 sm:$0xff]   ;;  %v1233_v39 = vld [vmem:[%s1638_s0 + $0x28] ss:$16 sps:$4 sm:$0xff]   ;;  %v1234_v40 = vld [vmem:[%s1638_s0 + $0x44] ss:$16 sps:$4 sm:$0xff]  }
  0x10   :  { %1033 = vmatpush3.bf16.msra.mxu0 %v1204_v14  ;;  %v1236_v41 = vld [vmem:[%s1638_s0 + $0x4c] ss:$16 sps:$4 sm:$0xff]   ;;  %v1238_v42 = vld [vmem:[%s1638_s0 + $0x40] ss:$16 sps:$4 sm:$0xff]   ;;  %v1239_v43 = vld [vmem:[%s1638_s0 + $0x48] ss:$16 sps:$4 sm:$0xff]  }
  0x11   :  { %1115 = vmatpush3.bf16.msra.mxu1 %v1205_v15  ;;  %1034 = vmatprep.subr.bf16.mxu0 %v1206_v16  ;;  %v1240_v44 = vld [vmem:[%s1638_s0 + $0x64] ss:$16 sps:$4 sm:$0xff]   ;;  %v1242_v45 = vld [vmem:[%s1638_s0 + $0x6c] ss:$16 sps:$4 sm:$0xff]   ;;  %v1244_v46 = vld [vmem:[%s1638_s0 + $0x60] ss:$16 sps:$4 sm:$0xff]  }
  0x12   :  { %1116 = vmatprep.subr.bf16.mxu1 %v1207_v17  ;;  %v1245_v47 = vld [vmem:[%s1638_s0 + $0x68] ss:$16 sps:$4 sm:$0xff]   ;;  %v1246_v48 = vld [vmem:[%s1638_s0 + $0x84] ss:$16 sps:$4 sm:$0xff]   ;;  %v1248_v49 = vld [vmem:[%s1638_s0 + $0x8c] ss:$16 sps:$4 sm:$0xff]  }
  0x13   :  { %v1250_v50 = vld [vmem:[%s1638_s0 + $0x80] ss:$16 sps:$4 sm:$0xff]   ;;  %v1251_v51 = vld [vmem:[%s1638_s0 + $0x88] ss:$16 sps:$4 sm:$0xff]   ;;  %v1252_v52 = vld [vmem:[%s1638_s0 + $0xa4] ss:$16 sps:$4 sm:$0xff]  }
  0x14   :  { %1035 = vmatpush3.bf16.msra.mxu0 %v1208_v18  ;;  %v1254_v53 = vld [vmem:[%s1638_s0 + $0xac] ss:$16 sps:$4 sm:$0xff]   ;;  %v1256_v54 = vld [vmem:[%s1638_s0 + $0xa0] ss:$16 sps:$4 sm:$0xff]   ;;  %v1257_v55 = vld [vmem:[%s1638_s0 + $0xa8] ss:$16 sps:$4 sm:$0xff]  }
  0x15   :  { %1117 = vmatpush3.bf16.msra.mxu1 %v1209_v19  ;;  %1036 = vmatprep.subr.bf16.mxu0 %v1210_v20  ;;  %v1258_v56 = vld [vmem:[%s1638_s0 + $0xc4] ss:$16 sps:$4 sm:$0xff]   ;;  %v1260_v57 = vld [vmem:[%s1638_s0 + $0xcc] ss:$16 sps:$4 sm:$0xff]   ;;  %v1262_v58 = vld [vmem:[%s1638_s0 + $0xc0] ss:$16 sps:$4 sm:$0xff]  }
  0x16   :  { %1118 = vmatprep.subr.bf16.mxu1 %v1211_v21  ;;  %v1263_v59 = vld [vmem:[%s1638_s0 + $0xc8] ss:$16 sps:$4 sm:$0xff]   ;;  %v1264_v60 = vld [vmem:[%s1638_s0 + $0xe4] ss:$16 sps:$4 sm:$0xff]   ;;  %v1266_v61 = vld [vmem:[%s1638_s0 + $0xec] ss:$16 sps:$4 sm:$0xff]  }
  0x17   :  { %v1268_v62 = vld [vmem:[%s1638_s0 + $0xe0] ss:$16 sps:$4 sm:$0xff]   ;;  %v1269_v63 = vld [vmem:[%s1638_s0 + $0xe8] ss:$16 sps:$4 sm:$0xff]   ;;  %v1270_v0 = vld [vmem:[%s1638_s0 + $0x104] ss:$16 sps:$4 sm:$0xff]  }
  0x18   :  { %1037 = vmatpush3.bf16.msra.mxu0 %v1212_v22  ;;  %v1272_v1 = vld [vmem:[%s1638_s0 + $0x10c] ss:$16 sps:$4 sm:$0xff]   ;;  %v1274_v2 = vld [vmem:[%s1638_s0 + $0x100] ss:$16 sps:$4 sm:$0xff]   ;;  %v1275_v3 = vld [vmem:[%s1638_s0 + $0x108] ss:$16 sps:$4 sm:$0xff]  }
  0x19   :  { %1119 = vmatpush3.bf16.msra.mxu1 %v1213_v23  ;;  %1038 = vmatprep.subr.bf16.mxu0 %v1214_v24  ;;  %v1276_v4 = vld [vmem:[%s1638_s0 + $0x124] ss:$16 sps:$4 sm:$0xff]   ;;  %v1278_v5 = vld [vmem:[%s1638_s0 + $0x12c] ss:$16 sps:$4 sm:$0xff]   ;;  %v1280_v8 = vld [vmem:[%s1638_s0 + $0x120] ss:$16 sps:$4 sm:$0xff]  }
  0x1a   :  { %1120 = vmatprep.subr.bf16.mxu1 %v1215_v25  ;;  %v1281_v9 = vld [vmem:[%s1638_s0 + $0x128] ss:$16 sps:$4 sm:$0xff]   ;;  %v1531_v16 = vld [vmem:[%s1639_s2] ss:$0 sm:$0xff] }
  0x1c   :  { %1039 = vmatpush3.bf16.msra.mxu0 %v1216_v26 }
  0x1d   :  { %1121 = vmatpush3.bf16.msra.mxu1 %v1217_v27  ;;  %1040 = vmatprep.subr.bf16.mxu0 %v1218_v28 }
  0x1e   :  { %1122 = vmatprep.subr.bf16.mxu1 %v1219_v29 }
  0x20   :  { %1041 = vmatpush3.bf16.msra.mxu0 %v1220_v30 }
  0x21   :  { %1123 = vmatpush3.bf16.msra.mxu1 %v1221_v31 }
  0x23   :  { %567 = vmatmul.mubr.bf16.vlgmr.msra.gmra.mrb[0].mxu0 %v1222_v32 }
  0x24   :  { %687 = vmatmul.mubr.bf16.vlgmr.msra.gmra.mrb[0].mxu1 %v1225_v34  ;;  %574 = vmatprep.mubr.bf16.mxu0 %v1228_v36 }
  0x25   :  { %694 = vmatprep.mubr.bf16.mxu1 %v1230_v37 }
  0x2b   :  { %575 = vmatmul.mubr.bf16.gmra.mrb[4].mxu0 %v1232_v38 }
  0x2c   :  { %695 = vmatmul.mubr.bf16.gmra.mrb[4].mxu1 %v1233_v39  ;;  %582 = vmatprep.mubr.bf16.mxu0 %v1234_v40 }
  0x2d   :  { %702 = vmatprep.mubr.bf16.mxu1 %v1236_v41 }
  0x33   :  { %583 = vmatmul.mubr.bf16.gmra.mrb[8].mxu0 %v1238_v42 }
  0x34   :  { %703 = vmatmul.mubr.bf16.gmra.mrb[8].mxu1 %v1239_v43  ;;  %590 = vmatprep.mubr.bf16.mxu0 %v1240_v44 }
  0x35   :  { %710 = vmatprep.mubr.bf16.mxu1 %v1242_v45 }
  0x3b   :  { %591 = vmatmul.mubr.bf16.gmra.mrb[12].mxu0 %v1244_v46 }
  0x3c   :  { %711 = vmatmul.mubr.bf16.gmra.mrb[12].mxu1 %v1245_v47  ;;  %598 = vmatprep.mubr.bf16.mxu0 %v1246_v48 }
  0x3d   :  { %718 = vmatprep.mubr.bf16.mxu1 %v1248_v49 }
  0x43   :  { %599 = vmatmul.mubr.bf16.gmra.mrb[16].mxu0 %v1250_v50 }
  0x44   :  { %719 = vmatmul.mubr.bf16.gmra.mrb[16].mxu1 %v1251_v51  ;;  %606 = vmatprep.mubr.bf16.mxu0 %v1252_v52 }
  0x45   :  { %726 = vmatprep.mubr.bf16.mxu1 %v1254_v53 }
  0x4b   :  { %607 = vmatmul.mubr.bf16.gmra.mrb[20].mxu0 %v1256_v54 }
  0x4c   :  { %727 = vmatmul.mubr.bf16.gmra.mrb[20].mxu1 %v1257_v55  ;;  %614 = vmatprep.mubr.bf16.mxu0 %v1258_v56 }
  0x4d   :  { %734 = vmatprep.mubr.bf16.mxu1 %v1260_v57 }
  0x53   :  { %615 = vmatmul.mubr.bf16.gmra.mrb[24].mxu0 %v1262_v58 }
  0x54   :  { %735 = vmatmul.mubr.bf16.gmra.mrb[24].mxu1 %v1263_v59  ;;  %622 = vmatprep.mubr.bf16.mxu0 %v1264_v60 }
  0x55   :  { %742 = vmatprep.mubr.bf16.mxu1 %v1266_v61 }
  0x5b   :  { %623 = vmatmul.mubr.bf16.gmra.mrb[28].mxu0 %v1268_v62 }
  0x5c   :  { %743 = vmatmul.mubr.bf16.gmra.mrb[28].mxu1 %v1269_v63  ;;  %630 = vmatprep.mubr.bf16.mxu0 %v1270_v0 }
  0x5d   :  { %750 = vmatprep.mubr.bf16.mxu1 %v1272_v1 }
  0x63   :  { %631 = vmatmul.mubr.bf16.gmra.mrb[32].mxu0 %v1274_v2 }
  0x64   :  { %751 = vmatmul.mubr.bf16.gmra.mrb[32].mxu1 %v1275_v3  ;;  %638 = vmatprep.mubr.bf16.mxu0 %v1276_v4 }
  0x65   :  { %758 = vmatprep.mubr.bf16.mxu1 %v1278_v5 }
  0x6b   :  { %639 = vmatmul.mubr.bf16.gmra.mrb[36].mxu0 %v1280_v8 }
  0x6c   :  { %759 = vmatmul.mubr.bf16.gmra.mrb[36].mxu1 %v1281_v9  ;;  %646 = vmatprep.mubr.bf16.mxu0 %v949_v10 }
  0x6d   :  { %766 = vmatprep.mubr.bf16.mxu1 %v951_v11 }
  0x73   :  { %647 = vmatmul.mubr.bf16.gmra.mrb[40].mxu0 %v948_v12 }
  0x74   :  { %767 = vmatmul.mubr.bf16.gmra.mrb[40].mxu1 %v950_v13 }
  0xf6   :  { %v1042_v14 = vpop.f32.mrb[0].mxu0 }
  0xf7   :  { %v1124_v15 = vpop.f32.mrb[0].mxu1  ;;  %v1043_v17 = vpop.f32.mrb[1].mxu0 }
  0xf8   :  { %v1044_v18 = vadd.f32 %v1043_v17, %v1042_v14  ;;  %v1125_v19 = vpop.f32.mrb[1].mxu1  ;;  %v1045_v20 = vpop.f32.mrb[2].mxu0 }
  0xf9   :  { %v1126_v21 = vadd.f32 %v1125_v19, %v1124_v15  ;;  %v1127_v22 = vpop.f32.mrb[2].mxu1  ;;  %v1046_v23 = vpop.f32.mrb[3].mxu0 }
  0xfa   :  { %v569_v24 = vadd.f32 %v1044_v18, %v1531_v16  ;;  %v1047_v25 = vadd.f32 %v1046_v23, %v1045_v20  ;;  %v1128_v26 = vpop.f32.mrb[3].mxu1 }
  0xfb   :  { %v1129_v27 = vadd.f32 %v1128_v26, %v1127_v22 }
  0xfc   :  { %v689_v28 = vadd.f32 %v1126_v21, %v569_v24  ;;  %v572_v29 = vadd.f32 %v1047_v25, %v1531_v16 }
  0xfe   :  { %v774_v30 = vmax.f32 %v689_v28, 0.0  ;;  %v692_v31 = vadd.f32 %v1129_v27, %v572_v29  ;;  %v1048_v32 = vpop.f32.mrb[4].mxu0 }
  0xff   :  { %v1130_v33 = vpop.f32.mrb[4].mxu1  ;;  %v1049_v34 = vpop.f32.mrb[5].mxu0 }
 0x100   :  { %v1005_v35 = vpack.c.bf16 %v774_v30, %v774_v30  ;;  %v775_v36 = vmax.f32 %v692_v31, 0.0  ;;  %v1050_v37 = vadd.f32 %v1049_v34, %v1048_v32  ;;  %v1131_v38 = vpop.f32.mrb[5].mxu1  ;;  %v1051_v39 = vpop.f32.mrb[6].mxu0 }
 0x101   :  { %v1132_v40 = vadd.f32 %v1131_v38, %v1130_v33  ;;  %v1133_v41 = vpop.f32.mrb[6].mxu1  ;;  %v1052_v42 = vpop.f32.mrb[7].mxu0 }
 0x102   :  { %881 = vst.msk [vmem:[%s1640_s3] sm:$0xf] %vm880_vm0, %v1005_v35  ;;  %v1006_v43 = vpack.c.bf16 %v775_v36, %v775_v36  ;;  %v577_v44 = vadd.f32 %v1050_v37, %v1531_v16  ;;  %v1053_v45 = vadd.f32 %v1052_v42, %v1051_v39  ;;  %v1134_v46 = vpop.f32.mrb[7].mxu1 }
 0x103   :  { %v1135_v47 = vadd.f32 %v1134_v46, %v1133_v41 }
 0x104   :  { %882 = vst.msk [vmem:[%s1640_s3 + $0x4] sm:$0xf] %vm880_vm0, %v1006_v43  ;;  %v697_v48 = vadd.f32 %v1132_v40, %v577_v44  ;;  %v580_v49 = vadd.f32 %v1053_v45, %v1531_v16 }
 0x106   :  { %v776_v50 = vmax.f32 %v697_v48, 0.0  ;;  %v700_v51 = vadd.f32 %v1135_v47, %v580_v49  ;;  %v1054_v52 = vpop.f32.mrb[8].mxu0 }
 0x107   :  { %v1136_v53 = vpop.f32.mrb[8].mxu1  ;;  %v1055_v54 = vpop.f32.mrb[9].mxu0 }
 0x108   :  { %v1007_v55 = vpack.c.bf16 %v776_v50, %v776_v50  ;;  %v777_v56 = vmax.f32 %v700_v51, 0.0  ;;  %v1056_v57 = vadd.f32 %v1055_v54, %v1054_v52  ;;  %v1137_v58 = vpop.f32.mrb[9].mxu1  ;;  %v1057_v59 = vpop.f32.mrb[10].mxu0 }
 0x109   :  { %v1138_v60 = vadd.f32 %v1137_v58, %v1136_v53  ;;  %v1139_v61 = vpop.f32.mrb[10].mxu1  ;;  %v1058_v62 = vpop.f32.mrb[11].mxu0 }
 0x10a   :  { %883 = vst.msk [vmem:[%s1640_s3 + $0x8] sm:$0xf] %vm880_vm0, %v1007_v55  ;;  %v1008_v63 = vpack.c.bf16 %v777_v56, %v777_v56  ;;  %v585_v0 = vadd.f32 %v1056_v57, %v1531_v16  ;;  %v1059_v1 = vadd.f32 %v1058_v62, %v1057_v59  ;;  %v1140_v2 = vpop.f32.mrb[11].mxu1 }
 0x10b   :  { %v1141_v3 = vadd.f32 %v1140_v2, %v1139_v61 }
 0x10c   :  { %884 = vst.msk [vmem:[%s1640_s3 + $0xc] sm:$0xf] %vm880_vm0, %v1008_v63  ;;  %v705_v4 = vadd.f32 %v1138_v60, %v585_v0  ;;  %v588_v5 = vadd.f32 %v1059_v1, %v1531_v16 }
 0x10e   :  { %v778_v6 = vmax.f32 %v705_v4, 0.0  ;;  %v708_v7 = vadd.f32 %v1141_v3, %v588_v5  ;;  %v1060_v8 = vpop.f32.mrb[12].mxu0 }
 0x10f   :  { %v1142_v9 = vpop.f32.mrb[12].mxu1  ;;  %v1061_v10 = vpop.f32.mrb[13].mxu0 }
 0x110   :  { %v1009_v11 = vpack.c.bf16 %v778_v6, %v778_v6  ;;  %v779_v12 = vmax.f32 %v708_v7, 0.0  ;;  %v1062_v13 = vadd.f32 %v1061_v10, %v1060_v8  ;;  %v1143_v14 = vpop.f32.mrb[13].mxu1  ;;  %v1063_v15 = vpop.f32.mrb[14].mxu0 }
 0x111   :  { %v1144_v17 = vadd.f32 %v1143_v14, %v1142_v9  ;;  %v1145_v18 = vpop.f32.mrb[14].mxu1  ;;  %v1064_v19 = vpop.f32.mrb[15].mxu0 }
 0x112   :  { %885 = vst.msk [vmem:[%s1640_s3 + $0x10] sm:$0xf] %vm880_vm0, %v1009_v11  ;;  %v1010_v20 = vpack.c.bf16 %v779_v12, %v779_v12  ;;  %v593_v21 = vadd.f32 %v1062_v13, %v1531_v16  ;;  %v1065_v22 = vadd.f32 %v1064_v19, %v1063_v15  ;;  %v1146_v23 = vpop.f32.mrb[15].mxu1 }
 0x113   :  { %v1147_v24 = vadd.f32 %v1146_v23, %v1145_v18 }
 0x114   :  { %886 = vst.msk [vmem:[%s1640_s3 + $0x14] sm:$0xf] %vm880_vm0, %v1010_v20  ;;  %v713_v25 = vadd.f32 %v1144_v17, %v593_v21  ;;  %v596_v26 = vadd.f32 %v1065_v22, %v1531_v16 }
 0x116   :  { %v780_v27 = vmax.f32 %v713_v25, 0.0  ;;  %v716_v28 = vadd.f32 %v1147_v24, %v596_v26  ;;  %v1066_v29 = vpop.f32.mrb[16].mxu0 }
 0x117   :  { %v1148_v30 = vpop.f32.mrb[16].mxu1  ;;  %v1067_v31 = vpop.f32.mrb[17].mxu0 }
 0x118   :  { %v1011_v32 = vpack.c.bf16 %v780_v27, %v780_v27  ;;  %v781_v33 = vmax.f32 %v716_v28, 0.0  ;;  %v1068_v34 = vadd.f32 %v1067_v31, %v1066_v29  ;;  %v1149_v35 = vpop.f32.mrb[17].mxu1  ;;  %v1069_v36 = vpop.f32.mrb[18].mxu0 }
 0x119   :  { %v1150_v37 = vadd.f32 %v1149_v35, %v1148_v30  ;;  %v1151_v38 = vpop.f32.mrb[18].mxu1  ;;  %v1070_v39 = vpop.f32.mrb[19].mxu0 }
 0x11a   :  { %887 = vst.msk [vmem:[%s1640_s3 + $0x18] sm:$0xf] %vm880_vm0, %v1011_v32  ;;  %v1012_v40 = vpack.c.bf16 %v781_v33, %v781_v33  ;;  %v601_v41 = vadd.f32 %v1068_v34, %v1531_v16  ;;  %v1071_v42 = vadd.f32 %v1070_v39, %v1069_v36  ;;  %v1152_v43 = vpop.f32.mrb[19].mxu1 }
 0x11b   :  { %v1153_v44 = vadd.f32 %v1152_v43, %v1151_v38 }
 0x11c   :  { %888 = vst.msk [vmem:[%s1640_s3 + $0x1c] sm:$0xf] %vm880_vm0, %v1012_v40  ;;  %v721_v45 = vadd.f32 %v1150_v37, %v601_v41  ;;  %v604_v46 = vadd.f32 %v1071_v42, %v1531_v16 }
 0x11e   :  { %v782_v47 = vmax.f32 %v721_v45, 0.0  ;;  %v724_v48 = vadd.f32 %v1153_v44, %v604_v46  ;;  %v1072_v49 = vpop.f32.mrb[20].mxu0 }
 0x11f   :  { %v1154_v50 = vpop.f32.mrb[20].mxu1  ;;  %v1073_v51 = vpop.f32.mrb[21].mxu0 }
 0x120   :  { %v1013_v52 = vpack.c.bf16 %v782_v47, %v782_v47  ;;  %v783_v53 = vmax.f32 %v724_v48, 0.0  ;;  %v1074_v54 = vadd.f32 %v1073_v51, %v1072_v49  ;;  %v1155_v55 = vpop.f32.mrb[21].mxu1  ;;  %v1075_v56 = vpop.f32.mrb[22].mxu0 }
 0x121   :  { %v1156_v57 = vadd.f32 %v1155_v55, %v1154_v50  ;;  %v1157_v58 = vpop.f32.mrb[22].mxu1  ;;  %v1076_v59 = vpop.f32.mrb[23].mxu0 }
 0x122   :  { %889 = vst.msk [vmem:[%s1640_s3 + $0x20] sm:$0xf] %vm880_vm0, %v1013_v52  ;;  %v1014_v60 = vpack.c.bf16 %v783_v53, %v783_v53  ;;  %v609_v61 = vadd.f32 %v1074_v54, %v1531_v16  ;;  %v1077_v62 = vadd.f32 %v1076_v59, %v1075_v56  ;;  %v1158_v63 = vpop.f32.mrb[23].mxu1 }
 0x123   :  { %v1159_v0 = vadd.f32 %v1158_v63, %v1157_v58 }
 0x124   :  { %890 = vst.msk [vmem:[%s1640_s3 + $0x24] sm:$0xf] %vm880_vm0, %v1014_v60  ;;  %v729_v1 = vadd.f32 %v1156_v57, %v609_v61  ;;  %v612_v2 = vadd.f32 %v1077_v62, %v1531_v16 }
 0x126   :  { %v784_v3 = vmax.f32 %v729_v1, 0.0  ;;  %v732_v4 = vadd.f32 %v1159_v0, %v612_v2  ;;  %v1078_v5 = vpop.f32.mrb[24].mxu0 }
 0x127   :  { %v1160_v6 = vpop.f32.mrb[24].mxu1  ;;  %v1079_v7 = vpop.f32.mrb[25].mxu0 }
 0x128   :  { %v1015_v8 = vpack.c.bf16 %v784_v3, %v784_v3  ;;  %v785_v9 = vmax.f32 %v732_v4, 0.0  ;;  %v1080_v10 = vadd.f32 %v1079_v7, %v1078_v5  ;;  %v1161_v11 = vpop.f32.mrb[25].mxu1  ;;  %v1081_v12 = vpop.f32.mrb[26].mxu0 }
 0x129   :  { %v1162_v13 = vadd.f32 %v1161_v11, %v1160_v6  ;;  %v1163_v14 = vpop.f32.mrb[26].mxu1  ;;  %v1082_v15 = vpop.f32.mrb[27].mxu0 }
 0x12a   :  { %891 = vst.msk [vmem:[%s1640_s3 + $0x28] sm:$0xf] %vm880_vm0, %v1015_v8  ;;  %v1016_v17 = vpack.c.bf16 %v785_v9, %v785_v9  ;;  %v617_v18 = vadd.f32 %v1080_v10, %v1531_v16  ;;  %v1083_v19 = vadd.f32 %v1082_v15, %v1081_v12  ;;  %v1164_v20 = vpop.f32.mrb[27].mxu1 }
 0x12b   :  { %v1165_v21 = vadd.f32 %v1164_v20, %v1163_v14 }
 0x12c   :  { %892 = vst.msk [vmem:[%s1640_s3 + $0x2c] sm:$0xf] %vm880_vm0, %v1016_v17  ;;  %v737_v22 = vadd.f32 %v1162_v13, %v617_v18  ;;  %v620_v23 = vadd.f32 %v1083_v19, %v1531_v16 }
 0x12e   :  { %v786_v24 = vmax.f32 %v737_v22, 0.0  ;;  %v740_v25 = vadd.f32 %v1165_v21, %v620_v23  ;;  %v1084_v26 = vpop.f32.mrb[28].mxu0 }
 0x12f   :  { %v1166_v27 = vpop.f32.mrb[28].mxu1  ;;  %v1085_v28 = vpop.f32.mrb[29].mxu0 }
 0x130   :  { %v1017_v29 = vpack.c.bf16 %v786_v24, %v786_v24  ;;  %v787_v30 = vmax.f32 %v740_v25, 0.0  ;;  %v1086_v31 = vadd.f32 %v1085_v28, %v1084_v26  ;;  %v1167_v32 = vpop.f32.mrb[29].mxu1  ;;  %v1087_v33 = vpop.f32.mrb[30].mxu0 }
 0x131   :  { %v1168_v34 = vadd.f32 %v1167_v32, %v1166_v27  ;;  %v1169_v35 = vpop.f32.mrb[30].mxu1  ;;  %v1088_v36 = vpop.f32.mrb[31].mxu0 }
 0x132   :  { %893 = vst.msk [vmem:[%s1640_s3 + $0x30] sm:$0xf] %vm880_vm0, %v1017_v29  ;;  %v1018_v37 = vpack.c.bf16 %v787_v30, %v787_v30  ;;  %v625_v38 = vadd.f32 %v1086_v31, %v1531_v16  ;;  %v1089_v39 = vadd.f32 %v1088_v36, %v1087_v33  ;;  %v1170_v40 = vpop.f32.mrb[31].mxu1 }
 0x133   :  { %v1171_v41 = vadd.f32 %v1170_v40, %v1169_v35 }
 0x134   :  { %894 = vst.msk [vmem:[%s1640_s3 + $0x34] sm:$0xf] %vm880_vm0, %v1018_v37  ;;  %v745_v42 = vadd.f32 %v1168_v34, %v625_v38  ;;  %v628_v43 = vadd.f32 %v1089_v39, %v1531_v16 }
 0x136   :  { %v788_v44 = vmax.f32 %v745_v42, 0.0  ;;  %v748_v45 = vadd.f32 %v1171_v41, %v628_v43  ;;  %v1090_v46 = vpop.f32.mrb[32].mxu0 }
 0x137   :  { %v1172_v47 = vpop.f32.mrb[32].mxu1  ;;  %v1091_v48 = vpop.f32.mrb[33].mxu0 }
 0x138   :  { %v1019_v49 = vpack.c.bf16 %v788_v44, %v788_v44  ;;  %v789_v50 = vmax.f32 %v748_v45, 0.0  ;;  %v1092_v51 = vadd.f32 %v1091_v48, %v1090_v46  ;;  %v1173_v52 = vpop.f32.mrb[33].mxu1  ;;  %v1093_v53 = vpop.f32.mrb[34].mxu0 }
 0x139   :  { %v1174_v54 = vadd.f32 %v1173_v52, %v1172_v47  ;;  %v1175_v55 = vpop.f32.mrb[34].mxu1  ;;  %v1094_v56 = vpop.f32.mrb[35].mxu0 }
 0x13a   :  { %895 = vst.msk [vmem:[%s1640_s3 + $0x38] sm:$0xf] %vm880_vm0, %v1019_v49  ;;  %v1020_v57 = vpack.c.bf16 %v789_v50, %v789_v50  ;;  %v633_v58 = vadd.f32 %v1092_v51, %v1531_v16  ;;  %v1095_v59 = vadd.f32 %v1094_v56, %v1093_v53  ;;  %v1176_v60 = vpop.f32.mrb[35].mxu1 }
 0x13b   :  { %v1177_v61 = vadd.f32 %v1176_v60, %v1175_v55 }
 0x13c   :  { %896 = vst.msk [vmem:[%s1640_s3 + $0x3c] sm:$0xf] %vm880_vm0, %v1020_v57  ;;  %v753_v62 = vadd.f32 %v1174_v54, %v633_v58  ;;  %v636_v63 = vadd.f32 %v1095_v59, %v1531_v16 }
 0x13e   :  { %v790_v0 = vmax.f32 %v753_v62, 0.0  ;;  %v756_v1 = vadd.f32 %v1177_v61, %v636_v63  ;;  %v1096_v2 = vpop.f32.mrb[36].mxu0 }
 0x13f   :  { %v1178_v3 = vpop.f32.mrb[36].mxu1  ;;  %v1097_v4 = vpop.f32.mrb[37].mxu0 }
 0x140   :  { %v1021_v5 = vpack.c.bf16 %v790_v0, %v790_v0  ;;  %v791_v6 = vmax.f32 %v756_v1, 0.0  ;;  %v1098_v7 = vadd.f32 %v1097_v4, %v1096_v2  ;;  %v1179_v8 = vpop.f32.mrb[37].mxu1  ;;  %v1099_v9 = vpop.f32.mrb[38].mxu0 }
 0x141   :  { %v1180_v10 = vadd.f32 %v1179_v8, %v1178_v3  ;;  %v1181_v11 = vpop.f32.mrb[38].mxu1  ;;  %v1100_v12 = vpop.f32.mrb[39].mxu0 }
 0x142   :  { %897 = vst.msk [vmem:[%s1640_s3 + $0x40] sm:$0xf] %vm880_vm0, %v1021_v5  ;;  %v1022_v13 = vpack.c.bf16 %v791_v6, %v791_v6  ;;  %v641_v14 = vadd.f32 %v1098_v7, %v1531_v16  ;;  %v1101_v15 = vadd.f32 %v1100_v12, %v1099_v9  ;;  %v1182_v17 = vpop.f32.mrb[39].mxu1 }
 0x143   :  { %v1183_v18 = vadd.f32 %v1182_v17, %v1181_v11 }
 0x144   :  { %898 = vst.msk [vmem:[%s1640_s3 + $0x44] sm:$0xf] %vm880_vm0, %v1022_v13  ;;  %v761_v19 = vadd.f32 %v1180_v10, %v641_v14  ;;  %v644_v20 = vadd.f32 %v1101_v15, %v1531_v16 }
 0x146   :  { %v792_v21 = vmax.f32 %v761_v19, 0.0  ;;  %v764_v22 = vadd.f32 %v1183_v18, %v644_v20  ;;  %v1102_v23 = vpop.f32.mrb[40].mxu0 }
 0x147   :  { %v1184_v24 = vpop.f32.mrb[40].mxu1  ;;  %v1103_v25 = vpop.f32.mrb[41].mxu0 }
 0x148   :  { %v1023_v26 = vpack.c.bf16 %v792_v21, %v792_v21  ;;  %v793_v27 = vmax.f32 %v764_v22, 0.0  ;;  %v1104_v28 = vadd.f32 %v1103_v25, %v1102_v23  ;;  %v1185_v29 = vpop.f32.mrb[41].mxu1  ;;  %v1105_v30 = vpop.f32.mrb[42].mxu0 }
 0x149   :  { %v1186_v31 = vadd.f32 %v1185_v29, %v1184_v24  ;;  %v1187_v32 = vpop.f32.mrb[42].mxu1  ;;  %v1106_v33 = vpop.f32.mrb[43].mxu0 }
 0x14a   :  { %899 = vst.msk [vmem:[%s1640_s3 + $0x48] sm:$0xf] %vm880_vm0, %v1023_v26  ;;  %v1024_v34 = vpack.c.bf16 %v793_v27, %v793_v27  ;;  %v649_v35 = vadd.f32 %v1104_v28, %v1531_v16  ;;  %v1188_v36 = vpop.f32.mrb[43].mxu1 }
 0x14c   :  { %900 = vst.msk [vmem:[%s1640_s3 + $0x4c] sm:$0xf] %vm880_vm0, %v1024_v34  ;;  %v769_v37 = vadd.f32 %v1186_v31, %v649_v35 }
 0x14e   :  { %v794_v38 = vmax.f32 %v769_v37, 0.0 }
 0x150   :  { %v1025_v39 = vpack.c.bf16 %v794_v38, %v794_v38 }
 0x152   :  { %902 = vst.msk [vmem:[%s1640_s3 + $0x50] sm:$0x1] %vm901_vm1, %v1025_v39 }

// kernel: dueling_dqn_forward.6
= control target key start
LH: loop header
LB: loop body
LE: loop exit
PB: predicated region body
PF: predicated region fallthrough
CT: control target
= control target key end

     0   :  { %v1248_v34 = vmov 0.0   ;;  %vm1249_vm0 = vmmov 0   ;;  %vm516_vm1 = vcmask 523264   ;;  %vm868_vm2 = vcmask 519168   ;;  %s1599_s1 = inlined_call_operand.vmem [shape: bf16[576,64], index: 1, kind: input, shape index: {}]   ;;  %s1600_s0 = inlined_call_operand.vmem [shape: bf16[98,576], index: 0, kind: input, shape index: {}]   ;;  %s1601_s2 = inlined_call_operand.vmem [shape: f32[1,64], index: 2, kind: input, shape index: {}]   ;;  %s1602_s3 = inlined_call_operand.vmem [shape: bf16[98,64], index: 3, kind: output, shape index: {}]  }
   0x1   :  { %v1165_v0 = vld [vmem:[%s1599_s1 + $0x40] sm:$0xff]   ;;  %v1169_v4 = vld [vmem:[%s1599_s1 + $0x48] sm:$0xff]   ;;  %v1173_v8 = vld [vmem:[%s1599_s1 + $0x50] sm:$0xff]   ;;  %vm881_vm3 = vcmask 516096  }
   0x2   :  { %v1166_v1 = vld [vmem:[%s1599_s1 + $0xc0] sm:$0xff]   ;;  %992 = vmatprep.subr.bf16.mxu0 %v1165_v0  ;;  %v1170_v5 = vld [vmem:[%s1599_s1 + $0xc8] sm:$0xff]   ;;  %v1174_v9 = vld [vmem:[%s1599_s1 + $0xd0] sm:$0xff]  }
   0x3   :  { %v1167_v2 = vld [vmem:[%s1599_s1] sm:$0xff]   ;;  %1050 = vmatprep.subr.bf16.mxu1 %v1166_v1  ;;  %v1171_v6 = vld [vmem:[%s1599_s1 + $0x8] sm:$0xff]   ;;  %v1175_v10 = vld [vmem:[%s1599_s1 + $0x10] sm:$0xff]  }
   0x4   :  { %v1168_v3 = vld [vmem:[%s1599_s1 + $0x80] sm:$0xff]   ;;  %993 = vmatpush3.bf16.msra.mxu0 %v1167_v2  ;;  %v1172_v7 = vld [vmem:[%s1599_s1 + $0x88] sm:$0xff]   ;;  %v1176_v11 = vld [vmem:[%s1599_s1 + $0x90] sm:$0xff]  }
   0x5   :  { %1051 = vmatpush3.bf16.msra.mxu1 %v1168_v3  ;;  %994 = vmatprep.subr.bf16.mxu0 %v1169_v4  ;;  %v1177_v12 = vld [vmem:[%s1599_s1 + $0x58] sm:$0xff]   ;;  %v1181_v16 = vld [vmem:[%s1599_s1 + $0x60] sm:$0xff]   ;;  %v1185_v20 = vld [vmem:[%s1599_s1 + $0x68] sm:$0xff]  }
   0x6   :  { %1052 = vmatprep.subr.bf16.mxu1 %v1170_v5  ;;  %v1178_v13 = vld [vmem:[%s1599_s1 + $0xd8] sm:$0xff]   ;;  %v1182_v17 = vld [vmem:[%s1599_s1 + $0xe0] sm:$0xff]   ;;  %v1186_v21 = vld [vmem:[%s1599_s1 + $0xe8] sm:$0xff]  }
   0x7   :  { %v1179_v14 = vld [vmem:[%s1599_s1 + $0x18] sm:$0xff]   ;;  %v1183_v18 = vld [vmem:[%s1599_s1 + $0x20] sm:$0xff]   ;;  %v1187_v22 = vld [vmem:[%s1599_s1 + $0x28] sm:$0xff]  }
   0x8   :  { %995 = vmatpush3.bf16.msra.mxu0 %v1171_v6  ;;  %v1180_v15 = vld [vmem:[%s1599_s1 + $0x98] sm:$0xff]   ;;  %v1184_v19 = vld [vmem:[%s1599_s1 + $0xa0] sm:$0xff]   ;;  %v1188_v23 = vld [vmem:[%s1599_s1 + $0xa8] sm:$0xff]  }
   0x9   :  { %1053 = vmatpush3.bf16.msra.mxu1 %v1172_v7  ;;  %996 = vmatprep.subr.bf16.mxu0 %v1173_v8  ;;  %v1189_v24 = vld [vmem:[%s1599_s1 + $0x70] sm:$0xff]   ;;  %v1193_v28 = vld [vmem:[%s1599_s1 + $0x78] sm:$0xff]   ;;  %v1202_v36 = vld [vmem:[%s1600_s0 + $0xc] ss:$20 sps:$4 sm:$0xff]  }
   0xa   :  { %1054 = vmatprep.subr.bf16.mxu1 %v1174_v9  ;;  %v1190_v25 = vld [vmem:[%s1599_s1 + $0xf0] sm:$0xff]   ;;  %v1194_v29 = vld [vmem:[%s1599_s1 + $0xf8] sm:$0xff]   ;;  %v1203_v37 = vld [vmem:[%s1599_s1 + $0x100] sm:$0xff]   ;;  %658 = vmatprep.mubr.bf16.mxu1 %v1202_v36 }
   0xb   :  { %v1191_v26 = vld [vmem:[%s1599_s1 + $0x30] sm:$0xff]   ;;  %v1195_v30 = vld [vmem:[%s1599_s1 + $0x38] sm:$0xff]   ;;  %v1204_v38 = vld [vmem:[%s1600_s0 + $0x2c] ss:$20 sps:$4 sm:$0xff]  }
   0xc   :  { %997 = vmatpush3.bf16.msra.mxu0 %v1175_v10  ;;  %v1192_v27 = vld [vmem:[%s1599_s1 + $0xb0] sm:$0xff]   ;;  %v1196_v31 = vld [vmem:[%s1599_s1 + $0xb8] sm:$0xff]   ;;  %v1214_v43 = vld [vmem:[%s1599_s1 + $0x108] sm:$0xff]  }
   0xd   :  { %1055 = vmatpush3.bf16.msra.mxu1 %v1176_v11  ;;  %998 = vmatprep.subr.bf16.mxu0 %v1177_v12  ;;  %v1197_v32 = vld [vmem:[%s1600_s0] ss:$20 sps:$4 sm:$0xff]   ;;  %v1199_v33 = vld [vmem:[%s1600_s0 + $0x4] ss:$20 sps:$4 sm:$0xff]   ;;  %v1200_v35 = vld [vmem:[%s1600_s0 + $0x8] ss:$20 sps:$4 sm:$0xff]  }
   0xe   :  { %1056 = vmatprep.subr.bf16.mxu1 %v1178_v13  ;;  %570 = vmatprep.mubr.bf16.mxu0 %v1199_v33  ;;  %v1206_v39 = vld [vmem:[%s1600_s0 + $0x34] ss:$20 sps:$4 sm:$0xff]   ;;  %v1209_v41 = vld [vmem:[%s1600_s0 + $0x30] ss:$20 sps:$4 sm:$0xff]   ;;  %v1216_v47 = vld [vmem:[%s1600_s0 + $0x58] ss:$20 sps:$4 sm:$0xff]  }
   0xf   :  { %v1208_v40 = vld [vmem:[%s1600_s0 + $0x28] ss:$20 sps:$4 sm:$0xff]   ;;  %v1223_v45 = vld [vmem:[%s1599_s1 + $0x110] sm:$0xff]   ;;  %v1219_v49 = vld [vmem:[%s1600_s0 + $0x84] ss:$20 sps:$4 sm:$0xff]  }
  0x10   :  { %999 = vmatpush3.bf16.msra.mxu0 %v1179_v14  ;;  %v1210_v42 = vld [vmem:[%s1600_s0 + $0x54] ss:$20 sps:$4 sm:$0xff]   ;;  %v1212_v44 = vld [vmem:[%s1600_s0 + $0x5c] ss:$20 sps:$4 sm:$0xff]   ;;  %v1221_v51 = vld [vmem:[%s1600_s0 + $0x78] ss:$20 sps:$4 sm:$0xff]  }
  0x11   :  { %1057 = vmatpush3.bf16.msra.mxu1 %v1180_v15  ;;  %1000 = vmatprep.subr.bf16.mxu0 %v1181_v16  ;;  %v1215_v46 = vld [vmem:[%s1600_s0 + $0x50] ss:$20 sps:$4 sm:$0xff]   ;;  %v1236_v50 = vld [vmem:[%s1599_s1 + $0x118] sm:$0xff]   ;;  %v1222_v52 = vld [vmem:[%s1600_s0 + $0x80] ss:$20 sps:$4 sm:$0xff]  }
  0x12   :  { %1058 = vmatprep.subr.bf16.mxu1 %v1182_v17  ;;  %v1217_v48 = vld [vmem:[%s1600_s0 + $0x7c] ss:$20 sps:$4 sm:$0xff]   ;;  %v1224_v53 = vld [vmem:[%s1600_s0 + $0xa4] ss:$20 sps:$4 sm:$0xff]   ;;  %v1226_v54 = vld [vmem:[%s1600_s0 + $0xac] ss:$20 sps:$4 sm:$0xff]  }
  0x13   :  { %v1228_v55 = vld [vmem:[%s1600_s0 + $0xa0] ss:$20 sps:$4 sm:$0xff]   ;;  %v1229_v56 = vld [vmem:[%s1600_s0 + $0xa8] ss:$20 sps:$4 sm:$0xff]   ;;  %v1235_v62 = vld [vmem:[%s1600_s0 + $0xd0] ss:$20 sps:$4 sm:$0xff]  }
  0x14   :  { %1001 = vmatpush3.bf16.msra.mxu0 %v1183_v18  ;;  %v1230_v57 = vld [vmem:[%s1600_s0 + $0xcc] ss:$20 sps:$4 sm:$0xff]   ;;  %v1232_v58 = vld [vmem:[%s1600_s0 + $0xd4] ss:$20 sps:$4 sm:$0xff]   ;;  %v52_v60 = vld [vmem:[%s1600_s0 + $0xf8] sm:$0x11] }
  0x15   :  { %1059 = vmatpush3.bf16.msra.mxu1 %v1184_v19  ;;  %1002 = vmatprep.subr.bf16.mxu0 %v1185_v20  ;;  %v51_v59 = vld [vmem:[%s1600_s0 + $0xf0] sm:$0x11]  ;;  %v1234_v61 = vld [vmem:[%s1600_s0 + $0xc8] ss:$20 sps:$4 sm:$0xff]   ;;  %v921_v0 = vcombine.high %v52_v60, %v52_v60  ;;  %v920_v2 = vcombine.low %v52_v60, %v52_v60  ;;  %v1243_v5 = vld [vmem:[%s1600_s0 + $0x38] ss:$20 sps:$4 sm:$0xff]  }
  0x16   :  { %1060 = vmatprep.subr.bf16.mxu1 %v1186_v21  ;;  %v919_v63 = vcombine.high %v51_v59, %v51_v59  ;;  %v918_v1 = vcombine.low %v51_v59, %v51_v59  ;;  %v1241_v3 = vld [vmem:[%s1600_s0 + $0x10] ss:$20 sps:$4 sm:$0xff]   ;;  %v1244_v6 = vld [vmem:[%s1600_s0 + $0xd8] ss:$20 sps:$4 sm:$0xff]   ;;  %v1245_v7 = vld [vmem:[%s1600_s0 + $0x60] ss:$20 sps:$4 sm:$0xff]  }
  0x17   :  { %v1242_v4 = vld [vmem:[%s1600_s0 + $0xb0] ss:$20 sps:$4 sm:$0xff]   ;;  %v1246_v8 = vld [vmem:[%s1600_s0 + $0x100] ss:$0 sps:$4 sm:$0x11]  }
  0x18   :  { %1003 = vmatpush3.bf16.msra.mxu0 %v1187_v22  ;;  %v1247_v9 = vld [vmem:[%s1600_s0 + $0x88] ss:$20 sps:$4 sm:$0xff]   ;;  %v1509_v11 = vld [vmem:[%s1601_s2] ss:$0 sm:$0xff] }
  0x19   :  { %1061 = vmatpush3.bf16.msra.mxu1 %v1188_v23  ;;  %1004 = vmatprep.subr.bf16.mxu0 %v1189_v24 }
  0x1a   :  { %1062 = vmatprep.subr.bf16.mxu1 %v1190_v25 }
  0x1c   :  { %1005 = vmatpush3.bf16.msra.mxu0 %v1191_v26 }
  0x1d   :  { %1063 = vmatpush3.bf16.msra.mxu1 %v1192_v27  ;;  %1006 = vmatprep.subr.bf16.mxu0 %v1193_v28 }
  0x1e   :  { %1064 = vmatprep.subr.bf16.mxu1 %v1194_v29 }
  0x20   :  { %1007 = vmatpush3.bf16.msra.mxu0 %v1195_v30 }
  0x21   :  { %1065 = vmatpush3.bf16.msra.mxu1 %v1196_v31  ;;  %1119 = vmatprep.subr.bf16.mxu0 %v1248_v34 }
  0x22   :  { %1155 = vmatprep.subr.bf16.mxu1 %v1248_v34 }
  0x23   :  { %571 = vmatmul.mubr.bf16.vlgmr.msra.gmra.mrb[0].mxu0 %v1197_v32 }
  0x24   :  { %659 = vmatmul.mubr.bf16.vlgmr.msra.gmra.mrb[0].mxu1 %v1200_v35  ;;  %1120 = vmatpush3.bf16.msra.mxu0 %v1203_v37 }
  0x25   :  { %578 = vmatprep.mubr.bf16.mxu0 %v1204_v38  ;;  %1159 = vmatpush3.bf16.msra.mxu1 %v1203_v37 }
  0x26   :  { %666 = vmatprep.mubr.bf16.mxu1 %v1206_v39  ;;  %1121 = vmatprep.subr.bf16.mxu0 %v1248_v34 }
  0x27   :  { %1156 = vmatprep.subr.bf16.mxu1 %v1248_v34 }
  0x28   :  { %1122 = vmatpush3.bf16.msra.mxu0 %v1214_v43 }
  0x29   :  { %1160 = vmatpush3.bf16.msra.mxu1 %v1214_v43  ;;  %1123 = vmatprep.subr.bf16.mxu0 %v1248_v34 }
  0x2a   :  { %1157 = vmatprep.subr.bf16.mxu1 %v1248_v34 }
  0x2b   :  { %579 = vmatmul.mubr.bf16.gmra.mrb[4].mxu0 %v1208_v40 }
  0x2c   :  { %667 = vmatmul.mubr.bf16.gmra.mrb[4].mxu1 %v1209_v41  ;;  %586 = vmatprep.mubr.bf16.mxu0 %v1210_v42 }
  0x2d   :  { %674 = vmatprep.mubr.bf16.mxu1 %v1212_v44  ;;  %1124 = vmatpush3.bf16.msra.mxu0 %v1223_v45 }
  0x2e   :  { %1161 = vmatpush3.bf16.msra.mxu1 %v1223_v45  ;;  %1125 = vmatprep.subr.bf16.mxu0 %v1248_v34 }
  0x2f   :  { %1158 = vmatprep.subr.bf16.mxu1 %v1248_v34 }
  0x31   :  { %1126 = vmatpush3.bf16.msra.mxu0 %v1236_v50 }
  0x32   :  { %1162 = vmatpush3.bf16.msra.mxu1 %v1236_v50 }
  0x33   :  { %587 = vmatmul.mubr.bf16.gmra.mrb[8].mxu0 %v1215_v46 }
  0x34   :  { %675 = vmatmul.mubr.bf16.gmra.mrb[8].mxu1 %v1216_v47  ;;  %594 = vmatprep.mubr.bf16.mxu0 %v1217_v48 }
  0x35   :  { %682 = vmatprep.mubr.bf16.mxu1 %v1219_v49 }
  0x3b   :  { %595 = vmatmul.mubr.bf16.gmra.mrb[12].mxu0 %v1221_v51 }
  0x3c   :  { %683 = vmatmul.mubr.bf16.gmra.mrb[12].mxu1 %v1222_v52  ;;  %602 = vmatprep.mubr.bf16.mxu0 %v1224_v53 }
  0x3d   :  { %690 = vmatprep.mubr.bf16.mxu1 %v1226_v54 }
  0x43   :  { %603 = vmatmul.mubr.bf16.gmra.mrb[16].mxu0 %v1228_v55 }
  0x44   :  { %691 = vmatmul.mubr.bf16.gmra.mrb[16].mxu1 %v1229_v56  ;;  %610 = vmatprep.mubr.bf16.mxu0 %v1230_v57 }
  0x45   :  { %698 = vmatprep.mubr.bf16.mxu1 %v1232_v58 }
  0x4b   :  { %611 = vmatmul.mubr.bf16.gmra.mrb[20].mxu0 %v1234_v61 }
  0x4c   :  { %699 = vmatmul.mubr.bf16.gmra.mrb[20].mxu1 %v1235_v62  ;;  %618 = vmatprep.mubr.bf16.mxu0 %v919_v63 }
  0x4d   :  { %706 = vmatprep.mubr.bf16.mxu1 %v921_v0 }
  0x53   :  { %619 = vmatmul.mubr.bf16.gmra.mrb[24].mxu0 %v918_v1 }
  0x54   :  { %707 = vmatmul.mubr.bf16.gmra.mrb[24].mxu1 %v920_v2  ;;  %1127 = vmatprep.mubr.msk.bf16.mxu0 %vm1249_vm0, %v1248_v34 }
  0x55   :  { %1143 = vmatprep.mubr.msk.bf16.mxu1 %vm1249_vm0, %v1248_v34 }
  0x5b   :  { %1128 = vmatmul.mubr.msk.bf16.vlgmr.msra.gmra.mrb[28].mxu0 %vm516_vm1, %v1241_v3 }
  0x5c   :  { %1144 = vmatmul.mubr.msk.bf16.vlgmr.msra.gmra.mrb[28].mxu1 %vm516_vm1, %v1242_v4  ;;  %1131 = vmatprep.mubr.msk.bf16.mxu0 %vm1249_vm0, %v1248_v34 }
  0x5d   :  { %1147 = vmatprep.mubr.msk.bf16.mxu1 %vm1249_vm0, %v1248_v34 }
  0x63   :  { %1132 = vmatmul.mubr.msk.bf16.gmra.mrb[32].mxu0 %vm516_vm1, %v1243_v5 }
  0x64   :  { %1148 = vmatmul.mubr.msk.bf16.gmra.mrb[32].mxu1 %vm516_vm1, %v1244_v6  ;;  %1135 = vmatprep.mubr.msk.bf16.mxu0 %vm1249_vm0, %v1248_v34 }
  0x65   :  { %1151 = vmatprep.mubr.msk.bf16.mxu1 %vm1249_vm0, %v1248_v34 }
  0x6b   :  { %1136 = vmatmul.mubr.msk.bf16.gmra.mrb[36].mxu0 %vm516_vm1, %v1245_v7 }
  0x6c   :  { %1152 = vmatmul.mubr.msk.bf16.gmra.mrb[36].mxu1 %vm516_vm1, %v1246_v8  ;;  %1139 = vmatprep.mubr.msk.bf16.mxu0 %vm1249_vm0, %v1248_v34 }
  0x73   :  { %1140 = vmatmul.mubr.msk.bf16.gmra.mrb[40].mxu0 %vm516_vm1, %v1247_v9 }
  0xf6   :  { %v1008_v10 = vpop.f32.mrb[0].mxu0 }
  0xf7   :  { %v1009_v12 = vpop.f32.mrb[1].mxu0  ;;  %v1066_v13 = vpop.f32.mrb[0].mxu1 }
  0xf8   :  { %v1010_v14 = vadd.f32 %v1009_v12, %v1008_v10  ;;  %v1011_v15 = vpop.f32.mrb[2].mxu0  ;;  %v1067_v16 = vpop.f32.mrb[1].mxu1 }
  0xf9   :  { %v1012_v17 = vpop.f32.mrb[3].mxu0  ;;  %v1068_v18 = vadd.f32 %v1067_v16, %v1066_v13  ;;  %v1069_v19 = vpop.f32.mrb[2].mxu1 }
  0xfa   :  { %v573_v20 = vadd.f32 %v1010_v14, %v1509_v11  ;;  %v1013_v21 = vadd.f32 %v1012_v17, %v1011_v15  ;;  %v1070_v22 = vpop.f32.mrb[3].mxu1 }
  0xfb   :  { %v1071_v23 = vadd.f32 %v1070_v22, %v1069_v19 }
  0xfc   :  { %v576_v24 = vadd.f32 %v1013_v21, %v1509_v11  ;;  %v1513_v25 = vadd.f32 %v1068_v18, %v573_v20 }
  0xfe   :  { %v1014_v26 = vpop.f32.mrb[4].mxu0  ;;  %v1515_v27 = vadd.f32 %v1071_v23, %v576_v24 }
  0xff   :  { %v1015_v28 = vpop.f32.mrb[5].mxu0  ;;  %v1072_v29 = vpop.f32.mrb[4].mxu1 }
 0x100   :  { %v1016_v30 = vadd.f32 %v1015_v28, %v1014_v26  ;;  %v1017_v31 = vpop.f32.mrb[6].mxu0  ;;  %v1073_v32 = vpop.f32.mrb[5].mxu1 }
 0x101   :  { %v1018_v33 = vpop.f32.mrb[7].mxu0  ;;  %v1074_v34 = vadd.f32 %v1073_v32, %v1072_v29  ;;  %v1075_v35 = vpop.f32.mrb[6].mxu1 }
 0x102   :  { %v581_v36 = vadd.f32 %v1016_v30, %v1509_v11  ;;  %v1019_v37 = vadd.f32 %v1018_v33, %v1017_v31  ;;  %v1076_v38 = vpop.f32.mrb[7].mxu1 }
 0x103   :  { %v1077_v39 = vadd.f32 %v1076_v38, %v1075_v35 }
 0x104   :  { %v584_v40 = vadd.f32 %v1019_v37, %v1509_v11  ;;  %v1519_v41 = vadd.f32 %v1074_v34, %v581_v36 }
 0x106   :  { %v1020_v42 = vpop.f32.mrb[8].mxu0  ;;  %v1521_v43 = vadd.f32 %v1077_v39, %v584_v40 }
 0x107   :  { %v1021_v44 = vpop.f32.mrb[9].mxu0  ;;  %v1078_v45 = vpop.f32.mrb[8].mxu1 }
 0x108   :  { %v1022_v46 = vadd.f32 %v1021_v44, %v1020_v42  ;;  %v1023_v47 = vpop.f32.mrb[10].mxu0  ;;  %v1079_v48 = vpop.f32.mrb[9].mxu1 }
 0x109   :  { %v1024_v49 = vpop.f32.mrb[11].mxu0  ;;  %v1080_v50 = vadd.f32 %v1079_v48, %v1078_v45  ;;  %v1081_v51 = vpop.f32.mrb[10].mxu1 }
 0x10a   :  { %v589_v52 = vadd.f32 %v1022_v46, %v1509_v11  ;;  %v1025_v53 = vadd.f32 %v1024_v49, %v1023_v47  ;;  %v1082_v54 = vpop.f32.mrb[11].mxu1 }
 0x10b   :  { %v1083_v55 = vadd.f32 %v1082_v54, %v1081_v51 }
 0x10c   :  { %v592_v56 = vadd.f32 %v1025_v53, %v1509_v11  ;;  %v1525_v57 = vadd.f32 %v1080_v50, %v589_v52 }
 0x10e   :  { %v1026_v58 = vpop.f32.mrb[12].mxu0  ;;  %v1527_v59 = vadd.f32 %v1083_v55, %v592_v56 }
 0x10f   :  { %v1027_v60 = vpop.f32.mrb[13].mxu0  ;;  %v1084_v61 = vpop.f32.mrb[12].mxu1 }
 0x110   :  { %v1028_v62 = vadd.f32 %v1027_v60, %v1026_v58  ;;  %v1029_v63 = vpop.f32.mrb[14].mxu0  ;;  %v1085_v0 = vpop.f32.mrb[13].mxu1 }
 0x111   :  { %v1030_v1 = vpop.f32.mrb[15].mxu0  ;;  %v1086_v2 = vadd.f32 %v1085_v0, %v1084_v61  ;;  %v1087_v3 = vpop.f32.mrb[14].mxu1 }
 0x112   :  { %v597_v4 = vadd.f32 %v1028_v62, %v1509_v11  ;;  %v1031_v5 = vadd.f32 %v1030_v1, %v1029_v63  ;;  %v1088_v6 = vpop.f32.mrb[15].mxu1 }
 0x113   :  { %v1089_v7 = vadd.f32 %v1088_v6, %v1087_v3 }
 0x114   :  { %v600_v8 = vadd.f32 %v1031_v5, %v1509_v11  ;;  %v1531_v9 = vadd.f32 %v1086_v2, %v597_v4 }
 0x116   :  { %v1032_v10 = vpop.f32.mrb[16].mxu0  ;;  %v1533_v12 = vadd.f32 %v1089_v7, %v600_v8 }
 0x117   :  { %v1033_v13 = vpop.f32.mrb[17].mxu0  ;;  %v1090_v14 = vpop.f32.mrb[16].mxu1 }
 0x118   :  { %v1034_v15 = vadd.f32 %v1033_v13, %v1032_v10  ;;  %v1035_v16 = vpop.f32.mrb[18].mxu0  ;;  %v1091_v17 = vpop.f32.mrb[17].mxu1 }
 0x119   :  { %v1036_v18 = vpop.f32.mrb[19].mxu0  ;;  %v1092_v19 = vadd.f32 %v1091_v17, %v1090_v14  ;;  %v1093_v20 = vpop.f32.mrb[18].mxu1 }
 0x11a   :  { %v605_v21 = vadd.f32 %v1034_v15, %v1509_v11  ;;  %v1037_v22 = vadd.f32 %v1036_v18, %v1035_v16  ;;  %v1094_v23 = vpop.f32.mrb[19].mxu1 }
 0x11b   :  { %v1095_v24 = vadd.f32 %v1094_v23, %v1093_v20 }
 0x11c   :  { %v608_v26 = vadd.f32 %v1037_v22, %v1509_v11  ;;  %v693_v28 = vadd.f32 %v1092_v19, %v605_v21 }
 0x11e   :  { %v1038_v29 = vpop.f32.mrb[20].mxu0  ;;  %v696_v30 = vadd.f32 %v1095_v24, %v608_v26 }
 0x11f   :  { %v1039_v31 = vpop.f32.mrb[21].mxu0  ;;  %v1096_v32 = vpop.f32.mrb[20].mxu1 }
 0x120   :  { %v1040_v33 = vadd.f32 %v1039_v31, %v1038_v29  ;;  %v1041_v34 = vpop.f32.mrb[22].mxu0  ;;  %v1097_v35 = vpop.f32.mrb[21].mxu1 }
 0x121   :  { %v1042_v36 = vpop.f32.mrb[23].mxu0  ;;  %v1098_v37 = vadd.f32 %v1097_v35, %v1096_v32  ;;  %v1099_v38 = vpop.f32.mrb[22].mxu1 }
 0x122   :  { %v613_v39 = vadd.f32 %v1040_v33, %v1509_v11  ;;  %v1043_v40 = vadd.f32 %v1042_v36, %v1041_v34  ;;  %v1100_v42 = vpop.f32.mrb[23].mxu1 }
 0x123   :  { %v1101_v44 = vadd.f32 %v1100_v42, %v1099_v38 }
 0x124   :  { %v616_v45 = vadd.f32 %v1043_v40, %v1509_v11  ;;  %v701_v46 = vadd.f32 %v1098_v37, %v613_v39 }
 0x126   :  { %v1044_v47 = vpop.f32.mrb[24].mxu0  ;;  %v704_v48 = vadd.f32 %v1101_v44, %v616_v45 }
 0x127   :  { %v1045_v49 = vpop.f32.mrb[25].mxu0  ;;  %v1102_v50 = vpop.f32.mrb[24].mxu1 }
 0x128   :  { %v1046_v51 = vadd.f32 %v1045_v49, %v1044_v47  ;;  %v1047_v52 = vpop.f32.mrb[26].mxu0  ;;  %v1103_v53 = vpop.f32.mrb[25].mxu1 }
 0x129   :  { %v1048_v54 = vpop.f32.mrb[27].mxu0  ;;  %v1104_v55 = vadd.f32 %v1103_v53, %v1102_v50  ;;  %v1105_v56 = vpop.f32.mrb[26].mxu1 }
 0x12a   :  { %v621_v58 = vadd.f32 %v1046_v51, %v1509_v11  ;;  %v1106_v60 = vpop.f32.mrb[27].mxu1 }
 0x12c   :  { %v709_v61 = vadd.f32 %v1104_v55, %v621_v58 }
 0x12e   :  { %v748_v62 = vpop.f32.mrb[28].mxu0 }
 0x12f   :  { %v749_v63 = vadd.f32 %v748_v62, %v1513_v25  ;;  %v780_v0 = vpop.f32.mrb[28].mxu1  ;;  %v1129_v1 = vpop.f32.mrb[29].mxu0 }
 0x130   :  { %v781_v2 = vadd.f32 %v780_v0, %v693_v28  ;;  %v1145_v3 = vpop.f32.mrb[29].mxu1  ;;  %v751_v4 = vpop.f32.mrb[30].mxu0 }
 0x131   :  { %v802_v5 = vmax.f32 %v749_v63, 0.0  ;;  %v752_v6 = vadd.f32 %v751_v4, %v1515_v27  ;;  %v783_v7 = vpop.f32.mrb[30].mxu1  ;;  %v1130_v8 = vpop.f32.mrb[31].mxu0 }
 0x132   :  { %v810_v10 = vmax.f32 %v781_v2, 0.0  ;;  %v784_v13 = vadd.f32 %v783_v7, %v696_v30  ;;  %v1146_v14 = vpop.f32.mrb[31].mxu1 }
 0x133   :  { %v979_v11 = vpack.c.bf16 %v802_v5, %v802_v5  ;;  %v803_v15 = vmax.f32 %v752_v6, 0.0 }
 0x134   :  { %v987_v16 = vpack.c.bf16 %v810_v10, %v810_v10  ;;  %v811_v17 = vmax.f32 %v784_v13, 0.0 }
 0x135   :  { %869 = vst.msk [vmem:[%s1602_s3] sm:$0xf] %vm868_vm2, %v979_v11  ;;  %v980_v25 = vpack.c.bf16 %v803_v15, %v803_v15 }
 0x136   :  { %877 = vst.msk [vmem:[%s1602_s3 + $0x20] sm:$0xf] %vm868_vm2, %v987_v16  ;;  %v988_v27 = vpack.c.bf16 %v811_v17, %v811_v17  ;;  %v756_v18 = vpop.f32.mrb[32].mxu0 }
 0x137   :  { %870 = vst.msk [vmem:[%s1602_s3 + $0x4] sm:$0xf] %vm868_vm2, %v980_v25  ;;  %v757_v19 = vadd.f32 %v756_v18, %v1519_v41  ;;  %v788_v20 = vpop.f32.mrb[32].mxu1  ;;  %v1133_v21 = vpop.f32.mrb[33].mxu0 }
 0x138   :  { %878 = vst.msk [vmem:[%s1602_s3 + $0x24] sm:$0xf] %vm868_vm2, %v988_v27  ;;  %v789_v22 = vadd.f32 %v788_v20, %v701_v46  ;;  %v1149_v23 = vpop.f32.mrb[33].mxu1  ;;  %v759_v24 = vpop.f32.mrb[34].mxu0 }
 0x139   :  { %v804_v26 = vmax.f32 %v757_v19, 0.0  ;;  %v760_v28 = vadd.f32 %v759_v24, %v1521_v43  ;;  %v791_v29 = vpop.f32.mrb[34].mxu1  ;;  %v1134_v30 = vpop.f32.mrb[35].mxu0 }
 0x13a   :  { %v812_v31 = vmax.f32 %v789_v22, 0.0  ;;  %v792_v32 = vadd.f32 %v791_v29, %v704_v48  ;;  %v1150_v33 = vpop.f32.mrb[35].mxu1 }
 0x13b   :  { %v981_v34 = vpack.c.bf16 %v804_v26, %v804_v26  ;;  %v805_v41 = vmax.f32 %v760_v28, 0.0 }
 0x13c   :  { %v989_v35 = vpack.c.bf16 %v812_v31, %v812_v31  ;;  %v813_v36 = vmax.f32 %v792_v32, 0.0 }
 0x13d   :  { %871 = vst.msk [vmem:[%s1602_s3 + $0x8] sm:$0xf] %vm868_vm2, %v981_v34  ;;  %v982_v37 = vpack.c.bf16 %v805_v41, %v805_v41 }
 0x13e   :  { %879 = vst.msk [vmem:[%s1602_s3 + $0x28] sm:$0xf] %vm868_vm2, %v989_v35  ;;  %v990_v43 = vpack.c.bf16 %v813_v36, %v813_v36  ;;  %v764_v38 = vpop.f32.mrb[36].mxu0 }
 0x13f   :  { %872 = vst.msk [vmem:[%s1602_s3 + $0xc] sm:$0xf] %vm868_vm2, %v982_v37  ;;  %v765_v39 = vadd.f32 %v764_v38, %v1525_v57  ;;  %v796_v40 = vpop.f32.mrb[36].mxu1  ;;  %v1137_v42 = vpop.f32.mrb[37].mxu0 }
 0x140   :  { %880 = vst.msk [vmem:[%s1602_s3 + $0x2c] sm:$0xf] %vm868_vm2, %v990_v43  ;;  %v797_v44 = vadd.f32 %v796_v40, %v709_v61  ;;  %v767_v45 = vpop.f32.mrb[38].mxu0  ;;  %v1153_v46 = vpop.f32.mrb[37].mxu1 }
 0x141   :  { %v806_v47 = vmax.f32 %v765_v39, 0.0  ;;  %v768_v48 = vadd.f32 %v767_v45, %v1527_v59  ;;  %v1138_v49 = vpop.f32.mrb[39].mxu0  ;;  %v799_v50 = vpop.f32.mrb[38].mxu1 }
 0x142   :  { %v814_v51 = vmax.f32 %v797_v44, 0.0  ;;  %v1154_v52 = vpop.f32.mrb[39].mxu1 }
 0x143   :  { %v983_v53 = vpack.c.bf16 %v806_v47, %v806_v47  ;;  %v807_v57 = vmax.f32 %v768_v48, 0.0 }
 0x144   :  { %v991_v54 = vpack.c.bf16 %v814_v51, %v814_v51 }
 0x145   :  { %873 = vst.msk [vmem:[%s1602_s3 + $0x10] sm:$0xf] %vm868_vm2, %v983_v53  ;;  %v984_v55 = vpack.c.bf16 %v807_v57, %v807_v57 }
 0x146   :  { %882 = vst.msk [vmem:[%s1602_s3 + $0x30] sm:$0x1] %vm881_vm3, %v991_v54  ;;  %v772_v56 = vpop.f32.mrb[40].mxu0 }
 0x147   :  { %874 = vst.msk [vmem:[%s1602_s3 + $0x14] sm:$0xf] %vm868_vm2, %v984_v55  ;;  %v773_v59 = vadd.f32 %v772_v56, %v1531_v9  ;;  %v1141_v58 = vpop.f32.mrb[41].mxu0 }
 0x148   :  { %v775_v60 = vpop.f32.mrb[42].mxu0 }
 0x149   :  { %v808_v61 = vmax.f32 %v773_v59, 0.0  ;;  %v776_v62 = vadd.f32 %v775_v60, %v1533_v12  ;;  %v1142_v63 = vpop.f32.mrb[43].mxu0 }
 0x14b   :  { %v985_v0 = vpack.c.bf16 %v808_v61, %v808_v61  ;;  %v809_v1 = vmax.f32 %v776_v62, 0.0 }
 0x14d   :  { %875 = vst.msk [vmem:[%s1602_s3 + $0x18] sm:$0xf] %vm868_vm2, %v985_v0  ;;  %v986_v2 = vpack.c.bf16 %v809_v1, %v809_v1 }
 0x14f   :  { %876 = vst.msk [vmem:[%s1602_s3 + $0x1c] sm:$0xf] %vm868_vm2, %v986_v2 }

// kernel: dueling_dqn_forward.7
= control target key start
LH: loop header
LB: loop body
LE: loop exit
PB: predicated region body
PF: predicated region fallthrough
CT: control target
= control target key end

     0   :  { %vm12597_vm0 = vcmask 48128   ;;  %s20007_s1 = inlined_call_operand.vmem [shape: bf16[3200,1024], index: 1, kind: input, shape index: {}]   ;;  %s20008_s0 = inlined_call_operand.vmem [shape: bf16[8,3200], index: 0, kind: input, shape index: {}]   ;;  %s20009_s3 = inlined_call_operand.vmem [shape: bf16[1024,7], index: 3, kind: input, shape index: {}]   ;;  %s20010_s2 = inlined_call_operand.vmem [shape: f32[1,1024], index: 2, kind: input, shape index: {}]   ;;  %s20011_s4 = inlined_call_operand.vmem [shape: f32[1,7], index: 4, kind: input, shape index: {}]   ;;  %s20012_s5 = inlined_call_operand.vmem [shape: f32[8,6], index: 5, kind: output, shape index: {}]  }
   0x1   :  { %v34_v0 = vld [vmem:[%s20007_s1] sm:$0xff]  ;;  %v35_v2 = vld [vmem:[%s20007_s1 + $0x8] sm:$0xff] }
   0x2   :  { %v38_v1 = vld [vmem:[%s20007_s1 + $0x20] sm:$0xff]  ;;  %v39_v4 = vld [vmem:[%s20007_s1 + $0x28] sm:$0xff] }
   0x3   :  { %v12635_v3 = vcombine.high %v34_v0, %v38_v1  ;;  %v12634_v5 = vcombine.low %v34_v0, %v38_v1  ;;  %v42_v6 = vld [vmem:[%s20007_s1 + $0x40] sm:$0xff]  ;;  %v12637_v8 = vcombine.high %v35_v2, %v39_v4  ;;  %v12636_v9 = vcombine.low %v35_v2, %v39_v4  ;;  %v43_v11 = vld [vmem:[%s20007_s1 + $0x48] sm:$0xff] }
   0x4   :  { %v46_v7 = vld [vmem:[%s20007_s1 + $0x60] sm:$0xff]  ;;  %v47_v12 = vld [vmem:[%s20007_s1 + $0x68] sm:$0xff] }
   0x5   :  { %v12643_v10 = vcombine.high %v42_v6, %v46_v7  ;;  %v50_v13 = vld [vmem:[%s20007_s1 + $0x80] sm:$0xff]  ;;  %9764 = vmatprep.subr.bf16.mxu0 %v12635_v3  ;;  %v12645_v14 = vcombine.high %v43_v11, %v47_v12  ;;  %v51_v16 = vld [vmem:[%s20007_s1 + $0x88] sm:$0xff]  ;;  %10297 = vmatprep.subr.bf16.mxu1 %v12637_v8  ;;  %v12642_v18 = vcombine.low %v42_v6, %v46_v7 }
   0x6   :  { %v54_v15 = vld [vmem:[%s20007_s1 + $0xa0] sm:$0xff]  ;;  %v55_v17 = vld [vmem:[%s20007_s1 + $0xa8] sm:$0xff]  ;;  %9765 = vmatpush1.bf16.msra.mxu0 %v12634_v5  ;;  %10298 = vmatpush1.bf16.msra.mxu1 %v12636_v9  ;;  %v12644_v19 = vcombine.low %v43_v11, %v47_v12 }
   0x7   :  { %9766 = vmatprep.subr.bf16.mxu0 %v12643_v10  ;;  %v12651_v20 = vcombine.high %v50_v13, %v54_v15  ;;  %10299 = vmatprep.subr.bf16.mxu1 %v12645_v14  ;;  %v12653_v21 = vcombine.high %v51_v16, %v55_v17  ;;  %v58_v22 = vld [vmem:[%s20007_s1 + $0xc0] sm:$0xff]  ;;  %v59_v24 = vld [vmem:[%s20007_s1 + $0xc8] sm:$0xff]  ;;  %v12650_v26 = vcombine.low %v50_v13, %v54_v15 }
   0x8   :  { %v62_v23 = vld [vmem:[%s20007_s1 + $0xe0] sm:$0xff]  ;;  %v63_v25 = vld [vmem:[%s20007_s1 + $0xe8] sm:$0xff]  ;;  %v12652_v27 = vcombine.low %v51_v16, %v55_v17 }
   0x9   :  { %v12659_v28 = vcombine.high %v58_v22, %v62_v23  ;;  %v12661_v29 = vcombine.high %v59_v24, %v63_v25  ;;  %v66_v30 = vld [vmem:[%s20007_s1 + $0x100] sm:$0xff]  ;;  %v67_v32 = vld [vmem:[%s20007_s1 + $0x108] sm:$0xff]  ;;  %v12658_v34 = vcombine.low %v58_v22, %v62_v23  ;;  %v12660_v35 = vcombine.low %v59_v24, %v63_v25 }
   0xa   :  { %9767 = vmatpush1.bf16.msra.mxu0 %v12642_v18  ;;  %10300 = vmatpush1.bf16.msra.mxu1 %v12644_v19  ;;  %v70_v31 = vld [vmem:[%s20007_s1 + $0x120] sm:$0xff]  ;;  %v71_v33 = vld [vmem:[%s20007_s1 + $0x128] sm:$0xff] }
   0xb   :  { %9768 = vmatprep.subr.bf16.mxu0 %v12651_v20  ;;  %10301 = vmatprep.subr.bf16.mxu1 %v12653_v21  ;;  %v12667_v36 = vcombine.high %v66_v30, %v70_v31  ;;  %v12669_v37 = vcombine.high %v67_v32, %v71_v33  ;;  %v74_v38 = vld [vmem:[%s20007_s1 + $0x140] sm:$0xff]  ;;  %v75_v40 = vld [vmem:[%s20007_s1 + $0x148] sm:$0xff]  ;;  %v12666_v42 = vcombine.low %v66_v30, %v70_v31 }
   0xc   :  { %v78_v39 = vld [vmem:[%s20007_s1 + $0x160] sm:$0xff]  ;;  %v79_v41 = vld [vmem:[%s20007_s1 + $0x168] sm:$0xff]  ;;  %v12668_v43 = vcombine.low %v67_v32, %v71_v33 }
   0xd   :  { %v12675_v44 = vcombine.high %v74_v38, %v78_v39  ;;  %v12677_v45 = vcombine.high %v75_v40, %v79_v41  ;;  %v82_v46 = vld [vmem:[%s20007_s1 + $0x180] sm:$0xff]  ;;  %v83_v48 = vld [vmem:[%s20007_s1 + $0x188] sm:$0xff]  ;;  %v12674_v50 = vcombine.low %v74_v38, %v78_v39  ;;  %v12676_v51 = vcombine.low %v75_v40, %v79_v41 }
   0xe   :  { %9769 = vmatpush1.bf16.msra.mxu0 %v12650_v26  ;;  %10302 = vmatpush1.bf16.msra.mxu1 %v12652_v27  ;;  %v86_v47 = vld [vmem:[%s20007_s1 + $0x1a0] sm:$0xff]  ;;  %v87_v49 = vld [vmem:[%s20007_s1 + $0x1a8] sm:$0xff] }
   0xf   :  { %9770 = vmatprep.subr.bf16.mxu0 %v12659_v28  ;;  %10303 = vmatprep.subr.bf16.mxu1 %v12661_v29  ;;  %v12683_v52 = vcombine.high %v82_v46, %v86_v47  ;;  %v14799_v53 = vld [vmem:[%s20008_s0] sm:$0xff]  ;;  %v12685_v54 = vcombine.high %v83_v48, %v87_v49  ;;  %v91_v58 = vld [vmem:[%s20007_s1 + $0x1c8] sm:$0xff]  ;;  %v12682_v60 = vcombine.low %v82_v46, %v86_v47 }
  0x10   :  { %v90_v55 = vld [vmem:[%s20007_s1 + $0x1c0] sm:$0xff]  ;;  %v14809_v57 = vcombine.high %v14799_v53, %v14799_v53  ;;  %v95_v59 = vld [vmem:[%s20007_s1 + $0x1e8] sm:$0xff]  ;;  %v12684_v61 = vcombine.low %v83_v48, %v87_v49 }
  0x11   :  { %v94_v56 = vld [vmem:[%s20007_s1 + $0x1e0] sm:$0xff]  ;;  %v12693_v63 = vcombine.high %v91_v58, %v95_v59  ;;  %v99_v2 = vld [vmem:[%s20007_s1 + $0x208] sm:$0xff]  ;;  %v12692_v5 = vcombine.low %v91_v58, %v95_v59 }
  0x12   :  { %9771 = vmatpush1.bf16.msra.mxu0 %v12658_v34  ;;  %10304 = vmatpush1.bf16.msra.mxu1 %v12660_v35  ;;  %v12691_v62 = vcombine.high %v90_v55, %v94_v56  ;;  %v98_v0 = vld [vmem:[%s20007_s1 + $0x200] sm:$0xff]  ;;  %v103_v3 = vld [vmem:[%s20007_s1 + $0x228] sm:$0xff]  ;;  %v12690_v4 = vcombine.low %v90_v55, %v94_v56 }
  0x13   :  { %9772 = vmatprep.subr.bf16.mxu0 %v12667_v36  ;;  %10305 = vmatprep.subr.bf16.mxu1 %v12669_v37  ;;  %v102_v1 = vld [vmem:[%s20007_s1 + $0x220] sm:$0xff]  ;;  %v12701_v7 = vcombine.high %v99_v2, %v103_v3  ;;  %v107_v10 = vld [vmem:[%s20007_s1 + $0x248] sm:$0xff]  ;;  %v12700_v13 = vcombine.low %v99_v2, %v103_v3 }
  0x14   :  { %9796 = vmatprep.mubr.bf16.mxu0 %v14809_v57  ;;  %10329 = vmatprep.mubr.bf16.mxu1 %v14809_v57  ;;  %v12699_v6 = vcombine.high %v98_v0, %v102_v1  ;;  %v106_v8 = vld [vmem:[%s20007_s1 + $0x240] sm:$0xff]  ;;  %v111_v11 = vld [vmem:[%s20007_s1 + $0x268] sm:$0xff]  ;;  %v12698_v12 = vcombine.low %v98_v0, %v102_v1 }
  0x15   :  { %v110_v9 = vld [vmem:[%s20007_s1 + $0x260] sm:$0xff]  ;;  %v12709_v15 = vcombine.high %v107_v10, %v111_v11  ;;  %v115_v18 = vld [vmem:[%s20007_s1 + $0x288] sm:$0xff]  ;;  %v12708_v21 = vcombine.low %v107_v10, %v111_v11 }
  0x16   :  { %9773 = vmatpush1.bf16.msra.mxu0 %v12666_v42  ;;  %10306 = vmatpush1.bf16.msra.mxu1 %v12668_v43  ;;  %v12707_v14 = vcombine.high %v106_v8, %v110_v9  ;;  %v114_v16 = vld [vmem:[%s20007_s1 + $0x280] sm:$0xff]  ;;  %v119_v19 = vld [vmem:[%s20007_s1 + $0x2a8] sm:$0xff]  ;;  %v12706_v20 = vcombine.low %v106_v8, %v110_v9 }
  0x17   :  { %9774 = vmatprep.subr.bf16.mxu0 %v12675_v44  ;;  %10307 = vmatprep.subr.bf16.mxu1 %v12677_v45  ;;  %v118_v17 = vld [vmem:[%s20007_s1 + $0x2a0] sm:$0xff]  ;;  %v12717_v23 = vcombine.high %v115_v18, %v119_v19  ;;  %v123_v26 = vld [vmem:[%s20007_s1 + $0x2c8] sm:$0xff]  ;;  %v12716_v29 = vcombine.low %v115_v18, %v119_v19 }
  0x18   :  { %v12715_v22 = vcombine.high %v114_v16, %v118_v17  ;;  %v122_v24 = vld [vmem:[%s20007_s1 + $0x2c0] sm:$0xff]  ;;  %v127_v27 = vld [vmem:[%s20007_s1 + $0x2e8] sm:$0xff]  ;;  %v12714_v28 = vcombine.low %v114_v16, %v118_v17 }
  0x19   :  { %v126_v25 = vld [vmem:[%s20007_s1 + $0x2e0] sm:$0xff]  ;;  %v12725_v31 = vcombine.high %v123_v26, %v127_v27  ;;  %v131_v34 = vld [vmem:[%s20007_s1 + $0x308] sm:$0xff]  ;;  %v12724_v37 = vcombine.low %v123_v26, %v127_v27 }
  0x1a   :  { %9775 = vmatpush1.bf16.msra.mxu0 %v12674_v50  ;;  %10308 = vmatpush1.bf16.msra.mxu1 %v12676_v51  ;;  %v12723_v30 = vcombine.high %v122_v24, %v126_v25  ;;  %v130_v32 = vld [vmem:[%s20007_s1 + $0x300] sm:$0xff]  ;;  %v135_v35 = vld [vmem:[%s20007_s1 + $0x328] sm:$0xff]  ;;  %v12722_v36 = vcombine.low %v122_v24, %v126_v25 }
  0x1b   :  { %9776 = vmatprep.subr.bf16.mxu0 %v12683_v52  ;;  %10309 = vmatprep.subr.bf16.mxu1 %v12685_v54  ;;  %v134_v33 = vld [vmem:[%s20007_s1 + $0x320] sm:$0xff]  ;;  %v12733_v39 = vcombine.high %v131_v34, %v135_v35  ;;  %v139_v42 = vld [vmem:[%s20007_s1 + $0x348] sm:$0xff]  ;;  %v12732_v45 = vcombine.low %v131_v34, %v135_v35 }
  0x1c   :  { %v12731_v38 = vcombine.high %v130_v32, %v134_v33  ;;  %v138_v40 = vld [vmem:[%s20007_s1 + $0x340] sm:$0xff]  ;;  %v143_v43 = vld [vmem:[%s20007_s1 + $0x368] sm:$0xff]  ;;  %v12730_v44 = vcombine.low %v130_v32, %v134_v33 }
  0x1d   :  { %v142_v41 = vld [vmem:[%s20007_s1 + $0x360] sm:$0xff]  ;;  %v12741_v47 = vcombine.high %v139_v42, %v143_v43  ;;  %v147_v50 = vld [vmem:[%s20007_s1 + $0x388] sm:$0xff]  ;;  %v12740_v54 = vcombine.low %v139_v42, %v143_v43 }
  0x1e   :  { %9777 = vmatpush1.bf16.msra.mxu0 %v12682_v60  ;;  %10310 = vmatpush1.bf16.msra.mxu1 %v12684_v61  ;;  %v12739_v46 = vcombine.high %v138_v40, %v142_v41  ;;  %v146_v48 = vld [vmem:[%s20007_s1 + $0x380] sm:$0xff]  ;;  %v151_v51 = vld [vmem:[%s20007_s1 + $0x3a8] sm:$0xff]  ;;  %v12738_v52 = vcombine.low %v138_v40, %v142_v41 }
  0x1f   :  { %9778 = vmatprep.subr.bf16.mxu0 %v12691_v62  ;;  %10311 = vmatprep.subr.bf16.mxu1 %v12693_v63  ;;  %v150_v49 = vld [vmem:[%s20007_s1 + $0x3a0] sm:$0xff]  ;;  %v12749_v56 = vcombine.high %v147_v50, %v151_v51  ;;  %v155_v60 = vld [vmem:[%s20007_s1 + $0x3c8] sm:$0xff]  ;;  %v12748_v63 = vcombine.low %v147_v50, %v151_v51 }
  0x20   :  { %v12747_v55 = vcombine.high %v146_v48, %v150_v49  ;;  %v154_v58 = vld [vmem:[%s20007_s1 + $0x3c0] sm:$0xff]  ;;  %v159_v61 = vld [vmem:[%s20007_s1 + $0x3e8] sm:$0xff]  ;;  %v12746_v62 = vcombine.low %v146_v48, %v150_v49 }
  0x21   :  { %v158_v59 = vld [vmem:[%s20007_s1 + $0x3e0] sm:$0xff]  ;;  %v12757_v1 = vcombine.high %v155_v60, %v159_v61 }
  0x22   :  { %9779 = vmatpush1.bf16.msra.mxu0 %v12690_v4  ;;  %10312 = vmatpush1.bf16.msra.mxu1 %v12692_v5  ;;  %v12755_v0 = vcombine.high %v154_v58, %v158_v59  ;;  %v162_v2 = vld [vmem:[%s20007_s1 + $0x400] sm:$0xff]  ;;  %v163_v4 = vld [vmem:[%s20007_s1 + $0x408] sm:$0xff] }
  0x23   :  { %9780 = vmatprep.subr.bf16.mxu0 %v12699_v6  ;;  %10313 = vmatprep.subr.bf16.mxu1 %v12701_v7  ;;  %v166_v3 = vld [vmem:[%s20007_s1 + $0x420] sm:$0xff]  ;;  %v167_v5 = vld [vmem:[%s20007_s1 + $0x428] sm:$0xff]  ;;  %v12754_v6 = vcombine.low %v154_v58, %v158_v59  ;;  %v12756_v7 = vcombine.low %v155_v60, %v159_v61 }
  0x24   :  { %v12763_v8 = vcombine.high %v162_v2, %v166_v3  ;;  %v12765_v9 = vcombine.high %v163_v4, %v167_v5  ;;  %v170_v10 = vld [vmem:[%s20007_s1 + $0x440] sm:$0xff]  ;;  %v12762_v16 = vcombine.low %v162_v2, %v166_v3  ;;  %v12764_v17 = vcombine.low %v163_v4, %v167_v5 }
  0x25   :  { %v174_v11 = vld [vmem:[%s20007_s1 + $0x460] sm:$0xff] }
  0x26   :  { %9781 = vmatpush1.bf16.msra.mxu0 %v12698_v12  ;;  %10314 = vmatpush1.bf16.msra.mxu1 %v12700_v13  ;;  %v14935_v12 = vcombine.low %v14799_v53, %v14799_v53  ;;  %v171_v13 = vld [vmem:[%s20007_s1 + $0x448] sm:$0xff]  ;;  %v12771_v53 = vcombine.high %v170_v10, %v174_v11  ;;  %v178_v19 = vld [vmem:[%s20007_s1 + $0x480] sm:$0xff]  ;;  %v12770_v24 = vcombine.low %v170_v10, %v174_v11 }
  0x27   :  { %9782 = vmatprep.subr.bf16.mxu0 %v12707_v14  ;;  %10315 = vmatprep.subr.bf16.mxu1 %v12709_v15  ;;  %v175_v14 = vld [vmem:[%s20007_s1 + $0x468] sm:$0xff] }
  0x28   :  { %v14946_v15 = vld [vmem:[%s20008_s0 + $0x8] sm:$0xff]  ;;  %v12773_v18 = vcombine.high %v171_v13, %v175_v14  ;;  %v12772_v25 = vcombine.low %v171_v13, %v175_v14 }
  0x2a   :  { %9783 = vmatpush1.bf16.msra.mxu0 %v12706_v20  ;;  %10316 = vmatpush1.bf16.msra.mxu1 %v12708_v21  ;;  %v182_v20 = vld [vmem:[%s20007_s1 + $0x4a0] sm:$0xff]  ;;  %v14956_v21 = vcombine.high %v14946_v15, %v14946_v15 }
  0x2b   :  { %9784 = vmatprep.subr.bf16.mxu0 %v12715_v22  ;;  %10317 = vmatprep.subr.bf16.mxu1 %v12717_v23  ;;  %v179_v22 = vld [vmem:[%s20007_s1 + $0x488] sm:$0xff]  ;;  %v12779_v26 = vcombine.high %v178_v19, %v182_v20  ;;  %v12778_v32 = vcombine.low %v178_v19, %v182_v20 }
  0x2c   :  { %v183_v23 = vld [vmem:[%s20007_s1 + $0x4a8] sm:$0xff] }
  0x2d   :  { %v12781_v27 = vcombine.high %v179_v22, %v183_v23  ;;  %v12780_v33 = vcombine.low %v179_v22, %v183_v23 }
  0x2e   :  { %9785 = vmatpush1.bf16.msra.mxu0 %v12714_v28  ;;  %10318 = vmatpush1.bf16.msra.mxu1 %v12716_v29  ;;  %v186_v28 = vld [vmem:[%s20007_s1 + $0x4c0] sm:$0xff] }
  0x2f   :  { %9786 = vmatprep.subr.bf16.mxu0 %v12723_v30  ;;  %10319 = vmatprep.subr.bf16.mxu1 %v12725_v31  ;;  %v190_v29 = vld [vmem:[%s20007_s1 + $0x4e0] sm:$0xff]  ;;  %v187_v30 = vld [vmem:[%s20007_s1 + $0x4c8] sm:$0xff] }
  0x30   :  { %v191_v31 = vld [vmem:[%s20007_s1 + $0x4e8] sm:$0xff]  ;;  %v12787_v34 = vcombine.high %v186_v28, %v190_v29  ;;  %v12786_v40 = vcombine.low %v186_v28, %v190_v29 }
  0x31   :  { %v12789_v35 = vcombine.high %v187_v30, %v191_v31  ;;  %v12788_v41 = vcombine.low %v187_v30, %v191_v31 }
  0x32   :  { %9787 = vmatpush1.bf16.msra.mxu0 %v12722_v36  ;;  %10320 = vmatpush1.bf16.msra.mxu1 %v12724_v37  ;;  %v194_v36 = vld [vmem:[%s20007_s1 + $0x500] sm:$0xff] }
  0x33   :  { %9788 = vmatprep.subr.bf16.mxu0 %v12731_v38  ;;  %10321 = vmatprep.subr.bf16.mxu1 %v12733_v39  ;;  %v198_v37 = vld [vmem:[%s20007_s1 + $0x520] sm:$0xff]  ;;  %v195_v38 = vld [vmem:[%s20007_s1 + $0x508] sm:$0xff] }
  0x34   :  { %v199_v39 = vld [vmem:[%s20007_s1 + $0x528] sm:$0xff]  ;;  %v12795_v42 = vcombine.high %v194_v36, %v198_v37  ;;  %v12794_v48 = vcombine.low %v194_v36, %v198_v37 }
  0x35   :  { %v12797_v43 = vcombine.high %v195_v38, %v199_v39  ;;  %v12796_v49 = vcombine.low %v195_v38, %v199_v39 }
  0x36   :  { %9789 = vmatpush1.bf16.msra.mxu0 %v12730_v44  ;;  %10322 = vmatpush1.bf16.msra.mxu1 %v12732_v45  ;;  %v202_v44 = vld [vmem:[%s20007_s1 + $0x540] sm:$0xff] }
  0x37   :  { %9790 = vmatprep.subr.bf16.mxu0 %v12739_v46  ;;  %10323 = vmatprep.subr.bf16.mxu1 %v12741_v47  ;;  %v206_v45 = vld [vmem:[%s20007_s1 + $0x560] sm:$0xff]  ;;  %v203_v46 = vld [vmem:[%s20007_s1 + $0x548] sm:$0xff] }
  0x38   :  { %v207_v47 = vld [vmem:[%s20007_s1 + $0x568] sm:$0xff]  ;;  %v12803_v50 = vcombine.high %v202_v44, %v206_v45  ;;  %v12802_v58 = vcombine.low %v202_v44, %v206_v45 }
  0x39   :  { %v12805_v51 = vcombine.high %v203_v46, %v207_v47  ;;  %v12804_v59 = vcombine.low %v203_v46, %v207_v47 }
  0x3a   :  { %9791 = vmatpush1.bf16.msra.mxu0 %v12738_v52  ;;  %10324 = vmatpush1.bf16.msra.mxu1 %v12740_v54  ;;  %v210_v52 = vld [vmem:[%s20007_s1 + $0x580] sm:$0xff] }
  0x3b   :  { %9792 = vmatprep.subr.bf16.mxu0 %v12747_v55  ;;  %10325 = vmatprep.subr.bf16.mxu1 %v12749_v56  ;;  %v214_v54 = vld [vmem:[%s20007_s1 + $0x5a0] sm:$0xff]  ;;  %v211_v55 = vld [vmem:[%s20007_s1 + $0x588] sm:$0xff] }
  0x3c   :  { %v215_v56 = vld [vmem:[%s20007_s1 + $0x5a8] sm:$0xff]  ;;  %v12811_v60 = vcombine.high %v210_v52, %v214_v54  ;;  %v12810_v2 = vcombine.low %v210_v52, %v214_v54 }
  0x3d   :  { %v12813_v61 = vcombine.high %v211_v55, %v215_v56  ;;  %v12812_v3 = vcombine.low %v211_v55, %v215_v56 }
  0x3e   :  { %9793 = vmatpush1.bf16.msra.mxu0 %v12746_v62  ;;  %10326 = vmatpush1.bf16.msra.mxu1 %v12748_v63  ;;  %v218_v62 = vld [vmem:[%s20007_s1 + $0x5c0] sm:$0xff] }
  0x3f   :  { %9794 = vmatprep.subr.bf16.mxu0 %v12755_v0  ;;  %10327 = vmatprep.subr.bf16.mxu1 %v12757_v1  ;;  %v222_v63 = vld [vmem:[%s20007_s1 + $0x5e0] sm:$0xff]  ;;  %v219_v0 = vld [vmem:[%s20007_s1 + $0x5c8] sm:$0xff] }
  0x40   :  { %v223_v1 = vld [vmem:[%s20007_s1 + $0x5e8] sm:$0xff]  ;;  %v12819_v4 = vcombine.high %v218_v62, %v222_v63  ;;  %v12818_v10 = vcombine.low %v218_v62, %v222_v63 }
  0x41   :  { %v12821_v5 = vcombine.high %v219_v0, %v223_v1  ;;  %v12820_v11 = vcombine.low %v219_v0, %v223_v1 }
  0x42   :  { %9795 = vmatpush1.bf16.msra.mxu0 %v12754_v6  ;;  %10328 = vmatpush1.bf16.msra.mxu1 %v12756_v7  ;;  %v226_v6 = vld [vmem:[%s20007_s1 + $0x600] sm:$0xff] }
  0x43   :  { %9805 = vmatprep.subr.bf16.mxu0 %v12763_v8  ;;  %10338 = vmatprep.subr.bf16.mxu1 %v12765_v9  ;;  %v230_v7 = vld [vmem:[%s20007_s1 + $0x620] sm:$0xff]  ;;  %v227_v8 = vld [vmem:[%s20007_s1 + $0x608] sm:$0xff] }
  0x44   :  { %v231_v9 = vld [vmem:[%s20007_s1 + $0x628] sm:$0xff]  ;;  %v12827_v13 = vcombine.high %v226_v6, %v230_v7  ;;  %v12826_v19 = vcombine.low %v226_v6, %v230_v7 }
  0x45   :  { %9797 = vmatmul.mubr.bf16.vlgmr.msra.gmra.mrb[0].mxu0 %v14935_v12  ;;  %10330 = vmatmul.mubr.bf16.vlgmr.msra.gmra.mrb[0].mxu1 %v14935_v12  ;;  %v12829_v14 = vcombine.high %v227_v8, %v231_v9  ;;  %v12828_v20 = vcombine.low %v227_v8, %v231_v9 }
  0x46   :  { %9806 = vmatpush1.bf16.msra.mxu0 %v12762_v16  ;;  %10339 = vmatpush1.bf16.msra.mxu1 %v12764_v17  ;;  %v234_v16 = vld [vmem:[%s20007_s1 + $0x640] sm:$0xff] }
  0x47   :  { %9807 = vmatprep.subr.bf16.mxu0 %v12771_v53  ;;  %10340 = vmatprep.subr.bf16.mxu1 %v12773_v18  ;;  %v238_v17 = vld [vmem:[%s20007_s1 + $0x660] sm:$0xff]  ;;  %v235_v53 = vld [vmem:[%s20007_s1 + $0x648] sm:$0xff] }
  0x48   :  { %9837 = vmatprep.mubr.bf16.mxu0 %v14956_v21  ;;  %10370 = vmatprep.mubr.bf16.mxu1 %v14956_v21  ;;  %v239_v18 = vld [vmem:[%s20007_s1 + $0x668] sm:$0xff]  ;;  %v12835_v22 = vcombine.high %v234_v16, %v238_v17  ;;  %v12834_v28 = vcombine.low %v234_v16, %v238_v17 }
  0x49   :  { %v12837_v23 = vcombine.high %v235_v53, %v239_v18  ;;  %v12836_v29 = vcombine.low %v235_v53, %v239_v18 }
  0x4a   :  { %9808 = vmatpush1.bf16.msra.mxu0 %v12770_v24  ;;  %10341 = vmatpush1.bf16.msra.mxu1 %v12772_v25  ;;  %v242_v24 = vld [vmem:[%s20007_s1 + $0x680] sm:$0xff] }
  0x4b   :  { %9809 = vmatprep.subr.bf16.mxu0 %v12779_v26  ;;  %10342 = vmatprep.subr.bf16.mxu1 %v12781_v27  ;;  %v246_v25 = vld [vmem:[%s20007_s1 + $0x6a0] sm:$0xff]  ;;  %v243_v26 = vld [vmem:[%s20007_s1 + $0x688] sm:$0xff] }
  0x4c   :  { %v247_v27 = vld [vmem:[%s20007_s1 + $0x6a8] sm:$0xff]  ;;  %v12843_v30 = vcombine.high %v242_v24, %v246_v25  ;;  %v12842_v36 = vcombine.low %v242_v24, %v246_v25  ;;  %v15155_v25 = vld [vmem:[%s20008_s0 + $0x10] sm:$0xff] }
  0x4d   :  { %v12845_v31 = vcombine.high %v243_v26, %v247_v27  ;;  %v12844_v37 = vcombine.low %v243_v26, %v247_v27  ;;  %v303_v24 = vld [vmem:[%s20007_s1 + $0x868] sm:$0xff] }
  0x4e   :  { %9810 = vmatpush1.bf16.msra.mxu0 %v12778_v32  ;;  %10343 = vmatpush1.bf16.msra.mxu1 %v12780_v33  ;;  %v250_v32 = vld [vmem:[%s20007_s1 + $0x6c0] sm:$0xff] }
  0x4f   :  { %9811 = vmatprep.subr.bf16.mxu0 %v12787_v34  ;;  %10344 = vmatprep.subr.bf16.mxu1 %v12789_v35  ;;  %v254_v33 = vld [vmem:[%s20007_s1 + $0x6e0] sm:$0xff]  ;;  %v251_v34 = vld [vmem:[%s20007_s1 + $0x6c8] sm:$0xff] }
  0x50   :  { %v255_v35 = vld [vmem:[%s20007_s1 + $0x6e8] sm:$0xff]  ;;  %v12851_v38 = vcombine.high %v250_v32, %v254_v33  ;;  %v12850_v44 = vcombine.low %v250_v32, %v254_v33 }
  0x51   :  { %v12853_v39 = vcombine.high %v251_v34, %v255_v35  ;;  %v12852_v45 = vcombine.low %v251_v34, %v255_v35  ;;  %v307_v32 = vld [vmem:[%s20007_s1 + $0x888] sm:$0xff] }
  0x52   :  { %9812 = vmatpush1.bf16.msra.mxu0 %v12786_v40  ;;  %10345 = vmatpush1.bf16.msra.mxu1 %v12788_v41  ;;  %v258_v40 = vld [vmem:[%s20007_s1 + $0x700] sm:$0xff]  ;;  %v311_v33 = vld [vmem:[%s20007_s1 + $0x8a8] sm:$0xff] }
  0x53   :  { %9813 = vmatprep.subr.bf16.mxu0 %v12795_v42  ;;  %10346 = vmatprep.subr.bf16.mxu1 %v12797_v43  ;;  %v262_v41 = vld [vmem:[%s20007_s1 + $0x720] sm:$0xff]  ;;  %v259_v42 = vld [vmem:[%s20007_s1 + $0x708] sm:$0xff] }
  0x54   :  { %v263_v43 = vld [vmem:[%s20007_s1 + $0x728] sm:$0xff]  ;;  %v12859_v46 = vcombine.high %v258_v40, %v262_v41  ;;  %v12858_v52 = vcombine.low %v258_v40, %v262_v41 }
  0x55   :  { %v12861_v47 = vcombine.high %v259_v42, %v263_v43  ;;  %v12860_v54 = vcombine.low %v259_v42, %v263_v43  ;;  %v315_v40 = vld [vmem:[%s20007_s1 + $0x8c8] sm:$0xff]  ;;  %v12908_v43 = vcombine.low %v307_v32, %v311_v33 }
  0x56   :  { %9814 = vmatpush1.bf16.msra.mxu0 %v12794_v48  ;;  %10347 = vmatpush1.bf16.msra.mxu1 %v12796_v49  ;;  %v266_v48 = vld [vmem:[%s20007_s1 + $0x740] sm:$0xff]  ;;  %v319_v41 = vld [vmem:[%s20007_s1 + $0x8e8] sm:$0xff] }
  0x57   :  { %9815 = vmatprep.subr.bf16.mxu0 %v12803_v50  ;;  %10348 = vmatprep.subr.bf16.mxu1 %v12805_v51  ;;  %v270_v49 = vld [vmem:[%s20007_s1 + $0x760] sm:$0xff]  ;;  %v267_v50 = vld [vmem:[%s20007_s1 + $0x748] sm:$0xff] }
  0x58   :  { %v271_v51 = vld [vmem:[%s20007_s1 + $0x768] sm:$0xff]  ;;  %v12867_v55 = vcombine.high %v266_v48, %v270_v49  ;;  %v12866_v62 = vcombine.low %v266_v48, %v270_v49 }
  0x59   :  { %v12869_v56 = vcombine.high %v267_v50, %v271_v51  ;;  %v12868_v63 = vcombine.low %v267_v50, %v271_v51  ;;  %v323_v48 = vld [vmem:[%s20007_s1 + $0x908] sm:$0xff]  ;;  %v12916_v51 = vcombine.low %v315_v40, %v319_v41 }
  0x5a   :  { %9816 = vmatpush1.bf16.msra.mxu0 %v12802_v58  ;;  %10349 = vmatpush1.bf16.msra.mxu1 %v12804_v59  ;;  %v274_v58 = vld [vmem:[%s20007_s1 + $0x780] sm:$0xff]  ;;  %v327_v49 = vld [vmem:[%s20007_s1 + $0x928] sm:$0xff] }
  0x5b   :  { %9817 = vmatprep.subr.bf16.mxu0 %v12811_v60  ;;  %10350 = vmatprep.subr.bf16.mxu1 %v12813_v61  ;;  %v278_v59 = vld [vmem:[%s20007_s1 + $0x7a0] sm:$0xff]  ;;  %v275_v60 = vld [vmem:[%s20007_s1 + $0x788] sm:$0xff] }
  0x5c   :  { %v279_v61 = vld [vmem:[%s20007_s1 + $0x7a8] sm:$0xff]  ;;  %v12875_v0 = vcombine.high %v274_v58, %v278_v59  ;;  %v12874_v6 = vcombine.low %v274_v58, %v278_v59 }
  0x5d   :  { %v12877_v1 = vcombine.high %v275_v60, %v279_v61  ;;  %v12876_v7 = vcombine.low %v275_v60, %v279_v61  ;;  %v331_v58 = vld [vmem:[%s20007_s1 + $0x948] sm:$0xff]  ;;  %v12924_v61 = vcombine.low %v323_v48, %v327_v49 }
  0x5e   :  { %9818 = vmatpush1.bf16.msra.mxu0 %v12810_v2  ;;  %10351 = vmatpush1.bf16.msra.mxu1 %v12812_v3  ;;  %v282_v2 = vld [vmem:[%s20007_s1 + $0x7c0] sm:$0xff]  ;;  %v335_v59 = vld [vmem:[%s20007_s1 + $0x968] sm:$0xff] }
  0x5f   :  { %9819 = vmatprep.subr.bf16.mxu0 %v12819_v4  ;;  %10352 = vmatprep.subr.bf16.mxu1 %v12821_v5  ;;  %v286_v3 = vld [vmem:[%s20007_s1 + $0x7e0] sm:$0xff]  ;;  %v283_v4 = vld [vmem:[%s20007_s1 + $0x7c8] sm:$0xff] }
  0x60   :  { %v287_v5 = vld [vmem:[%s20007_s1 + $0x7e8] sm:$0xff]  ;;  %v12883_v8 = vcombine.high %v282_v2, %v286_v3  ;;  %v12882_v16 = vcombine.low %v282_v2, %v286_v3 }
  0x61   :  { %v12885_v9 = vcombine.high %v283_v4, %v287_v5  ;;  %v12884_v17 = vcombine.low %v283_v4, %v287_v5  ;;  %v339_v2 = vld [vmem:[%s20007_s1 + $0x988] sm:$0xff]  ;;  %v12932_v5 = vcombine.low %v331_v58, %v335_v59 }
  0x62   :  { %9820 = vmatpush1.bf16.msra.mxu0 %v12818_v10  ;;  %10353 = vmatpush1.bf16.msra.mxu1 %v12820_v11  ;;  %v290_v10 = vld [vmem:[%s20007_s1 + $0x800] sm:$0xff]  ;;  %v343_v3 = vld [vmem:[%s20007_s1 + $0x9a8] sm:$0xff] }
  0x63   :  { %9821 = vmatprep.subr.bf16.mxu0 %v12827_v13  ;;  %10354 = vmatprep.subr.bf16.mxu1 %v12829_v14  ;;  %v294_v11 = vld [vmem:[%s20007_s1 + $0x820] sm:$0xff]  ;;  %v291_v13 = vld [vmem:[%s20007_s1 + $0x808] sm:$0xff] }
  0x64   :  { %v295_v14 = vld [vmem:[%s20007_s1 + $0x828] sm:$0xff]  ;;  %v12891_v53 = vcombine.high %v290_v10, %v294_v11  ;;  %v12890_v26 = vcombine.low %v290_v10, %v294_v11 }
  0x65   :  { %v12893_v18 = vcombine.high %v291_v13, %v295_v14  ;;  %v12892_v27 = vcombine.low %v291_v13, %v295_v14  ;;  %v347_v10 = vld [vmem:[%s20007_s1 + $0x9c8] sm:$0xff]  ;;  %v12940_v14 = vcombine.low %v339_v2, %v343_v3 }
  0x66   :  { %9822 = vmatpush1.bf16.msra.mxu0 %v12826_v19  ;;  %10355 = vmatpush1.bf16.msra.mxu1 %v12828_v20  ;;  %v298_v19 = vld [vmem:[%s20007_s1 + $0x840] sm:$0xff]  ;;  %v351_v11 = vld [vmem:[%s20007_s1 + $0x9e8] sm:$0xff] }
  0x67   :  { %9823 = vmatprep.subr.bf16.mxu0 %v12835_v22  ;;  %10356 = vmatprep.subr.bf16.mxu1 %v12837_v23  ;;  %v302_v20 = vld [vmem:[%s20007_s1 + $0x860] sm:$0xff]  ;;  %v15144_v22 = vcombine.low %v14946_v15, %v14946_v15  ;;  %v299_v23 = vld [vmem:[%s20007_s1 + $0x848] sm:$0xff] }
  0x68   :  { %v12899_v15 = vcombine.high %v298_v19, %v302_v20  ;;  %v12898_v34 = vcombine.low %v298_v19, %v302_v20  ;;  %v12900_v35 = vcombine.low %v299_v23, %v303_v24  ;;  %v355_v19 = vld [vmem:[%s20007_s1 + $0xa08] sm:$0xff] }
  0x69   :  { %v359_v20 = vld [vmem:[%s20007_s1 + $0xa28] sm:$0xff] }
  0x6a   :  { %9824 = vmatpush1.bf16.msra.mxu0 %v12834_v28  ;;  %10357 = vmatpush1.bf16.msra.mxu1 %v12836_v29  ;;  %v12901_v28 = vcombine.high %v299_v23, %v303_v24  ;;  %v306_v29 = vld [vmem:[%s20007_s1 + $0x880] sm:$0xff]  ;;  %v12948_v24 = vcombine.low %v347_v10, %v351_v11 }
  0x6b   :  { %9825 = vmatprep.subr.bf16.mxu0 %v12843_v30  ;;  %10358 = vmatprep.subr.bf16.mxu1 %v12845_v31  ;;  %v310_v30 = vld [vmem:[%s20007_s1 + $0x8a0] sm:$0xff]  ;;  %v15165_v31 = vcombine.high %v15155_v25, %v15155_v25 }
  0x6c   :  { %v12906_v42 = vcombine.low %v306_v29, %v310_v30 }
  0x6e   :  { %9826 = vmatpush1.bf16.msra.mxu0 %v12842_v36  ;;  %10359 = vmatpush1.bf16.msra.mxu1 %v12844_v37  ;;  %v12907_v36 = vcombine.high %v306_v29, %v310_v30  ;;  %v12909_v37 = vcombine.high %v307_v32, %v311_v33  ;;  %v363_v29 = vld [vmem:[%s20007_s1 + $0xa48] sm:$0xff]  ;;  %v12956_v33 = vcombine.low %v355_v19, %v359_v20 }
  0x6f   :  { %9827 = vmatprep.subr.bf16.mxu0 %v12851_v38  ;;  %10360 = vmatprep.subr.bf16.mxu1 %v12853_v39  ;;  %v314_v38 = vld [vmem:[%s20007_s1 + $0x8c0] sm:$0xff]  ;;  %v367_v30 = vld [vmem:[%s20007_s1 + $0xa68] sm:$0xff] }
  0x70   :  { %v318_v39 = vld [vmem:[%s20007_s1 + $0x8e0] sm:$0xff] }
  0x71   :  { %v12914_v50 = vcombine.low %v314_v38, %v318_v39 }
  0x72   :  { %9828 = vmatpush1.bf16.msra.mxu0 %v12850_v44  ;;  %10361 = vmatpush1.bf16.msra.mxu1 %v12852_v45  ;;  %v12915_v44 = vcombine.high %v314_v38, %v318_v39  ;;  %v12917_v45 = vcombine.high %v315_v40, %v319_v41  ;;  %v371_v38 = vld [vmem:[%s20007_s1 + $0xa88] sm:$0xff]  ;;  %v12964_v41 = vcombine.low %v363_v29, %v367_v30 }
  0x73   :  { %9829 = vmatprep.subr.bf16.mxu0 %v12859_v46  ;;  %10362 = vmatprep.subr.bf16.mxu1 %v12861_v47  ;;  %v322_v46 = vld [vmem:[%s20007_s1 + $0x900] sm:$0xff]  ;;  %v375_v39 = vld [vmem:[%s20007_s1 + $0xaa8] sm:$0xff] }
  0x74   :  { %v326_v47 = vld [vmem:[%s20007_s1 + $0x920] sm:$0xff] }
  0x75   :  { %v12922_v60 = vcombine.low %v322_v46, %v326_v47 }
  0x76   :  { %9830 = vmatpush1.bf16.msra.mxu0 %v12858_v52  ;;  %10363 = vmatpush1.bf16.msra.mxu1 %v12860_v54  ;;  %v12923_v52 = vcombine.high %v322_v46, %v326_v47  ;;  %v12925_v54 = vcombine.high %v323_v48, %v327_v49  ;;  %v379_v46 = vld [vmem:[%s20007_s1 + $0xac8] sm:$0xff]  ;;  %v12972_v49 = vcombine.low %v371_v38, %v375_v39 }
  0x77   :  { %9831 = vmatprep.subr.bf16.mxu0 %v12867_v55  ;;  %10364 = vmatprep.subr.bf16.mxu1 %v12869_v56  ;;  %v330_v55 = vld [vmem:[%s20007_s1 + $0x940] sm:$0xff]  ;;  %v383_v47 = vld [vmem:[%s20007_s1 + $0xae8] sm:$0xff] }
  0x78   :  { %v334_v56 = vld [vmem:[%s20007_s1 + $0x960] sm:$0xff] }
  0x79   :  { %v12930_v4 = vcombine.low %v330_v55, %v334_v56 }
  0x7a   :  { %9832 = vmatpush1.bf16.msra.mxu0 %v12866_v62  ;;  %10365 = vmatpush1.bf16.msra.mxu1 %v12868_v63  ;;  %v12931_v62 = vcombine.high %v330_v55, %v334_v56  ;;  %v12933_v63 = vcombine.high %v331_v58, %v335_v59  ;;  %v387_v55 = vld [vmem:[%s20007_s1 + $0xb08] sm:$0xff]  ;;  %v12980_v59 = vcombine.low %v379_v46, %v383_v47 }
  0x7b   :  { %9833 = vmatprep.subr.bf16.mxu0 %v12875_v0  ;;  %10366 = vmatprep.subr.bf16.mxu1 %v12877_v1  ;;  %v338_v0 = vld [vmem:[%s20007_s1 + $0x980] sm:$0xff]  ;;  %v391_v56 = vld [vmem:[%s20007_s1 + $0xb28] sm:$0xff] }
  0x7c   :  { %v342_v1 = vld [vmem:[%s20007_s1 + $0x9a0] sm:$0xff] }
  0x7d   :  { %v12938_v13 = vcombine.low %v338_v0, %v342_v1 }
  0x7e   :  { %9834 = vmatpush1.bf16.msra.mxu0 %v12874_v6  ;;  %10367 = vmatpush1.bf16.msra.mxu1 %v12876_v7  ;;  %v12939_v6 = vcombine.high %v338_v0, %v342_v1  ;;  %v12941_v7 = vcombine.high %v339_v2, %v343_v3  ;;  %v395_v0 = vld [vmem:[%s20007_s1 + $0xb48] sm:$0xff]  ;;  %v12988_v3 = vcombine.low %v387_v55, %v391_v56 }
  0x7f   :  { %9835 = vmatprep.subr.bf16.mxu0 %v12883_v8  ;;  %10368 = vmatprep.subr.bf16.mxu1 %v12885_v9  ;;  %v346_v8 = vld [vmem:[%s20007_s1 + $0x9c0] sm:$0xff]  ;;  %v399_v1 = vld [vmem:[%s20007_s1 + $0xb68] sm:$0xff] }
  0x80   :  { %v350_v9 = vld [vmem:[%s20007_s1 + $0x9e0] sm:$0xff] }
  0x81   :  { %v12946_v23 = vcombine.low %v346_v8, %v350_v9 }
  0x82   :  { %9836 = vmatpush1.bf16.msra.mxu0 %v12882_v16  ;;  %10369 = vmatpush1.bf16.msra.mxu1 %v12884_v17  ;;  %v12947_v16 = vcombine.high %v346_v8, %v350_v9  ;;  %v12949_v17 = vcombine.high %v347_v10, %v351_v11  ;;  %v403_v8 = vld [vmem:[%s20007_s1 + $0xb88] sm:$0xff]  ;;  %v12996_v11 = vcombine.low %v395_v0, %v399_v1 }
  0x83   :  { %9846 = vmatprep.subr.bf16.mxu0 %v12891_v53  ;;  %10379 = vmatprep.subr.bf16.mxu1 %v12893_v18  ;;  %v354_v53 = vld [vmem:[%s20007_s1 + $0xa00] sm:$0xff]  ;;  %v407_v9 = vld [vmem:[%s20007_s1 + $0xba8] sm:$0xff] }
  0x84   :  { %v358_v18 = vld [vmem:[%s20007_s1 + $0xa20] sm:$0xff] }
  0x85   :  { %9838 = vmatmul.mubr.bf16.vlgmr.msra.gmra.mrb[0].mxu0 %v15144_v22  ;;  %10371 = vmatmul.mubr.bf16.vlgmr.msra.gmra.mrb[0].mxu1 %v15144_v22  ;;  %v12954_v32 = vcombine.low %v354_v53, %v358_v18 }
  0x86   :  { %9847 = vmatpush1.bf16.msra.mxu0 %v12890_v26  ;;  %10380 = vmatpush1.bf16.msra.mxu1 %v12892_v27  ;;  %v12955_v26 = vcombine.high %v354_v53, %v358_v18  ;;  %v12957_v27 = vcombine.high %v355_v19, %v359_v20  ;;  %v411_v53 = vld [vmem:[%s20007_s1 + $0xbc8] sm:$0xff]  ;;  %v13004_v20 = vcombine.low %v403_v8, %v407_v9 }
  0x87   :  { %9848 = vmatprep.subr.bf16.mxu0 %v12899_v15  ;;  %10381 = vmatprep.subr.bf16.mxu1 %v12901_v28  ;;  %v362_v15 = vld [vmem:[%s20007_s1 + $0xa40] sm:$0xff]  ;;  %v415_v18 = vld [vmem:[%s20007_s1 + $0xbe8] sm:$0xff] }
  0x88   :  { %9878 = vmatprep.mubr.bf16.mxu0 %v15165_v31  ;;  %10411 = vmatprep.mubr.bf16.mxu1 %v15165_v31  ;;  %v366_v28 = vld [vmem:[%s20007_s1 + $0xa60] sm:$0xff] }
  0x89   :  { %v12962_v40 = vcombine.low %v362_v15, %v366_v28 }
  0x8a   :  { %9849 = vmatpush1.bf16.msra.mxu0 %v12898_v34  ;;  %10382 = vmatpush1.bf16.msra.mxu1 %v12900_v35  ;;  %v12963_v34 = vcombine.high %v362_v15, %v366_v28  ;;  %v12965_v35 = vcombine.high %v363_v29, %v367_v30  ;;  %v419_v15 = vld [vmem:[%s20007_s1 + $0xc08] sm:$0xff]  ;;  %v13012_v30 = vcombine.low %v411_v53, %v415_v18 }
  0x8b   :  { %9850 = vmatprep.subr.bf16.mxu0 %v12907_v36  ;;  %10383 = vmatprep.subr.bf16.mxu1 %v12909_v37  ;;  %v370_v36 = vld [vmem:[%s20007_s1 + $0xa80] sm:$0xff]  ;;  %v423_v28 = vld [vmem:[%s20007_s1 + $0xc28] sm:$0xff] }
  0x8c   :  { %v374_v37 = vld [vmem:[%s20007_s1 + $0xaa0] sm:$0xff] }
  0x8d   :  { %v12970_v48 = vcombine.low %v370_v36, %v374_v37 }
  0x8e   :  { %9851 = vmatpush1.bf16.msra.mxu0 %v12906_v42  ;;  %10384 = vmatpush1.bf16.msra.mxu1 %v12908_v43  ;;  %v12971_v42 = vcombine.high %v370_v36, %v374_v37  ;;  %v12973_v43 = vcombine.high %v371_v38, %v375_v39  ;;  %v15353_v36 = vcombine.low %v15155_v25, %v15155_v25  ;;  %v427_v37 = vld [vmem:[%s20007_s1 + $0xc48] sm:$0xff]  ;;  %v15364_v39 = vld [vmem:[%s20008_s0 + $0x18] sm:$0xff] }
  0x8f   :  { %9852 = vmatprep.subr.bf16.mxu0 %v12915_v44  ;;  %10385 = vmatprep.subr.bf16.mxu1 %v12917_v45  ;;  %v378_v44 = vld [vmem:[%s20007_s1 + $0xac0] sm:$0xff]  ;;  %v431_v38 = vld [vmem:[%s20007_s1 + $0xc68] sm:$0xff] }
  0x90   :  { %v382_v45 = vld [vmem:[%s20007_s1 + $0xae0] sm:$0xff] }
  0x91   :  { %v12978_v58 = vcombine.low %v378_v44, %v382_v45 }
  0x92   :  { %9853 = vmatpush1.bf16.msra.mxu0 %v12914_v50  ;;  %10386 = vmatpush1.bf16.msra.mxu1 %v12916_v51  ;;  %v12979_v50 = vcombine.high %v378_v44, %v382_v45  ;;  %v12981_v51 = vcombine.high %v379_v46, %v383_v47  ;;  %v438_v44 = vld [vmem:[%s20007_s1 + $0xca0] sm:$0xff]  ;;  %v15374_v45 = vcombine.high %v15364_v39, %v15364_v39  ;;  %v435_v46 = vld [vmem:[%s20007_s1 + $0xc88] sm:$0xff] }
  0x93   :  { %9854 = vmatprep.subr.bf16.mxu0 %v12923_v52  ;;  %10387 = vmatprep.subr.bf16.mxu1 %v12925_v54  ;;  %v386_v52 = vld [vmem:[%s20007_s1 + $0xb00] sm:$0xff]  ;;  %v439_v47 = vld [vmem:[%s20007_s1 + $0xca8] sm:$0xff] }
  0x94   :  { %v390_v54 = vld [vmem:[%s20007_s1 + $0xb20] sm:$0xff] }
  0x95   :  { %v12986_v2 = vcombine.low %v386_v52, %v390_v54 }
  0x96   :  { %9855 = vmatpush1.bf16.msra.mxu0 %v12922_v60  ;;  %10388 = vmatpush1.bf16.msra.mxu1 %v12924_v61  ;;  %v12987_v60 = vcombine.high %v386_v52, %v390_v54  ;;  %v12989_v61 = vcombine.high %v387_v55, %v391_v56  ;;  %v442_v52 = vld [vmem:[%s20007_s1 + $0xcc0] sm:$0xff]  ;;  %v443_v55 = vld [vmem:[%s20007_s1 + $0xcc8] sm:$0xff] }
  0x97   :  { %9856 = vmatprep.subr.bf16.mxu0 %v12931_v62  ;;  %10389 = vmatprep.subr.bf16.mxu1 %v12933_v63  ;;  %v394_v62 = vld [vmem:[%s20007_s1 + $0xb40] sm:$0xff]  ;;  %v447_v56 = vld [vmem:[%s20007_s1 + $0xce8] sm:$0xff] }
  0x98   :  { %v398_v63 = vld [vmem:[%s20007_s1 + $0xb60] sm:$0xff] }
  0x99   :  { %v12994_v10 = vcombine.low %v394_v62, %v398_v63  ;;  %v446_v54 = vld [vmem:[%s20007_s1 + $0xce0] sm:$0xff] }
  0x9a   :  { %9857 = vmatpush1.bf16.msra.mxu0 %v12930_v4  ;;  %10390 = vmatpush1.bf16.msra.mxu1 %v12932_v5  ;;  %v12995_v4 = vcombine.high %v394_v62, %v398_v63  ;;  %v12997_v5 = vcombine.high %v395_v0, %v399_v1  ;;  %v450_v62 = vld [vmem:[%s20007_s1 + $0xd00] sm:$0xff]  ;;  %v451_v0 = vld [vmem:[%s20007_s1 + $0xd08] sm:$0xff] }
  0x9b   :  { %9858 = vmatprep.subr.bf16.mxu0 %v12939_v6  ;;  %10391 = vmatprep.subr.bf16.mxu1 %v12941_v7  ;;  %v402_v6 = vld [vmem:[%s20007_s1 + $0xb80] sm:$0xff]  ;;  %v455_v1 = vld [vmem:[%s20007_s1 + $0xd28] sm:$0xff] }
  0x9c   :  { %v406_v7 = vld [vmem:[%s20007_s1 + $0xba0] sm:$0xff] }
  0x9d   :  { %v13002_v19 = vcombine.low %v402_v6, %v406_v7  ;;  %v454_v63 = vld [vmem:[%s20007_s1 + $0xd20] sm:$0xff] }
  0x9e   :  { %9859 = vmatpush1.bf16.msra.mxu0 %v12938_v13  ;;  %10392 = vmatpush1.bf16.msra.mxu1 %v12940_v14  ;;  %v13003_v13 = vcombine.high %v402_v6, %v406_v7  ;;  %v13005_v14 = vcombine.high %v403_v8, %v407_v9  ;;  %v458_v6 = vld [vmem:[%s20007_s1 + $0xd40] sm:$0xff]  ;;  %v459_v8 = vld [vmem:[%s20007_s1 + $0xd48] sm:$0xff] }
  0x9f   :  { %9860 = vmatprep.subr.bf16.mxu0 %v12947_v16  ;;  %10393 = vmatprep.subr.bf16.mxu1 %v12949_v17  ;;  %v410_v16 = vld [vmem:[%s20007_s1 + $0xbc0] sm:$0xff]  ;;  %v463_v9 = vld [vmem:[%s20007_s1 + $0xd68] sm:$0xff] }
  0xa0   :  { %v414_v17 = vld [vmem:[%s20007_s1 + $0xbe0] sm:$0xff] }
  0xa1   :  { %v13010_v29 = vcombine.low %v410_v16, %v414_v17  ;;  %v462_v7 = vld [vmem:[%s20007_s1 + $0xd60] sm:$0xff] }
  0xa2   :  { %9861 = vmatpush1.bf16.msra.mxu0 %v12946_v23  ;;  %10394 = vmatpush1.bf16.msra.mxu1 %v12948_v24  ;;  %v13011_v23 = vcombine.high %v410_v16, %v414_v17  ;;  %v13013_v24 = vcombine.high %v411_v53, %v415_v18  ;;  %v466_v16 = vld [vmem:[%s20007_s1 + $0xd80] sm:$0xff]  ;;  %v467_v53 = vld [vmem:[%s20007_s1 + $0xd88] sm:$0xff] }
  0xa3   :  { %9862 = vmatprep.subr.bf16.mxu0 %v12955_v26  ;;  %10395 = vmatprep.subr.bf16.mxu1 %v12957_v27  ;;  %v418_v26 = vld [vmem:[%s20007_s1 + $0xc00] sm:$0xff]  ;;  %v471_v18 = vld [vmem:[%s20007_s1 + $0xda8] sm:$0xff] }
  0xa4   :  { %v422_v27 = vld [vmem:[%s20007_s1 + $0xc20] sm:$0xff] }
  0xa5   :  { %v470_v17 = vld [vmem:[%s20007_s1 + $0xda0] sm:$0xff] }
  0xa6   :  { %9863 = vmatpush1.bf16.msra.mxu0 %v12954_v32  ;;  %10396 = vmatpush1.bf16.msra.mxu1 %v12956_v33  ;;  %v13019_v32 = vcombine.high %v418_v26, %v422_v27  ;;  %v13021_v33 = vcombine.high %v419_v15, %v423_v28 }
  0xa7   :  { %9864 = vmatprep.subr.bf16.mxu0 %v12963_v34  ;;  %10397 = vmatprep.subr.bf16.mxu1 %v12965_v35  ;;  %v426_v34 = vld [vmem:[%s20007_s1 + $0xc40] sm:$0xff] }
  0xa8   :  { %v430_v35 = vld [vmem:[%s20007_s1 + $0xc60] sm:$0xff] }
  0xa9   :  { %v13027_v25 = vcombine.high %v426_v34, %v430_v35 }
  0xaa   :  { %9865 = vmatpush1.bf16.msra.mxu0 %v12962_v40  ;;  %10398 = vmatpush1.bf16.msra.mxu1 %v12964_v41  ;;  %v13018_v40 = vcombine.low %v418_v26, %v422_v27  ;;  %v13020_v41 = vcombine.low %v419_v15, %v423_v28  ;;  %v474_v26 = vld [vmem:[%s20007_s1 + $0xdc0] sm:$0xff]  ;;  %v475_v15 = vld [vmem:[%s20007_s1 + $0xdc8] sm:$0xff] }
  0xab   :  { %9866 = vmatprep.subr.bf16.mxu0 %v12971_v42  ;;  %10399 = vmatprep.subr.bf16.mxu1 %v12973_v43  ;;  %v13029_v42 = vcombine.high %v427_v37, %v431_v38  ;;  %v434_v43 = vld [vmem:[%s20007_s1 + $0xc80] sm:$0xff]  ;;  %v479_v28 = vld [vmem:[%s20007_s1 + $0xde8] sm:$0xff] }
  0xac   :  { %v478_v27 = vld [vmem:[%s20007_s1 + $0xde0] sm:$0xff] }
  0xae   :  { %9867 = vmatpush1.bf16.msra.mxu0 %v12970_v48  ;;  %10400 = vmatpush1.bf16.msra.mxu1 %v12972_v49  ;;  %v13026_v48 = vcombine.low %v426_v34, %v430_v35  ;;  %v13028_v49 = vcombine.low %v427_v37, %v431_v38  ;;  %v482_v34 = vld [vmem:[%s20007_s1 + $0xe00] sm:$0xff]  ;;  %v483_v37 = vld [vmem:[%s20007_s1 + $0xe08] sm:$0xff] }
  0xaf   :  { %9868 = vmatprep.subr.bf16.mxu0 %v12979_v50  ;;  %10401 = vmatprep.subr.bf16.mxu1 %v12981_v51  ;;  %v13035_v50 = vcombine.high %v434_v43, %v438_v44  ;;  %v13037_v51 = vcombine.high %v435_v46, %v439_v47  ;;  %v486_v35 = vld [vmem:[%s20007_s1 + $0xe20] sm:$0xff]  ;;  %v487_v38 = vld [vmem:[%s20007_s1 + $0xe28] sm:$0xff] }
  0xb2   :  { %9869 = vmatpush1.bf16.msra.mxu0 %v12978_v58  ;;  %10402 = vmatpush1.bf16.msra.mxu1 %v12980_v59  ;;  %v13034_v58 = vcombine.low %v434_v43, %v438_v44  ;;  %v13036_v59 = vcombine.low %v435_v46, %v439_v47  ;;  %v490_v43 = vld [vmem:[%s20007_s1 + $0xe40] sm:$0xff]  ;;  %v491_v46 = vld [vmem:[%s20007_s1 + $0xe48] sm:$0xff] }
  0xb3   :  { %9870 = vmatprep.subr.bf16.mxu0 %v12987_v60  ;;  %10403 = vmatprep.subr.bf16.mxu1 %v12989_v61  ;;  %v13043_v60 = vcombine.high %v442_v52, %v446_v54  ;;  %v13045_v61 = vcombine.high %v443_v55, %v447_v56  ;;  %v494_v44 = vld [vmem:[%s20007_s1 + $0xe60] sm:$0xff]  ;;  %v495_v47 = vld [vmem:[%s20007_s1 + $0xe68] sm:$0xff] }
  0xb6   :  { %9871 = vmatpush1.bf16.msra.mxu0 %v12986_v2  ;;  %10404 = vmatpush1.bf16.msra.mxu1 %v12988_v3  ;;  %v13042_v2 = vcombine.low %v442_v52, %v446_v54  ;;  %v13044_v3 = vcombine.low %v443_v55, %v447_v56  ;;  %v498_v52 = vld [vmem:[%s20007_s1 + $0xe80] sm:$0xff]  ;;  %v499_v55 = vld [vmem:[%s20007_s1 + $0xe88] sm:$0xff] }
  0xb7   :  { %9872 = vmatprep.subr.bf16.mxu0 %v12995_v4  ;;  %10405 = vmatprep.subr.bf16.mxu1 %v12997_v5  ;;  %v13051_v4 = vcombine.high %v450_v62, %v454_v63  ;;  %v13053_v5 = vcombine.high %v451_v0, %v455_v1  ;;  %v502_v54 = vld [vmem:[%s20007_s1 + $0xea0] sm:$0xff]  ;;  %v503_v56 = vld [vmem:[%s20007_s1 + $0xea8] sm:$0xff] }
  0xba   :  { %9873 = vmatpush1.bf16.msra.mxu0 %v12994_v10  ;;  %10406 = vmatpush1.bf16.msra.mxu1 %v12996_v11  ;;  %v13050_v10 = vcombine.low %v450_v62, %v454_v63  ;;  %v13052_v11 = vcombine.low %v451_v0, %v455_v1  ;;  %v506_v62 = vld [vmem:[%s20007_s1 + $0xec0] sm:$0xff]  ;;  %v507_v0 = vld [vmem:[%s20007_s1 + $0xec8] sm:$0xff] }
  0xbb   :  { %9874 = vmatprep.subr.bf16.mxu0 %v13003_v13  ;;  %10407 = vmatprep.subr.bf16.mxu1 %v13005_v14  ;;  %v13059_v13 = vcombine.high %v458_v6, %v462_v7  ;;  %v13061_v14 = vcombine.high %v459_v8, %v463_v9  ;;  %v510_v63 = vld [vmem:[%s20007_s1 + $0xee0] sm:$0xff]  ;;  %v511_v1 = vld [vmem:[%s20007_s1 + $0xee8] sm:$0xff] }
  0xbe   :  { %9875 = vmatpush1.bf16.msra.mxu0 %v13002_v19  ;;  %10408 = vmatpush1.bf16.msra.mxu1 %v13004_v20  ;;  %v13058_v19 = vcombine.low %v458_v6, %v462_v7  ;;  %v13060_v20 = vcombine.low %v459_v8, %v463_v9  ;;  %v514_v6 = vld [vmem:[%s20007_s1 + $0xf00] sm:$0xff]  ;;  %v515_v8 = vld [vmem:[%s20007_s1 + $0xf08] sm:$0xff] }
  0xbf   :  { %9876 = vmatprep.subr.bf16.mxu0 %v13011_v23  ;;  %10409 = vmatprep.subr.bf16.mxu1 %v13013_v24  ;;  %v13067_v23 = vcombine.high %v466_v16, %v470_v17  ;;  %v13069_v24 = vcombine.high %v467_v53, %v471_v18  ;;  %v518_v7 = vld [vmem:[%s20007_s1 + $0xf20] sm:$0xff]  ;;  %v519_v9 = vld [vmem:[%s20007_s1 + $0xf28] sm:$0xff] }
  0xc2   :  { %9877 = vmatpush1.bf16.msra.mxu0 %v13010_v29  ;;  %10410 = vmatpush1.bf16.msra.mxu1 %v13012_v30  ;;  %v13066_v29 = vcombine.low %v466_v16, %v470_v17  ;;  %v13068_v30 = vcombine.low %v467_v53, %v471_v18  ;;  %v522_v16 = vld [vmem:[%s20007_s1 + $0xf40] sm:$0xff]  ;;  %v523_v53 = vld [vmem:[%s20007_s1 + $0xf48] sm:$0xff] }
  0xc3   :  { %9887 = vmatprep.subr.bf16.mxu0 %v13019_v32  ;;  %10420 = vmatprep.subr.bf16.mxu1 %v13021_v33  ;;  %v13075_v32 = vcombine.high %v474_v26, %v478_v27  ;;  %v13077_v33 = vcombine.high %v475_v15, %v479_v28  ;;  %v526_v17 = vld [vmem:[%s20007_s1 + $0xf60] sm:$0xff]  ;;  %v527_v18 = vld [vmem:[%s20007_s1 + $0xf68] sm:$0xff] }
  0xc5   :  { %9879 = vmatmul.mubr.bf16.vlgmr.msra.gmra.mrb[0].mxu0 %v15353_v36  ;;  %10412 = vmatmul.mubr.bf16.vlgmr.msra.gmra.mrb[0].mxu1 %v15353_v36 }
  0xc6   :  { %9888 = vmatpush1.bf16.msra.mxu0 %v13018_v40  ;;  %10421 = vmatpush1.bf16.msra.mxu1 %v13020_v41  ;;  %v13074_v40 = vcombine.low %v474_v26, %v478_v27  ;;  %v13076_v41 = vcombine.low %v475_v15, %v479_v28  ;;  %v530_v26 = vld [vmem:[%s20007_s1 + $0xf80] sm:$0xff]  ;;  %v531_v15 = vld [vmem:[%s20007_s1 + $0xf88] sm:$0xff] }
  0xc7   :  { %9889 = vmatprep.subr.bf16.mxu0 %v13027_v25  ;;  %10422 = vmatprep.subr.bf16.mxu1 %v13029_v42  ;;  %v13083_v25 = vcombine.high %v482_v34, %v486_v35  ;;  %v13085_v42 = vcombine.high %v483_v37, %v487_v38  ;;  %v534_v27 = vld [vmem:[%s20007_s1 + $0xfa0] sm:$0xff]  ;;  %v535_v28 = vld [vmem:[%s20007_s1 + $0xfa8] sm:$0xff] }
  0xc8   :  { %9919 = vmatprep.mubr.bf16.mxu0 %v15374_v45  ;;  %10452 = vmatprep.mubr.bf16.mxu1 %v15374_v45 }
  0xca   :  { %9890 = vmatpush1.bf16.msra.mxu0 %v13026_v48  ;;  %10423 = vmatpush1.bf16.msra.mxu1 %v13028_v49  ;;  %v13082_v48 = vcombine.low %v482_v34, %v486_v35  ;;  %v13084_v49 = vcombine.low %v483_v37, %v487_v38  ;;  %v538_v34 = vld [vmem:[%s20007_s1 + $0xfc0] sm:$0xff]  ;;  %v539_v37 = vld [vmem:[%s20007_s1 + $0xfc8] sm:$0xff] }
  0xcb   :  { %9891 = vmatprep.subr.bf16.mxu0 %v13035_v50  ;;  %10424 = vmatprep.subr.bf16.mxu1 %v13037_v51  ;;  %v13091_v50 = vcombine.high %v490_v43, %v494_v44  ;;  %v13093_v51 = vcombine.high %v491_v46, %v495_v47  ;;  %v542_v35 = vld [vmem:[%s20007_s1 + $0xfe0] sm:$0xff]  ;;  %v543_v38 = vld [vmem:[%s20007_s1 + $0xfe8] sm:$0xff] }
  0xce   :  { %9892 = vmatpush1.bf16.msra.mxu0 %v13034_v58  ;;  %10425 = vmatpush1.bf16.msra.mxu1 %v13036_v59  ;;  %v13090_v58 = vcombine.low %v490_v43, %v494_v44  ;;  %v13092_v59 = vcombine.low %v491_v46, %v495_v47  ;;  %v546_v43 = vld [vmem:[%s20007_s1 + $0x1000] sm:$0xff]  ;;  %v547_v46 = vld [vmem:[%s20007_s1 + $0x1008] sm:$0xff] }
  0xcf   :  { %9893 = vmatprep.subr.bf16.mxu0 %v13043_v60  ;;  %10426 = vmatprep.subr.bf16.mxu1 %v13045_v61  ;;  %v13099_v60 = vcombine.high %v498_v52, %v502_v54  ;;  %v13101_v61 = vcombine.high %v499_v55, %v503_v56  ;;  %v550_v44 = vld [vmem:[%s20007_s1 + $0x1020] sm:$0xff]  ;;  %v551_v47 = vld [vmem:[%s20007_s1 + $0x1028] sm:$0xff] }
  0xd2   :  { %9894 = vmatpush1.bf16.msra.mxu0 %v13042_v2  ;;  %10427 = vmatpush1.bf16.msra.mxu1 %v13044_v3  ;;  %v13098_v2 = vcombine.low %v498_v52, %v502_v54  ;;  %v13100_v3 = vcombine.low %v499_v55, %v503_v56  ;;  %v554_v52 = vld [vmem:[%s20007_s1 + $0x1040] sm:$0xff]  ;;  %v15562_v55 = vcombine.low %v15364_v39, %v15364_v39  ;;  %v555_v56 = vld [vmem:[%s20007_s1 + $0x1048] sm:$0xff] }
  0xd3   :  { %9895 = vmatprep.subr.bf16.mxu0 %v13051_v4  ;;  %10428 = vmatprep.subr.bf16.mxu1 %v13053_v5  ;;  %v13107_v4 = vcombine.high %v506_v62, %v510_v63  ;;  %v13109_v5 = vcombine.high %v507_v0, %v511_v1  ;;  %v558_v54 = vld [vmem:[%s20007_s1 + $0x1060] sm:$0xff] }
  0xd4   :  { %v13155_v39 = vcombine.high %v554_v52, %v558_v54 }
  0xd6   :  { %9896 = vmatpush1.bf16.msra.mxu0 %v13050_v10  ;;  %10429 = vmatpush1.bf16.msra.mxu1 %v13052_v11  ;;  %v13106_v10 = vcombine.low %v506_v62, %v510_v63  ;;  %v13108_v11 = vcombine.low %v507_v0, %v511_v1  ;;  %v562_v63 = vld [vmem:[%s20007_s1 + $0x1080] sm:$0xff] }
  0xd7   :  { %9897 = vmatprep.subr.bf16.mxu0 %v13059_v13  ;;  %10430 = vmatprep.subr.bf16.mxu1 %v13061_v14  ;;  %v13115_v13 = vcombine.high %v514_v6, %v518_v7  ;;  %v13117_v14 = vcombine.high %v515_v8, %v519_v9  ;;  %v566_v0 = vld [vmem:[%s20007_s1 + $0x10a0] sm:$0xff] }
  0xda   :  { %9898 = vmatpush1.bf16.msra.mxu0 %v13058_v19  ;;  %10431 = vmatpush1.bf16.msra.mxu1 %v13060_v20  ;;  %v13114_v19 = vcombine.low %v514_v6, %v518_v7  ;;  %v13116_v20 = vcombine.low %v515_v8, %v519_v9  ;;  %v13163_v6 = vcombine.high %v562_v63, %v566_v0  ;;  %v570_v8 = vld [vmem:[%s20007_s1 + $0x10c0] sm:$0xff] }
  0xdb   :  { %9899 = vmatprep.subr.bf16.mxu0 %v13067_v23  ;;  %10432 = vmatprep.subr.bf16.mxu1 %v13069_v24  ;;  %v13123_v23 = vcombine.high %v522_v16, %v526_v17  ;;  %v13125_v24 = vcombine.high %v523_v53, %v527_v18  ;;  %v574_v9 = vld [vmem:[%s20007_s1 + $0x10e0] sm:$0xff] }
  0xde   :  { %9900 = vmatpush1.bf16.msra.mxu0 %v13066_v29  ;;  %10433 = vmatpush1.bf16.msra.mxu1 %v13068_v30  ;;  %v13122_v29 = vcombine.low %v522_v16, %v526_v17  ;;  %v13124_v30 = vcombine.low %v523_v53, %v527_v18  ;;  %v13171_v16 = vcombine.high %v570_v8, %v574_v9  ;;  %v578_v53 = vld [vmem:[%s20007_s1 + $0x1100] sm:$0xff] }
  0xdf   :  { %9901 = vmatprep.subr.bf16.mxu0 %v13075_v32  ;;  %10434 = vmatprep.subr.bf16.mxu1 %v13077_v33  ;;  %v13131_v32 = vcombine.high %v530_v26, %v534_v27  ;;  %v13133_v33 = vcombine.high %v531_v15, %v535_v28  ;;  %v582_v18 = vld [vmem:[%s20007_s1 + $0x1120] sm:$0xff] }
  0xe2   :  { %9902 = vmatpush1.bf16.msra.mxu0 %v13074_v40  ;;  %10435 = vmatpush1.bf16.msra.mxu1 %v13076_v41  ;;  %v13130_v40 = vcombine.low %v530_v26, %v534_v27  ;;  %v13132_v41 = vcombine.low %v531_v15, %v535_v28  ;;  %v13179_v26 = vcombine.high %v578_v53, %v582_v18  ;;  %v586_v15 = vld [vmem:[%s20007_s1 + $0x1140] sm:$0xff] }
  0xe3   :  { %9903 = vmatprep.subr.bf16.mxu0 %v13083_v25  ;;  %10436 = vmatprep.subr.bf16.mxu1 %v13085_v42  ;;  %v13139_v25 = vcombine.high %v538_v34, %v542_v35  ;;  %v13141_v42 = vcombine.high %v539_v37, %v543_v38  ;;  %v590_v28 = vld [vmem:[%s20007_s1 + $0x1160] sm:$0xff] }
  0xe6   :  { %9904 = vmatpush1.bf16.msra.mxu0 %v13082_v48  ;;  %10437 = vmatpush1.bf16.msra.mxu1 %v13084_v49  ;;  %v13138_v48 = vcombine.low %v538_v34, %v542_v35  ;;  %v13140_v49 = vcombine.low %v539_v37, %v543_v38  ;;  %v13187_v34 = vcombine.high %v586_v15, %v590_v28  ;;  %v594_v37 = vld [vmem:[%s20007_s1 + $0x1180] sm:$0xff] }
  0xe7   :  { %9905 = vmatprep.subr.bf16.mxu0 %v13091_v50  ;;  %10438 = vmatprep.subr.bf16.mxu1 %v13093_v51  ;;  %v13147_v50 = vcombine.high %v546_v43, %v550_v44  ;;  %v13149_v51 = vcombine.high %v547_v46, %v551_v47  ;;  %v598_v38 = vld [vmem:[%s20007_s1 + $0x11a0] sm:$0xff] }
  0xea   :  { %9906 = vmatpush1.bf16.msra.mxu0 %v13090_v58  ;;  %10439 = vmatpush1.bf16.msra.mxu1 %v13092_v59  ;;  %v559_v58 = vld [vmem:[%s20007_s1 + $0x1068] sm:$0xff]  ;;  %v15573_v59 = vld [vmem:[%s20008_s0 + $0x20] sm:$0xff] }
  0xeb   :  { %9907 = vmatprep.subr.bf16.mxu0 %v13099_v60  ;;  %10440 = vmatprep.subr.bf16.mxu1 %v13101_v61  ;;  %v13146_v60 = vcombine.low %v546_v43, %v550_v44  ;;  %v13148_v61 = vcombine.low %v547_v46, %v551_v47  ;;  %v13157_v62 = vcombine.high %v555_v56, %v559_v58  ;;  %v602_v46 = vld [vmem:[%s20007_s1 + $0x11c0] sm:$0xff] }
  0xec   :  { %v15583_v1 = vcombine.high %v15573_v59, %v15573_v59  ;;  %v13195_v43 = vcombine.high %v594_v37, %v598_v38  ;;  %v606_v47 = vld [vmem:[%s20007_s1 + $0x11e0] sm:$0xff] }
  0xee   :  { %9908 = vmatpush1.bf16.msra.mxu0 %v13098_v2  ;;  %10441 = vmatpush1.bf16.msra.mxu1 %v13100_v3  ;;  %v563_v2 = vld [vmem:[%s20007_s1 + $0x1088] sm:$0xff] }
  0xef   :  { %9909 = vmatprep.subr.bf16.mxu0 %v13107_v4  ;;  %10442 = vmatprep.subr.bf16.mxu1 %v13109_v5  ;;  %v567_v3 = vld [vmem:[%s20007_s1 + $0x10a8] sm:$0xff]  ;;  %v13154_v4 = vcombine.low %v554_v52, %v558_v54  ;;  %v13156_v5 = vcombine.low %v555_v56, %v559_v58  ;;  %v13203_v52 = vcombine.high %v602_v46, %v606_v47  ;;  %v610_v56 = vld [vmem:[%s20007_s1 + $0x1200] sm:$0xff] }
  0xf0   :  { %v13165_v7 = vcombine.high %v563_v2, %v567_v3  ;;  %v614_v58 = vld [vmem:[%s20007_s1 + $0x1220] sm:$0xff] }
  0xf2   :  { %9910 = vmatpush1.bf16.msra.mxu0 %v13106_v10  ;;  %10443 = vmatpush1.bf16.msra.mxu1 %v13108_v11  ;;  %v571_v10 = vld [vmem:[%s20007_s1 + $0x10c8] sm:$0xff] }
  0xf3   :  { %9911 = vmatprep.subr.bf16.mxu0 %v13115_v13  ;;  %10444 = vmatprep.subr.bf16.mxu1 %v13117_v14  ;;  %v575_v11 = vld [vmem:[%s20007_s1 + $0x10e8] sm:$0xff]  ;;  %v13162_v13 = vcombine.low %v562_v63, %v566_v0  ;;  %v13164_v14 = vcombine.low %v563_v2, %v567_v3  ;;  %v13211_v63 = vcombine.high %v610_v56, %v614_v58  ;;  %v618_v2 = vld [vmem:[%s20007_s1 + $0x1240] sm:$0xff] }
  0xf4   :  { %v13173_v17 = vcombine.high %v571_v10, %v575_v11  ;;  %v622_v3 = vld [vmem:[%s20007_s1 + $0x1260] sm:$0xff] }
  0xf6   :  { %9912 = vmatpush1.bf16.msra.mxu0 %v13114_v19  ;;  %10445 = vmatpush1.bf16.msra.mxu1 %v13116_v20  ;;  %v579_v19 = vld [vmem:[%s20007_s1 + $0x1108] sm:$0xff] }
  0xf7   :  { %9913 = vmatprep.subr.bf16.mxu0 %v13123_v23  ;;  %10446 = vmatprep.subr.bf16.mxu1 %v13125_v24  ;;  %v583_v20 = vld [vmem:[%s20007_s1 + $0x1128] sm:$0xff]  ;;  %v13170_v23 = vcombine.low %v570_v8, %v574_v9  ;;  %v13172_v24 = vcombine.low %v571_v10, %v575_v11  ;;  %v13219_v8 = vcombine.high %v618_v2, %v622_v3  ;;  %v626_v10 = vld [vmem:[%s20007_s1 + $0x1280] sm:$0xff] }
  0xf8   :  { %v13181_v27 = vcombine.high %v579_v19, %v583_v20  ;;  %v630_v11 = vld [vmem:[%s20007_s1 + $0x12a0] sm:$0xff] }
  0xfa   :  { %9914 = vmatpush1.bf16.msra.mxu0 %v13122_v29  ;;  %10447 = vmatpush1.bf16.msra.mxu1 %v13124_v30  ;;  %v587_v29 = vld [vmem:[%s20007_s1 + $0x1148] sm:$0xff] }
  0xfb   :  { %9915 = vmatprep.subr.bf16.mxu0 %v13131_v32  ;;  %10448 = vmatprep.subr.bf16.mxu1 %v13133_v33  ;;  %v591_v30 = vld [vmem:[%s20007_s1 + $0x1168] sm:$0xff]  ;;  %v13178_v32 = vcombine.low %v578_v53, %v582_v18  ;;  %v13180_v33 = vcombine.low %v579_v19, %v583_v20  ;;  %v13227_v53 = vcombine.high %v626_v10, %v630_v11  ;;  %v634_v19 = vld [vmem:[%s20007_s1 + $0x12c0] sm:$0xff] }
  0xfc   :  { %v13189_v35 = vcombine.high %v587_v29, %v591_v30  ;;  %v638_v20 = vld [vmem:[%s20007_s1 + $0x12e0] sm:$0xff] }
  0xfe   :  { %9916 = vmatpush1.bf16.msra.mxu0 %v13130_v40  ;;  %10449 = vmatpush1.bf16.msra.mxu1 %v13132_v41  ;;  %v595_v40 = vld [vmem:[%s20007_s1 + $0x1188] sm:$0xff] }
  0xff   :  { %9917 = vmatprep.subr.bf16.mxu0 %v13139_v25  ;;  %10450 = vmatprep.subr.bf16.mxu1 %v13141_v42  ;;  %v599_v41 = vld [vmem:[%s20007_s1 + $0x11a8] sm:$0xff]  ;;  %v13186_v25 = vcombine.low %v586_v15, %v590_v28  ;;  %v13188_v42 = vcombine.low %v587_v29, %v591_v30  ;;  %v13235_v15 = vcombine.high %v634_v19, %v638_v20  ;;  %v642_v29 = vld [vmem:[%s20007_s1 + $0x1300] sm:$0xff] }
 0x100   :  { %v13197_v44 = vcombine.high %v595_v40, %v599_v41  ;;  %v646_v30 = vld [vmem:[%s20007_s1 + $0x1320] sm:$0xff] }
 0x102   :  { %9918 = vmatpush1.bf16.msra.mxu0 %v13138_v48  ;;  %10451 = vmatpush1.bf16.msra.mxu1 %v13140_v49  ;;  %v603_v48 = vld [vmem:[%s20007_s1 + $0x11c8] sm:$0xff] }
 0x103   :  { %9928 = vmatprep.subr.bf16.mxu0 %v13147_v50  ;;  %10461 = vmatprep.subr.bf16.mxu1 %v13149_v51  ;;  %v607_v49 = vld [vmem:[%s20007_s1 + $0x11e8] sm:$0xff]  ;;  %v13194_v50 = vcombine.low %v594_v37, %v598_v38  ;;  %v13196_v51 = vcombine.low %v595_v40, %v599_v41  ;;  %v13243_v37 = vcombine.high %v642_v29, %v646_v30  ;;  %v650_v40 = vld [vmem:[%s20007_s1 + $0x1340] sm:$0xff] }
 0x104   :  { %v13205_v54 = vcombine.high %v603_v48, %v607_v49  ;;  %v654_v41 = vld [vmem:[%s20007_s1 + $0x1360] sm:$0xff] }
 0x105   :  { %9920 = vmatmul.mubr.bf16.vlgmr.msra.gmra.mrb[0].mxu0 %v15562_v55  ;;  %10453 = vmatmul.mubr.bf16.vlgmr.msra.gmra.mrb[0].mxu1 %v15562_v55 }
 0x106   :  { %9929 = vmatpush1.bf16.msra.mxu0 %v13146_v60  ;;  %10462 = vmatpush1.bf16.msra.mxu1 %v13148_v61  ;;  %v611_v60 = vld [vmem:[%s20007_s1 + $0x1208] sm:$0xff] }
 0x107   :  { %9930 = vmatprep.subr.bf16.mxu0 %v13155_v39  ;;  %10463 = vmatprep.subr.bf16.mxu1 %v13157_v62  ;;  %v615_v61 = vld [vmem:[%s20007_s1 + $0x1228] sm:$0xff]  ;;  %v13202_v39 = vcombine.low %v602_v46, %v606_v47  ;;  %v13204_v62 = vcombine.low %v603_v48, %v607_v49  ;;  %v13251_v46 = vcombine.high %v650_v40, %v654_v41  ;;  %v658_v48 = vld [vmem:[%s20007_s1 + $0x1380] sm:$0xff] }
 0x108   :  { %9960 = vmatprep.mubr.bf16.mxu0 %v15583_v1  ;;  %10493 = vmatprep.mubr.bf16.mxu1 %v15583_v1  ;;  %v13213_v0 = vcombine.high %v611_v60, %v615_v61  ;;  %v662_v49 = vld [vmem:[%s20007_s1 + $0x13a0] sm:$0xff] }
 0x10a   :  { %9931 = vmatpush1.bf16.msra.mxu0 %v13154_v4  ;;  %10464 = vmatpush1.bf16.msra.mxu1 %v13156_v5  ;;  %v619_v4 = vld [vmem:[%s20007_s1 + $0x1248] sm:$0xff] }
 0x10b   :  { %9932 = vmatprep.subr.bf16.mxu0 %v13163_v6  ;;  %10465 = vmatprep.subr.bf16.mxu1 %v13165_v7  ;;  %v623_v5 = vld [vmem:[%s20007_s1 + $0x1268] sm:$0xff]  ;;  %v13210_v6 = vcombine.low %v610_v56, %v614_v58  ;;  %v13212_v7 = vcombine.low %v611_v60, %v615_v61  ;;  %v13259_v56 = vcombine.high %v658_v48, %v662_v49  ;;  %v666_v60 = vld [vmem:[%s20007_s1 + $0x13c0] sm:$0xff] }
 0x10c   :  { %v13221_v9 = vcombine.high %v619_v4, %v623_v5  ;;  %v670_v61 = vld [vmem:[%s20007_s1 + $0x13e0] sm:$0xff] }
 0x10e   :  { %9933 = vmatpush1.bf16.msra.mxu0 %v13162_v13  ;;  %10466 = vmatpush1.bf16.msra.mxu1 %v13164_v14  ;;  %v627_v13 = vld [vmem:[%s20007_s1 + $0x1288] sm:$0xff] }
 0x10f   :  { %9934 = vmatprep.subr.bf16.mxu0 %v13171_v16  ;;  %10467 = vmatprep.subr.bf16.mxu1 %v13173_v17  ;;  %v631_v14 = vld [vmem:[%s20007_s1 + $0x12a8] sm:$0xff]  ;;  %v13218_v16 = vcombine.low %v618_v2, %v622_v3  ;;  %v13220_v17 = vcombine.low %v619_v4, %v623_v5  ;;  %v13267_v2 = vcombine.high %v666_v60, %v670_v61  ;;  %v674_v4 = vld [vmem:[%s20007_s1 + $0x1400] sm:$0xff] }
 0x110   :  { %v13229_v18 = vcombine.high %v627_v13, %v631_v14  ;;  %v678_v5 = vld [vmem:[%s20007_s1 + $0x1420] sm:$0xff] }
 0x112   :  { %9935 = vmatpush1.bf16.msra.mxu0 %v13170_v23  ;;  %10468 = vmatpush1.bf16.msra.mxu1 %v13172_v24  ;;  %v635_v23 = vld [vmem:[%s20007_s1 + $0x12c8] sm:$0xff] }
 0x113   :  { %9936 = vmatprep.subr.bf16.mxu0 %v13179_v26  ;;  %10469 = vmatprep.subr.bf16.mxu1 %v13181_v27  ;;  %v639_v24 = vld [vmem:[%s20007_s1 + $0x12e8] sm:$0xff]  ;;  %v13226_v26 = vcombine.low %v626_v10, %v630_v11  ;;  %v13228_v27 = vcombine.low %v627_v13, %v631_v14  ;;  %v13275_v10 = vcombine.high %v674_v4, %v678_v5  ;;  %v682_v13 = vld [vmem:[%s20007_s1 + $0x1440] sm:$0xff] }
 0x114   :  { %v13237_v28 = vcombine.high %v635_v23, %v639_v24  ;;  %v686_v14 = vld [vmem:[%s20007_s1 + $0x1460] sm:$0xff] }
 0x116   :  { %9937 = vmatpush1.bf16.msra.mxu0 %v13178_v32  ;;  %10470 = vmatpush1.bf16.msra.mxu1 %v13180_v33  ;;  %v643_v32 = vld [vmem:[%s20007_s1 + $0x1308] sm:$0xff] }
 0x117   :  { %9938 = vmatprep.subr.bf16.mxu0 %v13187_v34  ;;  %10471 = vmatprep.subr.bf16.mxu1 %v13189_v35  ;;  %v647_v33 = vld [vmem:[%s20007_s1 + $0x1328] sm:$0xff]  ;;  %v13234_v34 = vcombine.low %v634_v19, %v638_v20  ;;  %v13236_v35 = vcombine.low %v635_v23, %v639_v24  ;;  %v13274_v19 = vcombine.low %v674_v4, %v678_v5  ;;  %v690_v24 = vld [vmem:[%s20007_s1 + $0x1480] sm:$0xff] }
 0x118   :  { %v13245_v38 = vcombine.high %v643_v32, %v647_v33 }
 0x11a   :  { %9939 = vmatpush1.bf16.msra.mxu0 %v13186_v25  ;;  %10472 = vmatpush1.bf16.msra.mxu1 %v13188_v42  ;;  %v651_v25 = vld [vmem:[%s20007_s1 + $0x1348] sm:$0xff] }
 0x11b   :  { %9940 = vmatprep.subr.bf16.mxu0 %v13195_v43  ;;  %10473 = vmatprep.subr.bf16.mxu1 %v13197_v44  ;;  %v655_v42 = vld [vmem:[%s20007_s1 + $0x1368] sm:$0xff]  ;;  %v13242_v43 = vcombine.low %v642_v29, %v646_v30  ;;  %v13244_v44 = vcombine.low %v643_v32, %v647_v33  ;;  %v13282_v29 = vcombine.low %v682_v13, %v686_v14 }
 0x11c   :  { %v13253_v47 = vcombine.high %v651_v25, %v655_v42 }
 0x11e   :  { %9941 = vmatpush1.bf16.msra.mxu0 %v13194_v50  ;;  %10474 = vmatpush1.bf16.msra.mxu1 %v13196_v51  ;;  %v659_v50 = vld [vmem:[%s20007_s1 + $0x1388] sm:$0xff] }
 0x11f   :  { %9942 = vmatprep.subr.bf16.mxu0 %v13203_v52  ;;  %10475 = vmatprep.subr.bf16.mxu1 %v13205_v54  ;;  %v663_v51 = vld [vmem:[%s20007_s1 + $0x13a8] sm:$0xff]  ;;  %v13250_v52 = vcombine.low %v650_v40, %v654_v41  ;;  %v13252_v54 = vcombine.low %v651_v25, %v655_v42 }
 0x120   :  { %v13261_v58 = vcombine.high %v659_v50, %v663_v51 }
 0x122   :  { %9943 = vmatpush1.bf16.msra.mxu0 %v13202_v39  ;;  %10476 = vmatpush1.bf16.msra.mxu1 %v13204_v62  ;;  %v667_v39 = vld [vmem:[%s20007_s1 + $0x13c8] sm:$0xff] }
 0x123   :  { %9944 = vmatprep.subr.bf16.mxu0 %v13211_v63  ;;  %10477 = vmatprep.subr.bf16.mxu1 %v13213_v0  ;;  %v671_v62 = vld [vmem:[%s20007_s1 + $0x13e8] sm:$0xff]  ;;  %v13258_v63 = vcombine.low %v658_v48, %v662_v49  ;;  %v13260_v0 = vcombine.low %v659_v50, %v663_v51 }
 0x124   :  { %v13269_v3 = vcombine.high %v667_v39, %v671_v62 }
 0x126   :  { %9945 = vmatpush1.bf16.msra.mxu0 %v13210_v6  ;;  %10478 = vmatpush1.bf16.msra.mxu1 %v13212_v7  ;;  %v675_v6 = vld [vmem:[%s20007_s1 + $0x1408] sm:$0xff] }
 0x127   :  { %9946 = vmatprep.subr.bf16.mxu0 %v13219_v8  ;;  %10479 = vmatprep.subr.bf16.mxu1 %v13221_v9  ;;  %v679_v7 = vld [vmem:[%s20007_s1 + $0x1428] sm:$0xff]  ;;  %v13266_v8 = vcombine.low %v666_v60, %v670_v61  ;;  %v13268_v9 = vcombine.low %v667_v39, %v671_v62 }
 0x128   :  { %v13277_v11 = vcombine.high %v675_v6, %v679_v7  ;;  %v13276_v20 = vcombine.low %v675_v6, %v679_v7 }
 0x12a   :  { %9947 = vmatpush1.bf16.msra.mxu0 %v13218_v16  ;;  %10480 = vmatpush1.bf16.msra.mxu1 %v13220_v17  ;;  %v15771_v16 = vcombine.low %v15573_v59, %v15573_v59  ;;  %v683_v17 = vld [vmem:[%s20007_s1 + $0x1448] sm:$0xff]  ;;  %v13283_v59 = vcombine.high %v682_v13, %v686_v14 }
 0x12b   :  { %9948 = vmatprep.subr.bf16.mxu0 %v13227_v53  ;;  %10481 = vmatprep.subr.bf16.mxu1 %v13229_v18  ;;  %v687_v53 = vld [vmem:[%s20007_s1 + $0x1468] sm:$0xff] }
 0x12c   :  { %v15782_v18 = vld [vmem:[%s20008_s0 + $0x28] sm:$0xff]  ;;  %v13285_v23 = vcombine.high %v683_v17, %v687_v53  ;;  %v13284_v30 = vcombine.low %v683_v17, %v687_v53 }
 0x12e   :  { %9949 = vmatpush1.bf16.msra.mxu0 %v13226_v26  ;;  %10482 = vmatpush1.bf16.msra.mxu1 %v13228_v27  ;;  %v694_v26 = vld [vmem:[%s20007_s1 + $0x14a0] sm:$0xff]  ;;  %v15792_v27 = vcombine.high %v15782_v18, %v15782_v18 }
 0x12f   :  { %9950 = vmatprep.subr.bf16.mxu0 %v13235_v15  ;;  %10483 = vmatprep.subr.bf16.mxu1 %v13237_v28  ;;  %v691_v15 = vld [vmem:[%s20007_s1 + $0x1488] sm:$0xff]  ;;  %v13291_v32 = vcombine.high %v690_v24, %v694_v26  ;;  %v13290_v40 = vcombine.low %v690_v24, %v694_v26 }
 0x130   :  { %v695_v28 = vld [vmem:[%s20007_s1 + $0x14a8] sm:$0xff] }
 0x131   :  { %v13293_v33 = vcombine.high %v691_v15, %v695_v28  ;;  %v13292_v41 = vcombine.low %v691_v15, %v695_v28 }
 0x132   :  { %9951 = vmatpush1.bf16.msra.mxu0 %v13234_v34  ;;  %10484 = vmatpush1.bf16.msra.mxu1 %v13236_v35  ;;  %v698_v34 = vld [vmem:[%s20007_s1 + $0x14c0] sm:$0xff] }
 0x133   :  { %9952 = vmatprep.subr.bf16.mxu0 %v13243_v37  ;;  %10485 = vmatprep.subr.bf16.mxu1 %v13245_v38  ;;  %v702_v35 = vld [vmem:[%s20007_s1 + $0x14e0] sm:$0xff]  ;;  %v699_v37 = vld [vmem:[%s20007_s1 + $0x14c8] sm:$0xff] }
 0x134   :  { %v703_v38 = vld [vmem:[%s20007_s1 + $0x14e8] sm:$0xff]  ;;  %v13299_v25 = vcombine.high %v698_v34, %v702_v35  ;;  %v13298_v48 = vcombine.low %v698_v34, %v702_v35 }
 0x135   :  { %v13301_v42 = vcombine.high %v699_v37, %v703_v38  ;;  %v13300_v49 = vcombine.low %v699_v37, %v703_v38 }
 0x136   :  { %9953 = vmatpush1.bf16.msra.mxu0 %v13242_v43  ;;  %10486 = vmatpush1.bf16.msra.mxu1 %v13244_v44  ;;  %v706_v43 = vld [vmem:[%s20007_s1 + $0x1500] sm:$0xff] }
 0x137   :  { %9954 = vmatprep.subr.bf16.mxu0 %v13251_v46  ;;  %10487 = vmatprep.subr.bf16.mxu1 %v13253_v47  ;;  %v710_v44 = vld [vmem:[%s20007_s1 + $0x1520] sm:$0xff]  ;;  %v707_v46 = vld [vmem:[%s20007_s1 + $0x1508] sm:$0xff] }
 0x138   :  { %v711_v47 = vld [vmem:[%s20007_s1 + $0x1528] sm:$0xff]  ;;  %v13307_v50 = vcombine.high %v706_v43, %v710_v44  ;;  %v13306_v60 = vcombine.low %v706_v43, %v710_v44 }
 0x139   :  { %v13309_v51 = vcombine.high %v707_v46, %v711_v47  ;;  %v13308_v61 = vcombine.low %v707_v46, %v711_v47 }
 0x13a   :  { %9955 = vmatpush1.bf16.msra.mxu0 %v13250_v52  ;;  %10488 = vmatpush1.bf16.msra.mxu1 %v13252_v54  ;;  %v714_v52 = vld [vmem:[%s20007_s1 + $0x1540] sm:$0xff] }
 0x13b   :  { %9956 = vmatprep.subr.bf16.mxu0 %v13259_v56  ;;  %10489 = vmatprep.subr.bf16.mxu1 %v13261_v58  ;;  %v718_v54 = vld [vmem:[%s20007_s1 + $0x1560] sm:$0xff]  ;;  %v715_v56 = vld [vmem:[%s20007_s1 + $0x1548] sm:$0xff] }
 0x13c   :  { %v719_v58 = vld [vmem:[%s20007_s1 + $0x1568] sm:$0xff]  ;;  %v13315_v39 = vcombine.high %v714_v52, %v718_v54  ;;  %v13314_v4 = vcombine.low %v714_v52, %v718_v54 }
 0x13d   :  { %v13317_v62 = vcombine.high %v715_v56, %v719_v58  ;;  %v13316_v5 = vcombine.low %v715_v56, %v719_v58 }
 0x13e   :  { %9957 = vmatpush1.bf16.msra.mxu0 %v13258_v63  ;;  %10490 = vmatpush1.bf16.msra.mxu1 %v13260_v0  ;;  %v722_v63 = vld [vmem:[%s20007_s1 + $0x1580] sm:$0xff] }
 0x13f   :  { %9958 = vmatprep.subr.bf16.mxu0 %v13267_v2  ;;  %10491 = vmatprep.subr.bf16.mxu1 %v13269_v3  ;;  %v726_v0 = vld [vmem:[%s20007_s1 + $0x15a0] sm:$0xff]  ;;  %v723_v2 = vld [vmem:[%s20007_s1 + $0x1588] sm:$0xff] }
 0x140   :  { %v727_v3 = vld [vmem:[%s20007_s1 + $0x15a8] sm:$0xff]  ;;  %v13323_v6 = vcombine.high %v722_v63, %v726_v0  ;;  %v13322_v13 = vcombine.low %v722_v63, %v726_v0 }
 0x141   :  { %v13325_v7 = vcombine.high %v723_v2, %v727_v3  ;;  %v13324_v14 = vcombine.low %v723_v2, %v727_v3 }
 0x142   :  { %9959 = vmatpush1.bf16.msra.mxu0 %v13266_v8  ;;  %10492 = vmatpush1.bf16.msra.mxu1 %v13268_v9  ;;  %v730_v8 = vld [vmem:[%s20007_s1 + $0x15c0] sm:$0xff] }
 0x143   :  { %9969 = vmatprep.subr.bf16.mxu0 %v13275_v10  ;;  %10502 = vmatprep.subr.bf16.mxu1 %v13277_v11  ;;  %v734_v9 = vld [vmem:[%s20007_s1 + $0x15e0] sm:$0xff]  ;;  %v731_v10 = vld [vmem:[%s20007_s1 + $0x15c8] sm:$0xff] }
 0x144   :  { %v735_v11 = vld [vmem:[%s20007_s1 + $0x15e8] sm:$0xff]  ;;  %v13331_v17 = vcombine.high %v730_v8, %v734_v9  ;;  %v13330_v24 = vcombine.low %v730_v8, %v734_v9 }
 0x145   :  { %9961 = vmatmul.mubr.bf16.vlgmr.msra.gmra.mrb[0].mxu0 %v15771_v16  ;;  %10494 = vmatmul.mubr.bf16.vlgmr.msra.gmra.mrb[0].mxu1 %v15771_v16  ;;  %v13333_v53 = vcombine.high %v731_v10, %v735_v11  ;;  %v13332_v26 = vcombine.low %v731_v10, %v735_v11 }
 0x146   :  { %9970 = vmatpush1.bf16.msra.mxu0 %v13274_v19  ;;  %10503 = vmatpush1.bf16.msra.mxu1 %v13276_v20  ;;  %v738_v19 = vld [vmem:[%s20007_s1 + $0x1600] sm:$0xff] }
 0x147   :  { %9971 = vmatprep.subr.bf16.mxu0 %v13283_v59  ;;  %10504 = vmatprep.subr.bf16.mxu1 %v13285_v23  ;;  %v742_v20 = vld [vmem:[%s20007_s1 + $0x1620] sm:$0xff]  ;;  %v739_v59 = vld [vmem:[%s20007_s1 + $0x1608] sm:$0xff] }
 0x148   :  { %10001 = vmatprep.mubr.bf16.mxu0 %v15792_v27  ;;  %10534 = vmatprep.mubr.bf16.mxu1 %v15792_v27  ;;  %v743_v23 = vld [vmem:[%s20007_s1 + $0x1628] sm:$0xff]  ;;  %v13339_v15 = vcombine.high %v738_v19, %v742_v20  ;;  %v13338_v34 = vcombine.low %v738_v19, %v742_v20 }
 0x149   :  { %v13341_v28 = vcombine.high %v739_v59, %v743_v23  ;;  %v13340_v35 = vcombine.low %v739_v59, %v743_v23 }
 0x14a   :  { %9972 = vmatpush1.bf16.msra.mxu0 %v13282_v29  ;;  %10505 = vmatpush1.bf16.msra.mxu1 %v13284_v30  ;;  %v746_v29 = vld [vmem:[%s20007_s1 + $0x1640] sm:$0xff] }
 0x14b   :  { %9973 = vmatprep.subr.bf16.mxu0 %v13291_v32  ;;  %10506 = vmatprep.subr.bf16.mxu1 %v13293_v33  ;;  %v750_v30 = vld [vmem:[%s20007_s1 + $0x1660] sm:$0xff]  ;;  %v747_v32 = vld [vmem:[%s20007_s1 + $0x1648] sm:$0xff] }
 0x14c   :  { %v751_v33 = vld [vmem:[%s20007_s1 + $0x1668] sm:$0xff]  ;;  %v13347_v37 = vcombine.high %v746_v29, %v750_v30  ;;  %v13346_v43 = vcombine.low %v746_v29, %v750_v30 }
 0x14d   :  { %v13349_v38 = vcombine.high %v747_v32, %v751_v33  ;;  %v13348_v44 = vcombine.low %v747_v32, %v751_v33 }
 0x14e   :  { %9974 = vmatpush1.bf16.msra.mxu0 %v13290_v40  ;;  %10507 = vmatpush1.bf16.msra.mxu1 %v13292_v41  ;;  %v754_v40 = vld [vmem:[%s20007_s1 + $0x1680] sm:$0xff] }
 0x14f   :  { %9975 = vmatprep.subr.bf16.mxu0 %v13299_v25  ;;  %10508 = vmatprep.subr.bf16.mxu1 %v13301_v42  ;;  %v758_v41 = vld [vmem:[%s20007_s1 + $0x16a0] sm:$0xff]  ;;  %v755_v25 = vld [vmem:[%s20007_s1 + $0x1688] sm:$0xff] }
 0x150   :  { %v759_v42 = vld [vmem:[%s20007_s1 + $0x16a8] sm:$0xff]  ;;  %v13355_v46 = vcombine.high %v754_v40, %v758_v41  ;;  %v13354_v52 = vcombine.low %v754_v40, %v758_v41 }
 0x151   :  { %v13357_v47 = vcombine.high %v755_v25, %v759_v42  ;;  %v13356_v54 = vcombine.low %v755_v25, %v759_v42 }
 0x152   :  { %9976 = vmatpush1.bf16.msra.mxu0 %v13298_v48  ;;  %10509 = vmatpush1.bf16.msra.mxu1 %v13300_v49  ;;  %v762_v48 = vld [vmem:[%s20007_s1 + $0x16c0] sm:$0xff] }
 0x153   :  { %9977 = vmatprep.subr.bf16.mxu0 %v13307_v50  ;;  %10510 = vmatprep.subr.bf16.mxu1 %v13309_v51  ;;  %v766_v49 = vld [vmem:[%s20007_s1 + $0x16e0] sm:$0xff]  ;;  %v763_v50 = vld [vmem:[%s20007_s1 + $0x16c8] sm:$0xff] }
 0x154   :  { %v767_v51 = vld [vmem:[%s20007_s1 + $0x16e8] sm:$0xff]  ;;  %v13363_v56 = vcombine.high %v762_v48, %v766_v49  ;;  %v13362_v63 = vcombine.low %v762_v48, %v766_v49  ;;  %v15991_v49 = vld [vmem:[%s20008_s0 + $0x30] sm:$0xff] }
 0x155   :  { %v13365_v58 = vcombine.high %v763_v50, %v767_v51  ;;  %v13364_v0 = vcombine.low %v763_v50, %v767_v51  ;;  %v815_v48 = vld [vmem:[%s20007_s1 + $0x1868] sm:$0xff] }
 0x156   :  { %9978 = vmatpush1.bf16.msra.mxu0 %v13306_v60  ;;  %10511 = vmatpush1.bf16.msra.mxu1 %v13308_v61  ;;  %v770_v60 = vld [vmem:[%s20007_s1 + $0x1700] sm:$0xff] }
 0x157   :  { %9979 = vmatprep.subr.bf16.mxu0 %v13315_v39  ;;  %10512 = vmatprep.subr.bf16.mxu1 %v13317_v62  ;;  %v774_v61 = vld [vmem:[%s20007_s1 + $0x1720] sm:$0xff]  ;;  %v771_v39 = vld [vmem:[%s20007_s1 + $0x1708] sm:$0xff] }
 0x158   :  { %v775_v62 = vld [vmem:[%s20007_s1 + $0x1728] sm:$0xff]  ;;  %v13371_v2 = vcombine.high %v770_v60, %v774_v61  ;;  %v13370_v8 = vcombine.low %v770_v60, %v774_v61 }
 0x159   :  { %v13373_v3 = vcombine.high %v771_v39, %v775_v62  ;;  %v13372_v9 = vcombine.low %v771_v39, %v775_v62  ;;  %v819_v60 = vld [vmem:[%s20007_s1 + $0x1888] sm:$0xff] }
 0x15a   :  { %9980 = vmatpush1.bf16.msra.mxu0 %v13314_v4  ;;  %10513 = vmatpush1.bf16.msra.mxu1 %v13316_v5  ;;  %v778_v4 = vld [vmem:[%s20007_s1 + $0x1740] sm:$0xff]  ;;  %v823_v61 = vld [vmem:[%s20007_s1 + $0x18a8] sm:$0xff] }
 0x15b   :  { %9981 = vmatprep.subr.bf16.mxu0 %v13323_v6  ;;  %10514 = vmatprep.subr.bf16.mxu1 %v13325_v7  ;;  %v782_v5 = vld [vmem:[%s20007_s1 + $0x1760] sm:$0xff]  ;;  %v779_v6 = vld [vmem:[%s20007_s1 + $0x1748] sm:$0xff] }
 0x15c   :  { %v783_v7 = vld [vmem:[%s20007_s1 + $0x1768] sm:$0xff]  ;;  %v13379_v10 = vcombine.high %v778_v4, %v782_v5  ;;  %v13378_v19 = vcombine.low %v778_v4, %v782_v5 }
 0x15d   :  { %v13381_v11 = vcombine.high %v779_v6, %v783_v7  ;;  %v13380_v20 = vcombine.low %v779_v6, %v783_v7  ;;  %v827_v4 = vld [vmem:[%s20007_s1 + $0x18c8] sm:$0xff]  ;;  %v13420_v7 = vcombine.low %v819_v60, %v823_v61 }
 0x15e   :  { %9982 = vmatpush1.bf16.msra.mxu0 %v13322_v13  ;;  %10515 = vmatpush1.bf16.msra.mxu1 %v13324_v14  ;;  %v786_v13 = vld [vmem:[%s20007_s1 + $0x1780] sm:$0xff]  ;;  %v831_v5 = vld [vmem:[%s20007_s1 + $0x18e8] sm:$0xff] }
 0x15f   :  { %9983 = vmatprep.subr.bf16.mxu0 %v13331_v17  ;;  %10516 = vmatprep.subr.bf16.mxu1 %v13333_v53  ;;  %v790_v14 = vld [vmem:[%s20007_s1 + $0x17a0] sm:$0xff]  ;;  %v787_v17 = vld [vmem:[%s20007_s1 + $0x1788] sm:$0xff] }
 0x160   :  { %v791_v53 = vld [vmem:[%s20007_s1 + $0x17a8] sm:$0xff]  ;;  %v13387_v59 = vcombine.high %v786_v13, %v790_v14  ;;  %v13386_v29 = vcombine.low %v786_v13, %v790_v14 }
 0x161   :  { %v13389_v23 = vcombine.high %v787_v17, %v791_v53  ;;  %v13388_v30 = vcombine.low %v787_v17, %v791_v53  ;;  %v835_v13 = vld [vmem:[%s20007_s1 + $0x1908] sm:$0xff]  ;;  %v13428_v53 = vcombine.low %v827_v4, %v831_v5 }
 0x162   :  { %9984 = vmatpush1.bf16.msra.mxu0 %v13330_v24  ;;  %10517 = vmatpush1.bf16.msra.mxu1 %v13332_v26  ;;  %v794_v24 = vld [vmem:[%s20007_s1 + $0x17c0] sm:$0xff]  ;;  %v839_v14 = vld [vmem:[%s20007_s1 + $0x1928] sm:$0xff] }
 0x163   :  { %9985 = vmatprep.subr.bf16.mxu0 %v13339_v15  ;;  %10518 = vmatprep.subr.bf16.mxu1 %v13341_v28  ;;  %v798_v26 = vld [vmem:[%s20007_s1 + $0x17e0] sm:$0xff]  ;;  %v795_v15 = vld [vmem:[%s20007_s1 + $0x17c8] sm:$0xff] }
 0x164   :  { %v799_v28 = vld [vmem:[%s20007_s1 + $0x17e8] sm:$0xff]  ;;  %v13395_v32 = vcombine.high %v794_v24, %v798_v26  ;;  %v13394_v40 = vcombine.low %v794_v24, %v798_v26 }
 0x165   :  { %v13397_v33 = vcombine.high %v795_v15, %v799_v28  ;;  %v13396_v41 = vcombine.low %v795_v15, %v799_v28  ;;  %v843_v24 = vld [vmem:[%s20007_s1 + $0x1948] sm:$0xff]  ;;  %v13436_v28 = vcombine.low %v835_v13, %v839_v14 }
 0x166   :  { %9986 = vmatpush1.bf16.msra.mxu0 %v13338_v34  ;;  %10519 = vmatpush1.bf16.msra.mxu1 %v13340_v35  ;;  %v802_v34 = vld [vmem:[%s20007_s1 + $0x1800] sm:$0xff]  ;;  %v847_v26 = vld [vmem:[%s20007_s1 + $0x1968] sm:$0xff] }
 0x167   :  { %9987 = vmatprep.subr.bf16.mxu0 %v13347_v37  ;;  %10520 = vmatprep.subr.bf16.mxu1 %v13349_v38  ;;  %v806_v35 = vld [vmem:[%s20007_s1 + $0x1820] sm:$0xff]  ;;  %v803_v37 = vld [vmem:[%s20007_s1 + $0x1808] sm:$0xff] }
 0x168   :  { %v807_v38 = vld [vmem:[%s20007_s1 + $0x1828] sm:$0xff]  ;;  %v13403_v25 = vcombine.high %v802_v34, %v806_v35  ;;  %v13402_v50 = vcombine.low %v802_v34, %v806_v35 }
 0x169   :  { %v13405_v42 = vcombine.high %v803_v37, %v807_v38  ;;  %v13404_v51 = vcombine.low %v803_v37, %v807_v38  ;;  %v851_v34 = vld [vmem:[%s20007_s1 + $0x1988] sm:$0xff]  ;;  %v13444_v38 = vcombine.low %v843_v24, %v847_v26 }
 0x16a   :  { %9988 = vmatpush1.bf16.msra.mxu0 %v13346_v43  ;;  %10521 = vmatpush1.bf16.msra.mxu1 %v13348_v44  ;;  %v810_v43 = vld [vmem:[%s20007_s1 + $0x1840] sm:$0xff]  ;;  %v855_v35 = vld [vmem:[%s20007_s1 + $0x19a8] sm:$0xff] }
 0x16b   :  { %9989 = vmatprep.subr.bf16.mxu0 %v13355_v46  ;;  %10522 = vmatprep.subr.bf16.mxu1 %v13357_v47  ;;  %v814_v44 = vld [vmem:[%s20007_s1 + $0x1860] sm:$0xff]  ;;  %v15980_v46 = vcombine.low %v15782_v18, %v15782_v18  ;;  %v811_v47 = vld [vmem:[%s20007_s1 + $0x1848] sm:$0xff] }
 0x16c   :  { %v13411_v18 = vcombine.high %v810_v43, %v814_v44  ;;  %v13410_v39 = vcombine.low %v810_v43, %v814_v44  ;;  %v13412_v62 = vcombine.low %v811_v47, %v815_v48  ;;  %v859_v43 = vld [vmem:[%s20007_s1 + $0x19c8] sm:$0xff] }
 0x16d   :  { %v863_v44 = vld [vmem:[%s20007_s1 + $0x19e8] sm:$0xff] }
 0x16e   :  { %9990 = vmatpush1.bf16.msra.mxu0 %v13354_v52  ;;  %10523 = vmatpush1.bf16.msra.mxu1 %v13356_v54  ;;  %v13413_v52 = vcombine.high %v811_v47, %v815_v48  ;;  %v818_v54 = vld [vmem:[%s20007_s1 + $0x1880] sm:$0xff]  ;;  %v13452_v48 = vcombine.low %v851_v34, %v855_v35 }
 0x16f   :  { %9991 = vmatprep.subr.bf16.mxu0 %v13363_v56  ;;  %10524 = vmatprep.subr.bf16.mxu1 %v13365_v58  ;;  %v822_v56 = vld [vmem:[%s20007_s1 + $0x18a0] sm:$0xff]  ;;  %v16001_v58 = vcombine.high %v15991_v49, %v15991_v49 }
 0x170   :  { %v13418_v6 = vcombine.low %v818_v54, %v822_v56 }
 0x172   :  { %9992 = vmatpush1.bf16.msra.mxu0 %v13362_v63  ;;  %10525 = vmatpush1.bf16.msra.mxu1 %v13364_v0  ;;  %v13419_v63 = vcombine.high %v818_v54, %v822_v56  ;;  %v13421_v0 = vcombine.high %v819_v60, %v823_v61  ;;  %v867_v54 = vld [vmem:[%s20007_s1 + $0x1a08] sm:$0xff]  ;;  %v13460_v61 = vcombine.low %v859_v43, %v863_v44 }
 0x173   :  { %9993 = vmatprep.subr.bf16.mxu0 %v13371_v2  ;;  %10526 = vmatprep.subr.bf16.mxu1 %v13373_v3  ;;  %v826_v2 = vld [vmem:[%s20007_s1 + $0x18c0] sm:$0xff]  ;;  %v871_v56 = vld [vmem:[%s20007_s1 + $0x1a28] sm:$0xff] }
 0x174   :  { %v830_v3 = vld [vmem:[%s20007_s1 + $0x18e0] sm:$0xff] }
 0x175   :  { %v13426_v17 = vcombine.low %v826_v2, %v830_v3 }
 0x176   :  { %9994 = vmatpush1.bf16.msra.mxu0 %v13370_v8  ;;  %10527 = vmatpush1.bf16.msra.mxu1 %v13372_v9  ;;  %v13427_v8 = vcombine.high %v826_v2, %v830_v3  ;;  %v13429_v9 = vcombine.high %v827_v4, %v831_v5  ;;  %v875_v2 = vld [vmem:[%s20007_s1 + $0x1a48] sm:$0xff]  ;;  %v13468_v5 = vcombine.low %v867_v54, %v871_v56 }
 0x177   :  { %9995 = vmatprep.subr.bf16.mxu0 %v13379_v10  ;;  %10528 = vmatprep.subr.bf16.mxu1 %v13381_v11  ;;  %v834_v10 = vld [vmem:[%s20007_s1 + $0x1900] sm:$0xff]  ;;  %v879_v3 = vld [vmem:[%s20007_s1 + $0x1a68] sm:$0xff] }
 0x178   :  { %v838_v11 = vld [vmem:[%s20007_s1 + $0x1920] sm:$0xff] }
 0x179   :  { %v13434_v15 = vcombine.low %v834_v10, %v838_v11 }
 0x17a   :  { %9996 = vmatpush1.bf16.msra.mxu0 %v13378_v19  ;;  %10529 = vmatpush1.bf16.msra.mxu1 %v13380_v20  ;;  %v13435_v19 = vcombine.high %v834_v10, %v838_v11  ;;  %v13437_v20 = vcombine.high %v835_v13, %v839_v14  ;;  %v883_v10 = vld [vmem:[%s20007_s1 + $0x1a88] sm:$0xff]  ;;  %v13476_v14 = vcombine.low %v875_v2, %v879_v3 }
 0x17b   :  { %9997 = vmatprep.subr.bf16.mxu0 %v13387_v59  ;;  %10530 = vmatprep.subr.bf16.mxu1 %v13389_v23  ;;  %v842_v59 = vld [vmem:[%s20007_s1 + $0x1940] sm:$0xff]  ;;  %v887_v11 = vld [vmem:[%s20007_s1 + $0x1aa8] sm:$0xff] }
 0x17c   :  { %v846_v23 = vld [vmem:[%s20007_s1 + $0x1960] sm:$0xff] }
 0x17d   :  { %v13442_v37 = vcombine.low %v842_v59, %v846_v23 }
 0x17e   :  { %9998 = vmatpush1.bf16.msra.mxu0 %v13386_v29  ;;  %10531 = vmatpush1.bf16.msra.mxu1 %v13388_v30  ;;  %v13443_v29 = vcombine.high %v842_v59, %v846_v23  ;;  %v13445_v30 = vcombine.high %v843_v24, %v847_v26  ;;  %v891_v59 = vld [vmem:[%s20007_s1 + $0x1ac8] sm:$0xff]  ;;  %v13484_v26 = vcombine.low %v883_v10, %v887_v11 }
 0x17f   :  { %9999 = vmatprep.subr.bf16.mxu0 %v13395_v32  ;;  %10532 = vmatprep.subr.bf16.mxu1 %v13397_v33  ;;  %v850_v32 = vld [vmem:[%s20007_s1 + $0x1980] sm:$0xff]  ;;  %v895_v23 = vld [vmem:[%s20007_s1 + $0x1ae8] sm:$0xff] }
 0x180   :  { %v854_v33 = vld [vmem:[%s20007_s1 + $0x19a0] sm:$0xff] }
 0x181   :  { %v13450_v47 = vcombine.low %v850_v32, %v854_v33 }
 0x182   :  { %10000 = vmatpush1.bf16.msra.mxu0 %v13394_v40  ;;  %10533 = vmatpush1.bf16.msra.mxu1 %v13396_v41  ;;  %v13451_v40 = vcombine.high %v850_v32, %v854_v33  ;;  %v13453_v41 = vcombine.high %v851_v34, %v855_v35  ;;  %v899_v32 = vld [vmem:[%s20007_s1 + $0x1b08] sm:$0xff]  ;;  %v13492_v35 = vcombine.low %v891_v59, %v895_v23 }
 0x183   :  { %10010 = vmatprep.subr.bf16.mxu0 %v13403_v25  ;;  %10543 = vmatprep.subr.bf16.mxu1 %v13405_v42  ;;  %v858_v25 = vld [vmem:[%s20007_s1 + $0x19c0] sm:$0xff]  ;;  %v903_v33 = vld [vmem:[%s20007_s1 + $0x1b28] sm:$0xff] }
 0x184   :  { %v862_v42 = vld [vmem:[%s20007_s1 + $0x19e0] sm:$0xff] }
 0x185   :  { %10002 = vmatmul.mubr.bf16.vlgmr.msra.gmra.mrb[0].mxu0 %v15980_v46  ;;  %10535 = vmatmul.mubr.bf16.vlgmr.msra.gmra.mrb[0].mxu1 %v15980_v46  ;;  %v13458_v60 = vcombine.low %v858_v25, %v862_v42 }
 0x186   :  { %10011 = vmatpush1.bf16.msra.mxu0 %v13402_v50  ;;  %10544 = vmatpush1.bf16.msra.mxu1 %v13404_v51  ;;  %v13459_v50 = vcombine.high %v858_v25, %v862_v42  ;;  %v13461_v51 = vcombine.high %v859_v43, %v863_v44  ;;  %v907_v25 = vld [vmem:[%s20007_s1 + $0x1b48] sm:$0xff]  ;;  %v13500_v44 = vcombine.low %v899_v32, %v903_v33 }
 0x187   :  { %10012 = vmatprep.subr.bf16.mxu0 %v13411_v18  ;;  %10545 = vmatprep.subr.bf16.mxu1 %v13413_v52  ;;  %v866_v18 = vld [vmem:[%s20007_s1 + $0x1a00] sm:$0xff]  ;;  %v911_v42 = vld [vmem:[%s20007_s1 + $0x1b68] sm:$0xff] }
 0x188   :  { %10042 = vmatprep.mubr.bf16.mxu0 %v16001_v58  ;;  %10575 = vmatprep.mubr.bf16.mxu1 %v16001_v58  ;;  %v870_v52 = vld [vmem:[%s20007_s1 + $0x1a20] sm:$0xff] }
 0x189   :  { %v13466_v4 = vcombine.low %v866_v18, %v870_v52 }
 0x18a   :  { %10013 = vmatpush1.bf16.msra.mxu0 %v13410_v39  ;;  %10546 = vmatpush1.bf16.msra.mxu1 %v13412_v62  ;;  %v13467_v39 = vcombine.high %v866_v18, %v870_v52  ;;  %v13469_v62 = vcombine.high %v867_v54, %v871_v56  ;;  %v915_v18 = vld [vmem:[%s20007_s1 + $0x1b88] sm:$0xff]  ;;  %v13508_v56 = vcombine.low %v907_v25, %v911_v42 }
 0x18b   :  { %10014 = vmatprep.subr.bf16.mxu0 %v13419_v63  ;;  %10547 = vmatprep.subr.bf16.mxu1 %v13421_v0  ;;  %v874_v63 = vld [vmem:[%s20007_s1 + $0x1a40] sm:$0xff]  ;;  %v919_v52 = vld [vmem:[%s20007_s1 + $0x1ba8] sm:$0xff] }
 0x18c   :  { %v878_v0 = vld [vmem:[%s20007_s1 + $0x1a60] sm:$0xff] }
 0x18d   :  { %v13474_v13 = vcombine.low %v874_v63, %v878_v0 }
 0x18e   :  { %10015 = vmatpush1.bf16.msra.mxu0 %v13418_v6  ;;  %10548 = vmatpush1.bf16.msra.mxu1 %v13420_v7  ;;  %v13475_v6 = vcombine.high %v874_v63, %v878_v0  ;;  %v13477_v7 = vcombine.high %v875_v2, %v879_v3  ;;  %v923_v63 = vld [vmem:[%s20007_s1 + $0x1bc8] sm:$0xff]  ;;  %v13516_v3 = vcombine.low %v915_v18, %v919_v52 }
 0x18f   :  { %10016 = vmatprep.subr.bf16.mxu0 %v13427_v8  ;;  %10549 = vmatprep.subr.bf16.mxu1 %v13429_v9  ;;  %v882_v8 = vld [vmem:[%s20007_s1 + $0x1a80] sm:$0xff]  ;;  %v927_v0 = vld [vmem:[%s20007_s1 + $0x1be8] sm:$0xff] }
 0x190   :  { %v886_v9 = vld [vmem:[%s20007_s1 + $0x1aa0] sm:$0xff] }
 0x191   :  { %v13482_v24 = vcombine.low %v882_v8, %v886_v9 }
 0x192   :  { %10017 = vmatpush1.bf16.msra.mxu0 %v13426_v17  ;;  %10550 = vmatpush1.bf16.msra.mxu1 %v13428_v53  ;;  %v13483_v17 = vcombine.high %v882_v8, %v886_v9  ;;  %v13485_v53 = vcombine.high %v883_v10, %v887_v11  ;;  %v931_v8 = vld [vmem:[%s20007_s1 + $0x1c08] sm:$0xff]  ;;  %v13524_v11 = vcombine.low %v923_v63, %v927_v0 }
 0x193   :  { %10018 = vmatprep.subr.bf16.mxu0 %v13435_v19  ;;  %10551 = vmatprep.subr.bf16.mxu1 %v13437_v20  ;;  %v890_v19 = vld [vmem:[%s20007_s1 + $0x1ac0] sm:$0xff]  ;;  %v935_v9 = vld [vmem:[%s20007_s1 + $0x1c28] sm:$0xff] }
 0x194   :  { %v894_v20 = vld [vmem:[%s20007_s1 + $0x1ae0] sm:$0xff] }
 0x195   :  { %v13490_v34 = vcombine.low %v890_v19, %v894_v20 }
 0x196   :  { %10019 = vmatpush1.bf16.msra.mxu0 %v13434_v15  ;;  %10552 = vmatpush1.bf16.msra.mxu1 %v13436_v28  ;;  %v13491_v15 = vcombine.high %v890_v19, %v894_v20  ;;  %v13493_v28 = vcombine.high %v891_v59, %v895_v23  ;;  %v16189_v19 = vcombine.low %v15991_v49, %v15991_v49  ;;  %v939_v20 = vld [vmem:[%s20007_s1 + $0x1c48] sm:$0xff]  ;;  %v16200_v23 = vld [vmem:[%s20008_s0 + $0x38] sm:$0xff] }
 0x197   :  { %10020 = vmatprep.subr.bf16.mxu0 %v13443_v29  ;;  %10553 = vmatprep.subr.bf16.mxu1 %v13445_v30  ;;  %v898_v29 = vld [vmem:[%s20007_s1 + $0x1b00] sm:$0xff]  ;;  %v943_v59 = vld [vmem:[%s20007_s1 + $0x1c68] sm:$0xff] }
 0x198   :  { %v902_v30 = vld [vmem:[%s20007_s1 + $0x1b20] sm:$0xff] }
 0x199   :  { %v13498_v43 = vcombine.low %v898_v29, %v902_v30 }
 0x19a   :  { %10021 = vmatpush1.bf16.msra.mxu0 %v13442_v37  ;;  %10554 = vmatpush1.bf16.msra.mxu1 %v13444_v38  ;;  %v13499_v37 = vcombine.high %v898_v29, %v902_v30  ;;  %v13501_v38 = vcombine.high %v899_v32, %v903_v33  ;;  %v950_v29 = vld [vmem:[%s20007_s1 + $0x1ca0] sm:$0xff]  ;;  %v16210_v30 = vcombine.high %v16200_v23, %v16200_v23  ;;  %v947_v32 = vld [vmem:[%s20007_s1 + $0x1c88] sm:$0xff] }
 0x19b   :  { %10022 = vmatprep.subr.bf16.mxu0 %v13451_v40  ;;  %10555 = vmatprep.subr.bf16.mxu1 %v13453_v41  ;;  %v906_v40 = vld [vmem:[%s20007_s1 + $0x1b40] sm:$0xff]  ;;  %v951_v33 = vld [vmem:[%s20007_s1 + $0x1ca8] sm:$0xff] }
 0x19c   :  { %v910_v41 = vld [vmem:[%s20007_s1 + $0x1b60] sm:$0xff] }
 0x19d   :  { %v13506_v54 = vcombine.low %v906_v40, %v910_v41 }
 0x19e   :  { %10023 = vmatpush1.bf16.msra.mxu0 %v13450_v47  ;;  %10556 = vmatpush1.bf16.msra.mxu1 %v13452_v48  ;;  %v13507_v47 = vcombine.high %v906_v40, %v910_v41  ;;  %v13509_v48 = vcombine.high %v907_v25, %v911_v42  ;;  %v954_v40 = vld [vmem:[%s20007_s1 + $0x1cc0] sm:$0xff]  ;;  %v955_v25 = vld [vmem:[%s20007_s1 + $0x1cc8] sm:$0xff] }
 0x19f   :  { %10024 = vmatprep.subr.bf16.mxu0 %v13459_v50  ;;  %10557 = vmatprep.subr.bf16.mxu1 %v13461_v51  ;;  %v914_v50 = vld [vmem:[%s20007_s1 + $0x1b80] sm:$0xff]  ;;  %v959_v42 = vld [vmem:[%s20007_s1 + $0x1ce8] sm:$0xff] }
 0x1a0   :  { %v918_v51 = vld [vmem:[%s20007_s1 + $0x1ba0] sm:$0xff] }
 0x1a1   :  { %v13514_v2 = vcombine.low %v914_v50, %v918_v51  ;;  %v958_v41 = vld [vmem:[%s20007_s1 + $0x1ce0] sm:$0xff] }
 0x1a2   :  { %10025 = vmatpush1.bf16.msra.mxu0 %v13458_v60  ;;  %10558 = vmatpush1.bf16.msra.mxu1 %v13460_v61  ;;  %v13515_v60 = vcombine.high %v914_v50, %v918_v51  ;;  %v13517_v61 = vcombine.high %v915_v18, %v919_v52  ;;  %v962_v50 = vld [vmem:[%s20007_s1 + $0x1d00] sm:$0xff]  ;;  %v963_v18 = vld [vmem:[%s20007_s1 + $0x1d08] sm:$0xff] }
 0x1a3   :  { %10026 = vmatprep.subr.bf16.mxu0 %v13467_v39  ;;  %10559 = vmatprep.subr.bf16.mxu1 %v13469_v62  ;;  %v922_v39 = vld [vmem:[%s20007_s1 + $0x1bc0] sm:$0xff]  ;;  %v967_v52 = vld [vmem:[%s20007_s1 + $0x1d28] sm:$0xff] }
 0x1a4   :  { %v926_v62 = vld [vmem:[%s20007_s1 + $0x1be0] sm:$0xff] }
 0x1a5   :  { %v13522_v10 = vcombine.low %v922_v39, %v926_v62  ;;  %v966_v51 = vld [vmem:[%s20007_s1 + $0x1d20] sm:$0xff] }
 0x1a6   :  { %10027 = vmatpush1.bf16.msra.mxu0 %v13466_v4  ;;  %10560 = vmatpush1.bf16.msra.mxu1 %v13468_v5  ;;  %v13523_v4 = vcombine.high %v922_v39, %v926_v62  ;;  %v13525_v5 = vcombine.high %v923_v63, %v927_v0  ;;  %v970_v39 = vld [vmem:[%s20007_s1 + $0x1d40] sm:$0xff]  ;;  %v971_v63 = vld [vmem:[%s20007_s1 + $0x1d48] sm:$0xff] }
 0x1a7   :  { %10028 = vmatprep.subr.bf16.mxu0 %v13475_v6  ;;  %10561 = vmatprep.subr.bf16.mxu1 %v13477_v7  ;;  %v930_v6 = vld [vmem:[%s20007_s1 + $0x1c00] sm:$0xff]  ;;  %v975_v0 = vld [vmem:[%s20007_s1 + $0x1d68] sm:$0xff] }
 0x1a8   :  { %v934_v7 = vld [vmem:[%s20007_s1 + $0x1c20] sm:$0xff] }
 0x1a9   :  { %v974_v62 = vld [vmem:[%s20007_s1 + $0x1d60] sm:$0xff] }
 0x1aa   :  { %10029 = vmatpush1.bf16.msra.mxu0 %v13474_v13  ;;  %10562 = vmatpush1.bf16.msra.mxu1 %v13476_v14  ;;  %v13531_v13 = vcombine.high %v930_v6, %v934_v7  ;;  %v13533_v14 = vcombine.high %v931_v8, %v935_v9 }
 0x1ab   :  { %10030 = vmatprep.subr.bf16.mxu0 %v13483_v17  ;;  %10563 = vmatprep.subr.bf16.mxu1 %v13485_v53  ;;  %v938_v17 = vld [vmem:[%s20007_s1 + $0x1c40] sm:$0xff] }
 0x1ac   :  { %v942_v53 = vld [vmem:[%s20007_s1 + $0x1c60] sm:$0xff] }
 0x1ad   :  { %v13539_v49 = vcombine.high %v938_v17, %v942_v53 }
 0x1ae   :  { %10031 = vmatpush1.bf16.msra.mxu0 %v13482_v24  ;;  %10564 = vmatpush1.bf16.msra.mxu1 %v13484_v26  ;;  %v13530_v24 = vcombine.low %v930_v6, %v934_v7  ;;  %v13532_v26 = vcombine.low %v931_v8, %v935_v9  ;;  %v978_v6 = vld [vmem:[%s20007_s1 + $0x1d80] sm:$0xff]  ;;  %v979_v8 = vld [vmem:[%s20007_s1 + $0x1d88] sm:$0xff] }
 0x1af   :  { %10032 = vmatprep.subr.bf16.mxu0 %v13491_v15  ;;  %10565 = vmatprep.subr.bf16.mxu1 %v13493_v28  ;;  %v13541_v15 = vcombine.high %v939_v20, %v943_v59  ;;  %v946_v28 = vld [vmem:[%s20007_s1 + $0x1c80] sm:$0xff]  ;;  %v983_v9 = vld [vmem:[%s20007_s1 + $0x1da8] sm:$0xff] }
 0x1b0   :  { %v982_v7 = vld [vmem:[%s20007_s1 + $0x1da0] sm:$0xff] }
 0x1b2   :  { %10033 = vmatpush1.bf16.msra.mxu0 %v13490_v34  ;;  %10566 = vmatpush1.bf16.msra.mxu1 %v13492_v35  ;;  %v13538_v34 = vcombine.low %v938_v17, %v942_v53  ;;  %v13540_v35 = vcombine.low %v939_v20, %v943_v59  ;;  %v986_v17 = vld [vmem:[%s20007_s1 + $0x1dc0] sm:$0xff]  ;;  %v987_v20 = vld [vmem:[%s20007_s1 + $0x1dc8] sm:$0xff] }
 0x1b3   :  { %10034 = vmatprep.subr.bf16.mxu0 %v13499_v37  ;;  %10567 = vmatprep.subr.bf16.mxu1 %v13501_v38  ;;  %v13547_v37 = vcombine.high %v946_v28, %v950_v29  ;;  %v13549_v38 = vcombine.high %v947_v32, %v951_v33  ;;  %v990_v53 = vld [vmem:[%s20007_s1 + $0x1de0] sm:$0xff]  ;;  %v991_v59 = vld [vmem:[%s20007_s1 + $0x1de8] sm:$0xff] }
 0x1b6   :  { %10035 = vmatpush1.bf16.msra.mxu0 %v13498_v43  ;;  %10568 = vmatpush1.bf16.msra.mxu1 %v13500_v44  ;;  %v13546_v43 = vcombine.low %v946_v28, %v950_v29  ;;  %v13548_v44 = vcombine.low %v947_v32, %v951_v33  ;;  %v994_v28 = vld [vmem:[%s20007_s1 + $0x1e00] sm:$0xff]  ;;  %v995_v32 = vld [vmem:[%s20007_s1 + $0x1e08] sm:$0xff] }
 0x1b7   :  { %10036 = vmatprep.subr.bf16.mxu0 %v13507_v47  ;;  %10569 = vmatprep.subr.bf16.mxu1 %v13509_v48  ;;  %v13555_v47 = vcombine.high %v954_v40, %v958_v41  ;;  %v13557_v48 = vcombine.high %v955_v25, %v959_v42  ;;  %v998_v29 = vld [vmem:[%s20007_s1 + $0x1e20] sm:$0xff]  ;;  %v999_v33 = vld [vmem:[%s20007_s1 + $0x1e28] sm:$0xff] }
 0x1ba   :  { %10037 = vmatpush1.bf16.msra.mxu0 %v13506_v54  ;;  %10570 = vmatpush1.bf16.msra.mxu1 %v13508_v56  ;;  %v13554_v54 = vcombine.low %v954_v40, %v958_v41  ;;  %v13556_v56 = vcombine.low %v955_v25, %v959_v42  ;;  %v1002_v40 = vld [vmem:[%s20007_s1 + $0x1e40] sm:$0xff]  ;;  %v1003_v25 = vld [vmem:[%s20007_s1 + $0x1e48] sm:$0xff] }
 0x1bb   :  { %10038 = vmatprep.subr.bf16.mxu0 %v13515_v60  ;;  %10571 = vmatprep.subr.bf16.mxu1 %v13517_v61  ;;  %v13563_v60 = vcombine.high %v962_v50, %v966_v51  ;;  %v13565_v61 = vcombine.high %v963_v18, %v967_v52  ;;  %v1006_v41 = vld [vmem:[%s20007_s1 + $0x1e60] sm:$0xff]  ;;  %v1007_v42 = vld [vmem:[%s20007_s1 + $0x1e68] sm:$0xff] }
 0x1be   :  { %10039 = vmatpush1.bf16.msra.mxu0 %v13514_v2  ;;  %10572 = vmatpush1.bf16.msra.mxu1 %v13516_v3  ;;  %v13562_v2 = vcombine.low %v962_v50, %v966_v51  ;;  %v13564_v3 = vcombine.low %v963_v18, %v967_v52  ;;  %v1010_v50 = vld [vmem:[%s20007_s1 + $0x1e80] sm:$0xff]  ;;  %v1011_v18 = vld [vmem:[%s20007_s1 + $0x1e88] sm:$0xff] }
 0x1bf   :  { %10040 = vmatprep.subr.bf16.mxu0 %v13523_v4  ;;  %10573 = vmatprep.subr.bf16.mxu1 %v13525_v5  ;;  %v13571_v4 = vcombine.high %v970_v39, %v974_v62  ;;  %v13573_v5 = vcombine.high %v971_v63, %v975_v0  ;;  %v1014_v51 = vld [vmem:[%s20007_s1 + $0x1ea0] sm:$0xff]  ;;  %v1015_v52 = vld [vmem:[%s20007_s1 + $0x1ea8] sm:$0xff] }
 0x1c2   :  { %10041 = vmatpush1.bf16.msra.mxu0 %v13522_v10  ;;  %10574 = vmatpush1.bf16.msra.mxu1 %v13524_v11  ;;  %v13570_v10 = vcombine.low %v970_v39, %v974_v62  ;;  %v13572_v11 = vcombine.low %v971_v63, %v975_v0  ;;  %v1018_v39 = vld [vmem:[%s20007_s1 + $0x1ec0] sm:$0xff]  ;;  %v1019_v63 = vld [vmem:[%s20007_s1 + $0x1ec8] sm:$0xff] }
 0x1c3   :  { %10051 = vmatprep.subr.bf16.mxu0 %v13531_v13  ;;  %10584 = vmatprep.subr.bf16.mxu1 %v13533_v14  ;;  %v13579_v13 = vcombine.high %v978_v6, %v982_v7  ;;  %v13581_v14 = vcombine.high %v979_v8, %v983_v9  ;;  %v1022_v62 = vld [vmem:[%s20007_s1 + $0x1ee0] sm:$0xff]  ;;  %v1023_v0 = vld [vmem:[%s20007_s1 + $0x1ee8] sm:$0xff] }
 0x1c5   :  { %10043 = vmatmul.mubr.bf16.vlgmr.msra.gmra.mrb[0].mxu0 %v16189_v19  ;;  %10576 = vmatmul.mubr.bf16.vlgmr.msra.gmra.mrb[0].mxu1 %v16189_v19 }
 0x1c6   :  { %10052 = vmatpush1.bf16.msra.mxu0 %v13530_v24  ;;  %10585 = vmatpush1.bf16.msra.mxu1 %v13532_v26  ;;  %v13578_v24 = vcombine.low %v978_v6, %v982_v7  ;;  %v13580_v26 = vcombine.low %v979_v8, %v983_v9  ;;  %v1026_v6 = vld [vmem:[%s20007_s1 + $0x1f00] sm:$0xff]  ;;  %v1027_v8 = vld [vmem:[%s20007_s1 + $0x1f08] sm:$0xff] }
 0x1c7   :  { %10053 = vmatprep.subr.bf16.mxu0 %v13539_v49  ;;  %10586 = vmatprep.subr.bf16.mxu1 %v13541_v15  ;;  %v13587_v49 = vcombine.high %v986_v17, %v990_v53  ;;  %v13589_v15 = vcombine.high %v987_v20, %v991_v59  ;;  %v1030_v7 = vld [vmem:[%s20007_s1 + $0x1f20] sm:$0xff]  ;;  %v1031_v9 = vld [vmem:[%s20007_s1 + $0x1f28] sm:$0xff] }
 0x1c8   :  { %10083 = vmatprep.mubr.bf16.mxu0 %v16210_v30  ;;  %10616 = vmatprep.mubr.bf16.mxu1 %v16210_v30 }
 0x1ca   :  { %10054 = vmatpush1.bf16.msra.mxu0 %v13538_v34  ;;  %10587 = vmatpush1.bf16.msra.mxu1 %v13540_v35  ;;  %v13586_v34 = vcombine.low %v986_v17, %v990_v53  ;;  %v13588_v35 = vcombine.low %v987_v20, %v991_v59  ;;  %v1034_v17 = vld [vmem:[%s20007_s1 + $0x1f40] sm:$0xff]  ;;  %v1035_v20 = vld [vmem:[%s20007_s1 + $0x1f48] sm:$0xff] }
 0x1cb   :  { %10055 = vmatprep.subr.bf16.mxu0 %v13547_v37  ;;  %10588 = vmatprep.subr.bf16.mxu1 %v13549_v38  ;;  %v13595_v37 = vcombine.high %v994_v28, %v998_v29  ;;  %v13597_v38 = vcombine.high %v995_v32, %v999_v33  ;;  %v1038_v53 = vld [vmem:[%s20007_s1 + $0x1f60] sm:$0xff]  ;;  %v1039_v59 = vld [vmem:[%s20007_s1 + $0x1f68] sm:$0xff] }
 0x1ce   :  { %10056 = vmatpush1.bf16.msra.mxu0 %v13546_v43  ;;  %10589 = vmatpush1.bf16.msra.mxu1 %v13548_v44  ;;  %v13594_v43 = vcombine.low %v994_v28, %v998_v29  ;;  %v13596_v44 = vcombine.low %v995_v32, %v999_v33  ;;  %v1042_v28 = vld [vmem:[%s20007_s1 + $0x1f80] sm:$0xff]  ;;  %v1043_v32 = vld [vmem:[%s20007_s1 + $0x1f88] sm:$0xff] }
 0x1cf   :  { %10057 = vmatprep.subr.bf16.mxu0 %v13555_v47  ;;  %10590 = vmatprep.subr.bf16.mxu1 %v13557_v48  ;;  %v13603_v47 = vcombine.high %v1002_v40, %v1006_v41  ;;  %v13605_v48 = vcombine.high %v1003_v25, %v1007_v42  ;;  %v1046_v29 = vld [vmem:[%s20007_s1 + $0x1fa0] sm:$0xff]  ;;  %v1047_v33 = vld [vmem:[%s20007_s1 + $0x1fa8] sm:$0xff] }
 0x1d2   :  { %10058 = vmatpush1.bf16.msra.mxu0 %v13554_v54  ;;  %10591 = vmatpush1.bf16.msra.mxu1 %v13556_v56  ;;  %v13602_v54 = vcombine.low %v1002_v40, %v1006_v41  ;;  %v13604_v56 = vcombine.low %v1003_v25, %v1007_v42  ;;  %v1050_v40 = vld [vmem:[%s20007_s1 + $0x1fc0] sm:$0xff]  ;;  %v1051_v25 = vld [vmem:[%s20007_s1 + $0x1fc8] sm:$0xff] }
 0x1d3   :  { %10059 = vmatprep.subr.bf16.mxu0 %v13563_v60  ;;  %10592 = vmatprep.subr.bf16.mxu1 %v13565_v61  ;;  %v13611_v60 = vcombine.high %v1010_v50, %v1014_v51  ;;  %v13613_v61 = vcombine.high %v1011_v18, %v1015_v52  ;;  %v1054_v41 = vld [vmem:[%s20007_s1 + $0x1fe0] sm:$0xff]  ;;  %v1055_v42 = vld [vmem:[%s20007_s1 + $0x1fe8] sm:$0xff] }
 0x1d6   :  { %10060 = vmatpush1.bf16.msra.mxu0 %v13562_v2  ;;  %10593 = vmatpush1.bf16.msra.mxu1 %v13564_v3  ;;  %v13610_v2 = vcombine.low %v1010_v50, %v1014_v51  ;;  %v13612_v3 = vcombine.low %v1011_v18, %v1015_v52  ;;  %v1058_v50 = vld [vmem:[%s20007_s1 + $0x2000] sm:$0xff]  ;;  %v1059_v18 = vld [vmem:[%s20007_s1 + $0x2008] sm:$0xff] }
 0x1d7   :  { %10061 = vmatprep.subr.bf16.mxu0 %v13571_v4  ;;  %10594 = vmatprep.subr.bf16.mxu1 %v13573_v5  ;;  %v13619_v4 = vcombine.high %v1018_v39, %v1022_v62  ;;  %v13621_v5 = vcombine.high %v1019_v63, %v1023_v0  ;;  %v1062_v51 = vld [vmem:[%s20007_s1 + $0x2020] sm:$0xff]  ;;  %v1063_v52 = vld [vmem:[%s20007_s1 + $0x2028] sm:$0xff] }
 0x1da   :  { %10062 = vmatpush1.bf16.msra.mxu0 %v13570_v10  ;;  %10595 = vmatpush1.bf16.msra.mxu1 %v13572_v11  ;;  %v13618_v10 = vcombine.low %v1018_v39, %v1022_v62  ;;  %v13620_v11 = vcombine.low %v1019_v63, %v1023_v0  ;;  %v1066_v39 = vld [vmem:[%s20007_s1 + $0x2040] sm:$0xff]  ;;  %v16398_v63 = vcombine.low %v16200_v23, %v16200_v23  ;;  %v1067_v0 = vld [vmem:[%s20007_s1 + $0x2048] sm:$0xff] }
 0x1db   :  { %10063 = vmatprep.subr.bf16.mxu0 %v13579_v13  ;;  %10596 = vmatprep.subr.bf16.mxu1 %v13581_v14  ;;  %v13627_v13 = vcombine.high %v1026_v6, %v1030_v7  ;;  %v13629_v14 = vcombine.high %v1027_v8, %v1031_v9  ;;  %v1070_v62 = vld [vmem:[%s20007_s1 + $0x2060] sm:$0xff] }
 0x1dc   :  { %v13667_v23 = vcombine.high %v1066_v39, %v1070_v62 }
 0x1de   :  { %10064 = vmatpush1.bf16.msra.mxu0 %v13578_v24  ;;  %10597 = vmatpush1.bf16.msra.mxu1 %v13580_v26  ;;  %v13626_v24 = vcombine.low %v1026_v6, %v1030_v7  ;;  %v13628_v26 = vcombine.low %v1027_v8, %v1031_v9  ;;  %v1074_v7 = vld [vmem:[%s20007_s1 + $0x2080] sm:$0xff] }
 0x1df   :  { %10065 = vmatprep.subr.bf16.mxu0 %v13587_v49  ;;  %10598 = vmatprep.subr.bf16.mxu1 %v13589_v15  ;;  %v13635_v49 = vcombine.high %v1034_v17, %v1038_v53  ;;  %v13637_v15 = vcombine.high %v1035_v20, %v1039_v59  ;;  %v1078_v8 = vld [vmem:[%s20007_s1 + $0x20a0] sm:$0xff] }
 0x1e2   :  { %10066 = vmatpush1.bf16.msra.mxu0 %v13586_v34  ;;  %10599 = vmatpush1.bf16.msra.mxu1 %v13588_v35  ;;  %v13634_v34 = vcombine.low %v1034_v17, %v1038_v53  ;;  %v13636_v35 = vcombine.low %v1035_v20, %v1039_v59  ;;  %v13675_v17 = vcombine.high %v1074_v7, %v1078_v8  ;;  %v1082_v20 = vld [vmem:[%s20007_s1 + $0x20c0] sm:$0xff] }
 0x1e3   :  { %10067 = vmatprep.subr.bf16.mxu0 %v13595_v37  ;;  %10600 = vmatprep.subr.bf16.mxu1 %v13597_v38  ;;  %v13643_v37 = vcombine.high %v1042_v28, %v1046_v29  ;;  %v13645_v38 = vcombine.high %v1043_v32, %v1047_v33  ;;  %v1086_v59 = vld [vmem:[%s20007_s1 + $0x20e0] sm:$0xff] }
 0x1e6   :  { %10068 = vmatpush1.bf16.msra.mxu0 %v13594_v43  ;;  %10601 = vmatpush1.bf16.msra.mxu1 %v13596_v44  ;;  %v13642_v43 = vcombine.low %v1042_v28, %v1046_v29  ;;  %v13644_v44 = vcombine.low %v1043_v32, %v1047_v33  ;;  %v13683_v28 = vcombine.high %v1082_v20, %v1086_v59  ;;  %v1090_v32 = vld [vmem:[%s20007_s1 + $0x2100] sm:$0xff] }
 0x1e7   :  { %10069 = vmatprep.subr.bf16.mxu0 %v13603_v47  ;;  %10602 = vmatprep.subr.bf16.mxu1 %v13605_v48  ;;  %v13651_v47 = vcombine.high %v1050_v40, %v1054_v41  ;;  %v13653_v48 = vcombine.high %v1051_v25, %v1055_v42  ;;  %v1094_v33 = vld [vmem:[%s20007_s1 + $0x2120] sm:$0xff] }
 0x1ea   :  { %10070 = vmatpush1.bf16.msra.mxu0 %v13602_v54  ;;  %10603 = vmatpush1.bf16.msra.mxu1 %v13604_v56  ;;  %v13650_v54 = vcombine.low %v1050_v40, %v1054_v41  ;;  %v13652_v56 = vcombine.low %v1051_v25, %v1055_v42  ;;  %v13691_v40 = vcombine.high %v1090_v32, %v1094_v33  ;;  %v1098_v25 = vld [vmem:[%s20007_s1 + $0x2140] sm:$0xff] }
 0x1eb   :  { %10071 = vmatprep.subr.bf16.mxu0 %v13611_v60  ;;  %10604 = vmatprep.subr.bf16.mxu1 %v13613_v61  ;;  %v13659_v60 = vcombine.high %v1058_v50, %v1062_v51  ;;  %v13661_v61 = vcombine.high %v1059_v18, %v1063_v52  ;;  %v1102_v42 = vld [vmem:[%s20007_s1 + $0x2160] sm:$0xff] }
 0x1ee   :  { %10072 = vmatpush1.bf16.msra.mxu0 %v13610_v2  ;;  %10605 = vmatpush1.bf16.msra.mxu1 %v13612_v3  ;;  %v1071_v2 = vld [vmem:[%s20007_s1 + $0x2068] sm:$0xff]  ;;  %v16409_v3 = vld [vmem:[%s20008_s0 + $0x40] sm:$0xff] }
 0x1ef   :  { %10073 = vmatprep.subr.bf16.mxu0 %v13619_v4  ;;  %10606 = vmatprep.subr.bf16.mxu1 %v13621_v5  ;;  %v13658_v4 = vcombine.low %v1058_v50, %v1062_v51  ;;  %v13660_v5 = vcombine.low %v1059_v18, %v1063_v52  ;;  %v13669_v6 = vcombine.high %v1067_v0, %v1071_v2  ;;  %v1106_v18 = vld [vmem:[%s20007_s1 + $0x2180] sm:$0xff] }
 0x1f0   :  { %v16419_v9 = vcombine.high %v16409_v3, %v16409_v3  ;;  %v13699_v50 = vcombine.high %v1098_v25, %v1102_v42  ;;  %v1110_v52 = vld [vmem:[%s20007_s1 + $0x21a0] sm:$0xff] }
 0x1f2   :  { %10074 = vmatpush1.bf16.msra.mxu0 %v13618_v10  ;;  %10607 = vmatpush1.bf16.msra.mxu1 %v13620_v11  ;;  %v1075_v10 = vld [vmem:[%s20007_s1 + $0x2088] sm:$0xff] }
 0x1f3   :  { %10075 = vmatprep.subr.bf16.mxu0 %v13627_v13  ;;  %10608 = vmatprep.subr.bf16.mxu1 %v13629_v14  ;;  %v1079_v11 = vld [vmem:[%s20007_s1 + $0x20a8] sm:$0xff]  ;;  %v13666_v13 = vcombine.low %v1066_v39, %v1070_v62  ;;  %v13668_v14 = vcombine.low %v1067_v0, %v1071_v2  ;;  %v13707_v39 = vcombine.high %v1106_v18, %v1110_v52  ;;  %v1114_v0 = vld [vmem:[%s20007_s1 + $0x21c0] sm:$0xff] }
 0x1f4   :  { %v13677_v53 = vcombine.high %v1075_v10, %v1079_v11  ;;  %v1118_v2 = vld [vmem:[%s20007_s1 + $0x21e0] sm:$0xff] }
 0x1f6   :  { %10076 = vmatpush1.bf16.msra.mxu0 %v13626_v24  ;;  %10609 = vmatpush1.bf16.msra.mxu1 %v13628_v26  ;;  %v1083_v24 = vld [vmem:[%s20007_s1 + $0x20c8] sm:$0xff] }
 0x1f7   :  { %10077 = vmatprep.subr.bf16.mxu0 %v13635_v49  ;;  %10610 = vmatprep.subr.bf16.mxu1 %v13637_v15  ;;  %v1087_v26 = vld [vmem:[%s20007_s1 + $0x20e8] sm:$0xff]  ;;  %v13674_v49 = vcombine.low %v1074_v7, %v1078_v8  ;;  %v13676_v15 = vcombine.low %v1075_v10, %v1079_v11  ;;  %v13715_v7 = vcombine.high %v1114_v0, %v1118_v2  ;;  %v1122_v10 = vld [vmem:[%s20007_s1 + $0x2200] sm:$0xff] }
 0x1f8   :  { %v13685_v29 = vcombine.high %v1083_v24, %v1087_v26  ;;  %v1126_v11 = vld [vmem:[%s20007_s1 + $0x2220] sm:$0xff] }
 0x1fa   :  { %10078 = vmatpush1.bf16.msra.mxu0 %v13634_v34  ;;  %10611 = vmatpush1.bf16.msra.mxu1 %v13636_v35  ;;  %v1091_v34 = vld [vmem:[%s20007_s1 + $0x2108] sm:$0xff] }
 0x1fb   :  { %10079 = vmatprep.subr.bf16.mxu0 %v13643_v37  ;;  %10612 = vmatprep.subr.bf16.mxu1 %v13645_v38  ;;  %v1095_v35 = vld [vmem:[%s20007_s1 + $0x2128] sm:$0xff]  ;;  %v13682_v37 = vcombine.low %v1082_v20, %v1086_v59  ;;  %v13684_v38 = vcombine.low %v1083_v24, %v1087_v26  ;;  %v13723_v20 = vcombine.high %v1122_v10, %v1126_v11  ;;  %v1130_v24 = vld [vmem:[%s20007_s1 + $0x2240] sm:$0xff] }
 0x1fc   :  { %v13693_v41 = vcombine.high %v1091_v34, %v1095_v35  ;;  %v1134_v26 = vld [vmem:[%s20007_s1 + $0x2260] sm:$0xff] }
 0x1fe   :  { %10080 = vmatpush1.bf16.msra.mxu0 %v13642_v43  ;;  %10613 = vmatpush1.bf16.msra.mxu1 %v13644_v44  ;;  %v1099_v43 = vld [vmem:[%s20007_s1 + $0x2148] sm:$0xff] }
 0x1ff   :  { %10081 = vmatprep.subr.bf16.mxu0 %v13651_v47  ;;  %10614 = vmatprep.subr.bf16.mxu1 %v13653_v48  ;;  %v1103_v44 = vld [vmem:[%s20007_s1 + $0x2168] sm:$0xff]  ;;  %v13690_v47 = vcombine.low %v1090_v32, %v1094_v33  ;;  %v13692_v48 = vcombine.low %v1091_v34, %v1095_v35  ;;  %v13731_v32 = vcombine.high %v1130_v24, %v1134_v26  ;;  %v1138_v34 = vld [vmem:[%s20007_s1 + $0x2280] sm:$0xff] }
 0x200   :  { %v13701_v51 = vcombine.high %v1099_v43, %v1103_v44  ;;  %v1142_v35 = vld [vmem:[%s20007_s1 + $0x22a0] sm:$0xff] }
 0x202   :  { %10082 = vmatpush1.bf16.msra.mxu0 %v13650_v54  ;;  %10615 = vmatpush1.bf16.msra.mxu1 %v13652_v56  ;;  %v1107_v54 = vld [vmem:[%s20007_s1 + $0x2188] sm:$0xff] }
 0x203   :  { %10092 = vmatprep.subr.bf16.mxu0 %v13659_v60  ;;  %10625 = vmatprep.subr.bf16.mxu1 %v13661_v61  ;;  %v1111_v56 = vld [vmem:[%s20007_s1 + $0x21a8] sm:$0xff]  ;;  %v13698_v60 = vcombine.low %v1098_v25, %v1102_v42  ;;  %v13700_v61 = vcombine.low %v1099_v43, %v1103_v44  ;;  %v13739_v25 = vcombine.high %v1138_v34, %v1142_v35  ;;  %v1146_v43 = vld [vmem:[%s20007_s1 + $0x22c0] sm:$0xff] }
 0x204   :  { %v13709_v62 = vcombine.high %v1107_v54, %v1111_v56  ;;  %v1150_v44 = vld [vmem:[%s20007_s1 + $0x22e0] sm:$0xff] }
 0x205   :  { %10084 = vmatmul.mubr.bf16.vlgmr.msra.gmra.mrb[0].mxu0 %v16398_v63  ;;  %10617 = vmatmul.mubr.bf16.vlgmr.msra.gmra.mrb[0].mxu1 %v16398_v63 }
 0x206   :  { %10093 = vmatpush1.bf16.msra.mxu0 %v13658_v4  ;;  %10626 = vmatpush1.bf16.msra.mxu1 %v13660_v5  ;;  %v1115_v4 = vld [vmem:[%s20007_s1 + $0x21c8] sm:$0xff] }
 0x207   :  { %10094 = vmatprep.subr.bf16.mxu0 %v13667_v23  ;;  %10627 = vmatprep.subr.bf16.mxu1 %v13669_v6  ;;  %v1119_v5 = vld [vmem:[%s20007_s1 + $0x21e8] sm:$0xff]  ;;  %v13706_v23 = vcombine.low %v1106_v18, %v1110_v52  ;;  %v13708_v6 = vcombine.low %v1107_v54, %v1111_v56  ;;  %v13747_v18 = vcombine.high %v1146_v43, %v1150_v44  ;;  %v1154_v54 = vld [vmem:[%s20007_s1 + $0x2300] sm:$0xff] }
 0x208   :  { %10124 = vmatprep.mubr.bf16.mxu0 %v16419_v9  ;;  %10657 = vmatprep.mubr.bf16.mxu1 %v16419_v9  ;;  %v13717_v8 = vcombine.high %v1115_v4, %v1119_v5  ;;  %v1158_v56 = vld [vmem:[%s20007_s1 + $0x2320] sm:$0xff] }
 0x20a   :  { %10095 = vmatpush1.bf16.msra.mxu0 %v13666_v13  ;;  %10628 = vmatpush1.bf16.msra.mxu1 %v13668_v14  ;;  %v1123_v13 = vld [vmem:[%s20007_s1 + $0x2208] sm:$0xff] }
 0x20b   :  { %10096 = vmatprep.subr.bf16.mxu0 %v13675_v17  ;;  %10629 = vmatprep.subr.bf16.mxu1 %v13677_v53  ;;  %v1127_v14 = vld [vmem:[%s20007_s1 + $0x2228] sm:$0xff]  ;;  %v13714_v17 = vcombine.low %v1114_v0, %v1118_v2  ;;  %v13716_v53 = vcombine.low %v1115_v4, %v1119_v5  ;;  %v13755_v0 = vcombine.high %v1154_v54, %v1158_v56  ;;  %v1162_v4 = vld [vmem:[%s20007_s1 + $0x2340] sm:$0xff] }
 0x20c   :  { %v13725_v59 = vcombine.high %v1123_v13, %v1127_v14  ;;  %v1166_v5 = vld [vmem:[%s20007_s1 + $0x2360] sm:$0xff] }
 0x20e   :  { %10097 = vmatpush1.bf16.msra.mxu0 %v13674_v49  ;;  %10630 = vmatpush1.bf16.msra.mxu1 %v13676_v15  ;;  %v1131_v49 = vld [vmem:[%s20007_s1 + $0x2248] sm:$0xff] }
 0x20f   :  { %10098 = vmatprep.subr.bf16.mxu0 %v13683_v28  ;;  %10631 = vmatprep.subr.bf16.mxu1 %v13685_v29  ;;  %v1135_v15 = vld [vmem:[%s20007_s1 + $0x2268] sm:$0xff]  ;;  %v13722_v28 = vcombine.low %v1122_v10, %v1126_v11  ;;  %v13724_v29 = vcombine.low %v1123_v13, %v1127_v14  ;;  %v13763_v10 = vcombine.high %v1162_v4, %v1166_v5  ;;  %v1170_v13 = vld [vmem:[%s20007_s1 + $0x2380] sm:$0xff] }
 0x210   :  { %v13733_v33 = vcombine.high %v1131_v49, %v1135_v15  ;;  %v1174_v14 = vld [vmem:[%s20007_s1 + $0x23a0] sm:$0xff] }
 0x212   :  { %10099 = vmatpush1.bf16.msra.mxu0 %v13682_v37  ;;  %10632 = vmatpush1.bf16.msra.mxu1 %v13684_v38  ;;  %v1139_v37 = vld [vmem:[%s20007_s1 + $0x2288] sm:$0xff] }
 0x213   :  { %10100 = vmatprep.subr.bf16.mxu0 %v13691_v40  ;;  %10633 = vmatprep.subr.bf16.mxu1 %v13693_v41  ;;  %v1143_v38 = vld [vmem:[%s20007_s1 + $0x22a8] sm:$0xff]  ;;  %v13730_v40 = vcombine.low %v1130_v24, %v1134_v26  ;;  %v13732_v41 = vcombine.low %v1131_v49, %v1135_v15  ;;  %v13771_v24 = vcombine.high %v1170_v13, %v1174_v14  ;;  %v1178_v49 = vld [vmem:[%s20007_s1 + $0x23c0] sm:$0xff] }
 0x214   :  { %v13741_v42 = vcombine.high %v1139_v37, %v1143_v38  ;;  %v1182_v15 = vld [vmem:[%s20007_s1 + $0x23e0] sm:$0xff] }
 0x216   :  { %10101 = vmatpush1.bf16.msra.mxu0 %v13690_v47  ;;  %10634 = vmatpush1.bf16.msra.mxu1 %v13692_v48  ;;  %v1147_v47 = vld [vmem:[%s20007_s1 + $0x22c8] sm:$0xff] }
 0x217   :  { %10102 = vmatprep.subr.bf16.mxu0 %v13699_v50  ;;  %10635 = vmatprep.subr.bf16.mxu1 %v13701_v51  ;;  %v1151_v48 = vld [vmem:[%s20007_s1 + $0x22e8] sm:$0xff]  ;;  %v13738_v50 = vcombine.low %v1138_v34, %v1142_v35  ;;  %v13740_v51 = vcombine.low %v1139_v37, %v1143_v38  ;;  %v13779_v34 = vcombine.high %v1178_v49, %v1182_v15  ;;  %v1186_v37 = vld [vmem:[%s20007_s1 + $0x2400] sm:$0xff] }
 0x218   :  { %v13749_v52 = vcombine.high %v1147_v47, %v1151_v48  ;;  %v1190_v38 = vld [vmem:[%s20007_s1 + $0x2420] sm:$0xff] }
 0x21a   :  { %10103 = vmatpush1.bf16.msra.mxu0 %v13698_v60  ;;  %10636 = vmatpush1.bf16.msra.mxu1 %v13700_v61  ;;  %v1155_v60 = vld [vmem:[%s20007_s1 + $0x2308] sm:$0xff] }
 0x21b   :  { %10104 = vmatprep.subr.bf16.mxu0 %v13707_v39  ;;  %10637 = vmatprep.subr.bf16.mxu1 %v13709_v62  ;;  %v1159_v61 = vld [vmem:[%s20007_s1 + $0x2328] sm:$0xff]  ;;  %v13746_v39 = vcombine.low %v1146_v43, %v1150_v44  ;;  %v13748_v62 = vcombine.low %v1147_v47, %v1151_v48  ;;  %v13787_v43 = vcombine.high %v1186_v37, %v1190_v38  ;;  %v1194_v47 = vld [vmem:[%s20007_s1 + $0x2440] sm:$0xff] }
 0x21c   :  { %v13757_v2 = vcombine.high %v1155_v60, %v1159_v61  ;;  %v1198_v48 = vld [vmem:[%s20007_s1 + $0x2460] sm:$0xff] }
 0x21e   :  { %10105 = vmatpush1.bf16.msra.mxu0 %v13706_v23  ;;  %10638 = vmatpush1.bf16.msra.mxu1 %v13708_v6  ;;  %v1163_v23 = vld [vmem:[%s20007_s1 + $0x2348] sm:$0xff] }
 0x21f   :  { %10106 = vmatprep.subr.bf16.mxu0 %v13715_v7  ;;  %10639 = vmatprep.subr.bf16.mxu1 %v13717_v8  ;;  %v1167_v6 = vld [vmem:[%s20007_s1 + $0x2368] sm:$0xff]  ;;  %v13754_v7 = vcombine.low %v1154_v54, %v1158_v56  ;;  %v13756_v8 = vcombine.low %v1155_v60, %v1159_v61  ;;  %v13786_v54 = vcombine.low %v1186_v37, %v1190_v38  ;;  %v1202_v61 = vld [vmem:[%s20007_s1 + $0x2480] sm:$0xff] }
 0x220   :  { %v13765_v11 = vcombine.high %v1163_v23, %v1167_v6 }
 0x222   :  { %10107 = vmatpush1.bf16.msra.mxu0 %v13714_v17  ;;  %10640 = vmatpush1.bf16.msra.mxu1 %v13716_v53  ;;  %v1171_v17 = vld [vmem:[%s20007_s1 + $0x2388] sm:$0xff] }
 0x223   :  { %10108 = vmatprep.subr.bf16.mxu0 %v13723_v20  ;;  %10641 = vmatprep.subr.bf16.mxu1 %v13725_v59  ;;  %v1175_v53 = vld [vmem:[%s20007_s1 + $0x23a8] sm:$0xff]  ;;  %v13762_v20 = vcombine.low %v1162_v4, %v1166_v5  ;;  %v13764_v59 = vcombine.low %v1163_v23, %v1167_v6  ;;  %v13794_v4 = vcombine.low %v1194_v47, %v1198_v48 }
 0x224   :  { %v13773_v26 = vcombine.high %v1171_v17, %v1175_v53 }
 0x226   :  { %10109 = vmatpush1.bf16.msra.mxu0 %v13722_v28  ;;  %10642 = vmatpush1.bf16.msra.mxu1 %v13724_v29  ;;  %v1179_v28 = vld [vmem:[%s20007_s1 + $0x23c8] sm:$0xff] }
 0x227   :  { %10110 = vmatprep.subr.bf16.mxu0 %v13731_v32  ;;  %10643 = vmatprep.subr.bf16.mxu1 %v13733_v33  ;;  %v1183_v29 = vld [vmem:[%s20007_s1 + $0x23e8] sm:$0xff]  ;;  %v13770_v32 = vcombine.low %v1170_v13, %v1174_v14  ;;  %v13772_v33 = vcombine.low %v1171_v17, %v1175_v53 }
 0x228   :  { %v13781_v35 = vcombine.high %v1179_v28, %v1183_v29 }
 0x22a   :  { %10111 = vmatpush1.bf16.msra.mxu0 %v13730_v40  ;;  %10644 = vmatpush1.bf16.msra.mxu1 %v13732_v41  ;;  %v1187_v40 = vld [vmem:[%s20007_s1 + $0x2408] sm:$0xff] }
 0x22b   :  { %10112 = vmatprep.subr.bf16.mxu0 %v13739_v25  ;;  %10645 = vmatprep.subr.bf16.mxu1 %v13741_v42  ;;  %v1191_v41 = vld [vmem:[%s20007_s1 + $0x2428] sm:$0xff]  ;;  %v13778_v25 = vcombine.low %v1178_v49, %v1182_v15  ;;  %v13780_v42 = vcombine.low %v1179_v28, %v1183_v29 }
 0x22c   :  { %v13789_v44 = vcombine.high %v1187_v40, %v1191_v41  ;;  %v13788_v56 = vcombine.low %v1187_v40, %v1191_v41 }
 0x22e   :  { %10113 = vmatpush1.bf16.msra.mxu0 %v13738_v50  ;;  %10646 = vmatpush1.bf16.msra.mxu1 %v13740_v51  ;;  %v16607_v50 = vcombine.low %v16409_v3, %v16409_v3  ;;  %v1195_v51 = vld [vmem:[%s20007_s1 + $0x2448] sm:$0xff]  ;;  %v13795_v3 = vcombine.high %v1194_v47, %v1198_v48 }
 0x22f   :  { %10114 = vmatprep.subr.bf16.mxu0 %v13747_v18  ;;  %10647 = vmatprep.subr.bf16.mxu1 %v13749_v52  ;;  %v1199_v18 = vld [vmem:[%s20007_s1 + $0x2468] sm:$0xff] }
 0x230   :  { %v16618_v52 = vld [vmem:[%s20008_s0 + $0x48] sm:$0xff]  ;;  %v13797_v60 = vcombine.high %v1195_v51, %v1199_v18  ;;  %v13796_v5 = vcombine.low %v1195_v51, %v1199_v18 }
 0x232   :  { %10115 = vmatpush1.bf16.msra.mxu0 %v13746_v39  ;;  %10648 = vmatpush1.bf16.msra.mxu1 %v13748_v62  ;;  %v1206_v39 = vld [vmem:[%s20007_s1 + $0x24a0] sm:$0xff]  ;;  %v16628_v62 = vcombine.high %v16618_v52, %v16618_v52 }
 0x233   :  { %10116 = vmatprep.subr.bf16.mxu0 %v13755_v0  ;;  %10649 = vmatprep.subr.bf16.mxu1 %v13757_v2  ;;  %v1203_v0 = vld [vmem:[%s20007_s1 + $0x2488] sm:$0xff]  ;;  %v13803_v23 = vcombine.high %v1202_v61, %v1206_v39  ;;  %v13802_v13 = vcombine.low %v1202_v61, %v1206_v39 }
 0x234   :  { %v1207_v2 = vld [vmem:[%s20007_s1 + $0x24a8] sm:$0xff] }
 0x235   :  { %v13805_v6 = vcombine.high %v1203_v0, %v1207_v2  ;;  %v13804_v14 = vcombine.low %v1203_v0, %v1207_v2 }
 0x236   :  { %10117 = vmatpush1.bf16.msra.mxu0 %v13754_v7  ;;  %10650 = vmatpush1.bf16.msra.mxu1 %v13756_v8  ;;  %v1210_v7 = vld [vmem:[%s20007_s1 + $0x24c0] sm:$0xff] }
 0x237   :  { %10118 = vmatprep.subr.bf16.mxu0 %v13763_v10  ;;  %10651 = vmatprep.subr.bf16.mxu1 %v13765_v11  ;;  %v1214_v8 = vld [vmem:[%s20007_s1 + $0x24e0] sm:$0xff]  ;;  %v1211_v10 = vld [vmem:[%s20007_s1 + $0x24c8] sm:$0xff] }
 0x238   :  { %v1215_v11 = vld [vmem:[%s20007_s1 + $0x24e8] sm:$0xff]  ;;  %v13811_v17 = vcombine.high %v1210_v7, %v1214_v8  ;;  %v13810_v49 = vcombine.low %v1210_v7, %v1214_v8 }
 0x239   :  { %v13813_v53 = vcombine.high %v1211_v10, %v1215_v11  ;;  %v13812_v15 = vcombine.low %v1211_v10, %v1215_v11 }
 0x23a   :  { %10119 = vmatpush1.bf16.msra.mxu0 %v13762_v20  ;;  %10652 = vmatpush1.bf16.msra.mxu1 %v13764_v59  ;;  %v1218_v20 = vld [vmem:[%s20007_s1 + $0x2500] sm:$0xff] }
 0x23b   :  { %10120 = vmatprep.subr.bf16.mxu0 %v13771_v24  ;;  %10653 = vmatprep.subr.bf16.mxu1 %v13773_v26  ;;  %v1222_v59 = vld [vmem:[%s20007_s1 + $0x2520] sm:$0xff]  ;;  %v1219_v24 = vld [vmem:[%s20007_s1 + $0x2508] sm:$0xff] }
 0x23c   :  { %v1223_v26 = vld [vmem:[%s20007_s1 + $0x2528] sm:$0xff]  ;;  %v13819_v28 = vcombine.high %v1218_v20, %v1222_v59  ;;  %v13818_v37 = vcombine.low %v1218_v20, %v1222_v59 }
 0x23d   :  { %v13821_v29 = vcombine.high %v1219_v24, %v1223_v26  ;;  %v13820_v38 = vcombine.low %v1219_v24, %v1223_v26 }
 0x23e   :  { %10121 = vmatpush1.bf16.msra.mxu0 %v13770_v32  ;;  %10654 = vmatpush1.bf16.msra.mxu1 %v13772_v33  ;;  %v1226_v32 = vld [vmem:[%s20007_s1 + $0x2540] sm:$0xff] }
 0x23f   :  { %10122 = vmatprep.subr.bf16.mxu0 %v13779_v34  ;;  %10655 = vmatprep.subr.bf16.mxu1 %v13781_v35  ;;  %v1230_v33 = vld [vmem:[%s20007_s1 + $0x2560] sm:$0xff]  ;;  %v1227_v34 = vld [vmem:[%s20007_s1 + $0x2548] sm:$0xff] }
 0x240   :  { %v1231_v35 = vld [vmem:[%s20007_s1 + $0x2568] sm:$0xff]  ;;  %v13827_v40 = vcombine.high %v1226_v32, %v1230_v33  ;;  %v13826_v47 = vcombine.low %v1226_v32, %v1230_v33 }
 0x241   :  { %v13829_v41 = vcombine.high %v1227_v34, %v1231_v35  ;;  %v13828_v48 = vcombine.low %v1227_v34, %v1231_v35 }
 0x242   :  { %10123 = vmatpush1.bf16.msra.mxu0 %v13778_v25  ;;  %10656 = vmatpush1.bf16.msra.mxu1 %v13780_v42  ;;  %v1234_v25 = vld [vmem:[%s20007_s1 + $0x2580] sm:$0xff] }
 0x243   :  { %10133 = vmatprep.subr.bf16.mxu0 %v13787_v43  ;;  %10666 = vmatprep.subr.bf16.mxu1 %v13789_v44  ;;  %v1238_v42 = vld [vmem:[%s20007_s1 + $0x25a0] sm:$0xff]  ;;  %v1235_v43 = vld [vmem:[%s20007_s1 + $0x2588] sm:$0xff] }
 0x244   :  { %v1239_v44 = vld [vmem:[%s20007_s1 + $0x25a8] sm:$0xff]  ;;  %v13835_v51 = vcombine.high %v1234_v25, %v1238_v42  ;;  %v13834_v61 = vcombine.low %v1234_v25, %v1238_v42 }
 0x245   :  { %10125 = vmatmul.mubr.bf16.vlgmr.msra.gmra.mrb[0].mxu0 %v16607_v50  ;;  %10658 = vmatmul.mubr.bf16.vlgmr.msra.gmra.mrb[0].mxu1 %v16607_v50  ;;  %v13837_v18 = vcombine.high %v1235_v43, %v1239_v44  ;;  %v13836_v39 = vcombine.low %v1235_v43, %v1239_v44 }
 0x246   :  { %10134 = vmatpush1.bf16.msra.mxu0 %v13786_v54  ;;  %10667 = vmatpush1.bf16.msra.mxu1 %v13788_v56  ;;  %v1242_v54 = vld [vmem:[%s20007_s1 + $0x25c0] sm:$0xff] }
 0x247   :  { %10135 = vmatprep.subr.bf16.mxu0 %v13795_v3  ;;  %10668 = vmatprep.subr.bf16.mxu1 %v13797_v60  ;;  %v1246_v56 = vld [vmem:[%s20007_s1 + $0x25e0] sm:$0xff]  ;;  %v1243_v3 = vld [vmem:[%s20007_s1 + $0x25c8] sm:$0xff] }
 0x248   :  { %10165 = vmatprep.mubr.bf16.mxu0 %v16628_v62  ;;  %10698 = vmatprep.mubr.bf16.mxu1 %v16628_v62  ;;  %v1247_v60 = vld [vmem:[%s20007_s1 + $0x25e8] sm:$0xff]  ;;  %v13843_v0 = vcombine.high %v1242_v54, %v1246_v56  ;;  %v13842_v7 = vcombine.low %v1242_v54, %v1246_v56 }
 0x249   :  { %v13845_v2 = vcombine.high %v1243_v3, %v1247_v60  ;;  %v13844_v8 = vcombine.low %v1243_v3, %v1247_v60 }
 0x24a   :  { %10136 = vmatpush1.bf16.msra.mxu0 %v13794_v4  ;;  %10669 = vmatpush1.bf16.msra.mxu1 %v13796_v5  ;;  %v1250_v4 = vld [vmem:[%s20007_s1 + $0x2600] sm:$0xff] }
 0x24b   :  { %10137 = vmatprep.subr.bf16.mxu0 %v13803_v23  ;;  %10670 = vmatprep.subr.bf16.mxu1 %v13805_v6  ;;  %v1254_v5 = vld [vmem:[%s20007_s1 + $0x2620] sm:$0xff]  ;;  %v1251_v23 = vld [vmem:[%s20007_s1 + $0x2608] sm:$0xff] }
 0x24c   :  { %v1255_v6 = vld [vmem:[%s20007_s1 + $0x2628] sm:$0xff]  ;;  %v13851_v10 = vcombine.high %v1250_v4, %v1254_v5  ;;  %v13850_v20 = vcombine.low %v1250_v4, %v1254_v5 }
 0x24d   :  { %v13853_v11 = vcombine.high %v1251_v23, %v1255_v6  ;;  %v13852_v59 = vcombine.low %v1251_v23, %v1255_v6 }
 0x24e   :  { %10138 = vmatpush1.bf16.msra.mxu0 %v13802_v13  ;;  %10671 = vmatpush1.bf16.msra.mxu1 %v13804_v14  ;;  %v1258_v13 = vld [vmem:[%s20007_s1 + $0x2640] sm:$0xff] }
 0x24f   :  { %10139 = vmatprep.subr.bf16.mxu0 %v13811_v17  ;;  %10672 = vmatprep.subr.bf16.mxu1 %v13813_v53  ;;  %v1262_v14 = vld [vmem:[%s20007_s1 + $0x2660] sm:$0xff]  ;;  %v1259_v17 = vld [vmem:[%s20007_s1 + $0x2648] sm:$0xff] }
 0x250   :  { %v1263_v53 = vld [vmem:[%s20007_s1 + $0x2668] sm:$0xff]  ;;  %v13859_v24 = vcombine.high %v1258_v13, %v1262_v14  ;;  %v13858_v32 = vcombine.low %v1258_v13, %v1262_v14 }
 0x251   :  { %v13861_v26 = vcombine.high %v1259_v17, %v1263_v53  ;;  %v13860_v33 = vcombine.low %v1259_v17, %v1263_v53 }
 0x252   :  { %10140 = vmatpush1.bf16.msra.mxu0 %v13810_v49  ;;  %10673 = vmatpush1.bf16.msra.mxu1 %v13812_v15  ;;  %v1266_v49 = vld [vmem:[%s20007_s1 + $0x2680] sm:$0xff] }
 0x253   :  { %10141 = vmatprep.subr.bf16.mxu0 %v13819_v28  ;;  %10674 = vmatprep.subr.bf16.mxu1 %v13821_v29  ;;  %v1270_v15 = vld [vmem:[%s20007_s1 + $0x26a0] sm:$0xff]  ;;  %v1267_v28 = vld [vmem:[%s20007_s1 + $0x2688] sm:$0xff] }
 0x254   :  { %v1271_v29 = vld [vmem:[%s20007_s1 + $0x26a8] sm:$0xff]  ;;  %v13867_v34 = vcombine.high %v1266_v49, %v1270_v15  ;;  %v13866_v25 = vcombine.low %v1266_v49, %v1270_v15 }
 0x255   :  { %v13869_v35 = vcombine.high %v1267_v28, %v1271_v29  ;;  %v13868_v42 = vcombine.low %v1267_v28, %v1271_v29 }
 0x256   :  { %10142 = vmatpush1.bf16.msra.mxu0 %v13818_v37  ;;  %10675 = vmatpush1.bf16.msra.mxu1 %v13820_v38  ;;  %v1274_v37 = vld [vmem:[%s20007_s1 + $0x26c0] sm:$0xff] }
 0x257   :  { %10143 = vmatprep.subr.bf16.mxu0 %v13827_v40  ;;  %10676 = vmatprep.subr.bf16.mxu1 %v13829_v41  ;;  %v1278_v38 = vld [vmem:[%s20007_s1 + $0x26e0] sm:$0xff]  ;;  %v1275_v40 = vld [vmem:[%s20007_s1 + $0x26c8] sm:$0xff] }
 0x258   :  { %v1279_v41 = vld [vmem:[%s20007_s1 + $0x26e8] sm:$0xff]  ;;  %v13875_v43 = vcombine.high %v1274_v37, %v1278_v38  ;;  %v13874_v54 = vcombine.low %v1274_v37, %v1278_v38 }
 0x259   :  { %v13877_v44 = vcombine.high %v1275_v40, %v1279_v41  ;;  %v13876_v56 = vcombine.low %v1275_v40, %v1279_v41 }
 0x25a   :  { %10144 = vmatpush1.bf16.msra.mxu0 %v13826_v47  ;;  %10677 = vmatpush1.bf16.msra.mxu1 %v13828_v48  ;;  %v1282_v47 = vld [vmem:[%s20007_s1 + $0x2700] sm:$0xff] }
 0x25b   :  { %10145 = vmatprep.subr.bf16.mxu0 %v13835_v51  ;;  %10678 = vmatprep.subr.bf16.mxu1 %v13837_v18  ;;  %v1286_v48 = vld [vmem:[%s20007_s1 + $0x2720] sm:$0xff]  ;;  %v1283_v51 = vld [vmem:[%s20007_s1 + $0x2708] sm:$0xff] }
 0x25c   :  { %v1287_v18 = vld [vmem:[%s20007_s1 + $0x2728] sm:$0xff]  ;;  %v13883_v3 = vcombine.high %v1282_v47, %v1286_v48  ;;  %v13882_v4 = vcombine.low %v1282_v47, %v1286_v48  ;;  %v16827_v48 = vld [vmem:[%s20008_s0 + $0x50] sm:$0xff] }
 0x25d   :  { %v13885_v60 = vcombine.high %v1283_v51, %v1287_v18  ;;  %v13884_v5 = vcombine.low %v1283_v51, %v1287_v18  ;;  %v1327_v47 = vld [vmem:[%s20007_s1 + $0x2868] sm:$0xff] }
 0x25e   :  { %10146 = vmatpush1.bf16.msra.mxu0 %v13834_v61  ;;  %10679 = vmatpush1.bf16.msra.mxu1 %v13836_v39  ;;  %v1290_v61 = vld [vmem:[%s20007_s1 + $0x2740] sm:$0xff] }
 0x25f   :  { %10147 = vmatprep.subr.bf16.mxu0 %v13843_v0  ;;  %10680 = vmatprep.subr.bf16.mxu1 %v13845_v2  ;;  %v1294_v39 = vld [vmem:[%s20007_s1 + $0x2760] sm:$0xff]  ;;  %v1291_v0 = vld [vmem:[%s20007_s1 + $0x2748] sm:$0xff] }
 0x260   :  { %v1295_v2 = vld [vmem:[%s20007_s1 + $0x2768] sm:$0xff]  ;;  %v13891_v23 = vcombine.high %v1290_v61, %v1294_v39  ;;  %v13890_v13 = vcombine.low %v1290_v61, %v1294_v39 }
 0x261   :  { %v13893_v6 = vcombine.high %v1291_v0, %v1295_v2  ;;  %v13892_v14 = vcombine.low %v1291_v0, %v1295_v2  ;;  %v1331_v61 = vld [vmem:[%s20007_s1 + $0x2888] sm:$0xff] }
 0x262   :  { %10148 = vmatpush1.bf16.msra.mxu0 %v13842_v7  ;;  %10681 = vmatpush1.bf16.msra.mxu1 %v13844_v8  ;;  %v1298_v7 = vld [vmem:[%s20007_s1 + $0x2780] sm:$0xff]  ;;  %v1335_v39 = vld [vmem:[%s20007_s1 + $0x28a8] sm:$0xff] }
 0x263   :  { %10149 = vmatprep.subr.bf16.mxu0 %v13851_v10  ;;  %10682 = vmatprep.subr.bf16.mxu1 %v13853_v11  ;;  %v1302_v8 = vld [vmem:[%s20007_s1 + $0x27a0] sm:$0xff]  ;;  %v1299_v10 = vld [vmem:[%s20007_s1 + $0x2788] sm:$0xff] }
 0x264   :  { %v1303_v11 = vld [vmem:[%s20007_s1 + $0x27a8] sm:$0xff]  ;;  %v13899_v17 = vcombine.high %v1298_v7, %v1302_v8  ;;  %v13898_v49 = vcombine.low %v1298_v7, %v1302_v8 }
 0x265   :  { %v13901_v53 = vcombine.high %v1299_v10, %v1303_v11  ;;  %v13900_v15 = vcombine.low %v1299_v10, %v1303_v11  ;;  %v1339_v7 = vld [vmem:[%s20007_s1 + $0x28c8] sm:$0xff]  ;;  %v13932_v11 = vcombine.low %v1331_v61, %v1335_v39 }
 0x266   :  { %10150 = vmatpush1.bf16.msra.mxu0 %v13850_v20  ;;  %10683 = vmatpush1.bf16.msra.mxu1 %v13852_v59  ;;  %v1306_v20 = vld [vmem:[%s20007_s1 + $0x27c0] sm:$0xff]  ;;  %v1343_v8 = vld [vmem:[%s20007_s1 + $0x28e8] sm:$0xff] }
 0x267   :  { %10151 = vmatprep.subr.bf16.mxu0 %v13859_v24  ;;  %10684 = vmatprep.subr.bf16.mxu1 %v13861_v26  ;;  %v1310_v59 = vld [vmem:[%s20007_s1 + $0x27e0] sm:$0xff]  ;;  %v1307_v24 = vld [vmem:[%s20007_s1 + $0x27c8] sm:$0xff] }
 0x268   :  { %v1311_v26 = vld [vmem:[%s20007_s1 + $0x27e8] sm:$0xff]  ;;  %v13907_v28 = vcombine.high %v1306_v20, %v1310_v59  ;;  %v13906_v37 = vcombine.low %v1306_v20, %v1310_v59 }
 0x269   :  { %v13909_v29 = vcombine.high %v1307_v24, %v1311_v26  ;;  %v13908_v38 = vcombine.low %v1307_v24, %v1311_v26  ;;  %v1347_v20 = vld [vmem:[%s20007_s1 + $0x2908] sm:$0xff]  ;;  %v13940_v26 = vcombine.low %v1339_v7, %v1343_v8 }
 0x26a   :  { %10152 = vmatpush1.bf16.msra.mxu0 %v13858_v32  ;;  %10685 = vmatpush1.bf16.msra.mxu1 %v13860_v33  ;;  %v1314_v32 = vld [vmem:[%s20007_s1 + $0x2800] sm:$0xff]  ;;  %v1351_v59 = vld [vmem:[%s20007_s1 + $0x2928] sm:$0xff] }
 0x26b   :  { %10153 = vmatprep.subr.bf16.mxu0 %v13867_v34  ;;  %10686 = vmatprep.subr.bf16.mxu1 %v13869_v35  ;;  %v1318_v33 = vld [vmem:[%s20007_s1 + $0x2820] sm:$0xff]  ;;  %v1315_v34 = vld [vmem:[%s20007_s1 + $0x2808] sm:$0xff] }
 0x26c   :  { %v1319_v35 = vld [vmem:[%s20007_s1 + $0x2828] sm:$0xff]  ;;  %v13915_v40 = vcombine.high %v1314_v32, %v1318_v33  ;;  %v13914_v51 = vcombine.low %v1314_v32, %v1318_v33 }
 0x26d   :  { %v13917_v41 = vcombine.high %v1315_v34, %v1319_v35  ;;  %v13916_v18 = vcombine.low %v1315_v34, %v1319_v35  ;;  %v1355_v32 = vld [vmem:[%s20007_s1 + $0x2948] sm:$0xff]  ;;  %v13948_v35 = vcombine.low %v1347_v20, %v1351_v59 }
 0x26e   :  { %10154 = vmatpush1.bf16.msra.mxu0 %v13866_v25  ;;  %10687 = vmatpush1.bf16.msra.mxu1 %v13868_v42  ;;  %v1322_v25 = vld [vmem:[%s20007_s1 + $0x2840] sm:$0xff]  ;;  %v1359_v33 = vld [vmem:[%s20007_s1 + $0x2968] sm:$0xff] }
 0x26f   :  { %10155 = vmatprep.subr.bf16.mxu0 %v13875_v43  ;;  %10688 = vmatprep.subr.bf16.mxu1 %v13877_v44  ;;  %v1326_v42 = vld [vmem:[%s20007_s1 + $0x2860] sm:$0xff]  ;;  %v16816_v43 = vcombine.low %v16618_v52, %v16618_v52  ;;  %v1323_v44 = vld [vmem:[%s20007_s1 + $0x2848] sm:$0xff] }
 0x270   :  { %v13923_v52 = vcombine.high %v1322_v25, %v1326_v42  ;;  %v13922_v0 = vcombine.low %v1322_v25, %v1326_v42  ;;  %v13924_v2 = vcombine.low %v1323_v44, %v1327_v47  ;;  %v1363_v25 = vld [vmem:[%s20007_s1 + $0x2988] sm:$0xff] }
 0x271   :  { %v1367_v42 = vld [vmem:[%s20007_s1 + $0x29a8] sm:$0xff] }
 0x272   :  { %10156 = vmatpush1.bf16.msra.mxu0 %v13874_v54  ;;  %10689 = vmatpush1.bf16.msra.mxu1 %v13876_v56  ;;  %v13925_v54 = vcombine.high %v1323_v44, %v1327_v47  ;;  %v1330_v56 = vld [vmem:[%s20007_s1 + $0x2880] sm:$0xff]  ;;  %v13956_v47 = vcombine.low %v1355_v32, %v1359_v33 }
 0x273   :  { %10157 = vmatprep.subr.bf16.mxu0 %v13883_v3  ;;  %10690 = vmatprep.subr.bf16.mxu1 %v13885_v60  ;;  %v1334_v3 = vld [vmem:[%s20007_s1 + $0x28a0] sm:$0xff]  ;;  %v16837_v60 = vcombine.high %v16827_v48, %v16827_v48 }
 0x274   :  { %v13930_v10 = vcombine.low %v1330_v56, %v1334_v3 }
 0x276   :  { %10158 = vmatpush1.bf16.msra.mxu0 %v13882_v4  ;;  %10691 = vmatpush1.bf16.msra.mxu1 %v13884_v5  ;;  %v13931_v4 = vcombine.high %v1330_v56, %v1334_v3  ;;  %v13933_v5 = vcombine.high %v1331_v61, %v1335_v39  ;;  %v1371_v56 = vld [vmem:[%s20007_s1 + $0x29c8] sm:$0xff]  ;;  %v13964_v39 = vcombine.low %v1363_v25, %v1367_v42 }
 0x277   :  { %10159 = vmatprep.subr.bf16.mxu0 %v13891_v23  ;;  %10692 = vmatprep.subr.bf16.mxu1 %v13893_v6  ;;  %v1338_v23 = vld [vmem:[%s20007_s1 + $0x28c0] sm:$0xff]  ;;  %v1375_v3 = vld [vmem:[%s20007_s1 + $0x29e8] sm:$0xff] }
 0x278   :  { %v1342_v6 = vld [vmem:[%s20007_s1 + $0x28e0] sm:$0xff] }
 0x279   :  { %v13938_v24 = vcombine.low %v1338_v23, %v1342_v6 }
 0x27a   :  { %10160 = vmatpush1.bf16.msra.mxu0 %v13890_v13  ;;  %10693 = vmatpush1.bf16.msra.mxu1 %v13892_v14  ;;  %v13939_v13 = vcombine.high %v1338_v23, %v1342_v6  ;;  %v13941_v14 = vcombine.high %v1339_v7, %v1343_v8  ;;  %v1379_v23 = vld [vmem:[%s20007_s1 + $0x2a08] sm:$0xff]  ;;  %v13972_v8 = vcombine.low %v1371_v56, %v1375_v3 }
 0x27b   :  { %10161 = vmatprep.subr.bf16.mxu0 %v13899_v17  ;;  %10694 = vmatprep.subr.bf16.mxu1 %v13901_v53  ;;  %v1346_v17 = vld [vmem:[%s20007_s1 + $0x2900] sm:$0xff]  ;;  %v1383_v6 = vld [vmem:[%s20007_s1 + $0x2a28] sm:$0xff] }
 0x27c   :  { %v1350_v53 = vld [vmem:[%s20007_s1 + $0x2920] sm:$0xff] }
 0x27d   :  { %v13946_v34 = vcombine.low %v1346_v17, %v1350_v53 }
 0x27e   :  { %10162 = vmatpush1.bf16.msra.mxu0 %v13898_v49  ;;  %10695 = vmatpush1.bf16.msra.mxu1 %v13900_v15  ;;  %v13947_v49 = vcombine.high %v1346_v17, %v1350_v53  ;;  %v13949_v15 = vcombine.high %v1347_v20, %v1351_v59  ;;  %v1387_v17 = vld [vmem:[%s20007_s1 + $0x2a48] sm:$0xff]  ;;  %v13980_v59 = vcombine.low %v1379_v23, %v1383_v6 }
 0x27f   :  { %10163 = vmatprep.subr.bf16.mxu0 %v13907_v28  ;;  %10696 = vmatprep.subr.bf16.mxu1 %v13909_v29  ;;  %v1354_v28 = vld [vmem:[%s20007_s1 + $0x2940] sm:$0xff]  ;;  %v1391_v53 = vld [vmem:[%s20007_s1 + $0x2a68] sm:$0xff] }
 0x280   :  { %v1358_v29 = vld [vmem:[%s20007_s1 + $0x2960] sm:$0xff] }
 0x281   :  { %v13954_v44 = vcombine.low %v1354_v28, %v1358_v29 }
 0x282   :  { %10164 = vmatpush1.bf16.msra.mxu0 %v13906_v37  ;;  %10697 = vmatpush1.bf16.msra.mxu1 %v13908_v38  ;;  %v13955_v37 = vcombine.high %v1354_v28, %v1358_v29  ;;  %v13957_v38 = vcombine.high %v1355_v32, %v1359_v33  ;;  %v1395_v28 = vld [vmem:[%s20007_s1 + $0x2a88] sm:$0xff]  ;;  %v13988_v33 = vcombine.low %v1387_v17, %v1391_v53 }
 0x283   :  { %10174 = vmatprep.subr.bf16.mxu0 %v13915_v40  ;;  %10707 = vmatprep.subr.bf16.mxu1 %v13917_v41  ;;  %v1362_v40 = vld [vmem:[%s20007_s1 + $0x2980] sm:$0xff]  ;;  %v1399_v29 = vld [vmem:[%s20007_s1 + $0x2aa8] sm:$0xff] }
 0x284   :  { %v1366_v41 = vld [vmem:[%s20007_s1 + $0x29a0] sm:$0xff] }
 0x285   :  { %10166 = vmatmul.mubr.bf16.vlgmr.msra.gmra.mrb[0].mxu0 %v16816_v43  ;;  %10699 = vmatmul.mubr.bf16.vlgmr.msra.gmra.mrb[0].mxu1 %v16816_v43  ;;  %v13962_v61 = vcombine.low %v1362_v40, %v1366_v41 }
 0x286   :  { %10175 = vmatpush1.bf16.msra.mxu0 %v13914_v51  ;;  %10708 = vmatpush1.bf16.msra.mxu1 %v13916_v18  ;;  %v13963_v51 = vcombine.high %v1362_v40, %v1366_v41  ;;  %v13965_v18 = vcombine.high %v1363_v25, %v1367_v42  ;;  %v1403_v40 = vld [vmem:[%s20007_s1 + $0x2ac8] sm:$0xff]  ;;  %v13996_v42 = vcombine.low %v1395_v28, %v1399_v29 }
 0x287   :  { %10176 = vmatprep.subr.bf16.mxu0 %v13923_v52  ;;  %10709 = vmatprep.subr.bf16.mxu1 %v13925_v54  ;;  %v1370_v52 = vld [vmem:[%s20007_s1 + $0x29c0] sm:$0xff]  ;;  %v1407_v41 = vld [vmem:[%s20007_s1 + $0x2ae8] sm:$0xff] }
 0x288   :  { %10206 = vmatprep.mubr.bf16.mxu0 %v16837_v60  ;;  %10739 = vmatprep.mubr.bf16.mxu1 %v16837_v60  ;;  %v1374_v54 = vld [vmem:[%s20007_s1 + $0x29e0] sm:$0xff] }
 0x289   :  { %v13970_v7 = vcombine.low %v1370_v52, %v1374_v54 }
 0x28a   :  { %10177 = vmatpush1.bf16.msra.mxu0 %v13922_v0  ;;  %10710 = vmatpush1.bf16.msra.mxu1 %v13924_v2  ;;  %v13971_v0 = vcombine.high %v1370_v52, %v1374_v54  ;;  %v13973_v2 = vcombine.high %v1371_v56, %v1375_v3  ;;  %v1411_v52 = vld [vmem:[%s20007_s1 + $0x2b08] sm:$0xff]  ;;  %v14004_v3 = vcombine.low %v1403_v40, %v1407_v41 }
 0x28b   :  { %10178 = vmatprep.subr.bf16.mxu0 %v13931_v4  ;;  %10711 = vmatprep.subr.bf16.mxu1 %v13933_v5  ;;  %v1378_v4 = vld [vmem:[%s20007_s1 + $0x2a00] sm:$0xff]  ;;  %v1415_v54 = vld [vmem:[%s20007_s1 + $0x2b28] sm:$0xff] }
 0x28c   :  { %v1382_v5 = vld [vmem:[%s20007_s1 + $0x2a20] sm:$0xff] }
 0x28d   :  { %v13978_v20 = vcombine.low %v1378_v4, %v1382_v5 }
 0x28e   :  { %10179 = vmatpush1.bf16.msra.mxu0 %v13930_v10  ;;  %10712 = vmatpush1.bf16.msra.mxu1 %v13932_v11  ;;  %v13979_v10 = vcombine.high %v1378_v4, %v1382_v5  ;;  %v13981_v11 = vcombine.high %v1379_v23, %v1383_v6  ;;  %v1419_v4 = vld [vmem:[%s20007_s1 + $0x2b48] sm:$0xff]  ;;  %v14012_v6 = vcombine.low %v1411_v52, %v1415_v54 }
 0x28f   :  { %10180 = vmatprep.subr.bf16.mxu0 %v13939_v13  ;;  %10713 = vmatprep.subr.bf16.mxu1 %v13941_v14  ;;  %v1386_v13 = vld [vmem:[%s20007_s1 + $0x2a40] sm:$0xff]  ;;  %v1423_v5 = vld [vmem:[%s20007_s1 + $0x2b68] sm:$0xff] }
 0x290   :  { %v1390_v14 = vld [vmem:[%s20007_s1 + $0x2a60] sm:$0xff] }
 0x291   :  { %v13986_v32 = vcombine.low %v1386_v13, %v1390_v14 }
 0x292   :  { %10181 = vmatpush1.bf16.msra.mxu0 %v13938_v24  ;;  %10714 = vmatpush1.bf16.msra.mxu1 %v13940_v26  ;;  %v13987_v24 = vcombine.high %v1386_v13, %v1390_v14  ;;  %v13989_v26 = vcombine.high %v1387_v17, %v1391_v53  ;;  %v1427_v13 = vld [vmem:[%s20007_s1 + $0x2b88] sm:$0xff]  ;;  %v14020_v53 = vcombine.low %v1419_v4, %v1423_v5 }
 0x293   :  { %10182 = vmatprep.subr.bf16.mxu0 %v13947_v49  ;;  %10715 = vmatprep.subr.bf16.mxu1 %v13949_v15  ;;  %v1394_v49 = vld [vmem:[%s20007_s1 + $0x2a80] sm:$0xff]  ;;  %v1431_v14 = vld [vmem:[%s20007_s1 + $0x2ba8] sm:$0xff] }
 0x294   :  { %v1398_v15 = vld [vmem:[%s20007_s1 + $0x2aa0] sm:$0xff] }
 0x295   :  { %v13994_v25 = vcombine.low %v1394_v49, %v1398_v15 }
 0x296   :  { %10183 = vmatpush1.bf16.msra.mxu0 %v13946_v34  ;;  %10716 = vmatpush1.bf16.msra.mxu1 %v13948_v35  ;;  %v13995_v34 = vcombine.high %v1394_v49, %v1398_v15  ;;  %v13997_v35 = vcombine.high %v1395_v28, %v1399_v29  ;;  %v1435_v49 = vld [vmem:[%s20007_s1 + $0x2bc8] sm:$0xff]  ;;  %v14028_v29 = vcombine.low %v1427_v13, %v1431_v14 }
 0x297   :  { %10184 = vmatprep.subr.bf16.mxu0 %v13955_v37  ;;  %10717 = vmatprep.subr.bf16.mxu1 %v13957_v38  ;;  %v1402_v37 = vld [vmem:[%s20007_s1 + $0x2ac0] sm:$0xff]  ;;  %v1439_v15 = vld [vmem:[%s20007_s1 + $0x2be8] sm:$0xff] }
 0x298   :  { %v1406_v38 = vld [vmem:[%s20007_s1 + $0x2ae0] sm:$0xff] }
 0x299   :  { %v14002_v56 = vcombine.low %v1402_v37, %v1406_v38 }
 0x29a   :  { %10185 = vmatpush1.bf16.msra.mxu0 %v13954_v44  ;;  %10718 = vmatpush1.bf16.msra.mxu1 %v13956_v47  ;;  %v14003_v44 = vcombine.high %v1402_v37, %v1406_v38  ;;  %v14005_v47 = vcombine.high %v1403_v40, %v1407_v41  ;;  %v1443_v37 = vld [vmem:[%s20007_s1 + $0x2c08] sm:$0xff]  ;;  %v14036_v41 = vcombine.low %v1435_v49, %v1439_v15 }
 0x29b   :  { %10186 = vmatprep.subr.bf16.mxu0 %v13963_v51  ;;  %10719 = vmatprep.subr.bf16.mxu1 %v13965_v18  ;;  %v1410_v51 = vld [vmem:[%s20007_s1 + $0x2b00] sm:$0xff]  ;;  %v1447_v38 = vld [vmem:[%s20007_s1 + $0x2c28] sm:$0xff] }
 0x29c   :  { %v1414_v18 = vld [vmem:[%s20007_s1 + $0x2b20] sm:$0xff] }
 0x29d   :  { %v14010_v23 = vcombine.low %v1410_v51, %v1414_v18 }
 0x29e   :  { %10187 = vmatpush1.bf16.msra.mxu0 %v13962_v61  ;;  %10720 = vmatpush1.bf16.msra.mxu1 %v13964_v39  ;;  %v14011_v61 = vcombine.high %v1410_v51, %v1414_v18  ;;  %v14013_v39 = vcombine.high %v1411_v52, %v1415_v54  ;;  %v17025_v51 = vcombine.low %v16827_v48, %v16827_v48  ;;  %v1451_v18 = vld [vmem:[%s20007_s1 + $0x2c48] sm:$0xff]  ;;  %v17036_v54 = vld [vmem:[%s20008_s0 + $0x58] sm:$0xff] }
 0x29f   :  { %10188 = vmatprep.subr.bf16.mxu0 %v13971_v0  ;;  %10721 = vmatprep.subr.bf16.mxu1 %v13973_v2  ;;  %v1418_v0 = vld [vmem:[%s20007_s1 + $0x2b40] sm:$0xff]  ;;  %v1455_v52 = vld [vmem:[%s20007_s1 + $0x2c68] sm:$0xff] }
 0x2a0   :  { %v1422_v2 = vld [vmem:[%s20007_s1 + $0x2b60] sm:$0xff] }
 0x2a1   :  { %v14018_v17 = vcombine.low %v1418_v0, %v1422_v2 }
 0x2a2   :  { %10189 = vmatpush1.bf16.msra.mxu0 %v13970_v7  ;;  %10722 = vmatpush1.bf16.msra.mxu1 %v13972_v8  ;;  %v14019_v7 = vcombine.high %v1418_v0, %v1422_v2  ;;  %v14021_v8 = vcombine.high %v1419_v4, %v1423_v5  ;;  %v1462_v0 = vld [vmem:[%s20007_s1 + $0x2ca0] sm:$0xff]  ;;  %v17046_v2 = vcombine.high %v17036_v54, %v17036_v54  ;;  %v1459_v4 = vld [vmem:[%s20007_s1 + $0x2c88] sm:$0xff] }
 0x2a3   :  { %10190 = vmatprep.subr.bf16.mxu0 %v13979_v10  ;;  %10723 = vmatprep.subr.bf16.mxu1 %v13981_v11  ;;  %v1426_v10 = vld [vmem:[%s20007_s1 + $0x2b80] sm:$0xff]  ;;  %v1463_v5 = vld [vmem:[%s20007_s1 + $0x2ca8] sm:$0xff] }
 0x2a4   :  { %v1430_v11 = vld [vmem:[%s20007_s1 + $0x2ba0] sm:$0xff] }
 0x2a5   :  { %v14026_v28 = vcombine.low %v1426_v10, %v1430_v11 }
 0x2a6   :  { %10191 = vmatpush1.bf16.msra.mxu0 %v13978_v20  ;;  %10724 = vmatpush1.bf16.msra.mxu1 %v13980_v59  ;;  %v14027_v20 = vcombine.high %v1426_v10, %v1430_v11  ;;  %v14029_v59 = vcombine.high %v1427_v13, %v1431_v14  ;;  %v1466_v10 = vld [vmem:[%s20007_s1 + $0x2cc0] sm:$0xff]  ;;  %v1467_v13 = vld [vmem:[%s20007_s1 + $0x2cc8] sm:$0xff] }
 0x2a7   :  { %10192 = vmatprep.subr.bf16.mxu0 %v13987_v24  ;;  %10725 = vmatprep.subr.bf16.mxu1 %v13989_v26  ;;  %v1434_v24 = vld [vmem:[%s20007_s1 + $0x2bc0] sm:$0xff]  ;;  %v1471_v14 = vld [vmem:[%s20007_s1 + $0x2ce8] sm:$0xff] }
 0x2a8   :  { %v1438_v26 = vld [vmem:[%s20007_s1 + $0x2be0] sm:$0xff] }
 0x2a9   :  { %v14034_v40 = vcombine.low %v1434_v24, %v1438_v26  ;;  %v1470_v11 = vld [vmem:[%s20007_s1 + $0x2ce0] sm:$0xff] }
 0x2aa   :  { %10193 = vmatpush1.bf16.msra.mxu0 %v13986_v32  ;;  %10726 = vmatpush1.bf16.msra.mxu1 %v13988_v33  ;;  %v14035_v32 = vcombine.high %v1434_v24, %v1438_v26  ;;  %v14037_v33 = vcombine.high %v1435_v49, %v1439_v15  ;;  %v1474_v24 = vld [vmem:[%s20007_s1 + $0x2d00] sm:$0xff]  ;;  %v1475_v49 = vld [vmem:[%s20007_s1 + $0x2d08] sm:$0xff] }
 0x2ab   :  { %10194 = vmatprep.subr.bf16.mxu0 %v13995_v34  ;;  %10727 = vmatprep.subr.bf16.mxu1 %v13997_v35  ;;  %v1442_v34 = vld [vmem:[%s20007_s1 + $0x2c00] sm:$0xff]  ;;  %v1479_v15 = vld [vmem:[%s20007_s1 + $0x2d28] sm:$0xff] }
 0x2ac   :  { %v1446_v35 = vld [vmem:[%s20007_s1 + $0x2c20] sm:$0xff] }
 0x2ad   :  { %v1478_v26 = vld [vmem:[%s20007_s1 + $0x2d20] sm:$0xff] }
 0x2ae   :  { %10195 = vmatpush1.bf16.msra.mxu0 %v13994_v25  ;;  %10728 = vmatpush1.bf16.msra.mxu1 %v13996_v42  ;;  %v14043_v25 = vcombine.high %v1442_v34, %v1446_v35  ;;  %v14045_v42 = vcombine.high %v1443_v37, %v1447_v38 }
 0x2af   :  { %10196 = vmatprep.subr.bf16.mxu0 %v14003_v44  ;;  %10729 = vmatprep.subr.bf16.mxu1 %v14005_v47  ;;  %v1450_v44 = vld [vmem:[%s20007_s1 + $0x2c40] sm:$0xff] }
 0x2b0   :  { %v1454_v47 = vld [vmem:[%s20007_s1 + $0x2c60] sm:$0xff] }
 0x2b1   :  { %v14051_v48 = vcombine.high %v1450_v44, %v1454_v47 }
 0x2b2   :  { %10197 = vmatpush1.bf16.msra.mxu0 %v14002_v56  ;;  %10730 = vmatpush1.bf16.msra.mxu1 %v14004_v3  ;;  %v14042_v56 = vcombine.low %v1442_v34, %v1446_v35  ;;  %v14044_v3 = vcombine.low %v1443_v37, %v1447_v38  ;;  %v1482_v34 = vld [vmem:[%s20007_s1 + $0x2d40] sm:$0xff]  ;;  %v1483_v37 = vld [vmem:[%s20007_s1 + $0x2d48] sm:$0xff] }
 0x2b3   :  { %10198 = vmatprep.subr.bf16.mxu0 %v14011_v61  ;;  %10731 = vmatprep.subr.bf16.mxu1 %v14013_v39  ;;  %v14053_v61 = vcombine.high %v1451_v18, %v1455_v52  ;;  %v1458_v39 = vld [vmem:[%s20007_s1 + $0x2c80] sm:$0xff]  ;;  %v1487_v38 = vld [vmem:[%s20007_s1 + $0x2d68] sm:$0xff] }
 0x2b4   :  { %v1486_v35 = vld [vmem:[%s20007_s1 + $0x2d60] sm:$0xff] }
 0x2b6   :  { %10199 = vmatpush1.bf16.msra.mxu0 %v14010_v23  ;;  %10732 = vmatpush1.bf16.msra.mxu1 %v14012_v6  ;;  %v14050_v23 = vcombine.low %v1450_v44, %v1454_v47  ;;  %v14052_v6 = vcombine.low %v1451_v18, %v1455_v52  ;;  %v1490_v44 = vld [vmem:[%s20007_s1 + $0x2d80] sm:$0xff]  ;;  %v1491_v18 = vld [vmem:[%s20007_s1 + $0x2d88] sm:$0xff] }
 0x2b7   :  { %10200 = vmatprep.subr.bf16.mxu0 %v14019_v7  ;;  %10733 = vmatprep.subr.bf16.mxu1 %v14021_v8  ;;  %v14059_v7 = vcombine.high %v1458_v39, %v1462_v0  ;;  %v14061_v8 = vcombine.high %v1459_v4, %v1463_v5  ;;  %v1494_v47 = vld [vmem:[%s20007_s1 + $0x2da0] sm:$0xff]  ;;  %v1495_v52 = vld [vmem:[%s20007_s1 + $0x2da8] sm:$0xff] }
 0x2ba   :  { %10201 = vmatpush1.bf16.msra.mxu0 %v14018_v17  ;;  %10734 = vmatpush1.bf16.msra.mxu1 %v14020_v53  ;;  %v14058_v17 = vcombine.low %v1458_v39, %v1462_v0  ;;  %v14060_v53 = vcombine.low %v1459_v4, %v1463_v5  ;;  %v1498_v39 = vld [vmem:[%s20007_s1 + $0x2dc0] sm:$0xff]  ;;  %v1499_v4 = vld [vmem:[%s20007_s1 + $0x2dc8] sm:$0xff] }
 0x2bb   :  { %10202 = vmatprep.subr.bf16.mxu0 %v14027_v20  ;;  %10735 = vmatprep.subr.bf16.mxu1 %v14029_v59  ;;  %v14067_v20 = vcombine.high %v1466_v10, %v1470_v11  ;;  %v14069_v59 = vcombine.high %v1467_v13, %v1471_v14  ;;  %v1502_v0 = vld [vmem:[%s20007_s1 + $0x2de0] sm:$0xff]  ;;  %v1503_v5 = vld [vmem:[%s20007_s1 + $0x2de8] sm:$0xff] }
 0x2be   :  { %10203 = vmatpush1.bf16.msra.mxu0 %v14026_v28  ;;  %10736 = vmatpush1.bf16.msra.mxu1 %v14028_v29  ;;  %v14066_v28 = vcombine.low %v1466_v10, %v1470_v11  ;;  %v14068_v29 = vcombine.low %v1467_v13, %v1471_v14  ;;  %v1506_v10 = vld [vmem:[%s20007_s1 + $0x2e00] sm:$0xff]  ;;  %v1507_v13 = vld [vmem:[%s20007_s1 + $0x2e08] sm:$0xff] }
 0x2bf   :  { %10204 = vmatprep.subr.bf16.mxu0 %v14035_v32  ;;  %10737 = vmatprep.subr.bf16.mxu1 %v14037_v33  ;;  %v14075_v32 = vcombine.high %v1474_v24, %v1478_v26  ;;  %v14077_v33 = vcombine.high %v1475_v49, %v1479_v15  ;;  %v1510_v11 = vld [vmem:[%s20007_s1 + $0x2e20] sm:$0xff]  ;;  %v1511_v14 = vld [vmem:[%s20007_s1 + $0x2e28] sm:$0xff] }
 0x2c2   :  { %10205 = vmatpush1.bf16.msra.mxu0 %v14034_v40  ;;  %10738 = vmatpush1.bf16.msra.mxu1 %v14036_v41  ;;  %v14074_v40 = vcombine.low %v1474_v24, %v1478_v26  ;;  %v14076_v41 = vcombine.low %v1475_v49, %v1479_v15  ;;  %v1514_v24 = vld [vmem:[%s20007_s1 + $0x2e40] sm:$0xff]  ;;  %v1515_v49 = vld [vmem:[%s20007_s1 + $0x2e48] sm:$0xff] }
 0x2c3   :  { %10215 = vmatprep.subr.bf16.mxu0 %v14043_v25  ;;  %10748 = vmatprep.subr.bf16.mxu1 %v14045_v42  ;;  %v14083_v25 = vcombine.high %v1482_v34, %v1486_v35  ;;  %v14085_v42 = vcombine.high %v1483_v37, %v1487_v38  ;;  %v1518_v26 = vld [vmem:[%s20007_s1 + $0x2e60] sm:$0xff]  ;;  %v1519_v15 = vld [vmem:[%s20007_s1 + $0x2e68] sm:$0xff] }
 0x2c5   :  { %10207 = vmatmul.mubr.bf16.vlgmr.msra.gmra.mrb[0].mxu0 %v17025_v51  ;;  %10740 = vmatmul.mubr.bf16.vlgmr.msra.gmra.mrb[0].mxu1 %v17025_v51 }
 0x2c6   :  { %10216 = vmatpush1.bf16.msra.mxu0 %v14042_v56  ;;  %10749 = vmatpush1.bf16.msra.mxu1 %v14044_v3  ;;  %v14082_v56 = vcombine.low %v1482_v34, %v1486_v35  ;;  %v14084_v3 = vcombine.low %v1483_v37, %v1487_v38  ;;  %v1522_v34 = vld [vmem:[%s20007_s1 + $0x2e80] sm:$0xff]  ;;  %v1523_v37 = vld [vmem:[%s20007_s1 + $0x2e88] sm:$0xff] }
 0x2c7   :  { %10217 = vmatprep.subr.bf16.mxu0 %v14051_v48  ;;  %10750 = vmatprep.subr.bf16.mxu1 %v14053_v61  ;;  %v14091_v48 = vcombine.high %v1490_v44, %v1494_v47  ;;  %v14093_v61 = vcombine.high %v1491_v18, %v1495_v52  ;;  %v1526_v35 = vld [vmem:[%s20007_s1 + $0x2ea0] sm:$0xff]  ;;  %v1527_v38 = vld [vmem:[%s20007_s1 + $0x2ea8] sm:$0xff] }
 0x2c8   :  { %10247 = vmatprep.mubr.bf16.mxu0 %v17046_v2  ;;  %10780 = vmatprep.mubr.bf16.mxu1 %v17046_v2 }
 0x2ca   :  { %10218 = vmatpush1.bf16.msra.mxu0 %v14050_v23  ;;  %10751 = vmatpush1.bf16.msra.mxu1 %v14052_v6  ;;  %v14090_v23 = vcombine.low %v1490_v44, %v1494_v47  ;;  %v14092_v6 = vcombine.low %v1491_v18, %v1495_v52  ;;  %v1530_v44 = vld [vmem:[%s20007_s1 + $0x2ec0] sm:$0xff]  ;;  %v1531_v18 = vld [vmem:[%s20007_s1 + $0x2ec8] sm:$0xff] }
 0x2cb   :  { %10219 = vmatprep.subr.bf16.mxu0 %v14059_v7  ;;  %10752 = vmatprep.subr.bf16.mxu1 %v14061_v8  ;;  %v14099_v7 = vcombine.high %v1498_v39, %v1502_v0  ;;  %v14101_v8 = vcombine.high %v1499_v4, %v1503_v5  ;;  %v1534_v47 = vld [vmem:[%s20007_s1 + $0x2ee0] sm:$0xff]  ;;  %v1535_v52 = vld [vmem:[%s20007_s1 + $0x2ee8] sm:$0xff] }
 0x2ce   :  { %10220 = vmatpush1.bf16.msra.mxu0 %v14058_v17  ;;  %10753 = vmatpush1.bf16.msra.mxu1 %v14060_v53  ;;  %v14098_v17 = vcombine.low %v1498_v39, %v1502_v0  ;;  %v14100_v53 = vcombine.low %v1499_v4, %v1503_v5  ;;  %v1538_v39 = vld [vmem:[%s20007_s1 + $0x2f00] sm:$0xff]  ;;  %v1539_v4 = vld [vmem:[%s20007_s1 + $0x2f08] sm:$0xff] }
 0x2cf   :  { %10221 = vmatprep.subr.bf16.mxu0 %v14067_v20  ;;  %10754 = vmatprep.subr.bf16.mxu1 %v14069_v59  ;;  %v14107_v20 = vcombine.high %v1506_v10, %v1510_v11  ;;  %v14109_v59 = vcombine.high %v1507_v13, %v1511_v14  ;;  %v1542_v0 = vld [vmem:[%s20007_s1 + $0x2f20] sm:$0xff]  ;;  %v1543_v5 = vld [vmem:[%s20007_s1 + $0x2f28] sm:$0xff] }
 0x2d2   :  { %10222 = vmatpush1.bf16.msra.mxu0 %v14066_v28  ;;  %10755 = vmatpush1.bf16.msra.mxu1 %v14068_v29  ;;  %v14106_v28 = vcombine.low %v1506_v10, %v1510_v11  ;;  %v14108_v29 = vcombine.low %v1507_v13, %v1511_v14  ;;  %v1546_v10 = vld [vmem:[%s20007_s1 + $0x2f40] sm:$0xff]  ;;  %v1547_v13 = vld [vmem:[%s20007_s1 + $0x2f48] sm:$0xff] }
 0x2d3   :  { %10223 = vmatprep.subr.bf16.mxu0 %v14075_v32  ;;  %10756 = vmatprep.subr.bf16.mxu1 %v14077_v33  ;;  %v14115_v32 = vcombine.high %v1514_v24, %v1518_v26  ;;  %v14117_v33 = vcombine.high %v1515_v49, %v1519_v15  ;;  %v1550_v11 = vld [vmem:[%s20007_s1 + $0x2f60] sm:$0xff]  ;;  %v1551_v14 = vld [vmem:[%s20007_s1 + $0x2f68] sm:$0xff] }
 0x2d6   :  { %10224 = vmatpush1.bf16.msra.mxu0 %v14074_v40  ;;  %10757 = vmatpush1.bf16.msra.mxu1 %v14076_v41  ;;  %v14114_v40 = vcombine.low %v1514_v24, %v1518_v26  ;;  %v14116_v41 = vcombine.low %v1515_v49, %v1519_v15  ;;  %v1554_v24 = vld [vmem:[%s20007_s1 + $0x2f80] sm:$0xff]  ;;  %v1555_v49 = vld [vmem:[%s20007_s1 + $0x2f88] sm:$0xff] }
 0x2d7   :  { %10225 = vmatprep.subr.bf16.mxu0 %v14083_v25  ;;  %10758 = vmatprep.subr.bf16.mxu1 %v14085_v42  ;;  %v14123_v25 = vcombine.high %v1522_v34, %v1526_v35  ;;  %v14125_v42 = vcombine.high %v1523_v37, %v1527_v38  ;;  %v1558_v26 = vld [vmem:[%s20007_s1 + $0x2fa0] sm:$0xff]  ;;  %v1559_v15 = vld [vmem:[%s20007_s1 + $0x2fa8] sm:$0xff] }
 0x2da   :  { %10226 = vmatpush1.bf16.msra.mxu0 %v14082_v56  ;;  %10759 = vmatpush1.bf16.msra.mxu1 %v14084_v3  ;;  %v14122_v56 = vcombine.low %v1522_v34, %v1526_v35  ;;  %v14124_v3 = vcombine.low %v1523_v37, %v1527_v38  ;;  %v1562_v34 = vld [vmem:[%s20007_s1 + $0x2fc0] sm:$0xff]  ;;  %v1563_v37 = vld [vmem:[%s20007_s1 + $0x2fc8] sm:$0xff] }
 0x2db   :  { %10227 = vmatprep.subr.bf16.mxu0 %v14091_v48  ;;  %10760 = vmatprep.subr.bf16.mxu1 %v14093_v61  ;;  %v14131_v48 = vcombine.high %v1530_v44, %v1534_v47  ;;  %v14133_v61 = vcombine.high %v1531_v18, %v1535_v52  ;;  %v1566_v35 = vld [vmem:[%s20007_s1 + $0x2fe0] sm:$0xff]  ;;  %v1567_v38 = vld [vmem:[%s20007_s1 + $0x2fe8] sm:$0xff] }
 0x2de   :  { %10228 = vmatpush1.bf16.msra.mxu0 %v14090_v23  ;;  %10761 = vmatpush1.bf16.msra.mxu1 %v14092_v6  ;;  %v14130_v23 = vcombine.low %v1530_v44, %v1534_v47  ;;  %v14132_v6 = vcombine.low %v1531_v18, %v1535_v52  ;;  %v1570_v44 = vld [vmem:[%s20007_s1 + $0x3000] sm:$0xff]  ;;  %v1571_v18 = vld [vmem:[%s20007_s1 + $0x3008] sm:$0xff] }
 0x2df   :  { %10229 = vmatprep.subr.bf16.mxu0 %v14099_v7  ;;  %10762 = vmatprep.subr.bf16.mxu1 %v14101_v8  ;;  %v14139_v7 = vcombine.high %v1538_v39, %v1542_v0  ;;  %v14141_v8 = vcombine.high %v1539_v4, %v1543_v5  ;;  %v1574_v47 = vld [vmem:[%s20007_s1 + $0x3020] sm:$0xff]  ;;  %v1575_v52 = vld [vmem:[%s20007_s1 + $0x3028] sm:$0xff] }
 0x2e2   :  { %10230 = vmatpush1.bf16.msra.mxu0 %v14098_v17  ;;  %10763 = vmatpush1.bf16.msra.mxu1 %v14100_v53  ;;  %v14138_v17 = vcombine.low %v1538_v39, %v1542_v0  ;;  %v14140_v53 = vcombine.low %v1539_v4, %v1543_v5  ;;  %v1578_v39 = vld [vmem:[%s20007_s1 + $0x3040] sm:$0xff]  ;;  %v17234_v4 = vcombine.low %v17036_v54, %v17036_v54  ;;  %v1579_v5 = vld [vmem:[%s20007_s1 + $0x3048] sm:$0xff] }
 0x2e3   :  { %10231 = vmatprep.subr.bf16.mxu0 %v14107_v20  ;;  %10764 = vmatprep.subr.bf16.mxu1 %v14109_v59  ;;  %v14147_v20 = vcombine.high %v1546_v10, %v1550_v11  ;;  %v14149_v59 = vcombine.high %v1547_v13, %v1551_v14  ;;  %v1582_v0 = vld [vmem:[%s20007_s1 + $0x3060] sm:$0xff] }
 0x2e4   :  { %v1586_v54 = vld [vmem:[%s20007_s1 + $0x3080] sm:$0xff] }
 0x2e6   :  { %10232 = vmatpush1.bf16.msra.mxu0 %v14106_v28  ;;  %10765 = vmatpush1.bf16.msra.mxu1 %v14108_v29  ;;  %v14146_v28 = vcombine.low %v1546_v10, %v1550_v11  ;;  %v14148_v29 = vcombine.low %v1547_v13, %v1551_v14  ;;  %v1590_v11 = vld [vmem:[%s20007_s1 + $0x30a0] sm:$0xff]  ;;  %v1587_v13 = vld [vmem:[%s20007_s1 + $0x3088] sm:$0xff] }
 0x2e7   :  { %10233 = vmatprep.subr.bf16.mxu0 %v14115_v32  ;;  %10766 = vmatprep.subr.bf16.mxu1 %v14117_v33  ;;  %v14155_v32 = vcombine.high %v1554_v24, %v1558_v26  ;;  %v14157_v33 = vcombine.high %v1555_v49, %v1559_v15  ;;  %v1591_v14 = vld [vmem:[%s20007_s1 + $0x30a8] sm:$0xff] }
 0x2ea   :  { %10234 = vmatpush1.bf16.msra.mxu0 %v14114_v40  ;;  %10767 = vmatpush1.bf16.msra.mxu1 %v14116_v41  ;;  %v14154_v40 = vcombine.low %v1554_v24, %v1558_v26  ;;  %v14156_v41 = vcombine.low %v1555_v49, %v1559_v15  ;;  %v1594_v24 = vld [vmem:[%s20007_s1 + $0x30c0] sm:$0xff]  ;;  %v14680_v49 = vmov 0   ;;  %v1595_v15 = vld [vmem:[%s20007_s1 + $0x30c8] sm:$0xff] }
 0x2eb   :  { %10235 = vmatprep.subr.bf16.mxu0 %v14123_v25  ;;  %10768 = vmatprep.subr.bf16.mxu1 %v14125_v42  ;;  %v14163_v25 = vcombine.high %v1562_v34, %v1566_v35  ;;  %v14165_v42 = vcombine.high %v1563_v37, %v1567_v38  ;;  %v1598_v26 = vld [vmem:[%s20007_s1 + $0x30e0] sm:$0xff] }
 0x2ee   :  { %10236 = vmatpush1.bf16.msra.mxu0 %v14122_v56  ;;  %10769 = vmatpush1.bf16.msra.mxu1 %v14124_v3  ;;  %v14162_v56 = vcombine.low %v1562_v34, %v1566_v35  ;;  %v14164_v3 = vcombine.low %v1563_v37, %v1567_v38  ;;  %v1602_v35 = vld [vmem:[%s20007_s1 + $0x3100] sm:$0xff]  ;;  %v1603_v38 = vld [vmem:[%s20007_s1 + $0x3108] sm:$0xff] }
 0x2ef   :  { %10237 = vmatprep.subr.bf16.mxu0 %v14131_v48  ;;  %10770 = vmatprep.subr.bf16.mxu1 %v14133_v61  ;;  %v14171_v48 = vcombine.high %v1570_v44, %v1574_v47  ;;  %v14173_v61 = vcombine.high %v1571_v18, %v1575_v52  ;;  %v1606_v37 = vld [vmem:[%s20007_s1 + $0x3120] sm:$0xff] }
 0x2f2   :  { %10238 = vmatpush1.bf16.msra.mxu0 %v14130_v23  ;;  %10771 = vmatpush1.bf16.msra.mxu1 %v14132_v6  ;;  %v1583_v23 = vld [vmem:[%s20007_s1 + $0x3068] sm:$0xff]  ;;  %v14170_v6 = vcombine.low %v1570_v44, %v1574_v47  ;;  %v1610_v47 = vld [vmem:[%s20007_s1 + $0x3140] sm:$0xff] }
 0x2f3   :  { %10239 = vmatprep.subr.bf16.mxu0 %v14139_v7  ;;  %10772 = vmatprep.subr.bf16.mxu1 %v14141_v8  ;;  %v14172_v7 = vcombine.low %v1571_v18, %v1575_v52  ;;  %v14179_v8 = vcombine.high %v1578_v39, %v1582_v0  ;;  %v14181_v10 = vcombine.high %v1579_v5, %v1583_v23  ;;  %v1614_v18 = vld [vmem:[%s20007_s1 + $0x3160] sm:$0xff]  ;;  %v1611_v52 = vld [vmem:[%s20007_s1 + $0x3148] sm:$0xff] }
 0x2f6   :  { %10240 = vmatpush1.bf16.msra.mxu0 %v14138_v17  ;;  %10773 = vmatpush1.bf16.msra.mxu1 %v14140_v53  ;;  %v14178_v17 = vcombine.low %v1578_v39, %v1582_v0  ;;  %v14180_v53 = vcombine.low %v1579_v5, %v1583_v23  ;;  %v1618_v0 = vld [vmem:[%s20007_s1 + $0x3180] sm:$0xff]  ;;  %v1619_v23 = vld [vmem:[%s20007_s1 + $0x3188] sm:$0xff] }
 0x2f7   :  { %10241 = vmatprep.subr.bf16.mxu0 %v14147_v20  ;;  %10774 = vmatprep.subr.bf16.mxu1 %v14149_v59  ;;  %v14187_v20 = vcombine.high %v1586_v54, %v1590_v11  ;;  %v14189_v59 = vcombine.high %v1587_v13, %v1591_v14  ;;  %v1622_v5 = vld [vmem:[%s20007_s1 + $0x31a0] sm:$0xff] }
 0x2fa   :  { %10242 = vmatpush1.bf16.msra.mxu0 %v14146_v28  ;;  %10775 = vmatpush1.bf16.msra.mxu1 %v14148_v29  ;;  %v1599_v28 = vld [vmem:[%s20007_s1 + $0x30e8] sm:$0xff]  ;;  %v14186_v29 = vcombine.low %v1586_v54, %v1590_v11  ;;  %v1626_v11 = vld [vmem:[%s20007_s1 + $0x31c0] sm:$0xff] }
 0x2fb   :  { %10243 = vmatprep.subr.bf16.mxu0 %v14155_v32  ;;  %10776 = vmatprep.subr.bf16.mxu1 %v14157_v33  ;;  %v14188_v32 = vcombine.low %v1587_v13, %v1591_v14  ;;  %v14195_v33 = vcombine.high %v1594_v24, %v1598_v26  ;;  %v14197_v34 = vcombine.high %v1595_v15, %v1599_v28  ;;  %v1630_v13 = vld [vmem:[%s20007_s1 + $0x31e0] sm:$0xff]  ;;  %v1627_v14 = vld [vmem:[%s20007_s1 + $0x31c8] sm:$0xff] }
 0x2fe   :  { %10244 = vmatpush1.bf16.msra.mxu0 %v14154_v40  ;;  %10777 = vmatpush1.bf16.msra.mxu1 %v14156_v41  ;;  %v1607_v40 = vld [vmem:[%s20007_s1 + $0x3128] sm:$0xff]  ;;  %v14194_v41 = vcombine.low %v1594_v24, %v1598_v26  ;;  %v36_v26 = vld [vmem:[%s20007_s1 + $0x10] sm:$0xff] }
 0x2ff   :  { %10245 = vmatprep.subr.bf16.mxu0 %v14163_v25  ;;  %10778 = vmatprep.subr.bf16.mxu1 %v14165_v42  ;;  %v14196_v25 = vcombine.low %v1595_v15, %v1599_v28  ;;  %v14203_v42 = vcombine.high %v1602_v35, %v1606_v37  ;;  %v14205_v44 = vcombine.high %v1603_v38, %v1607_v40  ;;  %v40_v15 = vld [vmem:[%s20007_s1 + $0x30] sm:$0xff]  ;;  %v37_v28 = vld [vmem:[%s20007_s1 + $0x18] sm:$0xff] }
 0x302   :  { %10246 = vmatpush1.bf16.msra.mxu0 %v14162_v56  ;;  %10779 = vmatpush1.bf16.msra.mxu1 %v14164_v3  ;;  %v1615_v56 = vld [vmem:[%s20007_s1 + $0x3168] sm:$0xff]  ;;  %v14202_v3 = vcombine.low %v1602_v35, %v1606_v37  ;;  %v44_v37 = vld [vmem:[%s20007_s1 + $0x50] sm:$0xff] }
 0x303   :  { %10256 = vmatprep.subr.bf16.mxu0 %v14171_v48  ;;  %10789 = vmatprep.subr.bf16.mxu1 %v14173_v61  ;;  %v14204_v48 = vcombine.low %v1603_v38, %v1607_v40  ;;  %v14211_v61 = vcombine.high %v1610_v47, %v1614_v18  ;;  %v14213_v39 = vcombine.high %v1611_v52, %v1615_v56  ;;  %v48_v38 = vld [vmem:[%s20007_s1 + $0x70] sm:$0xff]  ;;  %v14614_v40 = vld [vmem:[%s20008_s0 + $0x60] ss:$0 sps:$4 sm:$0xff]  }
 0x305   :  { %10248 = vmatmul.mubr.bf16.vlgmr.msra.gmra.mrb[0].mxu0 %v17234_v4  ;;  %10781 = vmatmul.mubr.bf16.vlgmr.msra.gmra.mrb[0].mxu1 %v17234_v4 }
 0x306   :  { %10257 = vmatpush1.bf16.msra.mxu0 %v14170_v6  ;;  %10790 = vmatpush1.bf16.msra.mxu1 %v14172_v7  ;;  %v1623_v6 = vld [vmem:[%s20007_s1 + $0x31a8] sm:$0xff]  ;;  %v14210_v7 = vcombine.low %v1610_v47, %v1614_v18  ;;  %v12647_v47 = vcombine.high %v44_v37, %v48_v38 }
 0x307   :  { %10258 = vmatprep.subr.bf16.mxu0 %v14179_v8  ;;  %10791 = vmatprep.subr.bf16.mxu1 %v14181_v10  ;;  %v14212_v8 = vcombine.low %v1611_v52, %v1615_v56  ;;  %v14219_v10 = vcombine.high %v1618_v0, %v1622_v5  ;;  %v14221_v54 = vcombine.high %v1619_v23, %v1623_v6  ;;  %v52_v52 = vld [vmem:[%s20007_s1 + $0x90] sm:$0xff] }
 0x308   :  { %10288 = vmatprep.mubr.bf16.mxu0 %v14680_v49  ;;  %10821 = vmatprep.mubr.bf16.mxu1 %v14680_v49  ;;  %v56_v56 = vld [vmem:[%s20007_s1 + $0xb0] sm:$0xff] }
 0x30a   :  { %10259 = vmatpush1.bf16.msra.mxu0 %v14178_v17  ;;  %10792 = vmatpush1.bf16.msra.mxu1 %v14180_v53  ;;  %v1631_v17 = vld [vmem:[%s20007_s1 + $0x31e8] sm:$0xff]  ;;  %v14218_v53 = vcombine.low %v1618_v0, %v1622_v5  ;;  %v12655_v0 = vcombine.high %v52_v52, %v56_v56 }
 0x30b   :  { %10260 = vmatprep.subr.bf16.mxu0 %v14187_v20  ;;  %10793 = vmatprep.subr.bf16.mxu1 %v14189_v59  ;;  %v14220_v20 = vcombine.low %v1619_v23, %v1623_v6  ;;  %v14227_v59 = vcombine.high %v1626_v11, %v1630_v13  ;;  %v14229_v24 = vcombine.high %v1627_v14, %v1631_v17  ;;  %v60_v23 = vld [vmem:[%s20007_s1 + $0xd0] sm:$0xff] }
 0x30c   :  { %v64_v6 = vld [vmem:[%s20007_s1 + $0xf0] sm:$0xff] }
 0x30e   :  { %10261 = vmatpush1.bf16.msra.mxu0 %v14186_v29  ;;  %10794 = vmatpush1.bf16.msra.mxu1 %v14188_v32  ;;  %v41_v29 = vld [vmem:[%s20007_s1 + $0x38] sm:$0xff]  ;;  %v14226_v32 = vcombine.low %v1626_v11, %v1630_v13  ;;  %v12663_v11 = vcombine.high %v60_v23, %v64_v6 }
 0x30f   :  { %10262 = vmatprep.subr.bf16.mxu0 %v14195_v33  ;;  %10795 = vmatprep.subr.bf16.mxu1 %v14197_v34  ;;  %v14228_v33 = vcombine.low %v1627_v14, %v1631_v17  ;;  %v12639_v34 = vcombine.high %v36_v26, %v40_v15  ;;  %v12641_v35 = vcombine.high %v37_v28, %v41_v29  ;;  %v68_v14 = vld [vmem:[%s20007_s1 + $0x110] sm:$0xff] }
 0x310   :  { %v72_v17 = vld [vmem:[%s20007_s1 + $0x130] sm:$0xff] }
 0x312   :  { %10263 = vmatpush1.bf16.msra.mxu0 %v14194_v41  ;;  %10796 = vmatpush1.bf16.msra.mxu1 %v14196_v25  ;;  %v45_v41 = vld [vmem:[%s20007_s1 + $0x58] sm:$0xff] }
 0x313   :  { %10264 = vmatprep.subr.bf16.mxu0 %v14203_v42  ;;  %10797 = vmatprep.subr.bf16.mxu1 %v14205_v44  ;;  %v49_v25 = vld [vmem:[%s20007_s1 + $0x78] sm:$0xff]  ;;  %v12638_v42 = vcombine.low %v36_v26, %v40_v15  ;;  %v12640_v44 = vcombine.low %v37_v28, %v41_v29  ;;  %v76_v15 = vld [vmem:[%s20007_s1 + $0x150] sm:$0xff] }
 0x314   :  { %v12649_v18 = vcombine.high %v45_v41, %v49_v25  ;;  %v80_v28 = vld [vmem:[%s20007_s1 + $0x170] sm:$0xff]  ;;  %v77_v29 = vld [vmem:[%s20007_s1 + $0x158] sm:$0xff] }
 0x316   :  { %10265 = vmatpush1.bf16.msra.mxu0 %v14202_v3  ;;  %10798 = vmatpush1.bf16.msra.mxu1 %v14204_v48  ;;  %v53_v3 = vld [vmem:[%s20007_s1 + $0x98] sm:$0xff] }
 0x317   :  { %10266 = vmatprep.subr.bf16.mxu0 %v14211_v61  ;;  %10799 = vmatprep.subr.bf16.mxu1 %v14213_v39  ;;  %v57_v48 = vld [vmem:[%s20007_s1 + $0xb8] sm:$0xff]  ;;  %v12646_v61 = vcombine.low %v44_v37, %v48_v38  ;;  %v12648_v39 = vcombine.low %v45_v41, %v49_v25  ;;  %v84_v38 = vld [vmem:[%s20007_s1 + $0x190] sm:$0xff] }
 0x318   :  { %v12657_v5 = vcombine.high %v53_v3, %v57_v48  ;;  %v85_v41 = vld [vmem:[%s20007_s1 + $0x198] sm:$0xff] }
 0x319   :  { %v89_v25 = vld [vmem:[%s20007_s1 + $0x1b8] sm:$0xff] }
 0x31a   :  { %10267 = vmatpush1.bf16.msra.mxu0 %v14210_v7  ;;  %10800 = vmatpush1.bf16.msra.mxu1 %v14212_v8  ;;  %v61_v7 = vld [vmem:[%s20007_s1 + $0xd8] sm:$0xff] }
 0x31b   :  { %10268 = vmatprep.subr.bf16.mxu0 %v14219_v10  ;;  %10801 = vmatprep.subr.bf16.mxu1 %v14221_v54  ;;  %v65_v8 = vld [vmem:[%s20007_s1 + $0xf8] sm:$0xff]  ;;  %v12654_v10 = vcombine.low %v52_v52, %v56_v56  ;;  %v12656_v54 = vcombine.low %v53_v3, %v57_v48  ;;  %v92_v52 = vld [vmem:[%s20007_s1 + $0x1d0] sm:$0xff] }
 0x31c   :  { %v12665_v13 = vcombine.high %v61_v7, %v65_v8  ;;  %v96_v56 = vld [vmem:[%s20007_s1 + $0x1f0] sm:$0xff]  ;;  %v93_v3 = vld [vmem:[%s20007_s1 + $0x1d8] sm:$0xff] }
 0x31d   :  { %v97_v48 = vld [vmem:[%s20007_s1 + $0x1f8] sm:$0xff] }
 0x31e   :  { %10269 = vmatpush1.bf16.msra.mxu0 %v14218_v53  ;;  %10802 = vmatpush1.bf16.msra.mxu1 %v14220_v20  ;;  %v73_v53 = vld [vmem:[%s20007_s1 + $0x138] sm:$0xff]  ;;  %v12662_v20 = vcombine.low %v60_v23, %v64_v6  ;;  %v100_v23 = vld [vmem:[%s20007_s1 + $0x210] sm:$0xff] }
 0x31f   :  { %10270 = vmatprep.subr.bf16.mxu0 %v14227_v59  ;;  %10803 = vmatprep.subr.bf16.mxu1 %v14229_v24  ;;  %v12664_v59 = vcombine.low %v61_v7, %v65_v8  ;;  %v12671_v24 = vcombine.high %v68_v14, %v72_v17  ;;  %v104_v6 = vld [vmem:[%s20007_s1 + $0x230] sm:$0xff]  ;;  %v101_v7 = vld [vmem:[%s20007_s1 + $0x218] sm:$0xff] }
 0x320   :  { %v105_v8 = vld [vmem:[%s20007_s1 + $0x238] sm:$0xff] }
 0x322   :  { %10271 = vmatpush1.bf16.msra.mxu0 %v14226_v32  ;;  %10804 = vmatpush1.bf16.msra.mxu1 %v14228_v33  ;;  %v81_v32 = vld [vmem:[%s20007_s1 + $0x178] sm:$0xff]  ;;  %v12670_v33 = vcombine.low %v68_v14, %v72_v17  ;;  %v108_v14 = vld [vmem:[%s20007_s1 + $0x250] sm:$0xff] }
 0x323   :  { %10830 = vmatprep.subr.bf16.mxu0 %v12639_v34  ;;  %11363 = vmatprep.subr.bf16.mxu1 %v12641_v35  ;;  %v12679_v35 = vcombine.high %v76_v15, %v80_v28  ;;  %v12681_v37 = vcombine.high %v77_v29, %v81_v32  ;;  %v112_v17 = vld [vmem:[%s20007_s1 + $0x270] sm:$0xff] }
 0x325   :  { %10289 = vmatmul.mubr.bf16.vlgmr.msra.gmra.mrb[0].mxu0 %v14614_v40  ;;  %10822 = vmatmul.mubr.bf16.vlgmr.msra.gmra.mrb[0].mxu1 %v14614_v40  ;;  %v88_v40 = vld [vmem:[%s20007_s1 + $0x1b0] sm:$0xff] }
 0x326   :  { %10831 = vmatpush1.bf16.msra.mxu0 %v12638_v42  ;;  %11364 = vmatpush1.bf16.msra.mxu1 %v12640_v44  ;;  %v12678_v42 = vcombine.low %v76_v15, %v80_v28  ;;  %v12680_v44 = vcombine.low %v77_v29, %v81_v32  ;;  %v116_v15 = vld [vmem:[%s20007_s1 + $0x290] sm:$0xff]  ;;  %v117_v29 = vld [vmem:[%s20007_s1 + $0x298] sm:$0xff] }
 0x327   :  { %10832 = vmatprep.subr.bf16.mxu0 %v12647_v47  ;;  %11365 = vmatprep.subr.bf16.mxu1 %v12649_v18  ;;  %v12687_v47 = vcombine.high %v84_v38, %v88_v40  ;;  %v12689_v18 = vcombine.high %v85_v41, %v89_v25  ;;  %v120_v28 = vld [vmem:[%s20007_s1 + $0x2b0] sm:$0xff]  ;;  %v121_v32 = vld [vmem:[%s20007_s1 + $0x2b8] sm:$0xff] }
 0x328   :  { %10862 = vmatprep.mubr.bf16.mxu0 %v14809_v57  ;;  %11395 = vmatprep.mubr.bf16.mxu1 %v14809_v57  ;;  %v69_v57 = vld [vmem:[%s20007_s1 + $0x118] sm:$0xff] }
 0x329   :  { %v12673_v26 = vcombine.high %v69_v57, %v73_v53  ;;  %v12672_v34 = vcombine.low %v69_v57, %v73_v53  ;;  %v109_v57 = vld [vmem:[%s20007_s1 + $0x258] sm:$0xff] }
 0x32a   :  { %10833 = vmatpush1.bf16.msra.mxu0 %v12646_v61  ;;  %11366 = vmatpush1.bf16.msra.mxu1 %v12648_v39  ;;  %v12686_v61 = vcombine.low %v84_v38, %v88_v40  ;;  %v12688_v39 = vcombine.low %v85_v41, %v89_v25  ;;  %v113_v53 = vld [vmem:[%s20007_s1 + $0x278] sm:$0xff]  ;;  %v124_v38 = vld [vmem:[%s20007_s1 + $0x2d0] sm:$0xff] }
 0x32b   :  { %10834 = vmatprep.subr.bf16.mxu0 %v12655_v0  ;;  %11367 = vmatprep.subr.bf16.mxu1 %v12657_v5  ;;  %v12695_v0 = vcombine.high %v92_v52, %v96_v56  ;;  %v12697_v5 = vcombine.high %v93_v3, %v97_v48  ;;  %v128_v40 = vld [vmem:[%s20007_s1 + $0x2f0] sm:$0xff]  ;;  %v125_v41 = vld [vmem:[%s20007_s1 + $0x2d8] sm:$0xff] }
 0x32c   :  { %v129_v25 = vld [vmem:[%s20007_s1 + $0x2f8] sm:$0xff] }
 0x32e   :  { %10835 = vmatpush1.bf16.msra.mxu0 %v12654_v10  ;;  %11368 = vmatpush1.bf16.msra.mxu1 %v12656_v54  ;;  %v12694_v10 = vcombine.low %v92_v52, %v96_v56  ;;  %v12696_v54 = vcombine.low %v93_v3, %v97_v48  ;;  %v132_v52 = vld [vmem:[%s20007_s1 + $0x310] sm:$0xff]  ;;  %v133_v3 = vld [vmem:[%s20007_s1 + $0x318] sm:$0xff] }
 0x32f   :  { %10836 = vmatprep.subr.bf16.mxu0 %v12663_v11  ;;  %11369 = vmatprep.subr.bf16.mxu1 %v12665_v13  ;;  %v12703_v11 = vcombine.high %v100_v23, %v104_v6  ;;  %v12705_v13 = vcombine.high %v101_v7, %v105_v8  ;;  %v136_v56 = vld [vmem:[%s20007_s1 + $0x330] sm:$0xff]  ;;  %v137_v48 = vld [vmem:[%s20007_s1 + $0x338] sm:$0xff] }
 0x332   :  { %10837 = vmatpush1.bf16.msra.mxu0 %v12662_v20  ;;  %11370 = vmatpush1.bf16.msra.mxu1 %v12664_v59  ;;  %v12702_v20 = vcombine.low %v100_v23, %v104_v6  ;;  %v12704_v59 = vcombine.low %v101_v7, %v105_v8  ;;  %v140_v23 = vld [vmem:[%s20007_s1 + $0x350] sm:$0xff]  ;;  %v141_v7 = vld [vmem:[%s20007_s1 + $0x358] sm:$0xff] }
 0x333   :  { %10838 = vmatprep.subr.bf16.mxu0 %v12671_v24  ;;  %11371 = vmatprep.subr.bf16.mxu1 %v12673_v26  ;;  %v12711_v24 = vcombine.high %v108_v14, %v112_v17  ;;  %v12713_v26 = vcombine.high %v109_v57, %v113_v53  ;;  %v144_v6 = vld [vmem:[%s20007_s1 + $0x370] sm:$0xff]  ;;  %v145_v8 = vld [vmem:[%s20007_s1 + $0x378] sm:$0xff] }
 0x336   :  { %10839 = vmatpush1.bf16.msra.mxu0 %v12670_v33  ;;  %11372 = vmatpush1.bf16.msra.mxu1 %v12672_v34  ;;  %v12710_v33 = vcombine.low %v108_v14, %v112_v17  ;;  %v12712_v34 = vcombine.low %v109_v57, %v113_v53  ;;  %v148_v14 = vld [vmem:[%s20007_s1 + $0x390] sm:$0xff]  ;;  %v149_v57 = vld [vmem:[%s20007_s1 + $0x398] sm:$0xff] }
 0x337   :  { %10840 = vmatprep.subr.bf16.mxu0 %v12679_v35  ;;  %11373 = vmatprep.subr.bf16.mxu1 %v12681_v37  ;;  %v12719_v35 = vcombine.high %v116_v15, %v120_v28  ;;  %v12721_v37 = vcombine.high %v117_v29, %v121_v32  ;;  %v152_v17 = vld [vmem:[%s20007_s1 + $0x3b0] sm:$0xff]  ;;  %v153_v53 = vld [vmem:[%s20007_s1 + $0x3b8] sm:$0xff] }
 0x33a   :  { %10841 = vmatpush1.bf16.msra.mxu0 %v12678_v42  ;;  %11374 = vmatpush1.bf16.msra.mxu1 %v12680_v44  ;;  %v12718_v42 = vcombine.low %v116_v15, %v120_v28  ;;  %v12720_v44 = vcombine.low %v117_v29, %v121_v32  ;;  %v156_v15 = vld [vmem:[%s20007_s1 + $0x3d0] sm:$0xff]  ;;  %v157_v29 = vld [vmem:[%s20007_s1 + $0x3d8] sm:$0xff] }
 0x33b   :  { %10842 = vmatprep.subr.bf16.mxu0 %v12687_v47  ;;  %11375 = vmatprep.subr.bf16.mxu1 %v12689_v18  ;;  %v12727_v47 = vcombine.high %v124_v38, %v128_v40  ;;  %v12729_v18 = vcombine.high %v125_v41, %v129_v25  ;;  %v160_v28 = vld [vmem:[%s20007_s1 + $0x3f0] sm:$0xff]  ;;  %v161_v32 = vld [vmem:[%s20007_s1 + $0x3f8] sm:$0xff] }
 0x33e   :  { %10843 = vmatpush1.bf16.msra.mxu0 %v12686_v61  ;;  %11376 = vmatpush1.bf16.msra.mxu1 %v12688_v39  ;;  %v12726_v61 = vcombine.low %v124_v38, %v128_v40  ;;  %v12728_v39 = vcombine.low %v125_v41, %v129_v25  ;;  %v164_v38 = vld [vmem:[%s20007_s1 + $0x410] sm:$0xff]  ;;  %v165_v41 = vld [vmem:[%s20007_s1 + $0x418] sm:$0xff] }
 0x33f   :  { %10844 = vmatprep.subr.bf16.mxu0 %v12695_v0  ;;  %11377 = vmatprep.subr.bf16.mxu1 %v12697_v5  ;;  %v12735_v0 = vcombine.high %v132_v52, %v136_v56  ;;  %v12737_v5 = vcombine.high %v133_v3, %v137_v48  ;;  %v168_v40 = vld [vmem:[%s20007_s1 + $0x430] sm:$0xff]  ;;  %v169_v25 = vld [vmem:[%s20007_s1 + $0x438] sm:$0xff] }
 0x342   :  { %10845 = vmatpush1.bf16.msra.mxu0 %v12694_v10  ;;  %11378 = vmatpush1.bf16.msra.mxu1 %v12696_v54  ;;  %v12734_v10 = vcombine.low %v132_v52, %v136_v56  ;;  %v12736_v54 = vcombine.low %v133_v3, %v137_v48  ;;  %v172_v52 = vld [vmem:[%s20007_s1 + $0x450] sm:$0xff]  ;;  %v173_v3 = vld [vmem:[%s20007_s1 + $0x458] sm:$0xff] }
 0x343   :  { %10846 = vmatprep.subr.bf16.mxu0 %v12703_v11  ;;  %11379 = vmatprep.subr.bf16.mxu1 %v12705_v13  ;;  %v12743_v11 = vcombine.high %v140_v23, %v144_v6  ;;  %v12745_v13 = vcombine.high %v141_v7, %v145_v8  ;;  %v176_v56 = vld [vmem:[%s20007_s1 + $0x470] sm:$0xff]  ;;  %v177_v48 = vld [vmem:[%s20007_s1 + $0x478] sm:$0xff] }
 0x346   :  { %10847 = vmatpush1.bf16.msra.mxu0 %v12702_v20  ;;  %11380 = vmatpush1.bf16.msra.mxu1 %v12704_v59  ;;  %v12742_v20 = vcombine.low %v140_v23, %v144_v6  ;;  %v12744_v59 = vcombine.low %v141_v7, %v145_v8  ;;  %v180_v23 = vld [vmem:[%s20007_s1 + $0x490] sm:$0xff]  ;;  %v181_v7 = vld [vmem:[%s20007_s1 + $0x498] sm:$0xff] }
 0x347   :  { %10848 = vmatprep.subr.bf16.mxu0 %v12711_v24  ;;  %11381 = vmatprep.subr.bf16.mxu1 %v12713_v26  ;;  %v12751_v24 = vcombine.high %v148_v14, %v152_v17  ;;  %v12753_v26 = vcombine.high %v149_v57, %v153_v53  ;;  %v184_v6 = vld [vmem:[%s20007_s1 + $0x4b0] sm:$0xff]  ;;  %v185_v8 = vld [vmem:[%s20007_s1 + $0x4b8] sm:$0xff] }
 0x34a   :  { %10849 = vmatpush1.bf16.msra.mxu0 %v12710_v33  ;;  %11382 = vmatpush1.bf16.msra.mxu1 %v12712_v34  ;;  %v12750_v33 = vcombine.low %v148_v14, %v152_v17  ;;  %v12752_v34 = vcombine.low %v149_v57, %v153_v53  ;;  %v188_v14 = vld [vmem:[%s20007_s1 + $0x4d0] sm:$0xff]  ;;  %v193_v57 = vld [vmem:[%s20007_s1 + $0x4f8] sm:$0xff]  ;;  %v12782_v53 = vcombine.low %v180_v23, %v184_v6 }
 0x34b   :  { %10850 = vmatprep.subr.bf16.mxu0 %v12719_v35  ;;  %11383 = vmatprep.subr.bf16.mxu1 %v12721_v37  ;;  %v12759_v35 = vcombine.high %v156_v15, %v160_v28  ;;  %v12761_v37 = vcombine.high %v157_v29, %v161_v32  ;;  %v192_v17 = vld [vmem:[%s20007_s1 + $0x4f0] sm:$0xff] }
 0x34e   :  { %10851 = vmatpush1.bf16.msra.mxu0 %v12718_v42  ;;  %11384 = vmatpush1.bf16.msra.mxu1 %v12720_v44  ;;  %v12758_v42 = vcombine.low %v156_v15, %v160_v28  ;;  %v12760_v44 = vcombine.low %v157_v29, %v161_v32  ;;  %v200_v15 = vld [vmem:[%s20007_s1 + $0x530] sm:$0xff]  ;;  %v201_v28 = vld [vmem:[%s20007_s1 + $0x538] sm:$0xff]  ;;  %v12790_v29 = vcombine.low %v188_v14, %v192_v17 }
 0x34f   :  { %10852 = vmatprep.subr.bf16.mxu0 %v12727_v47  ;;  %11385 = vmatprep.subr.bf16.mxu1 %v12729_v18  ;;  %v12767_v47 = vcombine.high %v164_v38, %v168_v40  ;;  %v12769_v18 = vcombine.high %v165_v41, %v169_v25 }
 0x352   :  { %10853 = vmatpush1.bf16.msra.mxu0 %v12726_v61  ;;  %11386 = vmatpush1.bf16.msra.mxu1 %v12728_v39  ;;  %v12766_v61 = vcombine.low %v164_v38, %v168_v40  ;;  %v12768_v39 = vcombine.low %v165_v41, %v169_v25  ;;  %v205_v38 = vld [vmem:[%s20007_s1 + $0x558] sm:$0xff] }
 0x353   :  { %10854 = vmatprep.subr.bf16.mxu0 %v12735_v0  ;;  %11387 = vmatprep.subr.bf16.mxu1 %v12737_v5  ;;  %v12775_v0 = vcombine.high %v172_v52, %v176_v56  ;;  %v12777_v5 = vcombine.high %v173_v3, %v177_v48  ;;  %v209_v40 = vld [vmem:[%s20007_s1 + $0x578] sm:$0xff] }
 0x356   :  { %10855 = vmatpush1.bf16.msra.mxu0 %v12734_v10  ;;  %11388 = vmatpush1.bf16.msra.mxu1 %v12736_v54  ;;  %v12774_v10 = vcombine.low %v172_v52, %v176_v56  ;;  %v12776_v54 = vcombine.low %v173_v3, %v177_v48  ;;  %v213_v52 = vld [vmem:[%s20007_s1 + $0x598] sm:$0xff]  ;;  %v12808_v48 = vcombine.low %v205_v38, %v209_v40 }
 0x357   :  { %10856 = vmatprep.subr.bf16.mxu0 %v12743_v11  ;;  %11389 = vmatprep.subr.bf16.mxu1 %v12745_v13  ;;  %v12783_v11 = vcombine.high %v180_v23, %v184_v6  ;;  %v12785_v13 = vcombine.high %v181_v7, %v185_v8  ;;  %v217_v56 = vld [vmem:[%s20007_s1 + $0x5b8] sm:$0xff] }
 0x358   :  { %v221_v23 = vld [vmem:[%s20007_s1 + $0x5d8] sm:$0xff] }
 0x359   :  { %v225_v6 = vld [vmem:[%s20007_s1 + $0x5f8] sm:$0xff] }
 0x35a   :  { %10857 = vmatpush1.bf16.msra.mxu0 %v12742_v20  ;;  %11390 = vmatpush1.bf16.msra.mxu1 %v12744_v59  ;;  %v12784_v20 = vcombine.low %v181_v7, %v185_v8  ;;  %v12791_v59 = vcombine.high %v188_v14, %v192_v17  ;;  %v12816_v8 = vcombine.low %v213_v52, %v217_v56  ;;  %v229_v14 = vld [vmem:[%s20007_s1 + $0x618] sm:$0xff] }
 0x35b   :  { %10858 = vmatprep.subr.bf16.mxu0 %v12751_v24  ;;  %11391 = vmatprep.subr.bf16.mxu1 %v12753_v26  ;;  %v196_v26 = vld [vmem:[%s20007_s1 + $0x510] sm:$0xff]  ;;  %v233_v17 = vld [vmem:[%s20007_s1 + $0x638] sm:$0xff] }
 0x35c   :  { %v12798_v41 = vcombine.low %v196_v26, %v200_v15 }
 0x35e   :  { %10859 = vmatpush1.bf16.msra.mxu0 %v12750_v33  ;;  %11392 = vmatpush1.bf16.msra.mxu1 %v12752_v34  ;;  %v12799_v33 = vcombine.high %v196_v26, %v200_v15  ;;  %v237_v26 = vld [vmem:[%s20007_s1 + $0x658] sm:$0xff] }
 0x35f   :  { %10860 = vmatprep.subr.bf16.mxu0 %v12759_v35  ;;  %11393 = vmatprep.subr.bf16.mxu1 %v12761_v37  ;;  %v204_v35 = vld [vmem:[%s20007_s1 + $0x550] sm:$0xff]  ;;  %v241_v15 = vld [vmem:[%s20007_s1 + $0x678] sm:$0xff] }
 0x360   :  { %v208_v37 = vld [vmem:[%s20007_s1 + $0x570] sm:$0xff] }
 0x361   :  { %v12806_v3 = vcombine.low %v204_v35, %v208_v37 }
 0x362   :  { %10861 = vmatpush1.bf16.msra.mxu0 %v12758_v42  ;;  %11394 = vmatpush1.bf16.msra.mxu1 %v12760_v44  ;;  %v12807_v42 = vcombine.high %v204_v35, %v208_v37  ;;  %v12809_v44 = vcombine.high %v205_v38, %v209_v40  ;;  %v245_v35 = vld [vmem:[%s20007_s1 + $0x698] sm:$0xff]  ;;  %v12840_v40 = vcombine.low %v237_v26, %v241_v15 }
 0x363   :  { %10871 = vmatprep.subr.bf16.mxu0 %v12767_v47  ;;  %11404 = vmatprep.subr.bf16.mxu1 %v12769_v18  ;;  %v212_v47 = vld [vmem:[%s20007_s1 + $0x590] sm:$0xff]  ;;  %v249_v37 = vld [vmem:[%s20007_s1 + $0x6b8] sm:$0xff] }
 0x364   :  { %v216_v18 = vld [vmem:[%s20007_s1 + $0x5b0] sm:$0xff] }
 0x365   :  { %10863 = vmatmul.mubr.bf16.vlgmr.msra.gmra.mrb[4].mxu0 %v14935_v12  ;;  %11396 = vmatmul.mubr.bf16.vlgmr.msra.gmra.mrb[4].mxu1 %v14935_v12  ;;  %v189_v12 = vld [vmem:[%s20007_s1 + $0x4d8] sm:$0xff]  ;;  %v12814_v7 = vcombine.low %v212_v47, %v216_v18 }
 0x366   :  { %10872 = vmatpush1.bf16.msra.mxu0 %v12766_v61  ;;  %11405 = vmatpush1.bf16.msra.mxu1 %v12768_v39  ;;  %v12793_v24 = vcombine.high %v189_v12, %v193_v57  ;;  %v12792_v32 = vcombine.low %v189_v12, %v193_v57  ;;  %v12815_v61 = vcombine.high %v212_v47, %v216_v18  ;;  %v253_v47 = vld [vmem:[%s20007_s1 + $0x6d8] sm:$0xff] }
 0x367   :  { %10873 = vmatprep.subr.bf16.mxu0 %v12775_v0  ;;  %11406 = vmatprep.subr.bf16.mxu1 %v12777_v5  ;;  %v12817_v39 = vcombine.high %v213_v52, %v217_v56  ;;  %v220_v0 = vld [vmem:[%s20007_s1 + $0x5d0] sm:$0xff]  ;;  %v12824_v57 = vcombine.low %v221_v23, %v225_v6  ;;  %v257_v18 = vld [vmem:[%s20007_s1 + $0x6f8] sm:$0xff]  ;;  %v12848_v56 = vcombine.low %v245_v35, %v249_v37 }
 0x368   :  { %10903 = vmatprep.mubr.bf16.mxu0 %v14956_v21  ;;  %11436 = vmatprep.mubr.bf16.mxu1 %v14956_v21  ;;  %v197_v21 = vld [vmem:[%s20007_s1 + $0x518] sm:$0xff]  ;;  %v224_v5 = vld [vmem:[%s20007_s1 + $0x5f0] sm:$0xff] }
 0x369   :  { %v12801_v34 = vcombine.high %v197_v21, %v201_v28  ;;  %v12800_v25 = vcombine.low %v197_v21, %v201_v28  ;;  %v12822_v12 = vcombine.low %v220_v0, %v224_v5  ;;  %v12832_v28 = vcombine.low %v229_v14, %v233_v17 }
 0x36a   :  { %10874 = vmatpush1.bf16.msra.mxu0 %v12774_v10  ;;  %11407 = vmatpush1.bf16.msra.mxu1 %v12776_v54  ;;  %v12823_v10 = vcombine.high %v220_v0, %v224_v5  ;;  %v12825_v54 = vcombine.high %v221_v23, %v225_v6  ;;  %v261_v0 = vld [vmem:[%s20007_s1 + $0x718] sm:$0xff]  ;;  %v12856_v6 = vcombine.low %v253_v47, %v257_v18 }
 0x36b   :  { %10875 = vmatprep.subr.bf16.mxu0 %v12783_v11  ;;  %11408 = vmatprep.subr.bf16.mxu1 %v12785_v13  ;;  %v228_v11 = vld [vmem:[%s20007_s1 + $0x610] sm:$0xff]  ;;  %v265_v5 = vld [vmem:[%s20007_s1 + $0x738] sm:$0xff] }
 0x36c   :  { %v232_v13 = vld [vmem:[%s20007_s1 + $0x630] sm:$0xff] }
 0x36d   :  { %v12830_v21 = vcombine.low %v228_v11, %v232_v13 }
 0x36e   :  { %10876 = vmatpush1.bf16.msra.mxu0 %v12782_v53  ;;  %11409 = vmatpush1.bf16.msra.mxu1 %v12784_v20  ;;  %v12831_v53 = vcombine.high %v228_v11, %v232_v13  ;;  %v12833_v20 = vcombine.high %v229_v14, %v233_v17  ;;  %v269_v11 = vld [vmem:[%s20007_s1 + $0x758] sm:$0xff]  ;;  %v12864_v17 = vcombine.low %v261_v0, %v265_v5 }
 0x36f   :  { %10877 = vmatprep.subr.bf16.mxu0 %v12791_v59  ;;  %11410 = vmatprep.subr.bf16.mxu1 %v12793_v24  ;;  %v236_v59 = vld [vmem:[%s20007_s1 + $0x650] sm:$0xff]  ;;  %v273_v13 = vld [vmem:[%s20007_s1 + $0x778] sm:$0xff] }
 0x370   :  { %v240_v24 = vld [vmem:[%s20007_s1 + $0x670] sm:$0xff] }
 0x371   :  { %v12838_v38 = vcombine.low %v236_v59, %v240_v24 }
 0x372   :  { %10878 = vmatpush1.bf16.msra.mxu0 %v12790_v29  ;;  %11411 = vmatpush1.bf16.msra.mxu1 %v12792_v32  ;;  %v12839_v29 = vcombine.high %v236_v59, %v240_v24  ;;  %v12841_v32 = vcombine.high %v237_v26, %v241_v15  ;;  %v277_v59 = vld [vmem:[%s20007_s1 + $0x798] sm:$0xff]  ;;  %v12872_v15 = vcombine.low %v269_v11, %v273_v13 }
 0x373   :  { %10879 = vmatprep.subr.bf16.mxu0 %v12799_v33  ;;  %11412 = vmatprep.subr.bf16.mxu1 %v12801_v34  ;;  %v244_v33 = vld [vmem:[%s20007_s1 + $0x690] sm:$0xff]  ;;  %v281_v24 = vld [vmem:[%s20007_s1 + $0x7b8] sm:$0xff] }
 0x374   :  { %v248_v34 = vld [vmem:[%s20007_s1 + $0x6b0] sm:$0xff] }
 0x375   :  { %v12846_v52 = vcombine.low %v244_v33, %v248_v34 }
 0x376   :  { %10880 = vmatpush1.bf16.msra.mxu0 %v12798_v41  ;;  %11413 = vmatpush1.bf16.msra.mxu1 %v12800_v25  ;;  %v12847_v41 = vcombine.high %v244_v33, %v248_v34  ;;  %v12849_v25 = vcombine.high %v245_v35, %v249_v37  ;;  %v285_v33 = vld [vmem:[%s20007_s1 + $0x7d8] sm:$0xff]  ;;  %v12880_v37 = vcombine.low %v277_v59, %v281_v24 }
 0x377   :  { %10881 = vmatprep.subr.bf16.mxu0 %v12807_v42  ;;  %11414 = vmatprep.subr.bf16.mxu1 %v12809_v44  ;;  %v252_v42 = vld [vmem:[%s20007_s1 + $0x6d0] sm:$0xff]  ;;  %v289_v34 = vld [vmem:[%s20007_s1 + $0x7f8] sm:$0xff] }
 0x378   :  { %v256_v44 = vld [vmem:[%s20007_s1 + $0x6f0] sm:$0xff] }
 0x379   :  { %v12854_v23 = vcombine.low %v252_v42, %v256_v44 }
 0x37a   :  { %10882 = vmatpush1.bf16.msra.mxu0 %v12806_v3  ;;  %11415 = vmatpush1.bf16.msra.mxu1 %v12808_v48  ;;  %v12855_v3 = vcombine.high %v252_v42, %v256_v44  ;;  %v12857_v48 = vcombine.high %v253_v47, %v257_v18  ;;  %v293_v42 = vld [vmem:[%s20007_s1 + $0x818] sm:$0xff]  ;;  %v12888_v18 = vcombine.low %v285_v33, %v289_v34 }
 0x37b   :  { %10883 = vmatprep.subr.bf16.mxu0 %v12815_v61  ;;  %11416 = vmatprep.subr.bf16.mxu1 %v12817_v39  ;;  %v260_v61 = vld [vmem:[%s20007_s1 + $0x710] sm:$0xff]  ;;  %v297_v44 = vld [vmem:[%s20007_s1 + $0x838] sm:$0xff] }
 0x37c   :  { %v264_v39 = vld [vmem:[%s20007_s1 + $0x730] sm:$0xff] }
 0x37d   :  { %v12862_v14 = vcombine.low %v260_v61, %v264_v39 }
 0x37e   :  { %10884 = vmatpush1.bf16.msra.mxu0 %v12814_v7  ;;  %11417 = vmatpush1.bf16.msra.mxu1 %v12816_v8  ;;  %v12863_v7 = vcombine.high %v260_v61, %v264_v39  ;;  %v12865_v8 = vcombine.high %v261_v0, %v265_v5  ;;  %v301_v61 = vld [vmem:[%s20007_s1 + $0x858] sm:$0xff]  ;;  %v12896_v5 = vcombine.low %v293_v42, %v297_v44 }
 0x37f   :  { %10885 = vmatprep.subr.bf16.mxu0 %v12823_v10  ;;  %11418 = vmatprep.subr.bf16.mxu1 %v12825_v54  ;;  %v268_v10 = vld [vmem:[%s20007_s1 + $0x750] sm:$0xff]  ;;  %v305_v39 = vld [vmem:[%s20007_s1 + $0x878] sm:$0xff] }
 0x380   :  { %v272_v54 = vld [vmem:[%s20007_s1 + $0x770] sm:$0xff] }
 0x381   :  { %v12870_v26 = vcombine.low %v268_v10, %v272_v54 }
 0x382   :  { %10886 = vmatpush1.bf16.msra.mxu0 %v12822_v12  ;;  %11419 = vmatpush1.bf16.msra.mxu1 %v12824_v57  ;;  %v12871_v12 = vcombine.high %v268_v10, %v272_v54  ;;  %v12873_v57 = vcombine.high %v269_v11, %v273_v13  ;;  %v309_v10 = vld [vmem:[%s20007_s1 + $0x898] sm:$0xff]  ;;  %v12904_v13 = vcombine.low %v301_v61, %v305_v39 }
 0x383   :  { %10887 = vmatprep.subr.bf16.mxu0 %v12831_v53  ;;  %11420 = vmatprep.subr.bf16.mxu1 %v12833_v20  ;;  %v276_v53 = vld [vmem:[%s20007_s1 + $0x790] sm:$0xff]  ;;  %v313_v54 = vld [vmem:[%s20007_s1 + $0x8b8] sm:$0xff] }
 0x384   :  { %v280_v20 = vld [vmem:[%s20007_s1 + $0x7b0] sm:$0xff] }
 0x385   :  { %v12878_v35 = vcombine.low %v276_v53, %v280_v20 }
 0x386   :  { %10888 = vmatpush1.bf16.msra.mxu0 %v12830_v21  ;;  %11421 = vmatpush1.bf16.msra.mxu1 %v12832_v28  ;;  %v12879_v21 = vcombine.high %v276_v53, %v280_v20  ;;  %v12881_v28 = vcombine.high %v277_v59, %v281_v24  ;;  %v321_v53 = vld [vmem:[%s20007_s1 + $0x8f8] sm:$0xff]  ;;  %v12912_v59 = vcombine.low %v309_v10, %v313_v54 }
 0x387   :  { %10889 = vmatprep.subr.bf16.mxu0 %v12839_v29  ;;  %11422 = vmatprep.subr.bf16.mxu1 %v12841_v32  ;;  %v284_v29 = vld [vmem:[%s20007_s1 + $0x7d0] sm:$0xff] }
 0x388   :  { %v288_v32 = vld [vmem:[%s20007_s1 + $0x7f0] sm:$0xff] }
 0x389   :  { %v12886_v47 = vcombine.low %v284_v29, %v288_v32 }
 0x38a   :  { %10890 = vmatpush1.bf16.msra.mxu0 %v12838_v38  ;;  %11423 = vmatpush1.bf16.msra.mxu1 %v12840_v40  ;;  %v12887_v38 = vcombine.high %v284_v29, %v288_v32  ;;  %v12889_v40 = vcombine.high %v285_v33, %v289_v34 }
 0x38b   :  { %10891 = vmatprep.subr.bf16.mxu0 %v12847_v41  ;;  %11424 = vmatprep.subr.bf16.mxu1 %v12849_v25  ;;  %v292_v41 = vld [vmem:[%s20007_s1 + $0x810] sm:$0xff] }
 0x38c   :  { %v296_v25 = vld [vmem:[%s20007_s1 + $0x830] sm:$0xff] }
 0x38d   :  { %v12894_v0 = vcombine.low %v292_v41, %v296_v25 }
 0x38e   :  { %10892 = vmatpush1.bf16.msra.mxu0 %v12846_v52  ;;  %11425 = vmatpush1.bf16.msra.mxu1 %v12848_v56  ;;  %v12895_v52 = vcombine.high %v292_v41, %v296_v25  ;;  %v12897_v56 = vcombine.high %v293_v42, %v297_v44 }
 0x38f   :  { %10893 = vmatprep.subr.bf16.mxu0 %v12855_v3  ;;  %11426 = vmatprep.subr.bf16.mxu1 %v12857_v48  ;;  %v300_v3 = vld [vmem:[%s20007_s1 + $0x850] sm:$0xff] }
 0x390   :  { %v304_v48 = vld [vmem:[%s20007_s1 + $0x870] sm:$0xff] }
 0x391   :  { %v12902_v11 = vcombine.low %v300_v3, %v304_v48 }
 0x392   :  { %10894 = vmatpush1.bf16.msra.mxu0 %v12854_v23  ;;  %11427 = vmatpush1.bf16.msra.mxu1 %v12856_v6  ;;  %v12903_v23 = vcombine.high %v300_v3, %v304_v48  ;;  %v12905_v6 = vcombine.high %v301_v61, %v305_v39 }
 0x393   :  { %10895 = vmatprep.subr.bf16.mxu0 %v12863_v7  ;;  %11428 = vmatprep.subr.bf16.mxu1 %v12865_v8  ;;  %v308_v7 = vld [vmem:[%s20007_s1 + $0x890] sm:$0xff] }
 0x394   :  { %v312_v8 = vld [vmem:[%s20007_s1 + $0x8b0] sm:$0xff] }
 0x395   :  { %v12910_v20 = vcombine.low %v308_v7, %v312_v8 }
 0x396   :  { %10896 = vmatpush1.bf16.msra.mxu0 %v12862_v14  ;;  %11429 = vmatpush1.bf16.msra.mxu1 %v12864_v17  ;;  %v12911_v14 = vcombine.high %v308_v7, %v312_v8  ;;  %v12913_v17 = vcombine.high %v309_v10, %v313_v54 }
 0x397   :  { %10897 = vmatprep.subr.bf16.mxu0 %v12871_v12  ;;  %11430 = vmatprep.subr.bf16.mxu1 %v12873_v57  ;;  %v316_v12 = vld [vmem:[%s20007_s1 + $0x8d0] sm:$0xff] }
 0x398   :  { %v320_v57 = vld [vmem:[%s20007_s1 + $0x8f0] sm:$0xff] }
 0x399   :  { %v12919_v24 = vcombine.high %v316_v12, %v320_v57  ;;  %v12918_v29 = vcombine.low %v316_v12, %v320_v57 }
 0x39a   :  { %10898 = vmatpush1.bf16.msra.mxu0 %v12870_v26  ;;  %11431 = vmatpush1.bf16.msra.mxu1 %v12872_v15  ;;  %v324_v15 = vld [vmem:[%s20007_s1 + $0x910] sm:$0xff] }
 0x39b   :  { %10899 = vmatprep.subr.bf16.mxu0 %v12879_v21  ;;  %11432 = vmatprep.subr.bf16.mxu1 %v12881_v28  ;;  %v328_v21 = vld [vmem:[%s20007_s1 + $0x930] sm:$0xff]  ;;  %v329_v28 = vld [vmem:[%s20007_s1 + $0x938] sm:$0xff] }
 0x39c   :  { %v12927_v33 = vcombine.high %v324_v15, %v328_v21  ;;  %v12926_v41 = vcombine.low %v324_v15, %v328_v21 }
 0x39e   :  { %10900 = vmatpush1.bf16.msra.mxu0 %v12878_v35  ;;  %11433 = vmatpush1.bf16.msra.mxu1 %v12880_v37  ;;  %v332_v35 = vld [vmem:[%s20007_s1 + $0x950] sm:$0xff] }
 0x39f   :  { %10901 = vmatprep.subr.bf16.mxu0 %v12887_v38  ;;  %11434 = vmatprep.subr.bf16.mxu1 %v12889_v40  ;;  %v336_v37 = vld [vmem:[%s20007_s1 + $0x970] sm:$0xff]  ;;  %v333_v38 = vld [vmem:[%s20007_s1 + $0x958] sm:$0xff] }
 0x3a0   :  { %v337_v40 = vld [vmem:[%s20007_s1 + $0x978] sm:$0xff]  ;;  %v12935_v42 = vcombine.high %v332_v35, %v336_v37  ;;  %v12934_v3 = vcombine.low %v332_v35, %v336_v37 }
 0x3a1   :  { %v12937_v44 = vcombine.high %v333_v38, %v337_v40  ;;  %v12936_v48 = vcombine.low %v333_v38, %v337_v40 }
 0x3a2   :  { %10902 = vmatpush1.bf16.msra.mxu0 %v12886_v47  ;;  %11435 = vmatpush1.bf16.msra.mxu1 %v12888_v18  ;;  %v340_v47 = vld [vmem:[%s20007_s1 + $0x990] sm:$0xff] }
 0x3a3   :  { %10912 = vmatprep.subr.bf16.mxu0 %v12895_v52  ;;  %11445 = vmatprep.subr.bf16.mxu1 %v12897_v56  ;;  %v344_v18 = vld [vmem:[%s20007_s1 + $0x9b0] sm:$0xff]  ;;  %v341_v52 = vld [vmem:[%s20007_s1 + $0x998] sm:$0xff] }
 0x3a4   :  { %v345_v56 = vld [vmem:[%s20007_s1 + $0x9b8] sm:$0xff]  ;;  %v12943_v61 = vcombine.high %v340_v47, %v344_v18  ;;  %v12942_v7 = vcombine.low %v340_v47, %v344_v18 }
 0x3a5   :  { %10904 = vmatmul.mubr.bf16.vlgmr.msra.gmra.mrb[4].mxu0 %v15144_v22  ;;  %11437 = vmatmul.mubr.bf16.vlgmr.msra.gmra.mrb[4].mxu1 %v15144_v22  ;;  %v317_v22 = vld [vmem:[%s20007_s1 + $0x8d8] sm:$0xff]  ;;  %v12945_v39 = vcombine.high %v341_v52, %v345_v56  ;;  %v12944_v8 = vcombine.low %v341_v52, %v345_v56 }
 0x3a6   :  { %10913 = vmatpush1.bf16.msra.mxu0 %v12894_v0  ;;  %11446 = vmatpush1.bf16.msra.mxu1 %v12896_v5  ;;  %v12921_v26 = vcombine.high %v317_v22, %v321_v53  ;;  %v12920_v32 = vcombine.low %v317_v22, %v321_v53  ;;  %v348_v0 = vld [vmem:[%s20007_s1 + $0x9d0] sm:$0xff] }
 0x3a7   :  { %10914 = vmatprep.subr.bf16.mxu0 %v12903_v23  ;;  %11447 = vmatprep.subr.bf16.mxu1 %v12905_v6  ;;  %v352_v5 = vld [vmem:[%s20007_s1 + $0x9f0] sm:$0xff]  ;;  %v349_v23 = vld [vmem:[%s20007_s1 + $0x9d8] sm:$0xff] }
 0x3a8   :  { %10944 = vmatprep.mubr.bf16.mxu0 %v15165_v31  ;;  %11477 = vmatprep.mubr.bf16.mxu1 %v15165_v31  ;;  %v325_v31 = vld [vmem:[%s20007_s1 + $0x918] sm:$0xff]  ;;  %v12951_v10 = vcombine.high %v348_v0, %v352_v5  ;;  %v12950_v12 = vcombine.low %v348_v0, %v352_v5 }
 0x3a9   :  { %v12929_v34 = vcombine.high %v325_v31, %v329_v28  ;;  %v12928_v25 = vcombine.low %v325_v31, %v329_v28  ;;  %v353_v6 = vld [vmem:[%s20007_s1 + $0x9f8] sm:$0xff] }
 0x3aa   :  { %10915 = vmatpush1.bf16.msra.mxu0 %v12902_v11  ;;  %11448 = vmatpush1.bf16.msra.mxu1 %v12904_v13  ;;  %v12953_v54 = vcombine.high %v349_v23, %v353_v6  ;;  %v356_v11 = vld [vmem:[%s20007_s1 + $0xa10] sm:$0xff]  ;;  %v12952_v57 = vcombine.low %v349_v23, %v353_v6 }
 0x3ab   :  { %10916 = vmatprep.subr.bf16.mxu0 %v12911_v14  ;;  %11449 = vmatprep.subr.bf16.mxu1 %v12913_v17  ;;  %v360_v13 = vld [vmem:[%s20007_s1 + $0xa30] sm:$0xff]  ;;  %v357_v14 = vld [vmem:[%s20007_s1 + $0xa18] sm:$0xff] }
 0x3ac   :  { %v361_v17 = vld [vmem:[%s20007_s1 + $0xa38] sm:$0xff]  ;;  %v12959_v22 = vcombine.high %v356_v11, %v360_v13  ;;  %v12958_v15 = vcombine.low %v356_v11, %v360_v13 }
 0x3ad   :  { %v12961_v53 = vcombine.high %v357_v14, %v361_v17  ;;  %v12960_v21 = vcombine.low %v357_v14, %v361_v17 }
 0x3ae   :  { %10917 = vmatpush1.bf16.msra.mxu0 %v12910_v20  ;;  %11450 = vmatpush1.bf16.msra.mxu1 %v12912_v59  ;;  %v364_v20 = vld [vmem:[%s20007_s1 + $0xa50] sm:$0xff] }
 0x3af   :  { %10918 = vmatprep.subr.bf16.mxu0 %v12919_v24  ;;  %11451 = vmatprep.subr.bf16.mxu1 %v12921_v26  ;;  %v368_v59 = vld [vmem:[%s20007_s1 + $0xa70] sm:$0xff]  ;;  %v365_v24 = vld [vmem:[%s20007_s1 + $0xa58] sm:$0xff] }
 0x3b0   :  { %v369_v26 = vld [vmem:[%s20007_s1 + $0xa78] sm:$0xff]  ;;  %v12967_v31 = vcombine.high %v364_v20, %v368_v59  ;;  %v12966_v35 = vcombine.low %v364_v20, %v368_v59 }
 0x3b1   :  { %v12969_v28 = vcombine.high %v365_v24, %v369_v26  ;;  %v12968_v37 = vcombine.low %v365_v24, %v369_v26 }
 0x3b2   :  { %10919 = vmatpush1.bf16.msra.mxu0 %v12918_v29  ;;  %11452 = vmatpush1.bf16.msra.mxu1 %v12920_v32  ;;  %v372_v29 = vld [vmem:[%s20007_s1 + $0xa90] sm:$0xff] }
 0x3b3   :  { %10920 = vmatprep.subr.bf16.mxu0 %v12927_v33  ;;  %11453 = vmatprep.subr.bf16.mxu1 %v12929_v34  ;;  %v376_v32 = vld [vmem:[%s20007_s1 + $0xab0] sm:$0xff]  ;;  %v373_v33 = vld [vmem:[%s20007_s1 + $0xa98] sm:$0xff] }
 0x3b4   :  { %v377_v34 = vld [vmem:[%s20007_s1 + $0xab8] sm:$0xff]  ;;  %v12975_v38 = vcombine.high %v372_v29, %v376_v32  ;;  %v12974_v47 = vcombine.low %v372_v29, %v376_v32 }
 0x3b5   :  { %v12977_v40 = vcombine.high %v373_v33, %v377_v34  ;;  %v12976_v18 = vcombine.low %v373_v33, %v377_v34 }
 0x3b6   :  { %10921 = vmatpush1.bf16.msra.mxu0 %v12926_v41  ;;  %11454 = vmatpush1.bf16.msra.mxu1 %v12928_v25  ;;  %v380_v41 = vld [vmem:[%s20007_s1 + $0xad0] sm:$0xff] }
 0x3b7   :  { %10922 = vmatprep.subr.bf16.mxu0 %v12935_v42  ;;  %11455 = vmatprep.subr.bf16.mxu1 %v12937_v44  ;;  %v384_v25 = vld [vmem:[%s20007_s1 + $0xaf0] sm:$0xff]  ;;  %v381_v42 = vld [vmem:[%s20007_s1 + $0xad8] sm:$0xff] }
 0x3b8   :  { %v385_v44 = vld [vmem:[%s20007_s1 + $0xaf8] sm:$0xff]  ;;  %v12983_v52 = vcombine.high %v380_v41, %v384_v25  ;;  %v12982_v0 = vcombine.low %v380_v41, %v384_v25 }
 0x3b9   :  { %v12985_v56 = vcombine.high %v381_v42, %v385_v44  ;;  %v12984_v5 = vcombine.low %v381_v42, %v385_v44 }
 0x3ba   :  { %10923 = vmatpush1.bf16.msra.mxu0 %v12934_v3  ;;  %11456 = vmatpush1.bf16.msra.mxu1 %v12936_v48  ;;  %v388_v3 = vld [vmem:[%s20007_s1 + $0xb10] sm:$0xff] }
 0x3bb   :  { %10924 = vmatprep.subr.bf16.mxu0 %v12943_v61  ;;  %11457 = vmatprep.subr.bf16.mxu1 %v12945_v39  ;;  %v392_v48 = vld [vmem:[%s20007_s1 + $0xb30] sm:$0xff]  ;;  %v389_v61 = vld [vmem:[%s20007_s1 + $0xb18] sm:$0xff] }
 0x3bc   :  { %v393_v39 = vld [vmem:[%s20007_s1 + $0xb38] sm:$0xff]  ;;  %v12991_v23 = vcombine.high %v388_v3, %v392_v48  ;;  %v12990_v11 = vcombine.low %v388_v3, %v392_v48 }
 0x3bd   :  { %v12993_v6 = vcombine.high %v389_v61, %v393_v39  ;;  %v12992_v13 = vcombine.low %v389_v61, %v393_v39 }
 0x3be   :  { %10925 = vmatpush1.bf16.msra.mxu0 %v12942_v7  ;;  %11458 = vmatpush1.bf16.msra.mxu1 %v12944_v8  ;;  %v396_v7 = vld [vmem:[%s20007_s1 + $0xb50] sm:$0xff] }
 0x3bf   :  { %10926 = vmatprep.subr.bf16.mxu0 %v12951_v10  ;;  %11459 = vmatprep.subr.bf16.mxu1 %v12953_v54  ;;  %v400_v8 = vld [vmem:[%s20007_s1 + $0xb70] sm:$0xff]  ;;  %v397_v10 = vld [vmem:[%s20007_s1 + $0xb58] sm:$0xff] }
 0x3c0   :  { %v401_v54 = vld [vmem:[%s20007_s1 + $0xb78] sm:$0xff]  ;;  %v12999_v14 = vcombine.high %v396_v7, %v400_v8  ;;  %v12998_v20 = vcombine.low %v396_v7, %v400_v8 }
 0x3c1   :  { %v13001_v17 = vcombine.high %v397_v10, %v401_v54  ;;  %v13000_v59 = vcombine.low %v397_v10, %v401_v54 }
 0x3c2   :  { %10927 = vmatpush1.bf16.msra.mxu0 %v12950_v12  ;;  %11460 = vmatpush1.bf16.msra.mxu1 %v12952_v57  ;;  %v404_v12 = vld [vmem:[%s20007_s1 + $0xb90] sm:$0xff] }
 0x3c3   :  { %10928 = vmatprep.subr.bf16.mxu0 %v12959_v22  ;;  %11461 = vmatprep.subr.bf16.mxu1 %v12961_v53  ;;  %v408_v57 = vld [vmem:[%s20007_s1 + $0xbb0] sm:$0xff]  ;;  %v405_v22 = vld [vmem:[%s20007_s1 + $0xb98] sm:$0xff] }
 0x3c4   :  { %v409_v53 = vld [vmem:[%s20007_s1 + $0xbb8] sm:$0xff]  ;;  %v13007_v24 = vcombine.high %v404_v12, %v408_v57  ;;  %v13006_v29 = vcombine.low %v404_v12, %v408_v57 }
 0x3c5   :  { %v13009_v26 = vcombine.high %v405_v22, %v409_v53  ;;  %v13008_v32 = vcombine.low %v405_v22, %v409_v53  ;;  %v452_v53 = vld [vmem:[%s20007_s1 + $0xd10] sm:$0xff] }
 0x3c6   :  { %10929 = vmatpush1.bf16.msra.mxu0 %v12958_v15  ;;  %11462 = vmatpush1.bf16.msra.mxu1 %v12960_v21  ;;  %v412_v15 = vld [vmem:[%s20007_s1 + $0xbd0] sm:$0xff] }
 0x3c7   :  { %10930 = vmatprep.subr.bf16.mxu0 %v12967_v31  ;;  %11463 = vmatprep.subr.bf16.mxu1 %v12969_v28  ;;  %v416_v21 = vld [vmem:[%s20007_s1 + $0xbf0] sm:$0xff]  ;;  %v413_v31 = vld [vmem:[%s20007_s1 + $0xbd8] sm:$0xff] }
 0x3c8   :  { %v417_v28 = vld [vmem:[%s20007_s1 + $0xbf8] sm:$0xff]  ;;  %v13015_v33 = vcombine.high %v412_v15, %v416_v21  ;;  %v13014_v41 = vcombine.low %v412_v15, %v416_v21 }
 0x3c9   :  { %v13017_v34 = vcombine.high %v413_v31, %v417_v28  ;;  %v13016_v25 = vcombine.low %v413_v31, %v417_v28  ;;  %v460_v31 = vld [vmem:[%s20007_s1 + $0xd50] sm:$0xff] }
 0x3ca   :  { %10931 = vmatpush1.bf16.msra.mxu0 %v12966_v35  ;;  %11464 = vmatpush1.bf16.msra.mxu1 %v12968_v37  ;;  %v420_v35 = vld [vmem:[%s20007_s1 + $0xc10] sm:$0xff] }
 0x3cb   :  { %10932 = vmatprep.subr.bf16.mxu0 %v12975_v38  ;;  %11465 = vmatprep.subr.bf16.mxu1 %v12977_v40  ;;  %v424_v37 = vld [vmem:[%s20007_s1 + $0xc30] sm:$0xff]  ;;  %v421_v38 = vld [vmem:[%s20007_s1 + $0xc18] sm:$0xff] }
 0x3cc   :  { %v425_v40 = vld [vmem:[%s20007_s1 + $0xc38] sm:$0xff]  ;;  %v13023_v42 = vcombine.high %v420_v35, %v424_v37  ;;  %v13022_v3 = vcombine.low %v420_v35, %v424_v37  ;;  %v464_v28 = vld [vmem:[%s20007_s1 + $0xd70] sm:$0xff] }
 0x3cd   :  { %v13025_v44 = vcombine.high %v421_v38, %v425_v40  ;;  %v13024_v48 = vcombine.low %v421_v38, %v425_v40  ;;  %v13063_v35 = vcombine.high %v460_v31, %v464_v28  ;;  %v468_v38 = vld [vmem:[%s20007_s1 + $0xd90] sm:$0xff] }
 0x3ce   :  { %10933 = vmatpush1.bf16.msra.mxu0 %v12974_v47  ;;  %11466 = vmatpush1.bf16.msra.mxu1 %v12976_v18  ;;  %v428_v47 = vld [vmem:[%s20007_s1 + $0xc50] sm:$0xff] }
 0x3cf   :  { %10934 = vmatprep.subr.bf16.mxu0 %v12983_v52  ;;  %11467 = vmatprep.subr.bf16.mxu1 %v12985_v56  ;;  %v432_v18 = vld [vmem:[%s20007_s1 + $0xc70] sm:$0xff]  ;;  %v429_v52 = vld [vmem:[%s20007_s1 + $0xc58] sm:$0xff] }
 0x3d0   :  { %v433_v56 = vld [vmem:[%s20007_s1 + $0xc78] sm:$0xff]  ;;  %v13031_v61 = vcombine.high %v428_v47, %v432_v18  ;;  %v13030_v7 = vcombine.low %v428_v47, %v432_v18  ;;  %v472_v40 = vld [vmem:[%s20007_s1 + $0xdb0] sm:$0xff] }
 0x3d1   :  { %v13033_v39 = vcombine.high %v429_v52, %v433_v56  ;;  %v13032_v8 = vcombine.low %v429_v52, %v433_v56  ;;  %v13071_v47 = vcombine.high %v468_v38, %v472_v40  ;;  %v476_v56 = vld [vmem:[%s20007_s1 + $0xdd0] sm:$0xff] }
 0x3d2   :  { %10935 = vmatpush1.bf16.msra.mxu0 %v12982_v0  ;;  %11468 = vmatpush1.bf16.msra.mxu1 %v12984_v5  ;;  %v436_v0 = vld [vmem:[%s20007_s1 + $0xc90] sm:$0xff] }
 0x3d3   :  { %10936 = vmatprep.subr.bf16.mxu0 %v12991_v23  ;;  %11469 = vmatprep.subr.bf16.mxu1 %v12993_v6  ;;  %v440_v5 = vld [vmem:[%s20007_s1 + $0xcb0] sm:$0xff]  ;;  %v437_v23 = vld [vmem:[%s20007_s1 + $0xc98] sm:$0xff] }
 0x3d4   :  { %v441_v6 = vld [vmem:[%s20007_s1 + $0xcb8] sm:$0xff]  ;;  %v13039_v10 = vcombine.high %v436_v0, %v440_v5 }
 0x3d5   :  { %v13041_v54 = vcombine.high %v437_v23, %v441_v6  ;;  %v13040_v12 = vcombine.low %v437_v23, %v441_v6  ;;  %v13070_v6 = vcombine.low %v468_v38, %v472_v40 }
 0x3d6   :  { %10937 = vmatpush1.bf16.msra.mxu0 %v12990_v11  ;;  %11470 = vmatpush1.bf16.msra.mxu1 %v12992_v13  ;;  %v444_v11 = vld [vmem:[%s20007_s1 + $0xcd0] sm:$0xff] }
 0x3d7   :  { %10938 = vmatprep.subr.bf16.mxu0 %v12999_v14  ;;  %11471 = vmatprep.subr.bf16.mxu1 %v13001_v17  ;;  %v448_v13 = vld [vmem:[%s20007_s1 + $0xcf0] sm:$0xff]  ;;  %v449_v14 = vld [vmem:[%s20007_s1 + $0xcf8] sm:$0xff]  ;;  %v13038_v17 = vcombine.low %v436_v0, %v440_v5 }
 0x3d8   :  { %v13047_v57 = vcombine.high %v444_v11, %v448_v13  ;;  %v481_v0 = vld [vmem:[%s20007_s1 + $0xdf8] sm:$0xff] }
 0x3da   :  { %10939 = vmatpush1.bf16.msra.mxu0 %v12998_v20  ;;  %11472 = vmatpush1.bf16.msra.mxu1 %v13000_v59  ;;  %v456_v20 = vld [vmem:[%s20007_s1 + $0xd30] sm:$0xff]  ;;  %v457_v59 = vld [vmem:[%s20007_s1 + $0xd38] sm:$0xff] }
 0x3db   :  { %10940 = vmatprep.subr.bf16.mxu0 %v13007_v24  ;;  %11473 = vmatprep.subr.bf16.mxu1 %v13009_v26  ;;  %v13046_v24 = vcombine.low %v444_v11, %v448_v13  ;;  %v13055_v15 = vcombine.high %v452_v53, %v456_v20 }
 0x3de   :  { %10941 = vmatpush1.bf16.msra.mxu0 %v13006_v29  ;;  %11474 = vmatpush1.bf16.msra.mxu1 %v13008_v32  ;;  %v461_v29 = vld [vmem:[%s20007_s1 + $0xd58] sm:$0xff] }
 0x3df   :  { %10942 = vmatprep.subr.bf16.mxu0 %v13015_v33  ;;  %11475 = vmatprep.subr.bf16.mxu1 %v13017_v34  ;;  %v465_v32 = vld [vmem:[%s20007_s1 + $0xd78] sm:$0xff]  ;;  %v13054_v33 = vcombine.low %v452_v53, %v456_v20 }
 0x3e0   :  { %v13065_v37 = vcombine.high %v461_v29, %v465_v32 }
 0x3e2   :  { %10943 = vmatpush1.bf16.msra.mxu0 %v13014_v41  ;;  %11476 = vmatpush1.bf16.msra.mxu1 %v13016_v25  ;;  %v469_v41 = vld [vmem:[%s20007_s1 + $0xd98] sm:$0xff] }
 0x3e3   :  { %10953 = vmatprep.subr.bf16.mxu0 %v13023_v42  ;;  %11486 = vmatprep.subr.bf16.mxu1 %v13025_v44  ;;  %v473_v25 = vld [vmem:[%s20007_s1 + $0xdb8] sm:$0xff]  ;;  %v13062_v42 = vcombine.low %v460_v31, %v464_v28  ;;  %v13064_v44 = vcombine.low %v461_v29, %v465_v32  ;;  %v500_v29 = vld [vmem:[%s20007_s1 + $0xe90] sm:$0xff] }
 0x3e4   :  { %v13073_v52 = vcombine.high %v469_v41, %v473_v25  ;;  %v504_v32 = vld [vmem:[%s20007_s1 + $0xeb0] sm:$0xff] }
 0x3e5   :  { %10945 = vmatmul.mubr.bf16.vlgmr.msra.gmra.mrb[4].mxu0 %v15353_v36  ;;  %11478 = vmatmul.mubr.bf16.vlgmr.msra.gmra.mrb[4].mxu1 %v15353_v36  ;;  %v445_v36 = vld [vmem:[%s20007_s1 + $0xcd8] sm:$0xff]  ;;  %v13103_v38 = vcombine.high %v500_v29, %v504_v32 }
 0x3e6   :  { %10954 = vmatpush1.bf16.msra.mxu0 %v13022_v3  ;;  %11487 = vmatpush1.bf16.msra.mxu1 %v13024_v48  ;;  %v13049_v22 = vcombine.high %v445_v36, %v449_v14  ;;  %v13048_v26 = vcombine.low %v445_v36, %v449_v14  ;;  %v480_v3 = vld [vmem:[%s20007_s1 + $0xdf0] sm:$0xff] }
 0x3e7   :  { %10955 = vmatprep.subr.bf16.mxu0 %v13031_v61  ;;  %11488 = vmatprep.subr.bf16.mxu1 %v13033_v39  ;;  %v477_v39 = vld [vmem:[%s20007_s1 + $0xdd8] sm:$0xff]  ;;  %v484_v36 = vld [vmem:[%s20007_s1 + $0xe10] sm:$0xff] }
 0x3e8   :  { %10985 = vmatprep.mubr.bf16.mxu0 %v15374_v45  ;;  %11518 = vmatprep.mubr.bf16.mxu1 %v15374_v45  ;;  %v453_v45 = vld [vmem:[%s20007_s1 + $0xd18] sm:$0xff]  ;;  %v13081_v13 = vcombine.high %v477_v39, %v481_v0  ;;  %v488_v14 = vld [vmem:[%s20007_s1 + $0xe30] sm:$0xff] }
 0x3e9   :  { %v13057_v21 = vcombine.high %v453_v45, %v457_v59  ;;  %v13056_v34 = vcombine.low %v453_v45, %v457_v59  ;;  %v13087_v53 = vcombine.high %v484_v36, %v488_v14  ;;  %v492_v45 = vld [vmem:[%s20007_s1 + $0xe50] sm:$0xff] }
 0x3ea   :  { %10956 = vmatpush1.bf16.msra.mxu0 %v13030_v7  ;;  %11489 = vmatpush1.bf16.msra.mxu1 %v13032_v8  ;;  %v496_v59 = vld [vmem:[%s20007_s1 + $0xe70] sm:$0xff] }
 0x3eb   :  { %10957 = vmatprep.subr.bf16.mxu0 %v13039_v10  ;;  %11490 = vmatprep.subr.bf16.mxu1 %v13041_v54  ;;  %v13072_v10 = vcombine.low %v469_v41, %v473_v25  ;;  %v13079_v54 = vcombine.high %v476_v56, %v480_v3  ;;  %v13095_v31 = vcombine.high %v492_v45, %v496_v59  ;;  %v508_v41 = vld [vmem:[%s20007_s1 + $0xed0] sm:$0xff] }
 0x3ec   :  { %v512_v25 = vld [vmem:[%s20007_s1 + $0xef0] sm:$0xff] }
 0x3ee   :  { %10958 = vmatpush1.bf16.msra.mxu0 %v13038_v17  ;;  %11491 = vmatpush1.bf16.msra.mxu1 %v13040_v12  ;;  %v485_v17 = vld [vmem:[%s20007_s1 + $0xe18] sm:$0xff] }
 0x3ef   :  { %10959 = vmatprep.subr.bf16.mxu0 %v13047_v57  ;;  %11492 = vmatprep.subr.bf16.mxu1 %v13049_v22  ;;  %v489_v12 = vld [vmem:[%s20007_s1 + $0xe38] sm:$0xff]  ;;  %v13078_v57 = vcombine.low %v476_v56, %v480_v3  ;;  %v13080_v22 = vcombine.low %v477_v39, %v481_v0  ;;  %v13111_v56 = vcombine.high %v508_v41, %v512_v25  ;;  %v516_v39 = vld [vmem:[%s20007_s1 + $0xf10] sm:$0xff] }
 0x3f0   :  { %v13089_v20 = vcombine.high %v485_v17, %v489_v12  ;;  %v520_v0 = vld [vmem:[%s20007_s1 + $0xf30] sm:$0xff] }
 0x3f2   :  { %10960 = vmatpush1.bf16.msra.mxu0 %v13046_v24  ;;  %11493 = vmatpush1.bf16.msra.mxu1 %v13048_v26  ;;  %v493_v24 = vld [vmem:[%s20007_s1 + $0xe58] sm:$0xff] }
 0x3f3   :  { %10961 = vmatprep.subr.bf16.mxu0 %v13055_v15  ;;  %11494 = vmatprep.subr.bf16.mxu1 %v13057_v21  ;;  %v497_v26 = vld [vmem:[%s20007_s1 + $0xe78] sm:$0xff]  ;;  %v13086_v15 = vcombine.low %v484_v36, %v488_v14  ;;  %v13088_v21 = vcombine.low %v485_v17, %v489_v12  ;;  %v13118_v17 = vcombine.low %v516_v39, %v520_v0 }
 0x3f4   :  { %v13097_v28 = vcombine.high %v493_v24, %v497_v26  ;;  %v525_v36 = vld [vmem:[%s20007_s1 + $0xf58] sm:$0xff] }
 0x3f5   :  { %v529_v14 = vld [vmem:[%s20007_s1 + $0xf78] sm:$0xff] }
 0x3f6   :  { %10962 = vmatpush1.bf16.msra.mxu0 %v13054_v33  ;;  %11495 = vmatpush1.bf16.msra.mxu1 %v13056_v34  ;;  %v501_v33 = vld [vmem:[%s20007_s1 + $0xe98] sm:$0xff] }
 0x3f7   :  { %10963 = vmatprep.subr.bf16.mxu0 %v13063_v35  ;;  %11496 = vmatprep.subr.bf16.mxu1 %v13065_v37  ;;  %v505_v34 = vld [vmem:[%s20007_s1 + $0xeb8] sm:$0xff]  ;;  %v13094_v35 = vcombine.low %v492_v45, %v496_v59  ;;  %v13096_v37 = vcombine.low %v493_v24, %v497_v26  ;;  %v13128_v26 = vcombine.low %v525_v36, %v529_v14 }
 0x3f8   :  { %v17995_v18 = vpop.f32.mrb[0].mxu0  ;;  %v18003_v48 = vpop.f32.mrb[0].mxu1  ;;  %v13105_v40 = vcombine.high %v501_v33, %v505_v34  ;;  %v533_v45 = vld [vmem:[%s20007_s1 + $0xf98] sm:$0xff] }
 0x3f9   :  { %v18005_v61 = vpop.f32.mrb[1].mxu0  ;;  %v18013_v5 = vpop.f32.mrb[1].mxu1  ;;  %v537_v59 = vld [vmem:[%s20007_s1 + $0xfb8] sm:$0xff] }
 0x3fa   :  { %v10294_v23 = vpop.f32.mrb[2].mxu0  ;;  %10964 = vmatpush1.bf16.msra.mxu0 %v13062_v42  ;;  %v10827_v7 = vpop.f32.mrb[2].mxu1  ;;  %11497 = vmatpush1.bf16.msra.mxu1 %v13064_v44  ;;  %v509_v42 = vld [vmem:[%s20007_s1 + $0xed8] sm:$0xff] }
 0x3fb   :  { %v10295_v8 = vpop.f32.mrb[3].mxu0  ;;  %10965 = vmatprep.subr.bf16.mxu0 %v13071_v47  ;;  %v10828_v11 = vpop.f32.mrb[3].mxu1  ;;  %11498 = vmatprep.subr.bf16.mxu1 %v13073_v52  ;;  %v513_v44 = vld [vmem:[%s20007_s1 + $0xef8] sm:$0xff]  ;;  %v13102_v47 = vcombine.low %v500_v29, %v504_v32  ;;  %v13104_v52 = vcombine.low %v501_v33, %v505_v34  ;;  %v13110_v7 = vcombine.low %v508_v41, %v512_v25 }
 0x3fc   :  { %v13113_v3 = vcombine.high %v509_v42, %v513_v44  ;;  %v517_v23 = vld [vmem:[%s20007_s1 + $0xf18] sm:$0xff]  ;;  %v13112_v8 = vcombine.low %v509_v42, %v513_v44  ;;  %v524_v11 = vld [vmem:[%s20007_s1 + $0xf50] sm:$0xff]  ;;  %v13136_v34 = vcombine.low %v533_v45, %v537_v59 }
 0x3fd   :  { %v541_v29 = vld [vmem:[%s20007_s1 + $0xfd8] sm:$0xff] }
 0x3fe   :  { %10966 = vmatpush1.bf16.msra.mxu0 %v13070_v6  ;;  %11499 = vmatpush1.bf16.msra.mxu1 %v13072_v10  ;;  %v521_v6 = vld [vmem:[%s20007_s1 + $0xf38] sm:$0xff]  ;;  %v13119_v10 = vcombine.high %v516_v39, %v520_v0 }
 0x3ff   :  { %10967 = vmatprep.subr.bf16.mxu0 %v13079_v54  ;;  %11500 = vmatprep.subr.bf16.mxu1 %v13081_v13  ;;  %v13121_v54 = vcombine.high %v517_v23, %v521_v6  ;;  %v528_v13 = vld [vmem:[%s20007_s1 + $0xf70] sm:$0xff]  ;;  %v13120_v12 = vcombine.low %v517_v23, %v521_v6  ;;  %v545_v32 = vld [vmem:[%s20007_s1 + $0xff8] sm:$0xff] }
 0x400   :  { %v13126_v24 = vcombine.low %v524_v11, %v528_v13  ;;  %v549_v41 = vld [vmem:[%s20007_s1 + $0x1018] sm:$0xff]  ;;  %v13144_v44 = vcombine.low %v541_v29, %v545_v32 }
 0x401   :  { %v553_v25 = vld [vmem:[%s20007_s1 + $0x1038] sm:$0xff] }
 0x402   :  { %10968 = vmatpush1.bf16.msra.mxu0 %v13078_v57  ;;  %11501 = vmatpush1.bf16.msra.mxu1 %v13080_v22  ;;  %v13127_v57 = vcombine.high %v524_v11, %v528_v13  ;;  %v13129_v22 = vcombine.high %v525_v36, %v529_v14  ;;  %v557_v39 = vld [vmem:[%s20007_s1 + $0x1058] sm:$0xff]  ;;  %v13152_v6 = vcombine.low %v549_v41, %v553_v25 }
 0x403   :  { %10969 = vmatprep.subr.bf16.mxu0 %v13087_v53  ;;  %11502 = vmatprep.subr.bf16.mxu1 %v13089_v20  ;;  %v532_v53 = vld [vmem:[%s20007_s1 + $0xf90] sm:$0xff]  ;;  %v561_v0 = vld [vmem:[%s20007_s1 + $0x1078] sm:$0xff] }
 0x404   :  { %v536_v20 = vld [vmem:[%s20007_s1 + $0xfb0] sm:$0xff]  ;;  %v565_v11 = vld [vmem:[%s20007_s1 + $0x1098] sm:$0xff]  ;;  %v13160_v14 = vcombine.low %v557_v39, %v561_v0 }
 0x405   :  { %v13134_v33 = vcombine.low %v532_v53, %v536_v20  ;;  %v569_v13 = vld [vmem:[%s20007_s1 + $0x10b8] sm:$0xff] }
 0x406   :  { %10970 = vmatpush1.bf16.msra.mxu0 %v13086_v15  ;;  %11503 = vmatpush1.bf16.msra.mxu1 %v13088_v21  ;;  %v13135_v15 = vcombine.high %v532_v53, %v536_v20  ;;  %v13137_v21 = vcombine.high %v533_v45, %v537_v59  ;;  %v577_v53 = vld [vmem:[%s20007_s1 + $0x10f8] sm:$0xff]  ;;  %v13168_v45 = vcombine.low %v565_v11, %v569_v13 }
 0x407   :  { %10971 = vmatprep.subr.bf16.mxu0 %v13095_v31  ;;  %11504 = vmatprep.subr.bf16.mxu1 %v13097_v28  ;;  %v540_v31 = vld [vmem:[%s20007_s1 + $0xfd0] sm:$0xff] }
 0x408   :  { %v544_v28 = vld [vmem:[%s20007_s1 + $0xff0] sm:$0xff] }
 0x409   :  { %v13142_v42 = vcombine.low %v540_v31, %v544_v28 }
 0x40a   :  { %10972 = vmatpush1.bf16.msra.mxu0 %v13094_v35  ;;  %11505 = vmatpush1.bf16.msra.mxu1 %v13096_v37  ;;  %v13143_v35 = vcombine.high %v540_v31, %v544_v28  ;;  %v13145_v37 = vcombine.high %v541_v29, %v545_v32 }
 0x40b   :  { %10973 = vmatprep.subr.bf16.mxu0 %v13103_v38  ;;  %11506 = vmatprep.subr.bf16.mxu1 %v13105_v40  ;;  %v548_v38 = vld [vmem:[%s20007_s1 + $0x1010] sm:$0xff] }
 0x40c   :  { %v552_v40 = vld [vmem:[%s20007_s1 + $0x1030] sm:$0xff] }
 0x40d   :  { %v13150_v23 = vcombine.low %v548_v38, %v552_v40 }
 0x40e   :  { %10974 = vmatpush1.bf16.msra.mxu0 %v13102_v47  ;;  %11507 = vmatpush1.bf16.msra.mxu1 %v13104_v52  ;;  %v13151_v47 = vcombine.high %v548_v38, %v552_v40  ;;  %v13153_v52 = vcombine.high %v549_v41, %v553_v25 }
 0x40f   :  { %10975 = vmatprep.subr.bf16.mxu0 %v13111_v56  ;;  %11508 = vmatprep.subr.bf16.mxu1 %v13113_v3  ;;  %v556_v56 = vld [vmem:[%s20007_s1 + $0x1050] sm:$0xff] }
 0x410   :  { %v560_v3 = vld [vmem:[%s20007_s1 + $0x1070] sm:$0xff] }
 0x411   :  { %v13158_v36 = vcombine.low %v556_v56, %v560_v3 }
 0x412   :  { %10976 = vmatpush1.bf16.msra.mxu0 %v13110_v7  ;;  %11509 = vmatpush1.bf16.msra.mxu1 %v13112_v8  ;;  %v13159_v7 = vcombine.high %v556_v56, %v560_v3  ;;  %v13161_v8 = vcombine.high %v557_v39, %v561_v0 }
 0x413   :  { %10977 = vmatprep.subr.bf16.mxu0 %v13119_v10  ;;  %11510 = vmatprep.subr.bf16.mxu1 %v13121_v54  ;;  %v564_v10 = vld [vmem:[%s20007_s1 + $0x1090] sm:$0xff] }
 0x414   :  { %v568_v54 = vld [vmem:[%s20007_s1 + $0x10b0] sm:$0xff] }
 0x415   :  { %v13166_v20 = vcombine.low %v564_v10, %v568_v54 }
 0x416   :  { %10978 = vmatpush1.bf16.msra.mxu0 %v13118_v17  ;;  %11511 = vmatpush1.bf16.msra.mxu1 %v13120_v12  ;;  %v13167_v17 = vcombine.high %v564_v10, %v568_v54  ;;  %v13169_v12 = vcombine.high %v565_v11, %v569_v13 }
 0x417   :  { %10979 = vmatprep.subr.bf16.mxu0 %v13127_v57  ;;  %11512 = vmatprep.subr.bf16.mxu1 %v13129_v22  ;;  %v572_v57 = vld [vmem:[%s20007_s1 + $0x10d0] sm:$0xff] }
 0x418   :  { %v576_v22 = vld [vmem:[%s20007_s1 + $0x10f0] sm:$0xff] }
 0x419   :  { %v13175_v59 = vcombine.high %v572_v57, %v576_v22  ;;  %v13174_v31 = vcombine.low %v572_v57, %v576_v22 }
 0x41a   :  { %10980 = vmatpush1.bf16.msra.mxu0 %v13126_v24  ;;  %11513 = vmatpush1.bf16.msra.mxu1 %v13128_v26  ;;  %v580_v26 = vld [vmem:[%s20007_s1 + $0x1110] sm:$0xff] }
 0x41b   :  { %10981 = vmatprep.subr.bf16.mxu0 %v13135_v15  ;;  %11514 = vmatprep.subr.bf16.mxu1 %v13137_v21  ;;  %v584_v15 = vld [vmem:[%s20007_s1 + $0x1130] sm:$0xff]  ;;  %v585_v21 = vld [vmem:[%s20007_s1 + $0x1138] sm:$0xff] }
 0x41c   :  { %v13183_v29 = vcombine.high %v580_v26, %v584_v15  ;;  %v13182_v38 = vcombine.low %v580_v26, %v584_v15 }
 0x41e   :  { %10982 = vmatpush1.bf16.msra.mxu0 %v13134_v33  ;;  %11515 = vmatpush1.bf16.msra.mxu1 %v13136_v34  ;;  %v588_v33 = vld [vmem:[%s20007_s1 + $0x1150] sm:$0xff] }
 0x41f   :  { %10983 = vmatprep.subr.bf16.mxu0 %v13143_v35  ;;  %11516 = vmatprep.subr.bf16.mxu1 %v13145_v37  ;;  %v592_v34 = vld [vmem:[%s20007_s1 + $0x1170] sm:$0xff]  ;;  %v589_v35 = vld [vmem:[%s20007_s1 + $0x1158] sm:$0xff] }
 0x420   :  { %v593_v37 = vld [vmem:[%s20007_s1 + $0x1178] sm:$0xff]  ;;  %v13191_v41 = vcombine.high %v588_v33, %v592_v34  ;;  %v13190_v56 = vcombine.low %v588_v33, %v592_v34 }
 0x421   :  { %v13193_v25 = vcombine.high %v589_v35, %v593_v37  ;;  %v13192_v3 = vcombine.low %v589_v35, %v593_v37 }
 0x422   :  { %10984 = vmatpush1.bf16.msra.mxu0 %v13142_v42  ;;  %11517 = vmatpush1.bf16.msra.mxu1 %v13144_v44  ;;  %v596_v42 = vld [vmem:[%s20007_s1 + $0x1190] sm:$0xff] }
 0x423   :  { %10994 = vmatprep.subr.bf16.mxu0 %v13151_v47  ;;  %11527 = vmatprep.subr.bf16.mxu1 %v13153_v52  ;;  %v600_v44 = vld [vmem:[%s20007_s1 + $0x11b0] sm:$0xff]  ;;  %v597_v47 = vld [vmem:[%s20007_s1 + $0x1198] sm:$0xff] }
 0x424   :  { %v601_v52 = vld [vmem:[%s20007_s1 + $0x11b8] sm:$0xff]  ;;  %v13199_v39 = vcombine.high %v596_v42, %v600_v44  ;;  %v13198_v10 = vcombine.low %v596_v42, %v600_v44 }
 0x425   :  { %10986 = vmatmul.mubr.bf16.vlgmr.msra.gmra.mrb[4].mxu0 %v15562_v55  ;;  %11519 = vmatmul.mubr.bf16.vlgmr.msra.gmra.mrb[4].mxu1 %v15562_v55  ;;  %v573_v55 = vld [vmem:[%s20007_s1 + $0x10d8] sm:$0xff]  ;;  %v13201_v0 = vcombine.high %v597_v47, %v601_v52  ;;  %v13200_v54 = vcombine.low %v597_v47, %v601_v52 }
 0x426   :  { %10995 = vmatpush1.bf16.msra.mxu0 %v13150_v23  ;;  %11528 = vmatpush1.bf16.msra.mxu1 %v13152_v6  ;;  %v13177_v24 = vcombine.high %v573_v55, %v577_v53  ;;  %v13176_v28 = vcombine.low %v573_v55, %v577_v53  ;;  %v604_v23 = vld [vmem:[%s20007_s1 + $0x11d0] sm:$0xff] }
 0x427   :  { %10996 = vmatprep.subr.bf16.mxu0 %v13159_v7  ;;  %11529 = vmatprep.subr.bf16.mxu1 %v13161_v8  ;;  %v608_v6 = vld [vmem:[%s20007_s1 + $0x11f0] sm:$0xff]  ;;  %v605_v7 = vld [vmem:[%s20007_s1 + $0x11d8] sm:$0xff] }
 0x428   :  { %11026 = vmatprep.mubr.bf16.mxu0 %v15583_v1  ;;  %11559 = vmatprep.mubr.bf16.mxu1 %v15583_v1  ;;  %v581_v1 = vld [vmem:[%s20007_s1 + $0x1118] sm:$0xff]  ;;  %v13207_v11 = vcombine.high %v604_v23, %v608_v6  ;;  %v13206_v57 = vcombine.low %v604_v23, %v608_v6 }
 0x429   :  { %v13185_v32 = vcombine.high %v581_v1, %v585_v21  ;;  %v13184_v40 = vcombine.low %v581_v1, %v585_v21  ;;  %v609_v8 = vld [vmem:[%s20007_s1 + $0x11f8] sm:$0xff] }
 0x42a   :  { %10997 = vmatpush1.bf16.msra.mxu0 %v13158_v36  ;;  %11530 = vmatpush1.bf16.msra.mxu1 %v13160_v14  ;;  %v13209_v13 = vcombine.high %v605_v7, %v609_v8  ;;  %v612_v36 = vld [vmem:[%s20007_s1 + $0x1210] sm:$0xff]  ;;  %v13208_v22 = vcombine.low %v605_v7, %v609_v8 }
 0x42b   :  { %10998 = vmatprep.subr.bf16.mxu0 %v13167_v17  ;;  %11531 = vmatprep.subr.bf16.mxu1 %v13169_v12  ;;  %v616_v14 = vld [vmem:[%s20007_s1 + $0x1230] sm:$0xff]  ;;  %v613_v17 = vld [vmem:[%s20007_s1 + $0x1218] sm:$0xff] }
 0x42c   :  { %v617_v12 = vld [vmem:[%s20007_s1 + $0x1238] sm:$0xff]  ;;  %v13215_v55 = vcombine.high %v612_v36, %v616_v14  ;;  %v13214_v26 = vcombine.low %v612_v36, %v616_v14 }
 0x42d   :  { %v13217_v53 = vcombine.high %v613_v17, %v617_v12  ;;  %v13216_v15 = vcombine.low %v613_v17, %v617_v12 }
 0x42e   :  { %10999 = vmatpush1.bf16.msra.mxu0 %v13166_v20  ;;  %11532 = vmatpush1.bf16.msra.mxu1 %v13168_v45  ;;  %v620_v20 = vld [vmem:[%s20007_s1 + $0x1250] sm:$0xff] }
 0x42f   :  { %11000 = vmatprep.subr.bf16.mxu0 %v13175_v59  ;;  %11533 = vmatprep.subr.bf16.mxu1 %v13177_v24  ;;  %v624_v45 = vld [vmem:[%s20007_s1 + $0x1270] sm:$0xff]  ;;  %v621_v59 = vld [vmem:[%s20007_s1 + $0x1258] sm:$0xff] }
 0x430   :  { %v625_v24 = vld [vmem:[%s20007_s1 + $0x1278] sm:$0xff]  ;;  %v13223_v1 = vcombine.high %v620_v20, %v624_v45  ;;  %v13222_v33 = vcombine.low %v620_v20, %v624_v45 }
 0x431   :  { %v13225_v21 = vcombine.high %v621_v59, %v625_v24  ;;  %v13224_v34 = vcombine.low %v621_v59, %v625_v24 }
 0x432   :  { %11001 = vmatpush1.bf16.msra.mxu0 %v13174_v31  ;;  %11534 = vmatpush1.bf16.msra.mxu1 %v13176_v28  ;;  %v628_v31 = vld [vmem:[%s20007_s1 + $0x1290] sm:$0xff] }
 0x433   :  { %11002 = vmatprep.subr.bf16.mxu0 %v13183_v29  ;;  %11535 = vmatprep.subr.bf16.mxu1 %v13185_v32  ;;  %v632_v28 = vld [vmem:[%s20007_s1 + $0x12b0] sm:$0xff]  ;;  %v629_v29 = vld [vmem:[%s20007_s1 + $0x1298] sm:$0xff] }
 0x434   :  { %v633_v32 = vld [vmem:[%s20007_s1 + $0x12b8] sm:$0xff]  ;;  %v13231_v35 = vcombine.high %v628_v31, %v632_v28  ;;  %v13230_v42 = vcombine.low %v628_v31, %v632_v28 }
 0x435   :  { %v13233_v37 = vcombine.high %v629_v29, %v633_v32  ;;  %v13232_v44 = vcombine.low %v629_v29, %v633_v32 }
 0x436   :  { %11003 = vmatpush1.bf16.msra.mxu0 %v13182_v38  ;;  %11536 = vmatpush1.bf16.msra.mxu1 %v13184_v40  ;;  %v636_v38 = vld [vmem:[%s20007_s1 + $0x12d0] sm:$0xff] }
 0x437   :  { %11004 = vmatprep.subr.bf16.mxu0 %v13191_v41  ;;  %11537 = vmatprep.subr.bf16.mxu1 %v13193_v25  ;;  %v640_v40 = vld [vmem:[%s20007_s1 + $0x12f0] sm:$0xff]  ;;  %v637_v41 = vld [vmem:[%s20007_s1 + $0x12d8] sm:$0xff] }
 0x438   :  { %v641_v25 = vld [vmem:[%s20007_s1 + $0x12f8] sm:$0xff]  ;;  %v13239_v47 = vcombine.high %v636_v38, %v640_v40  ;;  %v13238_v23 = vcombine.low %v636_v38, %v640_v40 }
 0x439   :  { %v13241_v52 = vcombine.high %v637_v41, %v641_v25  ;;  %v13240_v6 = vcombine.low %v637_v41, %v641_v25 }
 0x43a   :  { %11005 = vmatpush1.bf16.msra.mxu0 %v13190_v56  ;;  %11538 = vmatpush1.bf16.msra.mxu1 %v13192_v3  ;;  %v644_v56 = vld [vmem:[%s20007_s1 + $0x1310] sm:$0xff] }
 0x43b   :  { %11006 = vmatprep.subr.bf16.mxu0 %v13199_v39  ;;  %11539 = vmatprep.subr.bf16.mxu1 %v13201_v0  ;;  %v648_v3 = vld [vmem:[%s20007_s1 + $0x1330] sm:$0xff]  ;;  %v645_v39 = vld [vmem:[%s20007_s1 + $0x1318] sm:$0xff] }
 0x43c   :  { %v649_v0 = vld [vmem:[%s20007_s1 + $0x1338] sm:$0xff]  ;;  %v13247_v7 = vcombine.high %v644_v56, %v648_v3  ;;  %v13246_v36 = vcombine.low %v644_v56, %v648_v3 }
 0x43d   :  { %v13249_v8 = vcombine.high %v645_v39, %v649_v0  ;;  %v13248_v14 = vcombine.low %v645_v39, %v649_v0 }
 0x43e   :  { %11007 = vmatpush1.bf16.msra.mxu0 %v13198_v10  ;;  %11540 = vmatpush1.bf16.msra.mxu1 %v13200_v54  ;;  %v652_v10 = vld [vmem:[%s20007_s1 + $0x1350] sm:$0xff] }
 0x43f   :  { %11008 = vmatprep.subr.bf16.mxu0 %v13207_v11  ;;  %11541 = vmatprep.subr.bf16.mxu1 %v13209_v13  ;;  %v656_v54 = vld [vmem:[%s20007_s1 + $0x1370] sm:$0xff]  ;;  %v653_v11 = vld [vmem:[%s20007_s1 + $0x1358] sm:$0xff] }
 0x440   :  { %v657_v13 = vld [vmem:[%s20007_s1 + $0x1378] sm:$0xff]  ;;  %v13255_v17 = vcombine.high %v652_v10, %v656_v54  ;;  %v13254_v20 = vcombine.low %v652_v10, %v656_v54 }
 0x441   :  { %v13257_v12 = vcombine.high %v653_v11, %v657_v13  ;;  %v13256_v45 = vcombine.low %v653_v11, %v657_v13 }
 0x442   :  { %11009 = vmatpush1.bf16.msra.mxu0 %v13206_v57  ;;  %11542 = vmatpush1.bf16.msra.mxu1 %v13208_v22  ;;  %v660_v57 = vld [vmem:[%s20007_s1 + $0x1390] sm:$0xff] }
 0x443   :  { %11010 = vmatprep.subr.bf16.mxu0 %v13215_v55  ;;  %11543 = vmatprep.subr.bf16.mxu1 %v13217_v53  ;;  %v664_v22 = vld [vmem:[%s20007_s1 + $0x13b0] sm:$0xff]  ;;  %v661_v55 = vld [vmem:[%s20007_s1 + $0x1398] sm:$0xff] }
 0x444   :  { %v665_v53 = vld [vmem:[%s20007_s1 + $0x13b8] sm:$0xff]  ;;  %v13263_v59 = vcombine.high %v660_v57, %v664_v22  ;;  %v13262_v31 = vcombine.low %v660_v57, %v664_v22 }
 0x445   :  { %v13265_v24 = vcombine.high %v661_v55, %v665_v53  ;;  %v13264_v28 = vcombine.low %v661_v55, %v665_v53  ;;  %v708_v53 = vld [vmem:[%s20007_s1 + $0x1510] sm:$0xff] }
 0x446   :  { %11011 = vmatpush1.bf16.msra.mxu0 %v13214_v26  ;;  %11544 = vmatpush1.bf16.msra.mxu1 %v13216_v15  ;;  %v668_v26 = vld [vmem:[%s20007_s1 + $0x13d0] sm:$0xff] }
 0x447   :  { %11012 = vmatprep.subr.bf16.mxu0 %v13223_v1  ;;  %11545 = vmatprep.subr.bf16.mxu1 %v13225_v21  ;;  %v672_v15 = vld [vmem:[%s20007_s1 + $0x13f0] sm:$0xff]  ;;  %v669_v1 = vld [vmem:[%s20007_s1 + $0x13d8] sm:$0xff] }
 0x448   :  { %v673_v21 = vld [vmem:[%s20007_s1 + $0x13f8] sm:$0xff]  ;;  %v13271_v29 = vcombine.high %v668_v26, %v672_v15  ;;  %v13270_v38 = vcombine.low %v668_v26, %v672_v15 }
 0x449   :  { %v13273_v32 = vcombine.high %v669_v1, %v673_v21  ;;  %v13272_v40 = vcombine.low %v669_v1, %v673_v21  ;;  %v716_v1 = vld [vmem:[%s20007_s1 + $0x1550] sm:$0xff] }
 0x44a   :  { %11013 = vmatpush1.bf16.msra.mxu0 %v13222_v33  ;;  %11546 = vmatpush1.bf16.msra.mxu1 %v13224_v34  ;;  %v676_v33 = vld [vmem:[%s20007_s1 + $0x1410] sm:$0xff] }
 0x44b   :  { %11014 = vmatprep.subr.bf16.mxu0 %v13231_v35  ;;  %11547 = vmatprep.subr.bf16.mxu1 %v13233_v37  ;;  %v680_v34 = vld [vmem:[%s20007_s1 + $0x1430] sm:$0xff]  ;;  %v677_v35 = vld [vmem:[%s20007_s1 + $0x1418] sm:$0xff] }
 0x44c   :  { %v681_v37 = vld [vmem:[%s20007_s1 + $0x1438] sm:$0xff]  ;;  %v13279_v41 = vcombine.high %v676_v33, %v680_v34  ;;  %v13278_v56 = vcombine.low %v676_v33, %v680_v34  ;;  %v720_v21 = vld [vmem:[%s20007_s1 + $0x1570] sm:$0xff] }
 0x44d   :  { %v13281_v25 = vcombine.high %v677_v35, %v681_v37  ;;  %v13280_v3 = vcombine.low %v677_v35, %v681_v37  ;;  %v13319_v33 = vcombine.high %v716_v1, %v720_v21  ;;  %v724_v35 = vld [vmem:[%s20007_s1 + $0x1590] sm:$0xff] }
 0x44e   :  { %11015 = vmatpush1.bf16.msra.mxu0 %v13230_v42  ;;  %11548 = vmatpush1.bf16.msra.mxu1 %v13232_v44  ;;  %v684_v42 = vld [vmem:[%s20007_s1 + $0x1450] sm:$0xff] }
 0x44f   :  { %11016 = vmatprep.subr.bf16.mxu0 %v13239_v47  ;;  %11549 = vmatprep.subr.bf16.mxu1 %v13241_v52  ;;  %v688_v44 = vld [vmem:[%s20007_s1 + $0x1470] sm:$0xff]  ;;  %v685_v47 = vld [vmem:[%s20007_s1 + $0x1458] sm:$0xff] }
 0x450   :  { %v689_v52 = vld [vmem:[%s20007_s1 + $0x1478] sm:$0xff]  ;;  %v13287_v39 = vcombine.high %v684_v42, %v688_v44  ;;  %v13286_v10 = vcombine.low %v684_v42, %v688_v44  ;;  %v728_v37 = vld [vmem:[%s20007_s1 + $0x15b0] sm:$0xff] }
 0x451   :  { %v13289_v0 = vcombine.high %v685_v47, %v689_v52  ;;  %v13288_v54 = vcombine.low %v685_v47, %v689_v52  ;;  %v13327_v42 = vcombine.high %v724_v35, %v728_v37  ;;  %v732_v47 = vld [vmem:[%s20007_s1 + $0x15d0] sm:$0xff] }
 0x452   :  { %11017 = vmatpush1.bf16.msra.mxu0 %v13238_v23  ;;  %11550 = vmatpush1.bf16.msra.mxu1 %v13240_v6  ;;  %v692_v23 = vld [vmem:[%s20007_s1 + $0x1490] sm:$0xff] }
 0x453   :  { %11018 = vmatprep.subr.bf16.mxu0 %v13247_v7  ;;  %11551 = vmatprep.subr.bf16.mxu1 %v13249_v8  ;;  %v696_v6 = vld [vmem:[%s20007_s1 + $0x14b0] sm:$0xff]  ;;  %v693_v7 = vld [vmem:[%s20007_s1 + $0x1498] sm:$0xff] }
 0x454   :  { %v697_v8 = vld [vmem:[%s20007_s1 + $0x14b8] sm:$0xff]  ;;  %v13295_v11 = vcombine.high %v692_v23, %v696_v6  ;;  %v736_v52 = vld [vmem:[%s20007_s1 + $0x15f0] sm:$0xff] }
 0x455   :  { %v13297_v13 = vcombine.high %v693_v7, %v697_v8  ;;  %v13296_v57 = vcombine.low %v693_v7, %v697_v8  ;;  %v740_v7 = vld [vmem:[%s20007_s1 + $0x1610] sm:$0xff] }
 0x456   :  { %11019 = vmatpush1.bf16.msra.mxu0 %v13246_v36  ;;  %11552 = vmatpush1.bf16.msra.mxu1 %v13248_v14  ;;  %v700_v36 = vld [vmem:[%s20007_s1 + $0x14d0] sm:$0xff] }
 0x457   :  { %11020 = vmatprep.subr.bf16.mxu0 %v13255_v17  ;;  %11553 = vmatprep.subr.bf16.mxu1 %v13257_v12  ;;  %v704_v14 = vld [vmem:[%s20007_s1 + $0x14f0] sm:$0xff]  ;;  %v705_v17 = vld [vmem:[%s20007_s1 + $0x14f8] sm:$0xff]  ;;  %v13294_v12 = vcombine.low %v692_v23, %v696_v6  ;;  %v13335_v23 = vcombine.high %v732_v47, %v736_v52 }
 0x458   :  { %v13303_v22 = vcombine.high %v700_v36, %v704_v14  ;;  %v744_v8 = vld [vmem:[%s20007_s1 + $0x1630] sm:$0xff] }
 0x45a   :  { %11021 = vmatpush1.bf16.msra.mxu0 %v13254_v20  ;;  %11554 = vmatpush1.bf16.msra.mxu1 %v13256_v45  ;;  %v712_v20 = vld [vmem:[%s20007_s1 + $0x1530] sm:$0xff]  ;;  %v713_v45 = vld [vmem:[%s20007_s1 + $0x1538] sm:$0xff] }
 0x45b   :  { %11022 = vmatprep.subr.bf16.mxu0 %v13263_v59  ;;  %11555 = vmatprep.subr.bf16.mxu1 %v13265_v24  ;;  %v13302_v59 = vcombine.low %v700_v36, %v704_v14  ;;  %v13311_v26 = vcombine.high %v708_v53, %v712_v20  ;;  %v13343_v36 = vcombine.high %v740_v7, %v744_v8 }
 0x45e   :  { %11023 = vmatpush1.bf16.msra.mxu0 %v13262_v31  ;;  %11556 = vmatpush1.bf16.msra.mxu1 %v13264_v28  ;;  %v717_v31 = vld [vmem:[%s20007_s1 + $0x1558] sm:$0xff] }
 0x45f   :  { %11024 = vmatprep.subr.bf16.mxu0 %v13271_v29  ;;  %11557 = vmatprep.subr.bf16.mxu1 %v13273_v32  ;;  %v721_v28 = vld [vmem:[%s20007_s1 + $0x1578] sm:$0xff]  ;;  %v13310_v29 = vcombine.low %v708_v53, %v712_v20 }
 0x460   :  { %v13321_v34 = vcombine.high %v717_v31, %v721_v28 }
 0x462   :  { %11025 = vmatpush1.bf16.msra.mxu0 %v13270_v38  ;;  %11558 = vmatpush1.bf16.msra.mxu1 %v13272_v40  ;;  %v725_v38 = vld [vmem:[%s20007_s1 + $0x1598] sm:$0xff] }
 0x463   :  { %11035 = vmatprep.subr.bf16.mxu0 %v13279_v41  ;;  %11568 = vmatprep.subr.bf16.mxu1 %v13281_v25  ;;  %v729_v40 = vld [vmem:[%s20007_s1 + $0x15b8] sm:$0xff]  ;;  %v13318_v41 = vcombine.low %v716_v1, %v720_v21  ;;  %v13320_v25 = vcombine.low %v717_v31, %v721_v28  ;;  %v764_v31 = vld [vmem:[%s20007_s1 + $0x16d0] sm:$0xff] }
 0x464   :  { %v13329_v44 = vcombine.high %v725_v38, %v729_v40  ;;  %v768_v28 = vld [vmem:[%s20007_s1 + $0x16f0] sm:$0xff] }
 0x465   :  { %11027 = vmatmul.mubr.bf16.vlgmr.msra.gmra.mrb[4].mxu0 %v15771_v16  ;;  %11560 = vmatmul.mubr.bf16.vlgmr.msra.gmra.mrb[4].mxu1 %v15771_v16  ;;  %v701_v16 = vld [vmem:[%s20007_s1 + $0x14d8] sm:$0xff] }
 0x466   :  { %11036 = vmatpush1.bf16.msra.mxu0 %v13278_v56  ;;  %11569 = vmatpush1.bf16.msra.mxu1 %v13280_v3  ;;  %v13305_v55 = vcombine.high %v701_v16, %v705_v17  ;;  %v13304_v24 = vcombine.low %v701_v16, %v705_v17  ;;  %v733_v56 = vld [vmem:[%s20007_s1 + $0x15d8] sm:$0xff]  ;;  %v748_v16 = vld [vmem:[%s20007_s1 + $0x1650] sm:$0xff] }
 0x467   :  { %11037 = vmatprep.subr.bf16.mxu0 %v13287_v39  ;;  %11570 = vmatprep.subr.bf16.mxu1 %v13289_v0  ;;  %v737_v3 = vld [vmem:[%s20007_s1 + $0x15f8] sm:$0xff]  ;;  %v13326_v39 = vcombine.low %v724_v35, %v728_v37  ;;  %v13328_v0 = vcombine.low %v725_v38, %v729_v40  ;;  %v752_v17 = vld [vmem:[%s20007_s1 + $0x1670] sm:$0xff]  ;;  %v13367_v35 = vcombine.high %v764_v31, %v768_v28 }
 0x468   :  { %11067 = vmatprep.mubr.bf16.mxu0 %v15792_v27  ;;  %11600 = vmatprep.mubr.bf16.mxu1 %v15792_v27  ;;  %v709_v27 = vld [vmem:[%s20007_s1 + $0x1518] sm:$0xff]  ;;  %v13337_v6 = vcombine.high %v733_v56, %v737_v3  ;;  %v13351_v53 = vcombine.high %v748_v16, %v752_v17  ;;  %v772_v38 = vld [vmem:[%s20007_s1 + $0x1710] sm:$0xff] }
 0x469   :  { %v13313_v15 = vcombine.high %v709_v27, %v713_v45  ;;  %v13312_v32 = vcombine.low %v709_v27, %v713_v45  ;;  %v756_v27 = vld [vmem:[%s20007_s1 + $0x1690] sm:$0xff] }
 0x46a   :  { %11038 = vmatpush1.bf16.msra.mxu0 %v13286_v10  ;;  %11571 = vmatpush1.bf16.msra.mxu1 %v13288_v54  ;;  %v741_v10 = vld [vmem:[%s20007_s1 + $0x1618] sm:$0xff]  ;;  %v760_v45 = vld [vmem:[%s20007_s1 + $0x16b0] sm:$0xff] }
 0x46b   :  { %11039 = vmatprep.subr.bf16.mxu0 %v13295_v11  ;;  %11572 = vmatprep.subr.bf16.mxu1 %v13297_v13  ;;  %v745_v54 = vld [vmem:[%s20007_s1 + $0x1638] sm:$0xff]  ;;  %v13334_v11 = vcombine.low %v732_v47, %v736_v52  ;;  %v13336_v13 = vcombine.low %v733_v56, %v737_v3  ;;  %v13359_v1 = vcombine.high %v756_v27, %v760_v45  ;;  %v776_v40 = vld [vmem:[%s20007_s1 + $0x1730] sm:$0xff] }
 0x46c   :  { %v13345_v14 = vcombine.high %v741_v10, %v745_v54  ;;  %v13375_v47 = vcombine.high %v772_v38, %v776_v40  ;;  %v780_v56 = vld [vmem:[%s20007_s1 + $0x1750] sm:$0xff] }
 0x46d   :  { %v784_v3 = vld [vmem:[%s20007_s1 + $0x1770] sm:$0xff] }
 0x46e   :  { %11040 = vmatpush1.bf16.msra.mxu0 %v13294_v12  ;;  %11573 = vmatpush1.bf16.msra.mxu1 %v13296_v57  ;;  %v749_v12 = vld [vmem:[%s20007_s1 + $0x1658] sm:$0xff] }
 0x46f   :  { %11041 = vmatprep.subr.bf16.mxu0 %v13303_v22  ;;  %11574 = vmatprep.subr.bf16.mxu1 %v13305_v55  ;;  %v753_v57 = vld [vmem:[%s20007_s1 + $0x1678] sm:$0xff]  ;;  %v13342_v22 = vcombine.low %v740_v7, %v744_v8  ;;  %v13344_v55 = vcombine.low %v741_v10, %v745_v54  ;;  %v13383_v7 = vcombine.high %v780_v56, %v784_v3  ;;  %v788_v10 = vld [vmem:[%s20007_s1 + $0x1790] sm:$0xff] }
 0x470   :  { %v13353_v20 = vcombine.high %v749_v12, %v753_v57  ;;  %v792_v54 = vld [vmem:[%s20007_s1 + $0x17b0] sm:$0xff] }
 0x472   :  { %11042 = vmatpush1.bf16.msra.mxu0 %v13302_v59  ;;  %11575 = vmatpush1.bf16.msra.mxu1 %v13304_v24  ;;  %v757_v59 = vld [vmem:[%s20007_s1 + $0x1698] sm:$0xff] }
 0x473   :  { %11043 = vmatprep.subr.bf16.mxu0 %v13311_v26  ;;  %11576 = vmatprep.subr.bf16.mxu1 %v13313_v15  ;;  %v761_v24 = vld [vmem:[%s20007_s1 + $0x16b8] sm:$0xff]  ;;  %v13350_v26 = vcombine.low %v748_v16, %v752_v17  ;;  %v13352_v15 = vcombine.low %v749_v12, %v753_v57  ;;  %v13391_v16 = vcombine.high %v788_v10, %v792_v54  ;;  %v796_v12 = vld [vmem:[%s20007_s1 + $0x17d0] sm:$0xff] }
 0x474   :  { %v13361_v21 = vcombine.high %v757_v59, %v761_v24  ;;  %v800_v57 = vld [vmem:[%s20007_s1 + $0x17f0] sm:$0xff] }
 0x476   :  { %11044 = vmatpush1.bf16.msra.mxu0 %v13310_v29  ;;  %11577 = vmatpush1.bf16.msra.mxu1 %v13312_v32  ;;  %v765_v29 = vld [vmem:[%s20007_s1 + $0x16d8] sm:$0xff] }
 0x477   :  { %11045 = vmatprep.subr.bf16.mxu0 %v13319_v33  ;;  %11578 = vmatprep.subr.bf16.mxu1 %v13321_v34  ;;  %v769_v32 = vld [vmem:[%s20007_s1 + $0x16f8] sm:$0xff]  ;;  %v13358_v33 = vcombine.low %v756_v27, %v760_v45  ;;  %v13360_v34 = vcombine.low %v757_v59, %v761_v24  ;;  %v13399_v27 = vcombine.high %v796_v12, %v800_v57  ;;  %v804_v59 = vld [vmem:[%s20007_s1 + $0x1810] sm:$0xff] }
 0x478   :  { %v13369_v37 = vcombine.high %v765_v29, %v769_v32  ;;  %v808_v24 = vld [vmem:[%s20007_s1 + $0x1830] sm:$0xff] }
 0x47a   :  { %11046 = vmatpush1.bf16.msra.mxu0 %v13318_v41  ;;  %11579 = vmatpush1.bf16.msra.mxu1 %v13320_v25  ;;  %v773_v41 = vld [vmem:[%s20007_s1 + $0x1718] sm:$0xff] }
 0x47b   :  { %11047 = vmatprep.subr.bf16.mxu0 %v13327_v42  ;;  %11580 = vmatprep.subr.bf16.mxu1 %v13329_v44  ;;  %v777_v25 = vld [vmem:[%s20007_s1 + $0x1738] sm:$0xff]  ;;  %v13366_v42 = vcombine.low %v764_v31, %v768_v28  ;;  %v13368_v44 = vcombine.low %v765_v29, %v769_v32  ;;  %v13407_v31 = vcombine.high %v804_v59, %v808_v24  ;;  %v812_v29 = vld [vmem:[%s20007_s1 + $0x1850] sm:$0xff] }
 0x47c   :  { %v13377_v52 = vcombine.high %v773_v41, %v777_v25  ;;  %v816_v32 = vld [vmem:[%s20007_s1 + $0x1870] sm:$0xff] }
 0x47e   :  { %11048 = vmatpush1.bf16.msra.mxu0 %v13326_v39  ;;  %11581 = vmatpush1.bf16.msra.mxu1 %v13328_v0  ;;  %v781_v39 = vld [vmem:[%s20007_s1 + $0x1758] sm:$0xff] }
 0x47f   :  { %11049 = vmatprep.subr.bf16.mxu0 %v13335_v23  ;;  %11582 = vmatprep.subr.bf16.mxu1 %v13337_v6  ;;  %v785_v0 = vld [vmem:[%s20007_s1 + $0x1778] sm:$0xff]  ;;  %v13374_v23 = vcombine.low %v772_v38, %v776_v40  ;;  %v13376_v6 = vcombine.low %v773_v41, %v777_v25  ;;  %v13415_v38 = vcombine.high %v812_v29, %v816_v32  ;;  %v820_v41 = vld [vmem:[%s20007_s1 + $0x1890] sm:$0xff] }
 0x480   :  { %v13385_v8 = vcombine.high %v781_v39, %v785_v0  ;;  %v824_v25 = vld [vmem:[%s20007_s1 + $0x18b0] sm:$0xff] }
 0x482   :  { %11050 = vmatpush1.bf16.msra.mxu0 %v13334_v11  ;;  %11583 = vmatpush1.bf16.msra.mxu1 %v13336_v13  ;;  %v789_v11 = vld [vmem:[%s20007_s1 + $0x1798] sm:$0xff] }
 0x483   :  { %11051 = vmatprep.subr.bf16.mxu0 %v13343_v36  ;;  %11584 = vmatprep.subr.bf16.mxu1 %v13345_v14  ;;  %v793_v13 = vld [vmem:[%s20007_s1 + $0x17b8] sm:$0xff]  ;;  %v13382_v36 = vcombine.low %v780_v56, %v784_v3  ;;  %v13384_v14 = vcombine.low %v781_v39, %v785_v0  ;;  %v13423_v56 = vcombine.high %v820_v41, %v824_v25  ;;  %v828_v39 = vld [vmem:[%s20007_s1 + $0x18d0] sm:$0xff] }
 0x484   :  { %v13393_v17 = vcombine.high %v789_v11, %v793_v13  ;;  %v832_v0 = vld [vmem:[%s20007_s1 + $0x18f0] sm:$0xff] }
 0x486   :  { %11052 = vmatpush1.bf16.msra.mxu0 %v13342_v22  ;;  %11585 = vmatpush1.bf16.msra.mxu1 %v13344_v55  ;;  %v797_v22 = vld [vmem:[%s20007_s1 + $0x17d8] sm:$0xff] }
 0x487   :  { %11053 = vmatprep.subr.bf16.mxu0 %v13351_v53  ;;  %11586 = vmatprep.subr.bf16.mxu1 %v13353_v20  ;;  %v801_v55 = vld [vmem:[%s20007_s1 + $0x17f8] sm:$0xff]  ;;  %v13390_v53 = vcombine.low %v788_v10, %v792_v54  ;;  %v13392_v20 = vcombine.low %v789_v11, %v793_v13  ;;  %v836_v54 = vld [vmem:[%s20007_s1 + $0x1910] sm:$0xff] }
 0x488   :  { %v13401_v45 = vcombine.high %v797_v22, %v801_v55  ;;  %v840_v11 = vld [vmem:[%s20007_s1 + $0x1930] sm:$0xff]  ;;  %v841_v13 = vld [vmem:[%s20007_s1 + $0x1938] sm:$0xff] }
 0x48a   :  { %11054 = vmatpush1.bf16.msra.mxu0 %v13350_v26  ;;  %11587 = vmatpush1.bf16.msra.mxu1 %v13352_v15  ;;  %v805_v26 = vld [vmem:[%s20007_s1 + $0x1818] sm:$0xff] }
 0x48b   :  { %11055 = vmatprep.subr.bf16.mxu0 %v13359_v1  ;;  %11588 = vmatprep.subr.bf16.mxu1 %v13361_v21  ;;  %v809_v15 = vld [vmem:[%s20007_s1 + $0x1838] sm:$0xff]  ;;  %v13398_v1 = vcombine.low %v796_v12, %v800_v57  ;;  %v13400_v21 = vcombine.low %v797_v22, %v801_v55  ;;  %v844_v12 = vld [vmem:[%s20007_s1 + $0x1950] sm:$0xff] }
 0x48c   :  { %v13409_v28 = vcombine.high %v805_v26, %v809_v15  ;;  %v848_v57 = vld [vmem:[%s20007_s1 + $0x1970] sm:$0xff]  ;;  %v845_v22 = vld [vmem:[%s20007_s1 + $0x1958] sm:$0xff] }
 0x48d   :  { %v849_v55 = vld [vmem:[%s20007_s1 + $0x1978] sm:$0xff] }
 0x48e   :  { %11056 = vmatpush1.bf16.msra.mxu0 %v13358_v33  ;;  %11589 = vmatpush1.bf16.msra.mxu1 %v13360_v34  ;;  %v813_v33 = vld [vmem:[%s20007_s1 + $0x1858] sm:$0xff] }
 0x48f   :  { %11057 = vmatprep.subr.bf16.mxu0 %v13367_v35  ;;  %11590 = vmatprep.subr.bf16.mxu1 %v13369_v37  ;;  %v817_v34 = vld [vmem:[%s20007_s1 + $0x1878] sm:$0xff]  ;;  %v13406_v35 = vcombine.low %v804_v59, %v808_v24  ;;  %v13408_v37 = vcombine.low %v805_v26, %v809_v15  ;;  %v852_v59 = vld [vmem:[%s20007_s1 + $0x1990] sm:$0xff] }
 0x490   :  { %v13417_v40 = vcombine.high %v813_v33, %v817_v34  ;;  %v856_v24 = vld [vmem:[%s20007_s1 + $0x19b0] sm:$0xff]  ;;  %v853_v26 = vld [vmem:[%s20007_s1 + $0x1998] sm:$0xff] }
 0x491   :  { %v857_v15 = vld [vmem:[%s20007_s1 + $0x19b8] sm:$0xff] }
 0x492   :  { %11058 = vmatpush1.bf16.msra.mxu0 %v13366_v42  ;;  %11591 = vmatpush1.bf16.msra.mxu1 %v13368_v44  ;;  %v821_v42 = vld [vmem:[%s20007_s1 + $0x1898] sm:$0xff] }
 0x493   :  { %11059 = vmatprep.subr.bf16.mxu0 %v13375_v47  ;;  %11592 = vmatprep.subr.bf16.mxu1 %v13377_v52  ;;  %v825_v44 = vld [vmem:[%s20007_s1 + $0x18b8] sm:$0xff]  ;;  %v13414_v47 = vcombine.low %v812_v29, %v816_v32  ;;  %v13416_v52 = vcombine.low %v813_v33, %v817_v34  ;;  %v860_v29 = vld [vmem:[%s20007_s1 + $0x19d0] sm:$0xff] }
 0x494   :  { %v13425_v3 = vcombine.high %v821_v42, %v825_v44  ;;  %v864_v32 = vld [vmem:[%s20007_s1 + $0x19f0] sm:$0xff]  ;;  %v861_v33 = vld [vmem:[%s20007_s1 + $0x19d8] sm:$0xff] }
 0x495   :  { %v865_v34 = vld [vmem:[%s20007_s1 + $0x19f8] sm:$0xff] }
 0x496   :  { %11060 = vmatpush1.bf16.msra.mxu0 %v13374_v23  ;;  %11593 = vmatpush1.bf16.msra.mxu1 %v13376_v6  ;;  %v833_v23 = vld [vmem:[%s20007_s1 + $0x18f8] sm:$0xff]  ;;  %v13422_v6 = vcombine.low %v820_v41, %v824_v25  ;;  %v868_v41 = vld [vmem:[%s20007_s1 + $0x1a10] sm:$0xff] }
 0x497   :  { %11061 = vmatprep.subr.bf16.mxu0 %v13383_v7  ;;  %11594 = vmatprep.subr.bf16.mxu1 %v13385_v8  ;;  %v13424_v7 = vcombine.low %v821_v42, %v825_v44  ;;  %v13431_v8 = vcombine.high %v828_v39, %v832_v0  ;;  %v872_v25 = vld [vmem:[%s20007_s1 + $0x1a30] sm:$0xff]  ;;  %v869_v42 = vld [vmem:[%s20007_s1 + $0x1a18] sm:$0xff] }
 0x498   :  { %v873_v44 = vld [vmem:[%s20007_s1 + $0x1a38] sm:$0xff] }
 0x49a   :  { %11062 = vmatpush1.bf16.msra.mxu0 %v13382_v36  ;;  %11595 = vmatpush1.bf16.msra.mxu1 %v13384_v14  ;;  %v13430_v36 = vcombine.low %v828_v39, %v832_v0  ;;  %v876_v39 = vld [vmem:[%s20007_s1 + $0x1a50] sm:$0xff] }
 0x49b   :  { %11063 = vmatprep.subr.bf16.mxu0 %v13391_v16  ;;  %11596 = vmatprep.subr.bf16.mxu1 %v13393_v17  ;;  %v13439_v16 = vcombine.high %v836_v54, %v840_v11  ;;  %v880_v0 = vld [vmem:[%s20007_s1 + $0x1a70] sm:$0xff] }
 0x49e   :  { %11064 = vmatpush1.bf16.msra.mxu0 %v13390_v53  ;;  %11597 = vmatpush1.bf16.msra.mxu1 %v13392_v20  ;;  %v13438_v53 = vcombine.low %v836_v54, %v840_v11  ;;  %v884_v54 = vld [vmem:[%s20007_s1 + $0x1a90] sm:$0xff] }
 0x49f   :  { %11065 = vmatprep.subr.bf16.mxu0 %v13399_v27  ;;  %11598 = vmatprep.subr.bf16.mxu1 %v13401_v45  ;;  %v13447_v27 = vcombine.high %v844_v12, %v848_v57  ;;  %v13449_v45 = vcombine.high %v845_v22, %v849_v55  ;;  %v888_v11 = vld [vmem:[%s20007_s1 + $0x1ab0] sm:$0xff] }
 0x4a2   :  { %11066 = vmatpush1.bf16.msra.mxu0 %v13398_v1  ;;  %11599 = vmatpush1.bf16.msra.mxu1 %v13400_v21  ;;  %v13446_v1 = vcombine.low %v844_v12, %v848_v57  ;;  %v13448_v21 = vcombine.low %v845_v22, %v849_v55  ;;  %v892_v12 = vld [vmem:[%s20007_s1 + $0x1ad0] sm:$0xff]  ;;  %v893_v22 = vld [vmem:[%s20007_s1 + $0x1ad8] sm:$0xff] }
 0x4a3   :  { %11076 = vmatprep.subr.bf16.mxu0 %v13407_v31  ;;  %11609 = vmatprep.subr.bf16.mxu1 %v13409_v28  ;;  %v13455_v31 = vcombine.high %v852_v59, %v856_v24  ;;  %v13457_v28 = vcombine.high %v853_v26, %v857_v15  ;;  %v896_v57 = vld [vmem:[%s20007_s1 + $0x1af0] sm:$0xff]  ;;  %v897_v55 = vld [vmem:[%s20007_s1 + $0x1af8] sm:$0xff] }
 0x4a5   :  { %11068 = vmatmul.mubr.bf16.vlgmr.msra.gmra.mrb[4].mxu0 %v15980_v46  ;;  %11601 = vmatmul.mubr.bf16.vlgmr.msra.gmra.mrb[4].mxu1 %v15980_v46  ;;  %v829_v46 = vld [vmem:[%s20007_s1 + $0x18d8] sm:$0xff] }
 0x4a6   :  { %11077 = vmatpush1.bf16.msra.mxu0 %v13406_v35  ;;  %11610 = vmatpush1.bf16.msra.mxu1 %v13408_v37  ;;  %v13433_v10 = vcombine.high %v829_v46, %v833_v23  ;;  %v13432_v14 = vcombine.low %v829_v46, %v833_v23  ;;  %v13454_v35 = vcombine.low %v852_v59, %v856_v24  ;;  %v877_v46 = vld [vmem:[%s20007_s1 + $0x1a58] sm:$0xff]  ;;  %v900_v59 = vld [vmem:[%s20007_s1 + $0x1b10] sm:$0xff] }
 0x4a7   :  { %11078 = vmatprep.subr.bf16.mxu0 %v13415_v38  ;;  %11611 = vmatprep.subr.bf16.mxu1 %v13417_v40  ;;  %v13456_v37 = vcombine.low %v853_v26, %v857_v15  ;;  %v13463_v38 = vcombine.high %v860_v29, %v864_v32  ;;  %v13465_v40 = vcombine.high %v861_v33, %v865_v34  ;;  %v881_v23 = vld [vmem:[%s20007_s1 + $0x1a78] sm:$0xff]  ;;  %v904_v24 = vld [vmem:[%s20007_s1 + $0x1b30] sm:$0xff] }
 0x4a8   :  { %11108 = vmatprep.mubr.bf16.mxu0 %v16001_v58  ;;  %11641 = vmatprep.mubr.bf16.mxu1 %v16001_v58  ;;  %v837_v58 = vld [vmem:[%s20007_s1 + $0x1918] sm:$0xff] }
 0x4a9   :  { %v13441_v17 = vcombine.high %v837_v58, %v841_v13  ;;  %v13440_v20 = vcombine.low %v837_v58, %v841_v13  ;;  %v885_v58 = vld [vmem:[%s20007_s1 + $0x1a98] sm:$0xff] }
 0x4aa   :  { %11079 = vmatpush1.bf16.msra.mxu0 %v13414_v47  ;;  %11612 = vmatpush1.bf16.msra.mxu1 %v13416_v52  ;;  %v13462_v47 = vcombine.low %v860_v29, %v864_v32  ;;  %v13464_v52 = vcombine.low %v861_v33, %v865_v34  ;;  %v889_v13 = vld [vmem:[%s20007_s1 + $0x1ab8] sm:$0xff]  ;;  %v908_v29 = vld [vmem:[%s20007_s1 + $0x1b50] sm:$0xff] }
 0x4ab   :  { %11080 = vmatprep.subr.bf16.mxu0 %v13423_v56  ;;  %11613 = vmatprep.subr.bf16.mxu1 %v13425_v3  ;;  %v13471_v56 = vcombine.high %v868_v41, %v872_v25  ;;  %v13473_v3 = vcombine.high %v869_v42, %v873_v44  ;;  %v901_v26 = vld [vmem:[%s20007_s1 + $0x1b18] sm:$0xff]  ;;  %v912_v32 = vld [vmem:[%s20007_s1 + $0x1b70] sm:$0xff] }
 0x4ac   :  { %v905_v15 = vld [vmem:[%s20007_s1 + $0x1b38] sm:$0xff] }
 0x4ad   :  { %v909_v33 = vld [vmem:[%s20007_s1 + $0x1b58] sm:$0xff] }
 0x4ae   :  { %11081 = vmatpush1.bf16.msra.mxu0 %v13422_v6  ;;  %11614 = vmatpush1.bf16.msra.mxu1 %v13424_v7  ;;  %v13470_v6 = vcombine.low %v868_v41, %v872_v25  ;;  %v13472_v7 = vcombine.low %v869_v42, %v873_v44  ;;  %v913_v34 = vld [vmem:[%s20007_s1 + $0x1b78] sm:$0xff]  ;;  %v916_v41 = vld [vmem:[%s20007_s1 + $0x1b90] sm:$0xff] }
 0x4af   :  { %11082 = vmatprep.subr.bf16.mxu0 %v13431_v8  ;;  %11615 = vmatprep.subr.bf16.mxu1 %v13433_v10  ;;  %v13479_v8 = vcombine.high %v876_v39, %v880_v0  ;;  %v13481_v10 = vcombine.high %v877_v46, %v881_v23  ;;  %v920_v25 = vld [vmem:[%s20007_s1 + $0x1bb0] sm:$0xff]  ;;  %v917_v42 = vld [vmem:[%s20007_s1 + $0x1b98] sm:$0xff] }
 0x4b0   :  { %v921_v44 = vld [vmem:[%s20007_s1 + $0x1bb8] sm:$0xff] }
 0x4b2   :  { %11083 = vmatpush1.bf16.msra.mxu0 %v13430_v36  ;;  %11616 = vmatpush1.bf16.msra.mxu1 %v13432_v14  ;;  %v13478_v36 = vcombine.low %v876_v39, %v880_v0  ;;  %v13480_v14 = vcombine.low %v877_v46, %v881_v23  ;;  %v924_v39 = vld [vmem:[%s20007_s1 + $0x1bd0] sm:$0xff]  ;;  %v925_v46 = vld [vmem:[%s20007_s1 + $0x1bd8] sm:$0xff] }
 0x4b3   :  { %11084 = vmatprep.subr.bf16.mxu0 %v13439_v16  ;;  %11617 = vmatprep.subr.bf16.mxu1 %v13441_v17  ;;  %v13487_v16 = vcombine.high %v884_v54, %v888_v11  ;;  %v13489_v17 = vcombine.high %v885_v58, %v889_v13  ;;  %v928_v0 = vld [vmem:[%s20007_s1 + $0x1bf0] sm:$0xff]  ;;  %v929_v23 = vld [vmem:[%s20007_s1 + $0x1bf8] sm:$0xff] }
 0x4b6   :  { %11085 = vmatpush1.bf16.msra.mxu0 %v13438_v53  ;;  %11618 = vmatpush1.bf16.msra.mxu1 %v13440_v20  ;;  %v13486_v53 = vcombine.low %v884_v54, %v888_v11  ;;  %v13488_v20 = vcombine.low %v885_v58, %v889_v13  ;;  %v932_v54 = vld [vmem:[%s20007_s1 + $0x1c10] sm:$0xff]  ;;  %v933_v58 = vld [vmem:[%s20007_s1 + $0x1c18] sm:$0xff] }
 0x4b7   :  { %11086 = vmatprep.subr.bf16.mxu0 %v13447_v27  ;;  %11619 = vmatprep.subr.bf16.mxu1 %v13449_v45  ;;  %v13495_v27 = vcombine.high %v892_v12, %v896_v57  ;;  %v13497_v45 = vcombine.high %v893_v22, %v897_v55  ;;  %v936_v11 = vld [vmem:[%s20007_s1 + $0x1c30] sm:$0xff]  ;;  %v937_v13 = vld [vmem:[%s20007_s1 + $0x1c38] sm:$0xff] }
 0x4ba   :  { %11087 = vmatpush1.bf16.msra.mxu0 %v13446_v1  ;;  %11620 = vmatpush1.bf16.msra.mxu1 %v13448_v21  ;;  %v13494_v1 = vcombine.low %v892_v12, %v896_v57  ;;  %v13496_v21 = vcombine.low %v893_v22, %v897_v55  ;;  %v940_v12 = vld [vmem:[%s20007_s1 + $0x1c50] sm:$0xff]  ;;  %v941_v22 = vld [vmem:[%s20007_s1 + $0x1c58] sm:$0xff] }
 0x4bb   :  { %11088 = vmatprep.subr.bf16.mxu0 %v13455_v31  ;;  %11621 = vmatprep.subr.bf16.mxu1 %v13457_v28  ;;  %v13503_v31 = vcombine.high %v900_v59, %v904_v24  ;;  %v13505_v28 = vcombine.high %v901_v26, %v905_v15  ;;  %v944_v57 = vld [vmem:[%s20007_s1 + $0x1c70] sm:$0xff]  ;;  %v945_v55 = vld [vmem:[%s20007_s1 + $0x1c78] sm:$0xff] }
 0x4be   :  { %11089 = vmatpush1.bf16.msra.mxu0 %v13454_v35  ;;  %11622 = vmatpush1.bf16.msra.mxu1 %v13456_v37  ;;  %v13502_v35 = vcombine.low %v900_v59, %v904_v24  ;;  %v13504_v37 = vcombine.low %v901_v26, %v905_v15  ;;  %v948_v59 = vld [vmem:[%s20007_s1 + $0x1c90] sm:$0xff]  ;;  %v949_v26 = vld [vmem:[%s20007_s1 + $0x1c98] sm:$0xff] }
 0x4bf   :  { %11090 = vmatprep.subr.bf16.mxu0 %v13463_v38  ;;  %11623 = vmatprep.subr.bf16.mxu1 %v13465_v40  ;;  %v13511_v38 = vcombine.high %v908_v29, %v912_v32  ;;  %v13513_v40 = vcombine.high %v909_v33, %v913_v34  ;;  %v952_v24 = vld [vmem:[%s20007_s1 + $0x1cb0] sm:$0xff]  ;;  %v953_v15 = vld [vmem:[%s20007_s1 + $0x1cb8] sm:$0xff] }
 0x4c2   :  { %11091 = vmatpush1.bf16.msra.mxu0 %v13462_v47  ;;  %11624 = vmatpush1.bf16.msra.mxu1 %v13464_v52  ;;  %v13510_v47 = vcombine.low %v908_v29, %v912_v32  ;;  %v13512_v52 = vcombine.low %v909_v33, %v913_v34  ;;  %v956_v29 = vld [vmem:[%s20007_s1 + $0x1cd0] sm:$0xff]  ;;  %v961_v33 = vld [vmem:[%s20007_s1 + $0x1cf8] sm:$0xff]  ;;  %v13550_v34 = vcombine.low %v948_v59, %v952_v24 }
 0x4c3   :  { %11092 = vmatprep.subr.bf16.mxu0 %v13471_v56  ;;  %11625 = vmatprep.subr.bf16.mxu1 %v13473_v3  ;;  %v13519_v56 = vcombine.high %v916_v41, %v920_v25  ;;  %v13521_v3 = vcombine.high %v917_v42, %v921_v44  ;;  %v960_v32 = vld [vmem:[%s20007_s1 + $0x1cf0] sm:$0xff] }
 0x4c6   :  { %11093 = vmatpush1.bf16.msra.mxu0 %v13470_v6  ;;  %11626 = vmatpush1.bf16.msra.mxu1 %v13472_v7  ;;  %v13518_v6 = vcombine.low %v916_v41, %v920_v25  ;;  %v13520_v7 = vcombine.low %v917_v42, %v921_v44  ;;  %v968_v41 = vld [vmem:[%s20007_s1 + $0x1d30] sm:$0xff]  ;;  %v969_v25 = vld [vmem:[%s20007_s1 + $0x1d38] sm:$0xff]  ;;  %v13558_v42 = vcombine.low %v956_v29, %v960_v32 }
 0x4c7   :  { %11094 = vmatprep.subr.bf16.mxu0 %v13479_v8  ;;  %11627 = vmatprep.subr.bf16.mxu1 %v13481_v10  ;;  %v13527_v8 = vcombine.high %v924_v39, %v928_v0  ;;  %v13529_v10 = vcombine.high %v925_v46, %v929_v23 }
 0x4ca   :  { %11095 = vmatpush1.bf16.msra.mxu0 %v13478_v36  ;;  %11628 = vmatpush1.bf16.msra.mxu1 %v13480_v14  ;;  %v13526_v36 = vcombine.low %v924_v39, %v928_v0  ;;  %v13528_v14 = vcombine.low %v925_v46, %v929_v23  ;;  %v973_v39 = vld [vmem:[%s20007_s1 + $0x1d58] sm:$0xff] }
 0x4cb   :  { %11096 = vmatprep.subr.bf16.mxu0 %v13487_v16  ;;  %11629 = vmatprep.subr.bf16.mxu1 %v13489_v17  ;;  %v13535_v16 = vcombine.high %v932_v54, %v936_v11  ;;  %v13537_v17 = vcombine.high %v933_v58, %v937_v13  ;;  %v977_v0 = vld [vmem:[%s20007_s1 + $0x1d78] sm:$0xff] }
 0x4ce   :  { %11097 = vmatpush1.bf16.msra.mxu0 %v13486_v53  ;;  %11630 = vmatpush1.bf16.msra.mxu1 %v13488_v20  ;;  %v13534_v53 = vcombine.low %v932_v54, %v936_v11  ;;  %v13536_v20 = vcombine.low %v933_v58, %v937_v13  ;;  %v981_v54 = vld [vmem:[%s20007_s1 + $0x1d98] sm:$0xff]  ;;  %v13576_v13 = vcombine.low %v973_v39, %v977_v0 }
 0x4cf   :  { %11098 = vmatprep.subr.bf16.mxu0 %v13495_v27  ;;  %11631 = vmatprep.subr.bf16.mxu1 %v13497_v45  ;;  %v13543_v27 = vcombine.high %v940_v12, %v944_v57  ;;  %v13545_v45 = vcombine.high %v941_v22, %v945_v55  ;;  %v985_v11 = vld [vmem:[%s20007_s1 + $0x1db8] sm:$0xff] }
 0x4d2   :  { %11099 = vmatpush1.bf16.msra.mxu0 %v13494_v1  ;;  %11632 = vmatpush1.bf16.msra.mxu1 %v13496_v21  ;;  %v13542_v1 = vcombine.low %v940_v12, %v944_v57  ;;  %v13544_v21 = vcombine.low %v941_v22, %v945_v55  ;;  %v989_v12 = vld [vmem:[%s20007_s1 + $0x1dd8] sm:$0xff]  ;;  %v13584_v55 = vcombine.low %v981_v54, %v985_v11 }
 0x4d3   :  { %11100 = vmatprep.subr.bf16.mxu0 %v13503_v31  ;;  %11633 = vmatprep.subr.bf16.mxu1 %v13505_v28  ;;  %v13551_v31 = vcombine.high %v948_v59, %v952_v24  ;;  %v13553_v28 = vcombine.high %v949_v26, %v953_v15  ;;  %v993_v57 = vld [vmem:[%s20007_s1 + $0x1df8] sm:$0xff] }
 0x4d4   :  { %v997_v59 = vld [vmem:[%s20007_s1 + $0x1e18] sm:$0xff] }
 0x4d5   :  { %v1001_v24 = vld [vmem:[%s20007_s1 + $0x1e38] sm:$0xff] }
 0x4d6   :  { %11101 = vmatpush1.bf16.msra.mxu0 %v13502_v35  ;;  %11634 = vmatpush1.bf16.msra.mxu1 %v13504_v37  ;;  %v13552_v35 = vcombine.low %v949_v26, %v953_v15  ;;  %v13559_v37 = vcombine.high %v956_v29, %v960_v32  ;;  %v13592_v15 = vcombine.low %v989_v12, %v993_v57  ;;  %v1005_v29 = vld [vmem:[%s20007_s1 + $0x1e58] sm:$0xff] }
 0x4d7   :  { %11102 = vmatprep.subr.bf16.mxu0 %v13511_v38  ;;  %11635 = vmatprep.subr.bf16.mxu1 %v13513_v40  ;;  %v964_v40 = vld [vmem:[%s20007_s1 + $0x1d10] sm:$0xff]  ;;  %v1009_v32 = vld [vmem:[%s20007_s1 + $0x1e78] sm:$0xff] }
 0x4d8   :  { %v13566_v46 = vcombine.low %v964_v40, %v968_v41 }
 0x4da   :  { %11103 = vmatpush1.bf16.msra.mxu0 %v13510_v47  ;;  %11636 = vmatpush1.bf16.msra.mxu1 %v13512_v52  ;;  %v13567_v47 = vcombine.high %v964_v40, %v968_v41  ;;  %v1013_v40 = vld [vmem:[%s20007_s1 + $0x1e98] sm:$0xff] }
 0x4db   :  { %11104 = vmatprep.subr.bf16.mxu0 %v13519_v56  ;;  %11637 = vmatprep.subr.bf16.mxu1 %v13521_v3  ;;  %v972_v56 = vld [vmem:[%s20007_s1 + $0x1d50] sm:$0xff]  ;;  %v1017_v41 = vld [vmem:[%s20007_s1 + $0x1eb8] sm:$0xff] }
 0x4dc   :  { %v976_v3 = vld [vmem:[%s20007_s1 + $0x1d70] sm:$0xff] }
 0x4dd   :  { %v13574_v58 = vcombine.low %v972_v56, %v976_v3 }
 0x4de   :  { %11105 = vmatpush1.bf16.msra.mxu0 %v13518_v6  ;;  %11638 = vmatpush1.bf16.msra.mxu1 %v13520_v7  ;;  %v13575_v6 = vcombine.high %v972_v56, %v976_v3  ;;  %v13577_v7 = vcombine.high %v973_v39, %v977_v0  ;;  %v1021_v56 = vld [vmem:[%s20007_s1 + $0x1ed8] sm:$0xff]  ;;  %v13616_v0 = vcombine.low %v1013_v40, %v1017_v41 }
 0x4df   :  { %11106 = vmatprep.subr.bf16.mxu0 %v13527_v8  ;;  %11639 = vmatprep.subr.bf16.mxu1 %v13529_v10  ;;  %v980_v8 = vld [vmem:[%s20007_s1 + $0x1d90] sm:$0xff]  ;;  %v1025_v3 = vld [vmem:[%s20007_s1 + $0x1ef8] sm:$0xff] }
 0x4e0   :  { %v984_v10 = vld [vmem:[%s20007_s1 + $0x1db0] sm:$0xff] }
 0x4e1   :  { %v13582_v22 = vcombine.low %v980_v8, %v984_v10 }
 0x4e2   :  { %11107 = vmatpush1.bf16.msra.mxu0 %v13526_v36  ;;  %11640 = vmatpush1.bf16.msra.mxu1 %v13528_v14  ;;  %v13583_v36 = vcombine.high %v980_v8, %v984_v10  ;;  %v13585_v14 = vcombine.high %v981_v54, %v985_v11  ;;  %v1029_v8 = vld [vmem:[%s20007_s1 + $0x1f18] sm:$0xff]  ;;  %v13624_v11 = vcombine.low %v1021_v56, %v1025_v3 }
 0x4e3   :  { %11117 = vmatprep.subr.bf16.mxu0 %v13535_v16  ;;  %11650 = vmatprep.subr.bf16.mxu1 %v13537_v17  ;;  %v988_v16 = vld [vmem:[%s20007_s1 + $0x1dd0] sm:$0xff]  ;;  %v1033_v10 = vld [vmem:[%s20007_s1 + $0x1f38] sm:$0xff] }
 0x4e4   :  { %v992_v17 = vld [vmem:[%s20007_s1 + $0x1df0] sm:$0xff] }
 0x4e5   :  { %11109 = vmatmul.mubr.bf16.vlgmr.msra.gmra.mrb[4].mxu0 %v16189_v19  ;;  %11642 = vmatmul.mubr.bf16.vlgmr.msra.gmra.mrb[4].mxu1 %v16189_v19  ;;  %v957_v19 = vld [vmem:[%s20007_s1 + $0x1cd8] sm:$0xff]  ;;  %v13590_v26 = vcombine.low %v988_v16, %v992_v17 }
 0x4e6   :  { %11118 = vmatpush1.bf16.msra.mxu0 %v13534_v53  ;;  %11651 = vmatpush1.bf16.msra.mxu1 %v13536_v20  ;;  %v13561_v38 = vcombine.high %v957_v19, %v961_v33  ;;  %v13560_v44 = vcombine.low %v957_v19, %v961_v33  ;;  %v13591_v53 = vcombine.high %v988_v16, %v992_v17  ;;  %v1037_v16 = vld [vmem:[%s20007_s1 + $0x1f58] sm:$0xff] }
 0x4e7   :  { %11119 = vmatprep.subr.bf16.mxu0 %v13543_v27  ;;  %11652 = vmatprep.subr.bf16.mxu1 %v13545_v45  ;;  %v13593_v20 = vcombine.high %v989_v12, %v993_v57  ;;  %v996_v27 = vld [vmem:[%s20007_s1 + $0x1e10] sm:$0xff]  ;;  %v13600_v33 = vcombine.low %v997_v59, %v1001_v24  ;;  %v1041_v17 = vld [vmem:[%s20007_s1 + $0x1f78] sm:$0xff]  ;;  %v13632_v57 = vcombine.low %v1029_v8, %v1033_v10 }
 0x4e8   :  { %11149 = vmatprep.mubr.bf16.mxu0 %v16210_v30  ;;  %11682 = vmatprep.mubr.bf16.mxu1 %v16210_v30  ;;  %v965_v30 = vld [vmem:[%s20007_s1 + $0x1d18] sm:$0xff]  ;;  %v1000_v45 = vld [vmem:[%s20007_s1 + $0x1e30] sm:$0xff] }
 0x4e9   :  { %v13569_v52 = vcombine.high %v965_v30, %v969_v25  ;;  %v13568_v23 = vcombine.low %v965_v30, %v969_v25  ;;  %v13598_v19 = vcombine.low %v996_v27, %v1000_v45  ;;  %v13608_v25 = vcombine.low %v1005_v29, %v1009_v32 }
 0x4ea   :  { %11120 = vmatpush1.bf16.msra.mxu0 %v13542_v1  ;;  %11653 = vmatpush1.bf16.msra.mxu1 %v13544_v21  ;;  %v13599_v1 = vcombine.high %v996_v27, %v1000_v45  ;;  %v13601_v21 = vcombine.high %v997_v59, %v1001_v24  ;;  %v1045_v27 = vld [vmem:[%s20007_s1 + $0x1f98] sm:$0xff]  ;;  %v13640_v24 = vcombine.low %v1037_v16, %v1041_v17 }
 0x4eb   :  { %11121 = vmatprep.subr.bf16.mxu0 %v13551_v31  ;;  %11654 = vmatprep.subr.bf16.mxu1 %v13553_v28  ;;  %v1004_v31 = vld [vmem:[%s20007_s1 + $0x1e50] sm:$0xff]  ;;  %v1049_v45 = vld [vmem:[%s20007_s1 + $0x1fb8] sm:$0xff] }
 0x4ec   :  { %v1008_v28 = vld [vmem:[%s20007_s1 + $0x1e70] sm:$0xff] }
 0x4ed   :  { %v13606_v30 = vcombine.low %v1004_v31, %v1008_v28 }
 0x4ee   :  { %11122 = vmatpush1.bf16.msra.mxu0 %v13550_v34  ;;  %11655 = vmatpush1.bf16.msra.mxu1 %v13552_v35  ;;  %v13607_v34 = vcombine.high %v1004_v31, %v1008_v28  ;;  %v13609_v35 = vcombine.high %v1005_v29, %v1009_v32  ;;  %v1053_v31 = vld [vmem:[%s20007_s1 + $0x1fd8] sm:$0xff]  ;;  %v13648_v32 = vcombine.low %v1045_v27, %v1049_v45 }
 0x4ef   :  { %11123 = vmatprep.subr.bf16.mxu0 %v13559_v37  ;;  %11656 = vmatprep.subr.bf16.mxu1 %v13561_v38  ;;  %v1012_v37 = vld [vmem:[%s20007_s1 + $0x1e90] sm:$0xff]  ;;  %v1057_v28 = vld [vmem:[%s20007_s1 + $0x1ff8] sm:$0xff] }
 0x4f0   :  { %v1016_v38 = vld [vmem:[%s20007_s1 + $0x1eb0] sm:$0xff] }
 0x4f1   :  { %v13614_v39 = vcombine.low %v1012_v37, %v1016_v38 }
 0x4f2   :  { %11124 = vmatpush1.bf16.msra.mxu0 %v13558_v42  ;;  %11657 = vmatpush1.bf16.msra.mxu1 %v13560_v44  ;;  %v13615_v42 = vcombine.high %v1012_v37, %v1016_v38  ;;  %v13617_v44 = vcombine.high %v1013_v40, %v1017_v41  ;;  %v1061_v37 = vld [vmem:[%s20007_s1 + $0x2018] sm:$0xff]  ;;  %v13656_v41 = vcombine.low %v1053_v31, %v1057_v28 }
 0x4f3   :  { %11125 = vmatprep.subr.bf16.mxu0 %v13567_v47  ;;  %11658 = vmatprep.subr.bf16.mxu1 %v13569_v52  ;;  %v1020_v47 = vld [vmem:[%s20007_s1 + $0x1ed0] sm:$0xff]  ;;  %v1065_v38 = vld [vmem:[%s20007_s1 + $0x2038] sm:$0xff] }
 0x4f4   :  { %v1024_v52 = vld [vmem:[%s20007_s1 + $0x1ef0] sm:$0xff] }
 0x4f5   :  { %v13622_v54 = vcombine.low %v1020_v47, %v1024_v52 }
 0x4f6   :  { %11126 = vmatpush1.bf16.msra.mxu0 %v13566_v46  ;;  %11659 = vmatpush1.bf16.msra.mxu1 %v13568_v23  ;;  %v13623_v46 = vcombine.high %v1020_v47, %v1024_v52  ;;  %v13625_v23 = vcombine.high %v1021_v56, %v1025_v3  ;;  %v1069_v47 = vld [vmem:[%s20007_s1 + $0x2058] sm:$0xff]  ;;  %v13664_v3 = vcombine.low %v1061_v37, %v1065_v38 }
 0x4f7   :  { %11127 = vmatprep.subr.bf16.mxu0 %v13575_v6  ;;  %11660 = vmatprep.subr.bf16.mxu1 %v13577_v7  ;;  %v1028_v6 = vld [vmem:[%s20007_s1 + $0x1f10] sm:$0xff]  ;;  %v1073_v52 = vld [vmem:[%s20007_s1 + $0x2078] sm:$0xff] }
 0x4f8   :  { %v1032_v7 = vld [vmem:[%s20007_s1 + $0x1f30] sm:$0xff] }
 0x4f9   :  { %v13630_v12 = vcombine.low %v1028_v6, %v1032_v7 }
 0x4fa   :  { %11128 = vmatpush1.bf16.msra.mxu0 %v13574_v58  ;;  %11661 = vmatpush1.bf16.msra.mxu1 %v13576_v13  ;;  %v13631_v58 = vcombine.high %v1028_v6, %v1032_v7  ;;  %v13633_v13 = vcombine.high %v1029_v8, %v1033_v10  ;;  %v1077_v6 = vld [vmem:[%s20007_s1 + $0x2098] sm:$0xff]  ;;  %v13672_v10 = vcombine.low %v1069_v47, %v1073_v52 }
 0x4fb   :  { %11129 = vmatprep.subr.bf16.mxu0 %v13583_v36  ;;  %11662 = vmatprep.subr.bf16.mxu1 %v13585_v14  ;;  %v1036_v36 = vld [vmem:[%s20007_s1 + $0x1f50] sm:$0xff]  ;;  %v1081_v7 = vld [vmem:[%s20007_s1 + $0x20b8] sm:$0xff] }
 0x4fc   :  { %v1040_v14 = vld [vmem:[%s20007_s1 + $0x1f70] sm:$0xff] }
 0x4fd   :  { %v13638_v59 = vcombine.low %v1036_v36, %v1040_v14 }
 0x4fe   :  { %11130 = vmatpush1.bf16.msra.mxu0 %v13582_v22  ;;  %11663 = vmatpush1.bf16.msra.mxu1 %v13584_v55  ;;  %v13639_v22 = vcombine.high %v1036_v36, %v1040_v14  ;;  %v13641_v55 = vcombine.high %v1037_v16, %v1041_v17  ;;  %v1089_v36 = vld [vmem:[%s20007_s1 + $0x20f8] sm:$0xff]  ;;  %v13680_v16 = vcombine.low %v1077_v6, %v1081_v7 }
 0x4ff   :  { %11131 = vmatprep.subr.bf16.mxu0 %v13591_v53  ;;  %11664 = vmatprep.subr.bf16.mxu1 %v13593_v20  ;;  %v1044_v53 = vld [vmem:[%s20007_s1 + $0x1f90] sm:$0xff] }
 0x500   :  { %v1048_v20 = vld [vmem:[%s20007_s1 + $0x1fb0] sm:$0xff] }
 0x501   :  { %v13646_v29 = vcombine.low %v1044_v53, %v1048_v20 }
 0x502   :  { %11132 = vmatpush1.bf16.msra.mxu0 %v13590_v26  ;;  %11665 = vmatpush1.bf16.msra.mxu1 %v13592_v15  ;;  %v13647_v26 = vcombine.high %v1044_v53, %v1048_v20  ;;  %v13649_v15 = vcombine.high %v1045_v27, %v1049_v45 }
 0x503   :  { %11133 = vmatprep.subr.bf16.mxu0 %v13599_v1  ;;  %11666 = vmatprep.subr.bf16.mxu1 %v13601_v21  ;;  %v1052_v1 = vld [vmem:[%s20007_s1 + $0x1fd0] sm:$0xff] }
 0x504   :  { %v1056_v21 = vld [vmem:[%s20007_s1 + $0x1ff0] sm:$0xff] }
 0x505   :  { %v13654_v40 = vcombine.low %v1052_v1, %v1056_v21 }
 0x506   :  { %11134 = vmatpush1.bf16.msra.mxu0 %v13598_v19  ;;  %11667 = vmatpush1.bf16.msra.mxu1 %v13600_v33  ;;  %v13655_v19 = vcombine.high %v1052_v1, %v1056_v21  ;;  %v13657_v33 = vcombine.high %v1053_v31, %v1057_v28 }
 0x507   :  { %11135 = vmatprep.subr.bf16.mxu0 %v13607_v34  ;;  %11668 = vmatprep.subr.bf16.mxu1 %v13609_v35  ;;  %v1060_v34 = vld [vmem:[%s20007_s1 + $0x2010] sm:$0xff] }
 0x508   :  { %v1064_v35 = vld [vmem:[%s20007_s1 + $0x2030] sm:$0xff] }
 0x509   :  { %v13662_v56 = vcombine.low %v1060_v34, %v1064_v35 }
 0x50a   :  { %11136 = vmatpush1.bf16.msra.mxu0 %v13606_v30  ;;  %11669 = vmatpush1.bf16.msra.mxu1 %v13608_v25  ;;  %v13663_v30 = vcombine.high %v1060_v34, %v1064_v35  ;;  %v13665_v25 = vcombine.high %v1061_v37, %v1065_v38 }
 0x50b   :  { %11137 = vmatprep.subr.bf16.mxu0 %v13615_v42  ;;  %11670 = vmatprep.subr.bf16.mxu1 %v13617_v44  ;;  %v1068_v42 = vld [vmem:[%s20007_s1 + $0x2050] sm:$0xff] }
 0x50c   :  { %v1072_v44 = vld [vmem:[%s20007_s1 + $0x2070] sm:$0xff] }
 0x50d   :  { %v13670_v8 = vcombine.low %v1068_v42, %v1072_v44 }
 0x50e   :  { %11138 = vmatpush1.bf16.msra.mxu0 %v13614_v39  ;;  %11671 = vmatpush1.bf16.msra.mxu1 %v13616_v0  ;;  %v13671_v39 = vcombine.high %v1068_v42, %v1072_v44  ;;  %v13673_v0 = vcombine.high %v1069_v47, %v1073_v52 }
 0x50f   :  { %11139 = vmatprep.subr.bf16.mxu0 %v13623_v46  ;;  %11672 = vmatprep.subr.bf16.mxu1 %v13625_v23  ;;  %v1076_v46 = vld [vmem:[%s20007_s1 + $0x2090] sm:$0xff] }
 0x510   :  { %v1080_v23 = vld [vmem:[%s20007_s1 + $0x20b0] sm:$0xff] }
 0x511   :  { %v13678_v14 = vcombine.low %v1076_v46, %v1080_v23 }
 0x512   :  { %11140 = vmatpush1.bf16.msra.mxu0 %v13622_v54  ;;  %11673 = vmatpush1.bf16.msra.mxu1 %v13624_v11  ;;  %v13679_v54 = vcombine.high %v1076_v46, %v1080_v23  ;;  %v13681_v11 = vcombine.high %v1077_v6, %v1081_v7 }
 0x513   :  { %11141 = vmatprep.subr.bf16.mxu0 %v13631_v58  ;;  %11674 = vmatprep.subr.bf16.mxu1 %v13633_v13  ;;  %v1084_v58 = vld [vmem:[%s20007_s1 + $0x20d0] sm:$0xff] }
 0x514   :  { %v1088_v13 = vld [vmem:[%s20007_s1 + $0x20f0] sm:$0xff] }
 0x515   :  { %v13687_v17 = vcombine.high %v1084_v58, %v1088_v13  ;;  %v13686_v53 = vcombine.low %v1084_v58, %v1088_v13 }
 0x516   :  { %11142 = vmatpush1.bf16.msra.mxu0 %v13630_v12  ;;  %11675 = vmatpush1.bf16.msra.mxu1 %v13632_v57  ;;  %v1092_v57 = vld [vmem:[%s20007_s1 + $0x2110] sm:$0xff] }
 0x517   :  { %11143 = vmatprep.subr.bf16.mxu0 %v13639_v22  ;;  %11676 = vmatprep.subr.bf16.mxu1 %v13641_v55  ;;  %v1096_v22 = vld [vmem:[%s20007_s1 + $0x2130] sm:$0xff]  ;;  %v1097_v55 = vld [vmem:[%s20007_s1 + $0x2138] sm:$0xff] }
 0x518   :  { %v13695_v27 = vcombine.high %v1092_v57, %v1096_v22  ;;  %v13694_v1 = vcombine.low %v1092_v57, %v1096_v22 }
 0x51a   :  { %11144 = vmatpush1.bf16.msra.mxu0 %v13638_v59  ;;  %11677 = vmatpush1.bf16.msra.mxu1 %v13640_v24  ;;  %v1100_v59 = vld [vmem:[%s20007_s1 + $0x2150] sm:$0xff] }
 0x51b   :  { %11145 = vmatprep.subr.bf16.mxu0 %v13647_v26  ;;  %11678 = vmatprep.subr.bf16.mxu1 %v13649_v15  ;;  %v1104_v24 = vld [vmem:[%s20007_s1 + $0x2170] sm:$0xff]  ;;  %v1101_v26 = vld [vmem:[%s20007_s1 + $0x2158] sm:$0xff] }
 0x51c   :  { %v1105_v15 = vld [vmem:[%s20007_s1 + $0x2178] sm:$0xff]  ;;  %v13703_v31 = vcombine.high %v1100_v59, %v1104_v24  ;;  %v13702_v34 = vcombine.low %v1100_v59, %v1104_v24 }
 0x51d   :  { %v13705_v28 = vcombine.high %v1101_v26, %v1105_v15  ;;  %v13704_v35 = vcombine.low %v1101_v26, %v1105_v15 }
 0x51e   :  { %11146 = vmatpush1.bf16.msra.mxu0 %v13646_v29  ;;  %11679 = vmatpush1.bf16.msra.mxu1 %v13648_v32  ;;  %v1108_v29 = vld [vmem:[%s20007_s1 + $0x2190] sm:$0xff] }
 0x51f   :  { %11147 = vmatprep.subr.bf16.mxu0 %v13655_v19  ;;  %11680 = vmatprep.subr.bf16.mxu1 %v13657_v33  ;;  %v1112_v32 = vld [vmem:[%s20007_s1 + $0x21b0] sm:$0xff]  ;;  %v1109_v19 = vld [vmem:[%s20007_s1 + $0x2198] sm:$0xff] }
 0x520   :  { %v1113_v33 = vld [vmem:[%s20007_s1 + $0x21b8] sm:$0xff]  ;;  %v13711_v37 = vcombine.high %v1108_v29, %v1112_v32  ;;  %v13710_v42 = vcombine.low %v1108_v29, %v1112_v32 }
 0x521   :  { %v13713_v38 = vcombine.high %v1109_v19, %v1113_v33  ;;  %v13712_v44 = vcombine.low %v1109_v19, %v1113_v33 }
 0x522   :  { %11148 = vmatpush1.bf16.msra.mxu0 %v13654_v40  ;;  %11681 = vmatpush1.bf16.msra.mxu1 %v13656_v41  ;;  %v1116_v40 = vld [vmem:[%s20007_s1 + $0x21d0] sm:$0xff] }
 0x523   :  { %11158 = vmatprep.subr.bf16.mxu0 %v13663_v30  ;;  %11691 = vmatprep.subr.bf16.mxu1 %v13665_v25  ;;  %v1120_v41 = vld [vmem:[%s20007_s1 + $0x21f0] sm:$0xff]  ;;  %v1117_v30 = vld [vmem:[%s20007_s1 + $0x21d8] sm:$0xff] }
 0x524   :  { %v1121_v25 = vld [vmem:[%s20007_s1 + $0x21f8] sm:$0xff]  ;;  %v13719_v47 = vcombine.high %v1116_v40, %v1120_v41  ;;  %v13718_v46 = vcombine.low %v1116_v40, %v1120_v41 }
 0x525   :  { %11150 = vmatmul.mubr.bf16.vlgmr.msra.gmra.mrb[4].mxu0 %v16398_v63  ;;  %11683 = vmatmul.mubr.bf16.vlgmr.msra.gmra.mrb[4].mxu1 %v16398_v63  ;;  %v1085_v63 = vld [vmem:[%s20007_s1 + $0x20d8] sm:$0xff]  ;;  %v13721_v52 = vcombine.high %v1117_v30, %v1121_v25  ;;  %v13720_v23 = vcombine.low %v1117_v30, %v1121_v25 }
 0x526   :  { %11159 = vmatpush1.bf16.msra.mxu0 %v13662_v56  ;;  %11692 = vmatpush1.bf16.msra.mxu1 %v13664_v3  ;;  %v13689_v12 = vcombine.high %v1085_v63, %v1089_v36  ;;  %v13688_v20 = vcombine.low %v1085_v63, %v1089_v36  ;;  %v1124_v56 = vld [vmem:[%s20007_s1 + $0x2210] sm:$0xff] }
 0x527   :  { %11160 = vmatprep.subr.bf16.mxu0 %v13671_v39  ;;  %11693 = vmatprep.subr.bf16.mxu1 %v13673_v0  ;;  %v1128_v3 = vld [vmem:[%s20007_s1 + $0x2230] sm:$0xff]  ;;  %v1125_v39 = vld [vmem:[%s20007_s1 + $0x2218] sm:$0xff] }
 0x528   :  { %11190 = vmatprep.mubr.bf16.mxu0 %v16419_v9  ;;  %11723 = vmatprep.mubr.bf16.mxu1 %v16419_v9  ;;  %v1093_v9 = vld [vmem:[%s20007_s1 + $0x2118] sm:$0xff]  ;;  %v13727_v6 = vcombine.high %v1124_v56, %v1128_v3  ;;  %v13726_v58 = vcombine.low %v1124_v56, %v1128_v3 }
 0x529   :  { %v13697_v45 = vcombine.high %v1093_v9, %v1097_v55  ;;  %v13696_v21 = vcombine.low %v1093_v9, %v1097_v55  ;;  %v1129_v0 = vld [vmem:[%s20007_s1 + $0x2238] sm:$0xff] }
 0x52a   :  { %11161 = vmatpush1.bf16.msra.mxu0 %v13670_v8  ;;  %11694 = vmatpush1.bf16.msra.mxu1 %v13672_v10  ;;  %v13729_v7 = vcombine.high %v1125_v39, %v1129_v0  ;;  %v1132_v8 = vld [vmem:[%s20007_s1 + $0x2250] sm:$0xff]  ;;  %v13728_v13 = vcombine.low %v1125_v39, %v1129_v0 }
 0x52b   :  { %11162 = vmatprep.subr.bf16.mxu0 %v13679_v54  ;;  %11695 = vmatprep.subr.bf16.mxu1 %v13681_v11  ;;  %v1136_v10 = vld [vmem:[%s20007_s1 + $0x2270] sm:$0xff]  ;;  %v1133_v54 = vld [vmem:[%s20007_s1 + $0x2258] sm:$0xff] }
 0x52c   :  { %v1137_v11 = vld [vmem:[%s20007_s1 + $0x2278] sm:$0xff]  ;;  %v13735_v63 = vcombine.high %v1132_v8, %v1136_v10  ;;  %v13734_v57 = vcombine.low %v1132_v8, %v1136_v10 }
 0x52d   :  { %v13737_v36 = vcombine.high %v1133_v54, %v1137_v11  ;;  %v13736_v22 = vcombine.low %v1133_v54, %v1137_v11 }
 0x52e   :  { %11163 = vmatpush1.bf16.msra.mxu0 %v13678_v14  ;;  %11696 = vmatpush1.bf16.msra.mxu1 %v13680_v16  ;;  %v1140_v14 = vld [vmem:[%s20007_s1 + $0x2290] sm:$0xff] }
 0x52f   :  { %11164 = vmatprep.subr.bf16.mxu0 %v13687_v17  ;;  %11697 = vmatprep.subr.bf16.mxu1 %v13689_v12  ;;  %v1144_v16 = vld [vmem:[%s20007_s1 + $0x22b0] sm:$0xff]  ;;  %v1141_v17 = vld [vmem:[%s20007_s1 + $0x2298] sm:$0xff] }
 0x530   :  { %v1145_v12 = vld [vmem:[%s20007_s1 + $0x22b8] sm:$0xff]  ;;  %v13743_v9 = vcombine.high %v1140_v14, %v1144_v16  ;;  %v13742_v59 = vcombine.low %v1140_v14, %v1144_v16 }
 0x531   :  { %v13745_v55 = vcombine.high %v1141_v17, %v1145_v12  ;;  %v13744_v24 = vcombine.low %v1141_v17, %v1145_v12 }
 0x532   :  { %11165 = vmatpush1.bf16.msra.mxu0 %v13686_v53  ;;  %11698 = vmatpush1.bf16.msra.mxu1 %v13688_v20  ;;  %v1148_v53 = vld [vmem:[%s20007_s1 + $0x22d0] sm:$0xff] }
 0x533   :  { %11166 = vmatprep.subr.bf16.mxu0 %v13695_v27  ;;  %11699 = vmatprep.subr.bf16.mxu1 %v13697_v45  ;;  %v1152_v20 = vld [vmem:[%s20007_s1 + $0x22f0] sm:$0xff]  ;;  %v1149_v27 = vld [vmem:[%s20007_s1 + $0x22d8] sm:$0xff] }
 0x534   :  { %v1153_v45 = vld [vmem:[%s20007_s1 + $0x22f8] sm:$0xff]  ;;  %v13751_v26 = vcombine.high %v1148_v53, %v1152_v20  ;;  %v13750_v29 = vcombine.low %v1148_v53, %v1152_v20 }
 0x535   :  { %v13753_v15 = vcombine.high %v1149_v27, %v1153_v45  ;;  %v13752_v32 = vcombine.low %v1149_v27, %v1153_v45 }
 0x536   :  { %11167 = vmatpush1.bf16.msra.mxu0 %v13694_v1  ;;  %11700 = vmatpush1.bf16.msra.mxu1 %v13696_v21  ;;  %v1156_v1 = vld [vmem:[%s20007_s1 + $0x2310] sm:$0xff] }
 0x537   :  { %11168 = vmatprep.subr.bf16.mxu0 %v13703_v31  ;;  %11701 = vmatprep.subr.bf16.mxu1 %v13705_v28  ;;  %v1160_v21 = vld [vmem:[%s20007_s1 + $0x2330] sm:$0xff]  ;;  %v1157_v31 = vld [vmem:[%s20007_s1 + $0x2318] sm:$0xff] }
 0x538   :  { %v1161_v28 = vld [vmem:[%s20007_s1 + $0x2338] sm:$0xff]  ;;  %v13759_v19 = vcombine.high %v1156_v1, %v1160_v21  ;;  %v13758_v40 = vcombine.low %v1156_v1, %v1160_v21 }
 0x539   :  { %v13761_v33 = vcombine.high %v1157_v31, %v1161_v28  ;;  %v13760_v41 = vcombine.low %v1157_v31, %v1161_v28 }
 0x53a   :  { %11169 = vmatpush1.bf16.msra.mxu0 %v13702_v34  ;;  %11702 = vmatpush1.bf16.msra.mxu1 %v13704_v35  ;;  %v1164_v34 = vld [vmem:[%s20007_s1 + $0x2350] sm:$0xff] }
 0x53b   :  { %11170 = vmatprep.subr.bf16.mxu0 %v13711_v37  ;;  %11703 = vmatprep.subr.bf16.mxu1 %v13713_v38  ;;  %v1168_v35 = vld [vmem:[%s20007_s1 + $0x2370] sm:$0xff]  ;;  %v1165_v37 = vld [vmem:[%s20007_s1 + $0x2358] sm:$0xff] }
 0x53c   :  { %v1169_v38 = vld [vmem:[%s20007_s1 + $0x2378] sm:$0xff]  ;;  %v13767_v30 = vcombine.high %v1164_v34, %v1168_v35  ;;  %v13766_v56 = vcombine.low %v1164_v34, %v1168_v35 }
 0x53d   :  { %v13769_v25 = vcombine.high %v1165_v37, %v1169_v38  ;;  %v13768_v3 = vcombine.low %v1165_v37, %v1169_v38  ;;  %v1220_v38 = vld [vmem:[%s20007_s1 + $0x2510] sm:$0xff] }
 0x53e   :  { %11171 = vmatpush1.bf16.msra.mxu0 %v13710_v42  ;;  %11704 = vmatpush1.bf16.msra.mxu1 %v13712_v44  ;;  %v1172_v42 = vld [vmem:[%s20007_s1 + $0x2390] sm:$0xff] }
 0x53f   :  { %11172 = vmatprep.subr.bf16.mxu0 %v13719_v47  ;;  %11705 = vmatprep.subr.bf16.mxu1 %v13721_v52  ;;  %v1176_v44 = vld [vmem:[%s20007_s1 + $0x23b0] sm:$0xff]  ;;  %v1173_v47 = vld [vmem:[%s20007_s1 + $0x2398] sm:$0xff] }
 0x540   :  { %v1177_v52 = vld [vmem:[%s20007_s1 + $0x23b8] sm:$0xff]  ;;  %v13775_v39 = vcombine.high %v1172_v42, %v1176_v44  ;;  %v13774_v8 = vcombine.low %v1172_v42, %v1176_v44 }
 0x541   :  { %v13777_v0 = vcombine.high %v1173_v47, %v1177_v52  ;;  %v13776_v10 = vcombine.low %v1173_v47, %v1177_v52  ;;  %v1228_v47 = vld [vmem:[%s20007_s1 + $0x2550] sm:$0xff] }
 0x542   :  { %11173 = vmatpush1.bf16.msra.mxu0 %v13718_v46  ;;  %11706 = vmatpush1.bf16.msra.mxu1 %v13720_v23  ;;  %v1180_v46 = vld [vmem:[%s20007_s1 + $0x23d0] sm:$0xff] }
 0x543   :  { %11174 = vmatprep.subr.bf16.mxu0 %v13727_v6  ;;  %11707 = vmatprep.subr.bf16.mxu1 %v13729_v7  ;;  %v1184_v23 = vld [vmem:[%s20007_s1 + $0x23f0] sm:$0xff]  ;;  %v1181_v6 = vld [vmem:[%s20007_s1 + $0x23d8] sm:$0xff] }
 0x544   :  { %v1185_v7 = vld [vmem:[%s20007_s1 + $0x23f8] sm:$0xff]  ;;  %v13783_v54 = vcombine.high %v1180_v46, %v1184_v23  ;;  %v13782_v14 = vcombine.low %v1180_v46, %v1184_v23  ;;  %v1232_v52 = vld [vmem:[%s20007_s1 + $0x2570] sm:$0xff] }
 0x545   :  { %v13785_v11 = vcombine.high %v1181_v6, %v1185_v7  ;;  %v13784_v16 = vcombine.low %v1181_v6, %v1185_v7  ;;  %v13831_v46 = vcombine.high %v1228_v47, %v1232_v52  ;;  %v1236_v6 = vld [vmem:[%s20007_s1 + $0x2590] sm:$0xff] }
 0x546   :  { %11175 = vmatpush1.bf16.msra.mxu0 %v13726_v58  ;;  %11708 = vmatpush1.bf16.msra.mxu1 %v13728_v13  ;;  %v1188_v58 = vld [vmem:[%s20007_s1 + $0x2410] sm:$0xff] }
 0x547   :  { %11176 = vmatprep.subr.bf16.mxu0 %v13735_v63  ;;  %11709 = vmatprep.subr.bf16.mxu1 %v13737_v36  ;;  %v1192_v13 = vld [vmem:[%s20007_s1 + $0x2430] sm:$0xff]  ;;  %v1189_v63 = vld [vmem:[%s20007_s1 + $0x2418] sm:$0xff] }
 0x548   :  { %v1193_v36 = vld [vmem:[%s20007_s1 + $0x2438] sm:$0xff]  ;;  %v13791_v17 = vcombine.high %v1188_v58, %v1192_v13  ;;  %v13790_v53 = vcombine.low %v1188_v58, %v1192_v13  ;;  %v1240_v7 = vld [vmem:[%s20007_s1 + $0x25b0] sm:$0xff] }
 0x549   :  { %v13793_v12 = vcombine.high %v1189_v63, %v1193_v36  ;;  %v13792_v20 = vcombine.low %v1189_v63, %v1193_v36  ;;  %v13839_v58 = vcombine.high %v1236_v6, %v1240_v7  ;;  %v1244_v63 = vld [vmem:[%s20007_s1 + $0x25d0] sm:$0xff] }
 0x54a   :  { %11177 = vmatpush1.bf16.msra.mxu0 %v13734_v57  ;;  %11710 = vmatpush1.bf16.msra.mxu1 %v13736_v22  ;;  %v1196_v57 = vld [vmem:[%s20007_s1 + $0x2450] sm:$0xff] }
 0x54b   :  { %11178 = vmatprep.subr.bf16.mxu0 %v13743_v9  ;;  %11711 = vmatprep.subr.bf16.mxu1 %v13745_v55  ;;  %v1200_v22 = vld [vmem:[%s20007_s1 + $0x2470] sm:$0xff]  ;;  %v1197_v9 = vld [vmem:[%s20007_s1 + $0x2458] sm:$0xff] }
 0x54c   :  { %v1201_v55 = vld [vmem:[%s20007_s1 + $0x2478] sm:$0xff]  ;;  %v13799_v27 = vcombine.high %v1196_v57, %v1200_v22  ;;  %v13798_v1 = vcombine.low %v1196_v57, %v1200_v22  ;;  %v1248_v36 = vld [vmem:[%s20007_s1 + $0x25f0] sm:$0xff] }
 0x54d   :  { %v13801_v45 = vcombine.high %v1197_v9, %v1201_v55  ;;  %v13800_v21 = vcombine.low %v1197_v9, %v1201_v55  ;;  %v13847_v57 = vcombine.high %v1244_v63, %v1248_v36  ;;  %v1252_v9 = vld [vmem:[%s20007_s1 + $0x2610] sm:$0xff] }
 0x54e   :  { %11179 = vmatpush1.bf16.msra.mxu0 %v13742_v59  ;;  %11712 = vmatpush1.bf16.msra.mxu1 %v13744_v24  ;;  %v1204_v59 = vld [vmem:[%s20007_s1 + $0x2490] sm:$0xff] }
 0x54f   :  { %11180 = vmatprep.subr.bf16.mxu0 %v13751_v26  ;;  %11713 = vmatprep.subr.bf16.mxu1 %v13753_v15  ;;  %v1208_v24 = vld [vmem:[%s20007_s1 + $0x24b0] sm:$0xff]  ;;  %v1205_v26 = vld [vmem:[%s20007_s1 + $0x2498] sm:$0xff] }
 0x550   :  { %v1209_v15 = vld [vmem:[%s20007_s1 + $0x24b8] sm:$0xff]  ;;  %v13807_v31 = vcombine.high %v1204_v59, %v1208_v24  ;;  %v1256_v55 = vld [vmem:[%s20007_s1 + $0x2630] sm:$0xff] }
 0x551   :  { %v13809_v28 = vcombine.high %v1205_v26, %v1209_v15  ;;  %v13808_v34 = vcombine.low %v1205_v26, %v1209_v15  ;;  %v1260_v26 = vld [vmem:[%s20007_s1 + $0x2650] sm:$0xff] }
 0x552   :  { %11181 = vmatpush1.bf16.msra.mxu0 %v13750_v29  ;;  %11714 = vmatpush1.bf16.msra.mxu1 %v13752_v32  ;;  %v1212_v29 = vld [vmem:[%s20007_s1 + $0x24d0] sm:$0xff] }
 0x553   :  { %11182 = vmatprep.subr.bf16.mxu0 %v13759_v19  ;;  %11715 = vmatprep.subr.bf16.mxu1 %v13761_v33  ;;  %v1216_v32 = vld [vmem:[%s20007_s1 + $0x24f0] sm:$0xff]  ;;  %v1217_v19 = vld [vmem:[%s20007_s1 + $0x24f8] sm:$0xff]  ;;  %v13806_v33 = vcombine.low %v1204_v59, %v1208_v24  ;;  %v13855_v59 = vcombine.high %v1252_v9, %v1256_v55 }
 0x554   :  { %v13815_v35 = vcombine.high %v1212_v29, %v1216_v32  ;;  %v1264_v15 = vld [vmem:[%s20007_s1 + $0x2670] sm:$0xff] }
 0x556   :  { %11183 = vmatpush1.bf16.msra.mxu0 %v13758_v40  ;;  %11716 = vmatpush1.bf16.msra.mxu1 %v13760_v41  ;;  %v1224_v40 = vld [vmem:[%s20007_s1 + $0x2530] sm:$0xff]  ;;  %v1225_v41 = vld [vmem:[%s20007_s1 + $0x2538] sm:$0xff] }
 0x557   :  { %11184 = vmatprep.subr.bf16.mxu0 %v13767_v30  ;;  %11717 = vmatprep.subr.bf16.mxu1 %v13769_v25  ;;  %v13814_v30 = vcombine.low %v1212_v29, %v1216_v32  ;;  %v13823_v42 = vcombine.high %v1220_v38, %v1224_v40  ;;  %v13863_v29 = vcombine.high %v1260_v26, %v1264_v15 }
 0x55a   :  { %11185 = vmatpush1.bf16.msra.mxu0 %v13766_v56  ;;  %11718 = vmatpush1.bf16.msra.mxu1 %v13768_v3  ;;  %v1229_v56 = vld [vmem:[%s20007_s1 + $0x2558] sm:$0xff] }
 0x55b   :  { %11186 = vmatprep.subr.bf16.mxu0 %v13775_v39  ;;  %11719 = vmatprep.subr.bf16.mxu1 %v13777_v0  ;;  %v1233_v3 = vld [vmem:[%s20007_s1 + $0x2578] sm:$0xff]  ;;  %v13822_v39 = vcombine.low %v1220_v38, %v1224_v40 }
 0x55c   :  { %v13833_v23 = vcombine.high %v1229_v56, %v1233_v3 }
 0x55e   :  { %11187 = vmatpush1.bf16.msra.mxu0 %v13774_v8  ;;  %11720 = vmatpush1.bf16.msra.mxu1 %v13776_v10  ;;  %v1237_v8 = vld [vmem:[%s20007_s1 + $0x2598] sm:$0xff] }
 0x55f   :  { %11188 = vmatprep.subr.bf16.mxu0 %v13783_v54  ;;  %11721 = vmatprep.subr.bf16.mxu1 %v13785_v11  ;;  %v1241_v10 = vld [vmem:[%s20007_s1 + $0x25b8] sm:$0xff]  ;;  %v13830_v54 = vcombine.low %v1228_v47, %v1232_v52  ;;  %v13832_v11 = vcombine.low %v1229_v56, %v1233_v3  ;;  %v1284_v56 = vld [vmem:[%s20007_s1 + $0x2710] sm:$0xff] }
 0x560   :  { %v13841_v13 = vcombine.high %v1237_v8, %v1241_v10  ;;  %v1288_v3 = vld [vmem:[%s20007_s1 + $0x2730] sm:$0xff] }
 0x562   :  { %11189 = vmatpush1.bf16.msra.mxu0 %v13782_v14  ;;  %11722 = vmatpush1.bf16.msra.mxu1 %v13784_v16  ;;  %v1245_v14 = vld [vmem:[%s20007_s1 + $0x25d8] sm:$0xff] }
 0x563   :  { %11199 = vmatprep.subr.bf16.mxu0 %v13791_v17  ;;  %11732 = vmatprep.subr.bf16.mxu1 %v13793_v12  ;;  %v1249_v16 = vld [vmem:[%s20007_s1 + $0x25f8] sm:$0xff]  ;;  %v13838_v17 = vcombine.low %v1236_v6, %v1240_v7  ;;  %v13840_v12 = vcombine.low %v1237_v8, %v1241_v10  ;;  %v13887_v6 = vcombine.high %v1284_v56, %v1288_v3  ;;  %v1292_v8 = vld [vmem:[%s20007_s1 + $0x2750] sm:$0xff] }
 0x564   :  { %v13849_v22 = vcombine.high %v1245_v14, %v1249_v16  ;;  %v1296_v10 = vld [vmem:[%s20007_s1 + $0x2770] sm:$0xff] }
 0x565   :  { %11191 = vmatmul.mubr.bf16.vlgmr.msra.gmra.mrb[4].mxu0 %v16607_v50  ;;  %11724 = vmatmul.mubr.bf16.vlgmr.msra.gmra.mrb[4].mxu1 %v16607_v50  ;;  %v1213_v50 = vld [vmem:[%s20007_s1 + $0x24d8] sm:$0xff] }
 0x566   :  { %11200 = vmatpush1.bf16.msra.mxu0 %v13790_v53  ;;  %11733 = vmatpush1.bf16.msra.mxu1 %v13792_v20  ;;  %v13817_v37 = vcombine.high %v1213_v50, %v1217_v19  ;;  %v13816_v25 = vcombine.low %v1213_v50, %v1217_v19  ;;  %v1253_v53 = vld [vmem:[%s20007_s1 + $0x2618] sm:$0xff]  ;;  %v1268_v50 = vld [vmem:[%s20007_s1 + $0x2690] sm:$0xff] }
 0x567   :  { %11201 = vmatprep.subr.bf16.mxu0 %v13799_v27  ;;  %11734 = vmatprep.subr.bf16.mxu1 %v13801_v45  ;;  %v1257_v20 = vld [vmem:[%s20007_s1 + $0x2638] sm:$0xff]  ;;  %v13846_v27 = vcombine.low %v1244_v63, %v1248_v36  ;;  %v13848_v45 = vcombine.low %v1245_v14, %v1249_v16  ;;  %v1272_v19 = vld [vmem:[%s20007_s1 + $0x26b0] sm:$0xff]  ;;  %v13895_v63 = vcombine.high %v1292_v8, %v1296_v10 }
 0x568   :  { %11231 = vmatprep.mubr.bf16.mxu0 %v16628_v62  ;;  %11764 = vmatprep.mubr.bf16.mxu1 %v16628_v62  ;;  %v1221_v62 = vld [vmem:[%s20007_s1 + $0x2518] sm:$0xff]  ;;  %v13857_v24 = vcombine.high %v1253_v53, %v1257_v20  ;;  %v13871_v38 = vcombine.high %v1268_v50, %v1272_v19  ;;  %v1300_v14 = vld [vmem:[%s20007_s1 + $0x2790] sm:$0xff] }
 0x569   :  { %v13825_v44 = vcombine.high %v1221_v62, %v1225_v41  ;;  %v13824_v0 = vcombine.low %v1221_v62, %v1225_v41  ;;  %v1276_v62 = vld [vmem:[%s20007_s1 + $0x26d0] sm:$0xff] }
 0x56a   :  { %11202 = vmatpush1.bf16.msra.mxu0 %v13798_v1  ;;  %11735 = vmatpush1.bf16.msra.mxu1 %v13800_v21  ;;  %v1261_v1 = vld [vmem:[%s20007_s1 + $0x2658] sm:$0xff]  ;;  %v1280_v41 = vld [vmem:[%s20007_s1 + $0x26f0] sm:$0xff] }
 0x56b   :  { %11203 = vmatprep.subr.bf16.mxu0 %v13807_v31  ;;  %11736 = vmatprep.subr.bf16.mxu1 %v13809_v28  ;;  %v1265_v21 = vld [vmem:[%s20007_s1 + $0x2678] sm:$0xff]  ;;  %v13854_v31 = vcombine.low %v1252_v9, %v1256_v55  ;;  %v13856_v28 = vcombine.low %v1253_v53, %v1257_v20  ;;  %v13879_v47 = vcombine.high %v1276_v62, %v1280_v41  ;;  %v1304_v16 = vld [vmem:[%s20007_s1 + $0x27b0] sm:$0xff] }
 0x56c   :  { %v13865_v32 = vcombine.high %v1261_v1, %v1265_v21  ;;  %v13903_v9 = vcombine.high %v1300_v14, %v1304_v16  ;;  %v1308_v53 = vld [vmem:[%s20007_s1 + $0x27d0] sm:$0xff] }
 0x56d   :  { %v1312_v20 = vld [vmem:[%s20007_s1 + $0x27f0] sm:$0xff] }
 0x56e   :  { %11204 = vmatpush1.bf16.msra.mxu0 %v13806_v33  ;;  %11737 = vmatpush1.bf16.msra.mxu1 %v13808_v34  ;;  %v1269_v33 = vld [vmem:[%s20007_s1 + $0x2698] sm:$0xff] }
 0x56f   :  { %11205 = vmatprep.subr.bf16.mxu0 %v13815_v35  ;;  %11738 = vmatprep.subr.bf16.mxu1 %v13817_v37  ;;  %v1273_v34 = vld [vmem:[%s20007_s1 + $0x26b8] sm:$0xff]  ;;  %v13862_v35 = vcombine.low %v1260_v26, %v1264_v15  ;;  %v13864_v37 = vcombine.low %v1261_v1, %v1265_v21  ;;  %v13911_v26 = vcombine.high %v1308_v53, %v1312_v20  ;;  %v1316_v1 = vld [vmem:[%s20007_s1 + $0x2810] sm:$0xff] }
 0x570   :  { %v13873_v40 = vcombine.high %v1269_v33, %v1273_v34  ;;  %v1320_v21 = vld [vmem:[%s20007_s1 + $0x2830] sm:$0xff] }
 0x572   :  { %11206 = vmatpush1.bf16.msra.mxu0 %v13814_v30  ;;  %11739 = vmatpush1.bf16.msra.mxu1 %v13816_v25  ;;  %v1277_v30 = vld [vmem:[%s20007_s1 + $0x26d8] sm:$0xff] }
 0x573   :  { %11207 = vmatprep.subr.bf16.mxu0 %v13823_v42  ;;  %11740 = vmatprep.subr.bf16.mxu1 %v13825_v44  ;;  %v1281_v25 = vld [vmem:[%s20007_s1 + $0x26f8] sm:$0xff]  ;;  %v13870_v42 = vcombine.low %v1268_v50, %v1272_v19  ;;  %v13872_v44 = vcombine.low %v1269_v33, %v1273_v34  ;;  %v13919_v50 = vcombine.high %v1316_v1, %v1320_v21  ;;  %v1324_v33 = vld [vmem:[%s20007_s1 + $0x2850] sm:$0xff] }
 0x574   :  { %v13881_v52 = vcombine.high %v1277_v30, %v1281_v25  ;;  %v1328_v34 = vld [vmem:[%s20007_s1 + $0x2870] sm:$0xff] }
 0x576   :  { %11208 = vmatpush1.bf16.msra.mxu0 %v13822_v39  ;;  %11741 = vmatpush1.bf16.msra.mxu1 %v13824_v0  ;;  %v1285_v39 = vld [vmem:[%s20007_s1 + $0x2718] sm:$0xff] }
 0x577   :  { %11209 = vmatprep.subr.bf16.mxu0 %v13831_v46  ;;  %11742 = vmatprep.subr.bf16.mxu1 %v13833_v23  ;;  %v1289_v0 = vld [vmem:[%s20007_s1 + $0x2738] sm:$0xff]  ;;  %v13878_v46 = vcombine.low %v1276_v62, %v1280_v41  ;;  %v13880_v23 = vcombine.low %v1277_v30, %v1281_v25  ;;  %v13927_v62 = vcombine.high %v1324_v33, %v1328_v34  ;;  %v1332_v30 = vld [vmem:[%s20007_s1 + $0x2890] sm:$0xff] }
 0x578   :  { %v13889_v7 = vcombine.high %v1285_v39, %v1289_v0  ;;  %v1336_v25 = vld [vmem:[%s20007_s1 + $0x28b0] sm:$0xff] }
 0x57a   :  { %11210 = vmatpush1.bf16.msra.mxu0 %v13830_v54  ;;  %11743 = vmatpush1.bf16.msra.mxu1 %v13832_v11  ;;  %v1293_v54 = vld [vmem:[%s20007_s1 + $0x2758] sm:$0xff] }
 0x57b   :  { %11211 = vmatprep.subr.bf16.mxu0 %v13839_v58  ;;  %11744 = vmatprep.subr.bf16.mxu1 %v13841_v13  ;;  %v1297_v11 = vld [vmem:[%s20007_s1 + $0x2778] sm:$0xff]  ;;  %v13886_v58 = vcombine.low %v1284_v56, %v1288_v3  ;;  %v13888_v13 = vcombine.low %v1285_v39, %v1289_v0  ;;  %v13935_v56 = vcombine.high %v1332_v30, %v1336_v25  ;;  %v1340_v39 = vld [vmem:[%s20007_s1 + $0x28d0] sm:$0xff] }
 0x57c   :  { %v13897_v36 = vcombine.high %v1293_v54, %v1297_v11  ;;  %v1344_v0 = vld [vmem:[%s20007_s1 + $0x28f0] sm:$0xff] }
 0x57e   :  { %11212 = vmatpush1.bf16.msra.mxu0 %v13838_v17  ;;  %11745 = vmatpush1.bf16.msra.mxu1 %v13840_v12  ;;  %v1301_v17 = vld [vmem:[%s20007_s1 + $0x2798] sm:$0xff] }
 0x57f   :  { %11213 = vmatprep.subr.bf16.mxu0 %v13847_v57  ;;  %11746 = vmatprep.subr.bf16.mxu1 %v13849_v22  ;;  %v1305_v12 = vld [vmem:[%s20007_s1 + $0x27b8] sm:$0xff]  ;;  %v13894_v57 = vcombine.low %v1292_v8, %v1296_v10  ;;  %v13896_v22 = vcombine.low %v1293_v54, %v1297_v11  ;;  %v1348_v10 = vld [vmem:[%s20007_s1 + $0x2910] sm:$0xff] }
 0x580   :  { %v13905_v55 = vcombine.high %v1301_v17, %v1305_v12  ;;  %v1352_v54 = vld [vmem:[%s20007_s1 + $0x2930] sm:$0xff]  ;;  %v1353_v11 = vld [vmem:[%s20007_s1 + $0x2938] sm:$0xff] }
 0x582   :  { %11214 = vmatpush1.bf16.msra.mxu0 %v13846_v27  ;;  %11747 = vmatpush1.bf16.msra.mxu1 %v13848_v45  ;;  %v1309_v27 = vld [vmem:[%s20007_s1 + $0x27d8] sm:$0xff] }
 0x583   :  { %11215 = vmatprep.subr.bf16.mxu0 %v13855_v59  ;;  %11748 = vmatprep.subr.bf16.mxu1 %v13857_v24  ;;  %v1313_v45 = vld [vmem:[%s20007_s1 + $0x27f8] sm:$0xff]  ;;  %v13902_v59 = vcombine.low %v1300_v14, %v1304_v16  ;;  %v13904_v24 = vcombine.low %v1301_v17, %v1305_v12  ;;  %v1356_v14 = vld [vmem:[%s20007_s1 + $0x2950] sm:$0xff] }
 0x584   :  { %v13913_v15 = vcombine.high %v1309_v27, %v1313_v45  ;;  %v1360_v16 = vld [vmem:[%s20007_s1 + $0x2970] sm:$0xff]  ;;  %v1357_v17 = vld [vmem:[%s20007_s1 + $0x2958] sm:$0xff] }
 0x585   :  { %v1361_v12 = vld [vmem:[%s20007_s1 + $0x2978] sm:$0xff] }
 0x586   :  { %11216 = vmatpush1.bf16.msra.mxu0 %v13854_v31  ;;  %11749 = vmatpush1.bf16.msra.mxu1 %v13856_v28  ;;  %v1317_v31 = vld [vmem:[%s20007_s1 + $0x2818] sm:$0xff] }
 0x587   :  { %11217 = vmatprep.subr.bf16.mxu0 %v13863_v29  ;;  %11750 = vmatprep.subr.bf16.mxu1 %v13865_v32  ;;  %v1321_v28 = vld [vmem:[%s20007_s1 + $0x2838] sm:$0xff]  ;;  %v13910_v29 = vcombine.low %v1308_v53, %v1312_v20  ;;  %v13912_v32 = vcombine.low %v1309_v27, %v1313_v45  ;;  %v1364_v53 = vld [vmem:[%s20007_s1 + $0x2990] sm:$0xff] }
 0x588   :  { %v13921_v19 = vcombine.high %v1317_v31, %v1321_v28  ;;  %v1368_v20 = vld [vmem:[%s20007_s1 + $0x29b0] sm:$0xff]  ;;  %v1365_v27 = vld [vmem:[%s20007_s1 + $0x2998] sm:$0xff] }
 0x589   :  { %v1369_v45 = vld [vmem:[%s20007_s1 + $0x29b8] sm:$0xff] }
 0x58a   :  { %11218 = vmatpush1.bf16.msra.mxu0 %v13862_v35  ;;  %11751 = vmatpush1.bf16.msra.mxu1 %v13864_v37  ;;  %v1325_v35 = vld [vmem:[%s20007_s1 + $0x2858] sm:$0xff] }
 0x58b   :  { %11219 = vmatprep.subr.bf16.mxu0 %v13871_v38  ;;  %11752 = vmatprep.subr.bf16.mxu1 %v13873_v40  ;;  %v1329_v37 = vld [vmem:[%s20007_s1 + $0x2878] sm:$0xff]  ;;  %v13918_v38 = vcombine.low %v1316_v1, %v1320_v21  ;;  %v13920_v40 = vcombine.low %v1317_v31, %v1321_v28  ;;  %v1372_v1 = vld [vmem:[%s20007_s1 + $0x29d0] sm:$0xff] }
 0x58c   :  { %v13929_v41 = vcombine.high %v1325_v35, %v1329_v37  ;;  %v1376_v21 = vld [vmem:[%s20007_s1 + $0x29f0] sm:$0xff]  ;;  %v1373_v31 = vld [vmem:[%s20007_s1 + $0x29d8] sm:$0xff] }
 0x58d   :  { %v1377_v28 = vld [vmem:[%s20007_s1 + $0x29f8] sm:$0xff] }
 0x58e   :  { %11220 = vmatpush1.bf16.msra.mxu0 %v13870_v42  ;;  %11753 = vmatpush1.bf16.msra.mxu1 %v13872_v44  ;;  %v1333_v42 = vld [vmem:[%s20007_s1 + $0x2898] sm:$0xff] }
 0x58f   :  { %11221 = vmatprep.subr.bf16.mxu0 %v13879_v47  ;;  %11754 = vmatprep.subr.bf16.mxu1 %v13881_v52  ;;  %v1337_v44 = vld [vmem:[%s20007_s1 + $0x28b8] sm:$0xff]  ;;  %v13926_v47 = vcombine.low %v1324_v33, %v1328_v34  ;;  %v13928_v52 = vcombine.low %v1325_v35, %v1329_v37  ;;  %v1380_v33 = vld [vmem:[%s20007_s1 + $0x2a10] sm:$0xff] }
 0x590   :  { %v13937_v3 = vcombine.high %v1333_v42, %v1337_v44  ;;  %v1384_v34 = vld [vmem:[%s20007_s1 + $0x2a30] sm:$0xff]  ;;  %v1381_v35 = vld [vmem:[%s20007_s1 + $0x2a18] sm:$0xff] }
 0x591   :  { %v1385_v37 = vld [vmem:[%s20007_s1 + $0x2a38] sm:$0xff] }
 0x592   :  { %11222 = vmatpush1.bf16.msra.mxu0 %v13878_v46  ;;  %11755 = vmatpush1.bf16.msra.mxu1 %v13880_v23  ;;  %v1345_v46 = vld [vmem:[%s20007_s1 + $0x28f8] sm:$0xff]  ;;  %v13934_v23 = vcombine.low %v1332_v30, %v1336_v25  ;;  %v1388_v30 = vld [vmem:[%s20007_s1 + $0x2a50] sm:$0xff] }
 0x593   :  { %11223 = vmatprep.subr.bf16.mxu0 %v13887_v6  ;;  %11756 = vmatprep.subr.bf16.mxu1 %v13889_v7  ;;  %v13936_v6 = vcombine.low %v1333_v42, %v1337_v44  ;;  %v13943_v7 = vcombine.high %v1340_v39, %v1344_v0  ;;  %v1392_v25 = vld [vmem:[%s20007_s1 + $0x2a70] sm:$0xff]  ;;  %v1389_v42 = vld [vmem:[%s20007_s1 + $0x2a58] sm:$0xff] }
 0x594   :  { %v1393_v44 = vld [vmem:[%s20007_s1 + $0x2a78] sm:$0xff] }
 0x596   :  { %11224 = vmatpush1.bf16.msra.mxu0 %v13886_v58  ;;  %11757 = vmatpush1.bf16.msra.mxu1 %v13888_v13  ;;  %v13942_v58 = vcombine.low %v1340_v39, %v1344_v0  ;;  %v1400_v39 = vld [vmem:[%s20007_s1 + $0x2ab0] sm:$0xff]  ;;  %v13993_v0 = vcombine.high %v1389_v42, %v1393_v44 }
 0x597   :  { %11225 = vmatprep.subr.bf16.mxu0 %v13895_v63  ;;  %11758 = vmatprep.subr.bf16.mxu1 %v13897_v36  ;;  %v13951_v63 = vcombine.high %v1348_v10, %v1352_v54 }
 0x59a   :  { %11226 = vmatpush1.bf16.msra.mxu0 %v13894_v57  ;;  %11759 = vmatpush1.bf16.msra.mxu1 %v13896_v22  ;;  %v13950_v57 = vcombine.low %v1348_v10, %v1352_v54  ;;  %v1408_v10 = vld [vmem:[%s20007_s1 + $0x2af0] sm:$0xff] }
 0x59b   :  { %11227 = vmatprep.subr.bf16.mxu0 %v13903_v9  ;;  %11760 = vmatprep.subr.bf16.mxu1 %v13905_v55  ;;  %v13959_v9 = vcombine.high %v1356_v14, %v1360_v16  ;;  %v13961_v55 = vcombine.high %v1357_v17, %v1361_v12 }
 0x59e   :  { %11228 = vmatpush1.bf16.msra.mxu0 %v13902_v59  ;;  %11761 = vmatpush1.bf16.msra.mxu1 %v13904_v24  ;;  %v13958_v59 = vcombine.low %v1356_v14, %v1360_v16  ;;  %v13960_v24 = vcombine.low %v1357_v17, %v1361_v12  ;;  %v1416_v14 = vld [vmem:[%s20007_s1 + $0x2b30] sm:$0xff]  ;;  %v1413_v17 = vld [vmem:[%s20007_s1 + $0x2b18] sm:$0xff] }
 0x59f   :  { %11229 = vmatprep.subr.bf16.mxu0 %v13911_v26  ;;  %11762 = vmatprep.subr.bf16.mxu1 %v13913_v15  ;;  %v13967_v26 = vcombine.high %v1364_v53, %v1368_v20  ;;  %v13969_v15 = vcombine.high %v1365_v27, %v1369_v45  ;;  %v1417_v12 = vld [vmem:[%s20007_s1 + $0x2b38] sm:$0xff] }
 0x5a2   :  { %11230 = vmatpush1.bf16.msra.mxu0 %v13910_v29  ;;  %11763 = vmatpush1.bf16.msra.mxu1 %v13912_v32  ;;  %v13966_v29 = vcombine.low %v1364_v53, %v1368_v20  ;;  %v13968_v32 = vcombine.low %v1365_v27, %v1369_v45  ;;  %v1424_v53 = vld [vmem:[%s20007_s1 + $0x2b70] sm:$0xff]  ;;  %v14017_v20 = vcombine.high %v1413_v17, %v1417_v12  ;;  %v1421_v27 = vld [vmem:[%s20007_s1 + $0x2b58] sm:$0xff] }
 0x5a3   :  { %11240 = vmatprep.subr.bf16.mxu0 %v13919_v50  ;;  %11773 = vmatprep.subr.bf16.mxu1 %v13921_v19  ;;  %v13975_v50 = vcombine.high %v1372_v1, %v1376_v21  ;;  %v13977_v19 = vcombine.high %v1373_v31, %v1377_v28  ;;  %v1425_v45 = vld [vmem:[%s20007_s1 + $0x2b78] sm:$0xff] }
 0x5a5   :  { %11232 = vmatmul.mubr.bf16.vlgmr.msra.gmra.mrb[4].mxu0 %v16816_v43  ;;  %11765 = vmatmul.mubr.bf16.vlgmr.msra.gmra.mrb[4].mxu1 %v16816_v43  ;;  %v1341_v43 = vld [vmem:[%s20007_s1 + $0x28d8] sm:$0xff] }
 0x5a6   :  { %11241 = vmatpush1.bf16.msra.mxu0 %v13918_v38  ;;  %11774 = vmatpush1.bf16.msra.mxu1 %v13920_v40  ;;  %v13945_v8 = vcombine.high %v1341_v43, %v1345_v46  ;;  %v13944_v13 = vcombine.low %v1341_v43, %v1345_v46  ;;  %v13974_v38 = vcombine.low %v1372_v1, %v1376_v21  ;;  %v1397_v43 = vld [vmem:[%s20007_s1 + $0x2a98] sm:$0xff]  ;;  %v1432_v1 = vld [vmem:[%s20007_s1 + $0x2bb0] sm:$0xff] }
 0x5a7   :  { %11242 = vmatprep.subr.bf16.mxu0 %v13927_v62  ;;  %11775 = vmatprep.subr.bf16.mxu1 %v13929_v41  ;;  %v13976_v40 = vcombine.low %v1373_v31, %v1377_v28  ;;  %v13983_v62 = vcombine.high %v1380_v33, %v1384_v34  ;;  %v13985_v41 = vcombine.high %v1381_v35, %v1385_v37  ;;  %v1401_v46 = vld [vmem:[%s20007_s1 + $0x2ab8] sm:$0xff] }
 0x5a8   :  { %11272 = vmatprep.mubr.bf16.mxu0 %v16837_v60  ;;  %11805 = vmatprep.mubr.bf16.mxu1 %v16837_v60  ;;  %v1349_v60 = vld [vmem:[%s20007_s1 + $0x2918] sm:$0xff]  ;;  %v14001_v54 = vcombine.high %v1397_v43, %v1401_v46  ;;  %v14025_v21 = vcombine.high %v1421_v27, %v1425_v45 }
 0x5a9   :  { %v13953_v36 = vcombine.high %v1349_v60, %v1353_v11  ;;  %v13952_v22 = vcombine.low %v1349_v60, %v1353_v11  ;;  %v1405_v60 = vld [vmem:[%s20007_s1 + $0x2ad8] sm:$0xff] }
 0x5aa   :  { %11243 = vmatpush1.bf16.msra.mxu0 %v13926_v47  ;;  %11776 = vmatpush1.bf16.msra.mxu1 %v13928_v52  ;;  %v13982_v47 = vcombine.low %v1380_v33, %v1384_v34  ;;  %v13984_v52 = vcombine.low %v1381_v35, %v1385_v37  ;;  %v1409_v11 = vld [vmem:[%s20007_s1 + $0x2af8] sm:$0xff]  ;;  %v1440_v33 = vld [vmem:[%s20007_s1 + $0x2bf0] sm:$0xff] }
 0x5ab   :  { %11244 = vmatprep.subr.bf16.mxu0 %v13935_v56  ;;  %11777 = vmatprep.subr.bf16.mxu1 %v13937_v3  ;;  %v13991_v56 = vcombine.high %v1388_v30, %v1392_v25  ;;  %v1396_v3 = vld [vmem:[%s20007_s1 + $0x2a90] sm:$0xff]  ;;  %v14009_v16 = vcombine.high %v1405_v60, %v1409_v11  ;;  %v1429_v31 = vld [vmem:[%s20007_s1 + $0x2b98] sm:$0xff] }
 0x5ac   :  { %v1433_v28 = vld [vmem:[%s20007_s1 + $0x2bb8] sm:$0xff] }
 0x5ad   :  { %v14033_v34 = vcombine.high %v1429_v31, %v1433_v28  ;;  %v1437_v35 = vld [vmem:[%s20007_s1 + $0x2bd8] sm:$0xff] }
 0x5ae   :  { %11245 = vmatpush1.bf16.msra.mxu0 %v13934_v23  ;;  %11778 = vmatpush1.bf16.msra.mxu1 %v13936_v6  ;;  %v13990_v23 = vcombine.low %v1388_v30, %v1392_v25  ;;  %v1404_v6 = vld [vmem:[%s20007_s1 + $0x2ad0] sm:$0xff]  ;;  %v1441_v37 = vld [vmem:[%s20007_s1 + $0x2bf8] sm:$0xff] }
 0x5af   :  { %11246 = vmatprep.subr.bf16.mxu0 %v13943_v7  ;;  %11779 = vmatprep.subr.bf16.mxu1 %v13945_v8  ;;  %v13992_v7 = vcombine.low %v1389_v42, %v1393_v44  ;;  %v13999_v8 = vcombine.high %v1396_v3, %v1400_v39  ;;  %v1448_v30 = vld [vmem:[%s20007_s1 + $0x2c30] sm:$0xff]  ;;  %v14041_v25 = vcombine.high %v1437_v35, %v1441_v37  ;;  %v1445_v42 = vld [vmem:[%s20007_s1 + $0x2c18] sm:$0xff] }
 0x5b0   :  { %v1449_v44 = vld [vmem:[%s20007_s1 + $0x2c38] sm:$0xff] }
 0x5b2   :  { %11247 = vmatpush1.bf16.msra.mxu0 %v13942_v58  ;;  %11780 = vmatpush1.bf16.msra.mxu1 %v13944_v13  ;;  %v13998_v58 = vcombine.low %v1396_v3, %v1400_v39  ;;  %v1412_v13 = vld [vmem:[%s20007_s1 + $0x2b10] sm:$0xff] }
 0x5b3   :  { %11248 = vmatprep.subr.bf16.mxu0 %v13951_v63  ;;  %11781 = vmatprep.subr.bf16.mxu1 %v13953_v36  ;;  %v14000_v63 = vcombine.low %v1397_v43, %v1401_v46  ;;  %v14007_v36 = vcombine.high %v1404_v6, %v1408_v10  ;;  %v1456_v39 = vld [vmem:[%s20007_s1 + $0x2c70] sm:$0xff]  ;;  %v1453_v43 = vld [vmem:[%s20007_s1 + $0x2c58] sm:$0xff] }
 0x5b4   :  { %v1457_v46 = vld [vmem:[%s20007_s1 + $0x2c78] sm:$0xff] }
 0x5b6   :  { %11249 = vmatpush1.bf16.msra.mxu0 %v13950_v57  ;;  %11782 = vmatpush1.bf16.msra.mxu1 %v13952_v22  ;;  %v14006_v57 = vcombine.low %v1404_v6, %v1408_v10  ;;  %v1420_v22 = vld [vmem:[%s20007_s1 + $0x2b50] sm:$0xff] }
 0x5b7   :  { %11250 = vmatprep.subr.bf16.mxu0 %v13959_v9  ;;  %11783 = vmatprep.subr.bf16.mxu1 %v13961_v55  ;;  %v14008_v9 = vcombine.low %v1405_v60, %v1409_v11  ;;  %v14015_v55 = vcombine.high %v1412_v13, %v1416_v14  ;;  %v1460_v6 = vld [vmem:[%s20007_s1 + $0x2c90] sm:$0xff]  ;;  %v1465_v60 = vld [vmem:[%s20007_s1 + $0x2cb8] sm:$0xff]  ;;  %v14057_v11 = vcombine.high %v1453_v43, %v1457_v46 }
 0x5ba   :  { %11251 = vmatpush1.bf16.msra.mxu0 %v13958_v59  ;;  %11784 = vmatpush1.bf16.msra.mxu1 %v13960_v24  ;;  %v14014_v59 = vcombine.low %v1412_v13, %v1416_v14  ;;  %v1428_v24 = vld [vmem:[%s20007_s1 + $0x2b90] sm:$0xff] }
 0x5bb   :  { %11252 = vmatprep.subr.bf16.mxu0 %v13967_v26  ;;  %11785 = vmatprep.subr.bf16.mxu1 %v13969_v15  ;;  %v14016_v26 = vcombine.low %v1413_v17, %v1417_v12  ;;  %v14023_v15 = vcombine.high %v1420_v22, %v1424_v53  ;;  %v1468_v13 = vld [vmem:[%s20007_s1 + $0x2cd0] sm:$0xff]  ;;  %v1469_v17 = vld [vmem:[%s20007_s1 + $0x2cd8] sm:$0xff] }
 0x5bc   :  { %v1472_v14 = vld [vmem:[%s20007_s1 + $0x2cf0] sm:$0xff] }
 0x5be   :  { %11253 = vmatpush1.bf16.msra.mxu0 %v13966_v29  ;;  %11786 = vmatpush1.bf16.msra.mxu1 %v13968_v32  ;;  %v14022_v29 = vcombine.low %v1420_v22, %v1424_v53  ;;  %v1436_v32 = vld [vmem:[%s20007_s1 + $0x2bd0] sm:$0xff] }
 0x5bf   :  { %11254 = vmatprep.subr.bf16.mxu0 %v13975_v50  ;;  %11787 = vmatprep.subr.bf16.mxu1 %v13977_v19  ;;  %v14024_v50 = vcombine.low %v1421_v27, %v1425_v45  ;;  %v14031_v19 = vcombine.high %v1428_v24, %v1432_v1  ;;  %v14070_v27 = vcombine.low %v1468_v13, %v1472_v14  ;;  %v1484_v45 = vld [vmem:[%s20007_s1 + $0x2d50] sm:$0xff] }
 0x5c2   :  { %11255 = vmatpush1.bf16.msra.mxu0 %v13974_v38  ;;  %11788 = vmatpush1.bf16.msra.mxu1 %v13976_v40  ;;  %v14030_v38 = vcombine.low %v1428_v24, %v1432_v1  ;;  %v1444_v40 = vld [vmem:[%s20007_s1 + $0x2c10] sm:$0xff]  ;;  %v1485_v1 = vld [vmem:[%s20007_s1 + $0x2d58] sm:$0xff] }
 0x5c3   :  { %11256 = vmatprep.subr.bf16.mxu0 %v13983_v62  ;;  %11789 = vmatprep.subr.bf16.mxu1 %v13985_v41  ;;  %v14032_v62 = vcombine.low %v1429_v31, %v1433_v28  ;;  %v14039_v41 = vcombine.high %v1436_v32, %v1440_v33  ;;  %v14047_v3 = vcombine.high %v1444_v40, %v1448_v30  ;;  %v1492_v28 = vld [vmem:[%s20007_s1 + $0x2d90] sm:$0xff] }
 0x5c6   :  { %11257 = vmatpush1.bf16.msra.mxu0 %v13982_v47  ;;  %11790 = vmatpush1.bf16.msra.mxu1 %v13984_v52  ;;  %v14038_v47 = vcombine.low %v1436_v32, %v1440_v33  ;;  %v1452_v52 = vld [vmem:[%s20007_s1 + $0x2c50] sm:$0xff]  ;;  %v1493_v33 = vld [vmem:[%s20007_s1 + $0x2d98] sm:$0xff] }
 0x5c7   :  { %11258 = vmatprep.subr.bf16.mxu0 %v13991_v56  ;;  %11791 = vmatprep.subr.bf16.mxu1 %v13993_v0  ;;  %v14040_v56 = vcombine.low %v1437_v35, %v1441_v37  ;;  %v14049_v0 = vcombine.high %v1445_v42, %v1449_v44  ;;  %v14055_v10 = vcombine.high %v1452_v52, %v1456_v39  ;;  %v1500_v37 = vld [vmem:[%s20007_s1 + $0x2dd0] sm:$0xff] }
 0x5ca   :  { %11259 = vmatpush1.bf16.msra.mxu0 %v13990_v23  ;;  %11792 = vmatpush1.bf16.msra.mxu1 %v13992_v7  ;;  %v14046_v23 = vcombine.low %v1444_v40, %v1448_v30  ;;  %v1464_v7 = vld [vmem:[%s20007_s1 + $0x2cb0] sm:$0xff]  ;;  %v1501_v30 = vld [vmem:[%s20007_s1 + $0x2dd8] sm:$0xff] }
 0x5cb   :  { %11260 = vmatprep.subr.bf16.mxu0 %v13999_v8  ;;  %11793 = vmatprep.subr.bf16.mxu1 %v14001_v54  ;;  %v14048_v8 = vcombine.low %v1445_v42, %v1449_v44  ;;  %v1461_v54 = vld [vmem:[%s20007_s1 + $0x2c98] sm:$0xff]  ;;  %v14062_v12 = vcombine.low %v1460_v6, %v1464_v7  ;;  %v1508_v44 = vld [vmem:[%s20007_s1 + $0x2e10] sm:$0xff] }
 0x5cc   :  { %v14064_v22 = vcombine.low %v1461_v54, %v1465_v60 }
 0x5ce   :  { %11261 = vmatpush1.bf16.msra.mxu0 %v13998_v58  ;;  %11794 = vmatpush1.bf16.msra.mxu1 %v14000_v63  ;;  %v14054_v58 = vcombine.low %v1452_v52, %v1456_v39  ;;  %v14056_v63 = vcombine.low %v1453_v43, %v1457_v46  ;;  %v1513_v39 = vld [vmem:[%s20007_s1 + $0x2e38] sm:$0xff]  ;;  %v1516_v46 = vld [vmem:[%s20007_s1 + $0x2e50] sm:$0xff] }
 0x5cf   :  { %11262 = vmatprep.subr.bf16.mxu0 %v14007_v36  ;;  %11795 = vmatprep.subr.bf16.mxu1 %v14009_v16  ;;  %v14063_v36 = vcombine.high %v1460_v6, %v1464_v7  ;;  %v14065_v16 = vcombine.high %v1461_v54, %v1465_v60  ;;  %v1521_v54 = vld [vmem:[%s20007_s1 + $0x2e78] sm:$0xff] }
 0x5d2   :  { %11263 = vmatpush1.bf16.msra.mxu0 %v14006_v57  ;;  %11796 = vmatpush1.bf16.msra.mxu1 %v14008_v9  ;;  %v1476_v57 = vld [vmem:[%s20007_s1 + $0x2d10] sm:$0xff]  ;;  %v14071_v9 = vcombine.high %v1468_v13, %v1472_v14  ;;  %v1525_v14 = vld [vmem:[%s20007_s1 + $0x2e98] sm:$0xff] }
 0x5d3   :  { %11264 = vmatprep.subr.bf16.mxu0 %v14015_v55  ;;  %11797 = vmatprep.subr.bf16.mxu1 %v14017_v20  ;;  %v1480_v55 = vld [vmem:[%s20007_s1 + $0x2d30] sm:$0xff]  ;;  %v1481_v20 = vld [vmem:[%s20007_s1 + $0x2d38] sm:$0xff] }
 0x5d4   :  { %v14079_v24 = vcombine.high %v1476_v57, %v1480_v55  ;;  %v14078_v31 = vcombine.low %v1476_v57, %v1480_v55  ;;  %v1533_v55 = vld [vmem:[%s20007_s1 + $0x2ed8] sm:$0xff] }
 0x5d6   :  { %11265 = vmatpush1.bf16.msra.mxu0 %v14014_v59  ;;  %11798 = vmatpush1.bf16.msra.mxu1 %v14016_v26  ;;  %v1488_v26 = vld [vmem:[%s20007_s1 + $0x2d70] sm:$0xff] }
 0x5d7   :  { %11266 = vmatprep.subr.bf16.mxu0 %v14023_v15  ;;  %11799 = vmatprep.subr.bf16.mxu1 %v14025_v21  ;;  %v1489_v21 = vld [vmem:[%s20007_s1 + $0x2d78] sm:$0xff]  ;;  %v14087_v32 = vcombine.high %v1484_v45, %v1488_v26  ;;  %v14086_v35 = vcombine.low %v1484_v45, %v1488_v26 }
 0x5d8   :  { %v1541_v26 = vld [vmem:[%s20007_s1 + $0x2f18] sm:$0xff] }
 0x5da   :  { %11267 = vmatpush1.bf16.msra.mxu0 %v14022_v29  ;;  %11800 = vmatpush1.bf16.msra.mxu1 %v14024_v50  ;;  %v1496_v50 = vld [vmem:[%s20007_s1 + $0x2db0] sm:$0xff] }
 0x5db   :  { %11268 = vmatprep.subr.bf16.mxu0 %v14031_v19  ;;  %11801 = vmatprep.subr.bf16.mxu1 %v14033_v34  ;;  %v14089_v19 = vcombine.high %v1485_v1, %v1489_v21  ;;  %v1497_v34 = vld [vmem:[%s20007_s1 + $0x2db8] sm:$0xff]  ;;  %v14095_v40 = vcombine.high %v1492_v28, %v1496_v50  ;;  %v14094_v42 = vcombine.low %v1492_v28, %v1496_v50 }
 0x5dc   :  { %v14096_v52 = vcombine.low %v1493_v33, %v1497_v34  ;;  %v1549_v50 = vld [vmem:[%s20007_s1 + $0x2f58] sm:$0xff] }
 0x5de   :  { %11269 = vmatpush1.bf16.msra.mxu0 %v14030_v38  ;;  %11802 = vmatpush1.bf16.msra.mxu1 %v14032_v62  ;;  %v14088_v38 = vcombine.low %v1485_v1, %v1489_v21  ;;  %v1504_v62 = vld [vmem:[%s20007_s1 + $0x2df0] sm:$0xff] }
 0x5df   :  { %11270 = vmatprep.subr.bf16.mxu0 %v14039_v41  ;;  %11803 = vmatprep.subr.bf16.mxu1 %v14041_v25  ;;  %v14097_v41 = vcombine.high %v1493_v33, %v1497_v34  ;;  %v1505_v25 = vld [vmem:[%s20007_s1 + $0x2df8] sm:$0xff]  ;;  %v14102_v43 = vcombine.low %v1500_v37, %v1504_v62 }
 0x5e0   :  { %v14104_v6 = vcombine.low %v1501_v30, %v1505_v25 }
 0x5e2   :  { %11271 = vmatpush1.bf16.msra.mxu0 %v14038_v47  ;;  %11804 = vmatpush1.bf16.msra.mxu1 %v14040_v56  ;;  %v1512_v47 = vld [vmem:[%s20007_s1 + $0x2e30] sm:$0xff]  ;;  %v14103_v56 = vcombine.high %v1500_v37, %v1504_v62  ;;  %v1557_v62 = vld [vmem:[%s20007_s1 + $0x2f98] sm:$0xff] }
 0x5e3   :  { %11281 = vmatprep.subr.bf16.mxu0 %v14047_v3  ;;  %11814 = vmatprep.subr.bf16.mxu1 %v14049_v0  ;;  %v1509_v3 = vld [vmem:[%s20007_s1 + $0x2e18] sm:$0xff]  ;;  %v14105_v0 = vcombine.high %v1501_v30, %v1505_v25  ;;  %v14111_v7 = vcombine.high %v1508_v44, %v1512_v47  ;;  %v14110_v60 = vcombine.low %v1508_v44, %v1512_v47  ;;  %v1564_v47 = vld [vmem:[%s20007_s1 + $0x2fd0] sm:$0xff] }
 0x5e5   :  { %11273 = vmatmul.mubr.bf16.vlgmr.msra.gmra.mrb[4].mxu0 %v17025_v51  ;;  %11806 = vmatmul.mubr.bf16.vlgmr.msra.gmra.mrb[4].mxu1 %v17025_v51  ;;  %v1473_v51 = vld [vmem:[%s20007_s1 + $0x2cf8] sm:$0xff] }
 0x5e6   :  { %11282 = vmatpush1.bf16.msra.mxu0 %v14046_v23  ;;  %11815 = vmatpush1.bf16.msra.mxu1 %v14048_v8  ;;  %v14073_v53 = vcombine.high %v1469_v17, %v1473_v51  ;;  %v14072_v59 = vcombine.low %v1469_v17, %v1473_v51  ;;  %v1520_v23 = vld [vmem:[%s20007_s1 + $0x2e70] sm:$0xff]  ;;  %v14113_v8 = vcombine.high %v1509_v3, %v1513_v39 }
 0x5e7   :  { %11283 = vmatprep.subr.bf16.mxu0 %v14055_v10  ;;  %11816 = vmatprep.subr.bf16.mxu1 %v14057_v11  ;;  %v1517_v10 = vld [vmem:[%s20007_s1 + $0x2e58] sm:$0xff]  ;;  %v14112_v11 = vcombine.low %v1509_v3, %v1513_v39  ;;  %v14118_v17 = vcombine.low %v1516_v46, %v1520_v23 }
 0x5e8   :  { %11313 = vmatprep.mubr.bf16.mxu0 %v17046_v2  ;;  %11846 = vmatprep.mubr.bf16.mxu1 %v17046_v2  ;;  %v1477_v2 = vld [vmem:[%s20007_s1 + $0x2d18] sm:$0xff]  ;;  %v14121_v13 = vcombine.high %v1517_v10, %v1521_v54  ;;  %v14120_v51 = vcombine.low %v1517_v10, %v1521_v54 }
 0x5e9   :  { %v14081_v15 = vcombine.high %v1477_v2, %v1481_v20  ;;  %v14080_v29 = vcombine.low %v1477_v2, %v1481_v20  ;;  %v1569_v3 = vld [vmem:[%s20007_s1 + $0x2ff8] sm:$0xff] }
 0x5ea   :  { %11284 = vmatpush1.bf16.msra.mxu0 %v14054_v58  ;;  %11817 = vmatpush1.bf16.msra.mxu1 %v14056_v63  ;;  %v14119_v58 = vcombine.high %v1516_v46, %v1520_v23  ;;  %v1524_v63 = vld [vmem:[%s20007_s1 + $0x2e90] sm:$0xff] }
 0x5eb   :  { %11285 = vmatprep.subr.bf16.mxu0 %v14063_v36  ;;  %11818 = vmatprep.subr.bf16.mxu1 %v14065_v16  ;;  %v1528_v36 = vld [vmem:[%s20007_s1 + $0x2eb0] sm:$0xff]  ;;  %v1529_v16 = vld [vmem:[%s20007_s1 + $0x2eb8] sm:$0xff] }
 0x5ec   :  { %v14129_v57 = vcombine.high %v1525_v14, %v1529_v16  ;;  %v14126_v2 = vcombine.low %v1524_v63, %v1528_v36  ;;  %v14128_v20 = vcombine.low %v1525_v14, %v1529_v16  ;;  %v1572_v23 = vld [vmem:[%s20007_s1 + $0x3010] sm:$0xff] }
 0x5ee   :  { %11286 = vmatpush1.bf16.msra.mxu0 %v14062_v12  ;;  %11819 = vmatpush1.bf16.msra.mxu1 %v14064_v22  ;;  %v14127_v12 = vcombine.high %v1524_v63, %v1528_v36  ;;  %v1532_v22 = vld [vmem:[%s20007_s1 + $0x2ed0] sm:$0xff]  ;;  %v1581_v63 = vld [vmem:[%s20007_s1 + $0x3058] sm:$0xff] }
 0x5ef   :  { %11287 = vmatprep.subr.bf16.mxu0 %v14071_v9  ;;  %11820 = vmatprep.subr.bf16.mxu1 %v14073_v53  ;;  %v1536_v9 = vld [vmem:[%s20007_s1 + $0x2ef0] sm:$0xff]  ;;  %v1537_v53 = vld [vmem:[%s20007_s1 + $0x2ef8] sm:$0xff] }
 0x5f0   :  { %v14137_v45 = vcombine.high %v1533_v55, %v1537_v53  ;;  %v14134_v1 = vcombine.low %v1532_v22, %v1536_v9  ;;  %v14136_v21 = vcombine.low %v1533_v55, %v1537_v53  ;;  %v1585_v36 = vld [vmem:[%s20007_s1 + $0x3078] sm:$0xff] }
 0x5f1   :  { %v14184_v53 = vcombine.low %v1581_v63, %v1585_v36 }
 0x5f2   :  { %11288 = vmatpush1.bf16.msra.mxu0 %v14070_v27  ;;  %11821 = vmatpush1.bf16.msra.mxu1 %v14072_v59  ;;  %v14135_v27 = vcombine.high %v1532_v22, %v1536_v9  ;;  %v1540_v59 = vld [vmem:[%s20007_s1 + $0x2f10] sm:$0xff]  ;;  %v1589_v22 = vld [vmem:[%s20007_s1 + $0x3098] sm:$0xff] }
 0x5f3   :  { %11289 = vmatprep.subr.bf16.mxu0 %v14079_v24  ;;  %11822 = vmatprep.subr.bf16.mxu1 %v14081_v15  ;;  %v1544_v24 = vld [vmem:[%s20007_s1 + $0x2f30] sm:$0xff]  ;;  %v1545_v15 = vld [vmem:[%s20007_s1 + $0x2f38] sm:$0xff] }
 0x5f4   :  { %v14145_v28 = vcombine.high %v1541_v26, %v1545_v15  ;;  %v14142_v33 = vcombine.low %v1540_v59, %v1544_v24  ;;  %v14144_v34 = vcombine.low %v1541_v26, %v1545_v15  ;;  %v1593_v9 = vld [vmem:[%s20007_s1 + $0x30b8] sm:$0xff] }
 0x5f5   :  { %v14192_v26 = vcombine.low %v1589_v22, %v1593_v9 }
 0x5f6   :  { %11290 = vmatpush1.bf16.msra.mxu0 %v14078_v31  ;;  %11823 = vmatpush1.bf16.msra.mxu1 %v14080_v29  ;;  %v14143_v31 = vcombine.high %v1540_v59, %v1544_v24  ;;  %v1548_v29 = vld [vmem:[%s20007_s1 + $0x2f50] sm:$0xff]  ;;  %v1601_v59 = vld [vmem:[%s20007_s1 + $0x30f8] sm:$0xff] }
 0x5f7   :  { %11291 = vmatprep.subr.bf16.mxu0 %v14087_v32  ;;  %11824 = vmatprep.subr.bf16.mxu1 %v14089_v19  ;;  %v1552_v32 = vld [vmem:[%s20007_s1 + $0x2f70] sm:$0xff]  ;;  %v1553_v19 = vld [vmem:[%s20007_s1 + $0x2f78] sm:$0xff] }
 0x5f8   :  { %v14153_v37 = vcombine.high %v1549_v50, %v1553_v19  ;;  %v14150_v30 = vcombine.low %v1548_v29, %v1552_v32  ;;  %v14152_v25 = vcombine.low %v1549_v50, %v1553_v19 }
 0x5fa   :  { %11292 = vmatpush1.bf16.msra.mxu0 %v14086_v35  ;;  %11825 = vmatpush1.bf16.msra.mxu1 %v14088_v38  ;;  %v14151_v35 = vcombine.high %v1548_v29, %v1552_v32  ;;  %v1556_v38 = vld [vmem:[%s20007_s1 + $0x2f90] sm:$0xff]  ;;  %v1609_v29 = vld [vmem:[%s20007_s1 + $0x3138] sm:$0xff] }
 0x5fb   :  { %11293 = vmatprep.subr.bf16.mxu0 %v14095_v40  ;;  %11826 = vmatprep.subr.bf16.mxu1 %v14097_v41  ;;  %v1560_v40 = vld [vmem:[%s20007_s1 + $0x2fb0] sm:$0xff]  ;;  %v1561_v41 = vld [vmem:[%s20007_s1 + $0x2fb8] sm:$0xff] }
 0x5fc   :  { %v14161_v44 = vcombine.high %v1557_v62, %v1561_v41  ;;  %v14158_v39 = vcombine.low %v1556_v38, %v1560_v40 }
 0x5fe   :  { %11294 = vmatpush1.bf16.msra.mxu0 %v14094_v42  ;;  %11827 = vmatpush1.bf16.msra.mxu1 %v14096_v52  ;;  %v14159_v42 = vcombine.high %v1556_v38, %v1560_v40  ;;  %v1568_v52 = vld [vmem:[%s20007_s1 + $0x2ff0] sm:$0xff]  ;;  %v1613_v38 = vld [vmem:[%s20007_s1 + $0x3158] sm:$0xff] }
 0x5ff   :  { %11295 = vmatprep.subr.bf16.mxu0 %v14103_v56  ;;  %11828 = vmatprep.subr.bf16.mxu1 %v14105_v0  ;;  %v1565_v56 = vld [vmem:[%s20007_s1 + $0x2fd8] sm:$0xff]  ;;  %v14160_v0 = vcombine.low %v1557_v62, %v1561_v41  ;;  %v14166_v10 = vcombine.low %v1564_v47, %v1568_v52 }
 0x600   :  { %v14169_v46 = vcombine.high %v1565_v56, %v1569_v3  ;;  %v14168_v54 = vcombine.low %v1565_v56, %v1569_v3  ;;  %v1617_v40 = vld [vmem:[%s20007_s1 + $0x3178] sm:$0xff]  ;;  %v19773_v3 = vld [vmem:[%s20010_s2] sm:$0xff] }
 0x601   :  { %v1625_v56 = vld [vmem:[%s20007_s1 + $0x31b8] sm:$0xff] }
 0x602   :  { %11296 = vmatpush1.bf16.msra.mxu0 %v14102_v43  ;;  %11829 = vmatpush1.bf16.msra.mxu1 %v14104_v6  ;;  %v14167_v43 = vcombine.high %v1564_v47, %v1568_v52  ;;  %v1576_v6 = vld [vmem:[%s20007_s1 + $0x3030] sm:$0xff]  ;;  %v1621_v52 = vld [vmem:[%s20007_s1 + $0x3198] sm:$0xff] }
 0x603   :  { %11297 = vmatprep.subr.bf16.mxu0 %v14111_v7  ;;  %11830 = vmatprep.subr.bf16.mxu1 %v14113_v8  ;;  %v1573_v7 = vld [vmem:[%s20007_s1 + $0x3018] sm:$0xff]  ;;  %v14174_v14 = vcombine.low %v1572_v23, %v1576_v6 }
 0x604   :  { %v1577_v8 = vld [vmem:[%s20007_s1 + $0x3038] sm:$0xff] }
 0x605   :  { %v14176_v16 = vcombine.low %v1573_v7, %v1577_v8 }
 0x606   :  { %11298 = vmatpush1.bf16.msra.mxu0 %v14110_v60  ;;  %11831 = vmatpush1.bf16.msra.mxu1 %v14112_v11  ;;  %v14175_v60 = vcombine.high %v1572_v23, %v1576_v6  ;;  %v14177_v11 = vcombine.high %v1573_v7, %v1577_v8  ;;  %v14225_v23 = vcombine.high %v1621_v52, %v1625_v56  ;;  %v1628_v6 = vld [vmem:[%s20007_s1 + $0x31d0] sm:$0xff] }
 0x607   :  { %11299 = vmatprep.subr.bf16.mxu0 %v14119_v58  ;;  %11832 = vmatprep.subr.bf16.mxu1 %v14121_v13  ;;  %v1580_v58 = vld [vmem:[%s20007_s1 + $0x3050] sm:$0xff] }
 0x608   :  { %v1584_v13 = vld [vmem:[%s20007_s1 + $0x3070] sm:$0xff] }
 0x609   :  { %v14182_v55 = vcombine.low %v1580_v58, %v1584_v13  ;;  %v1632_v7 = vld [vmem:[%s20007_s1 + $0x31f0] sm:$0xff] }
 0x60a   :  { %11300 = vmatpush1.bf16.msra.mxu0 %v14118_v17  ;;  %11833 = vmatpush1.bf16.msra.mxu1 %v14120_v51  ;;  %v14183_v17 = vcombine.high %v1580_v58, %v1584_v13  ;;  %v14185_v51 = vcombine.high %v1581_v63, %v1585_v36  ;;  %v14224_v58 = vcombine.low %v1621_v52, %v1625_v56  ;;  %v14644_v56 = vld [vmem:[%s20009_s3 + $0xf8] sm:$0xff]  }
 0x60b   :  { %11301 = vmatprep.subr.bf16.mxu0 %v14127_v12  ;;  %11834 = vmatprep.subr.bf16.mxu1 %v14129_v57  ;;  %v1588_v12 = vld [vmem:[%s20007_s1 + $0x3090] sm:$0xff]  ;;  %v14231_v13 = vcombine.high %v1628_v6, %v1632_v7 }
 0x60c   :  { %v1592_v57 = vld [vmem:[%s20007_s1 + $0x30b0] sm:$0xff] }
 0x60d   :  { %v14190_v24 = vcombine.low %v1588_v12, %v1592_v57 }
 0x60e   :  { %11302 = vmatpush1.bf16.msra.mxu0 %v14126_v2  ;;  %11835 = vmatpush1.bf16.msra.mxu1 %v14128_v20  ;;  %v14191_v2 = vcombine.high %v1588_v12, %v1592_v57  ;;  %v14193_v20 = vcombine.high %v1589_v22, %v1593_v9  ;;  %v14616_v12 = vld [vmem:[%s20009_s3 + $0xc0] sm:$0xff]   ;;  %v14619_v9 = vld [vmem:[%s20009_s3 + $0x48] sm:$0xff]  }
 0x60f   :  { %11303 = vmatprep.subr.bf16.mxu0 %v14135_v27  ;;  %11836 = vmatprep.subr.bf16.mxu1 %v14137_v45  ;;  %v1596_v27 = vld [vmem:[%s20007_s1 + $0x30d0] sm:$0xff] }
 0x610   :  { %v1600_v45 = vld [vmem:[%s20007_s1 + $0x30f0] sm:$0xff] }
 0x611   :  { %v14199_v15 = vcombine.high %v1596_v27, %v1600_v45  ;;  %v14198_v32 = vcombine.low %v1596_v27, %v1600_v45  ;;  %v14621_v27 = vld [vmem:[%s20009_s3 + $0x8] sm:$0xff]  }
 0x612   :  { %11304 = vmatpush1.bf16.msra.mxu0 %v14134_v1  ;;  %11837 = vmatpush1.bf16.msra.mxu1 %v14136_v21  ;;  %v1604_v21 = vld [vmem:[%s20007_s1 + $0x3110] sm:$0xff]  ;;  %v14622_v45 = vld [vmem:[%s20009_s3 + $0x88] sm:$0xff]  }
 0x613   :  { %11305 = vmatprep.subr.bf16.mxu0 %v14143_v31  ;;  %11838 = vmatprep.subr.bf16.mxu1 %v14145_v28  ;;  %v1608_v31 = vld [vmem:[%s20007_s1 + $0x3130] sm:$0xff]  ;;  %v1636_v28 = vlaneseq }
 0x614   :  { %v14207_v19 = vcombine.high %v1604_v21, %v1608_v31  ;;  %v14206_v62 = vcombine.low %v1604_v21, %v1608_v31  ;;  %v14629_v21 = vld [vmem:[%s20009_s3 + $0x18] sm:$0xff]  }
 0x615   :  { %v14630_v31 = vld [vmem:[%s20009_s3 + $0x98] sm:$0xff]  }
 0x616   :  { %11306 = vmatpush1.bf16.msra.mxu0 %v14142_v33  ;;  %11839 = vmatpush1.bf16.msra.mxu1 %v14144_v34  ;;  %v1612_v34 = vld [vmem:[%s20007_s1 + $0x3150] sm:$0xff] }
 0x617   :  { %11307 = vmatprep.subr.bf16.mxu0 %v14151_v35  ;;  %11840 = vmatprep.subr.bf16.mxu1 %v14153_v37  ;;  %v1616_v35 = vld [vmem:[%s20007_s1 + $0x3170] sm:$0xff]  ;;  %v19749_v37 = vshrl.u32 %v1636_v28, 7  ;;  %v14631_v28 = vld [vmem:[%s20009_s3 + $0x60] sm:$0xff]  }
 0x619   :  { %v1642_v47 = vsub.s32 1, %v19749_v37 }
 0x61a   :  { %11308 = vmatpush1.bf16.msra.mxu0 %v14150_v30  ;;  %11841 = vmatpush1.bf16.msra.mxu1 %v14152_v25  ;;  %v14215_v30 = vcombine.high %v1612_v34, %v1616_v35  ;;  %v14217_v25 = vcombine.high %v1613_v38, %v1617_v40 }
 0x61b   :  { %11309 = vmatprep.subr.bf16.mxu0 %v14159_v42  ;;  %11842 = vmatprep.subr.bf16.mxu1 %v14161_v44  ;;  %v1620_v42 = vld [vmem:[%s20007_s1 + $0x3190] sm:$0xff]  ;;  %v1643_v8 = vrot.slane %v19773_v3, %v1642_v47  ;;  %v14643_v47 = vld [vmem:[%s20009_s3 + $0x78] sm:$0xff]  }
 0x61c   :  { %v1624_v44 = vld [vmem:[%s20007_s1 + $0x31b0] sm:$0xff] }
 0x61d   :  { %v14388_v36 = vadd.f32 %v18005_v61, %v1643_v8  ;;  %v14617_v61 = vld [vmem:[%s20009_s3] sm:$0xff]   ;;  %v14651_v8 = vld [vmem:[%s20009_s3 + $0x148] sm:$0xff]  }
 0x61e   :  { %11310 = vmatpush1.bf16.msra.mxu0 %v14158_v39  ;;  %11843 = vmatpush1.bf16.msra.mxu1 %v14160_v0  ;;  %v1650_v39 = vsub.s32 3, %v19749_v37  ;;  %v14214_v0 = vcombine.low %v1612_v34, %v1616_v35  ;;  %v14636_v34 = vld [vmem:[%s20009_s3 + $0xe8] sm:$0xff]  }
 0x61f   :  { %11311 = vmatprep.subr.bf16.mxu0 %v14167_v43  ;;  %11844 = vmatprep.subr.bf16.mxu1 %v14169_v46  ;;  %v14216_v43 = vcombine.low %v1613_v38, %v1617_v40  ;;  %v14223_v46 = vcombine.high %v1620_v42, %v1624_v44  ;;  %v11897_v57 = vmax.f32 %v14388_v36, 0.0  ;;  %v14637_v35 = vld [vmem:[%s20009_s3 + $0x28] sm:$0xff]   ;;  %v14658_v36 = vld [vmem:[%s20009_s3 + $0x190] sm:$0xff]  }
 0x620   :  { %v14638_v40 = vld [vmem:[%s20009_s3 + $0xa8] sm:$0xff]  }
 0x622   :  { %11312 = vmatpush1.bf16.msra.mxu0 %v14166_v10  ;;  %11845 = vmatpush1.bf16.msra.mxu1 %v14168_v54  ;;  %v1629_v10 = vld [vmem:[%s20007_s1 + $0x31d8] sm:$0xff] }
 0x623   :  { %11322 = vmatprep.subr.bf16.mxu0 %v14175_v60  ;;  %11855 = vmatprep.subr.bf16.mxu1 %v14177_v11  ;;  %v1633_v54 = vld [vmem:[%s20007_s1 + $0x31f8] sm:$0xff]  ;;  %v1651_v60 = vrot.slane %v19773_v3, %v1650_v39  ;;  %v14222_v11 = vcombine.low %v1620_v42, %v1624_v44  ;;  %v14642_v44 = vld [vmem:[%s20009_s3 + $0xb0] sm:$0xff]  }
 0x624   :  { %v14233_v63 = vcombine.high %v1629_v10, %v1633_v54 }
 0x625   :  { %11314 = vmatmul.mubr.bf16.vlgmr.msra.gmra.mrb[4].mxu0 %v17234_v4  ;;  %11847 = vmatmul.mubr.bf16.vlgmr.msra.gmra.mrb[4].mxu1 %v17234_v4  ;;  %v1597_v4 = vld [vmem:[%s20007_s1 + $0x30d8] sm:$0xff] }
 0x626   :  { %11323 = vmatpush1.bf16.msra.mxu0 %v14174_v14  ;;  %11856 = vmatpush1.bf16.msra.mxu1 %v14176_v16  ;;  %v14201_v1 = vcombine.high %v1597_v4, %v1601_v59  ;;  %v14200_v50 = vcombine.low %v1597_v4, %v1601_v59  ;;  %v14390_v14 = vadd.f32 %v18013_v5, %v1651_v60  ;;  %v14618_v5 = vld [vmem:[%s20009_s3 + $0x80] sm:$0xff]   ;;  %v14623_v4 = vld [vmem:[%s20009_s3 + $0x50] sm:$0xff]   ;;  %v14653_v60 = vld [vmem:[%s20009_s3 + $0x108] sm:$0xff]  }
 0x627   :  { %11324 = vmatprep.subr.bf16.mxu0 %v14183_v17  ;;  %11857 = vmatprep.subr.bf16.mxu1 %v14185_v51  ;;  %v14230_v16 = vcombine.low %v1628_v6, %v1632_v7  ;;  %v14232_v17 = vcombine.low %v1629_v10, %v1633_v54  ;;  %v14615_v51 = vld [vmem:[%s20009_s3 + $0x40] sm:$0xff]   ;;  %v14624_v59 = vld [vmem:[%s20009_s3 + $0xd0] sm:$0xff]   ;;  %v14652_v54 = vld [vmem:[%s20009_s3 + $0x1c8] sm:$0xff]  }
 0x628   :  { %11354 = vmatprep.mubr.bf16.mxu0 %v14680_v49  ;;  %11887 = vmatprep.mubr.bf16.mxu1 %v14680_v49  ;;  %v1605_v49 = vld [vmem:[%s20007_s1 + $0x3118] sm:$0xff]  ;;  %v11899_v22 = vmax.f32 %v14390_v14, 0.0  ;;  %v14650_v7 = vld [vmem:[%s20009_s3 + $0x180] sm:$0xff]  }
 0x629   :  { %v14209_v33 = vcombine.high %v1605_v49, %v1609_v29  ;;  %v14208_v41 = vcombine.low %v1605_v49, %v1609_v29  ;;  %v14632_v49 = vld [vmem:[%s20009_s3 + $0xe0] sm:$0xff]   ;;  %v14659_v14 = vld [vmem:[%s20009_s3 + $0x158] sm:$0xff]  }
 0x62a   :  { %11325 = vmatpush1.bf16.msra.mxu0 %v14182_v55  ;;  %11858 = vmatpush1.bf16.msra.mxu1 %v14184_v53  ;;  %v11905_v55 = vpack.c.bf16 %v11897_v57, %v11897_v57  ;;  %v14679_v53 = vld [vmem:[%s20008_s0 + $0x60] ss:$0 sps:$4 sm:$0xff]  }
 0x62b   :  { %11326 = vmatprep.subr.bf16.mxu0 %v14191_v2  ;;  %11859 = vmatprep.subr.bf16.mxu1 %v14193_v20  ;;  %v14620_v2 = vld [vmem:[%s20009_s3 + $0xc8] sm:$0xff]   ;;  %v11907_v20 = vpack.c.bf16 %v11899_v22, %v11899_v22  ;;  %v14633_v29 = vld [vmem:[%s20009_s3 + $0x20] sm:$0xff]  }
 0x62c   :  { %v14664_v57 = vld [vmem:[%s20009_s3 + $0x1e0] sm:$0xff]  }
 0x62d   :  { %v14665_v22 = vld [vmem:[%s20009_s3 + $0x120] sm:$0xff]  }
 0x62e   :  { %11327 = vmatpush1.bf16.msra.mxu0 %v14190_v24  ;;  %11860 = vmatpush1.bf16.msra.mxu1 %v14192_v26  ;;  %v14625_v24 = vld [vmem:[%s20009_s3 + $0x10] sm:$0xff]  }
 0x62f   :  { %11328 = vmatprep.subr.bf16.mxu0 %v14199_v15  ;;  %11861 = vmatprep.subr.bf16.mxu1 %v14201_v1  ;;  %v14626_v26 = vld [vmem:[%s20009_s3 + $0x90] sm:$0xff]   ;;  %v14627_v15 = vld [vmem:[%s20009_s3 + $0x58] sm:$0xff]  }
 0x630   :  { %v14628_v1 = vld [vmem:[%s20009_s3 + $0xd8] sm:$0xff]  }
 0x632   :  { %11329 = vmatpush1.bf16.msra.mxu0 %v14198_v32  ;;  %11862 = vmatpush1.bf16.msra.mxu1 %v14200_v50  ;;  %v1638_v32 = vsub.s32 0, %v19749_v37  ;;  %v14634_v50 = vld [vmem:[%s20009_s3 + $0xa0] sm:$0xff]  }
 0x633   :  { %11330 = vmatprep.subr.bf16.mxu0 %v14207_v19  ;;  %11863 = vmatprep.subr.bf16.mxu1 %v14209_v33  ;;  %v14635_v19 = vld [vmem:[%s20009_s3 + $0x68] sm:$0xff]   ;;  %v1646_v33 = vsub.s32 2, %v19749_v37 }
 0x634   :  { %v1639_v38 = vrot.slane %v19773_v3, %v1638_v32 }
 0x636   :  { %11331 = vmatpush1.bf16.msra.mxu0 %v14206_v62  ;;  %11864 = vmatpush1.bf16.msra.mxu1 %v14208_v41  ;;  %v14639_v62 = vld [vmem:[%s20009_s3 + $0x70] sm:$0xff]   ;;  %v1647_v41 = vrot.slane %v19773_v3, %v1646_v33  ;;  %v14387_v42 = vadd.f32 %v17995_v18, %v1639_v38  ;;  %v14645_v18 = vld [vmem:[%s20009_s3 + $0x38] sm:$0xff]  }
 0x637   :  { %11332 = vmatprep.subr.bf16.mxu0 %v14215_v30  ;;  %11865 = vmatprep.subr.bf16.mxu1 %v14217_v25  ;;  %v14640_v30 = vld [vmem:[%s20009_s3 + $0xf0] sm:$0xff]  }
 0x638   :  { %v14641_v25 = vld [vmem:[%s20009_s3 + $0x30] sm:$0xff]   ;;  %v14389_v52 = vadd.f32 %v18003_v48, %v1647_v41  ;;  %v11896_v39 = vmax.f32 %v14387_v42, 0.0  ;;  %v14647_v48 = vld [vmem:[%s20009_s3 + $0x140] sm:$0xff]  }
 0x63a   :  { %11333 = vmatpush1.bf16.msra.mxu0 %v14214_v0  ;;  %11866 = vmatpush1.bf16.msra.mxu1 %v14216_v43  ;;  %v14646_v0 = vld [vmem:[%s20009_s3 + $0xb8] sm:$0xff]   ;;  %v11898_v43 = vmax.f32 %v14389_v52, 0.0  ;;  %v11904_v6 = vpack.c.bf16 %v11896_v39, %v11896_v39 }
 0x63b   :  { %11334 = vmatprep.subr.bf16.mxu0 %v14223_v46  ;;  %11867 = vmatprep.subr.bf16.mxu1 %v14225_v23  ;;  %v14648_v46 = vld [vmem:[%s20009_s3 + $0x1c0] sm:$0xff]  }
 0x63c   :  { %v14649_v23 = vld [vmem:[%s20009_s3 + $0x100] sm:$0xff]   ;;  %v11906_v10 = vpack.c.bf16 %v11898_v43, %v11898_v43 }
 0x63d   :  { %v14234_v43 = vld [vmem:[%s20011_s4] ss:$0 sm:$0xff] }
 0x63e   :  { %11335 = vmatpush1.bf16.msra.mxu0 %v14222_v11  ;;  %11868 = vmatpush1.bf16.msra.mxu1 %v14224_v58  ;;  %v14654_v11 = vld [vmem:[%s20009_s3 + $0x188] sm:$0xff]   ;;  %v14655_v58 = vld [vmem:[%s20009_s3 + $0x150] sm:$0xff]  }
 0x63f   :  { %11336 = vmatprep.subr.bf16.mxu0 %v14231_v13  ;;  %11869 = vmatprep.subr.bf16.mxu1 %v14233_v63  ;;  %v14656_v13 = vld [vmem:[%s20009_s3 + $0x1d0] sm:$0xff]  }
 0x640   :  { %v14657_v63 = vld [vmem:[%s20009_s3 + $0x110] sm:$0xff]  }
 0x642   :  { %11337 = vmatpush1.bf16.msra.mxu0 %v14230_v16  ;;  %11870 = vmatpush1.bf16.msra.mxu1 %v14232_v17  ;;  %v14660_v16 = vld [vmem:[%s20009_s3 + $0x1d8] sm:$0xff]  }
 0x643   :  { %14299 = vmatprep.subr.bf16.mxu0 %v14615_v51  ;;  %14321 = vmatprep.subr.bf16.mxu1 %v14616_v12  ;;  %v14661_v17 = vld [vmem:[%s20009_s3 + $0x118] sm:$0xff]   ;;  %v14663_v12 = vld [vmem:[%s20009_s3 + $0x160] sm:$0xff]  }
 0x644   :  { %v14662_v51 = vld [vmem:[%s20009_s3 + $0x198] sm:$0xff]  }
 0x645   :  { %11355 = vmatmul.mubr.bf16.vlgmr.msra.gmra.mrb[4].mxu0 %v14679_v53  ;;  %11888 = vmatmul.mubr.bf16.vlgmr.msra.gmra.mrb[4].mxu1 %v14679_v53  ;;  %v14670_v53 = vld [vmem:[%s20009_s3 + $0x1a8] sm:$0xff]  }
 0x646   :  { %14300 = vmatpush3.bf16.msra.mxu0 %v14617_v61  ;;  %12463 = vmatprep.mubr.bf16.mxu0 %v11905_v55  ;;  %v14666_v61 = vld [vmem:[%s20009_s3 + $0x1a0] sm:$0xff]   ;;  %v14669_v55 = vld [vmem:[%s20009_s3 + $0x128] sm:$0xff]  }
 0x647   :  { %14322 = vmatpush3.bf16.msra.mxu1 %v14618_v5  ;;  %12503 = vmatprep.mubr.bf16.mxu1 %v11907_v20  ;;  %v14667_v5 = vld [vmem:[%s20009_s3 + $0x168] sm:$0xff]   ;;  %v14672_v20 = vld [vmem:[%s20009_s3 + $0x1f0] sm:$0xff]  }
 0x648   :  { %14301 = vmatprep.subr.bf16.mxu0 %v14619_v9  ;;  %14323 = vmatprep.subr.bf16.mxu1 %v14620_v2  ;;  %v14668_v9 = vld [vmem:[%s20009_s3 + $0x1e8] sm:$0xff]   ;;  %v14671_v2 = vld [vmem:[%s20009_s3 + $0x170] sm:$0xff]  }
 0x64a   :  { %14302 = vmatpush3.bf16.msra.mxu0 %v14621_v27  ;;  %v14673_v27 = vld [vmem:[%s20009_s3 + $0x130] sm:$0xff]  }
 0x64b   :  { %14324 = vmatpush3.bf16.msra.mxu1 %v14622_v45  ;;  %14303 = vmatprep.subr.bf16.mxu0 %v14623_v4  ;;  %v14674_v45 = vld [vmem:[%s20009_s3 + $0x1b0] sm:$0xff]   ;;  %v14675_v4 = vld [vmem:[%s20009_s3 + $0x178] sm:$0xff]  }
 0x64c   :  { %14325 = vmatprep.subr.bf16.mxu1 %v14624_v59  ;;  %v14676_v59 = vld [vmem:[%s20009_s3 + $0x1f8] sm:$0xff]  }
 0x64e   :  { %14304 = vmatpush3.bf16.msra.mxu0 %v14625_v24  ;;  %v14677_v24 = vld [vmem:[%s20009_s3 + $0x138] sm:$0xff]  }
 0x64f   :  { %14326 = vmatpush3.bf16.msra.mxu1 %v14626_v26  ;;  %14305 = vmatprep.subr.bf16.mxu0 %v14627_v15  ;;  %v14678_v26 = vld [vmem:[%s20009_s3 + $0x1b8] sm:$0xff]   ;;  %v1654_v15 = vsub.s32 4, %v19749_v37 }
 0x650   :  { %14327 = vmatprep.subr.bf16.mxu1 %v14628_v1  ;;  %v1662_v1 = vsub.s32 6, %v19749_v37 }
 0x652   :  { %14306 = vmatpush3.bf16.msra.mxu0 %v14629_v21  ;;  %v1658_v21 = vsub.s32 5, %v19749_v37 }
 0x653   :  { %14328 = vmatpush3.bf16.msra.mxu1 %v14630_v31  ;;  %14307 = vmatprep.subr.bf16.mxu0 %v14631_v28  ;;  %v1666_v31 = vsub.s32 7, %v19749_v37  ;;  %v1655_v28 = vrot.slane %v19773_v3, %v1654_v15 }
 0x654   :  { %14329 = vmatprep.subr.bf16.mxu1 %v14632_v49  ;;  %v1663_v49 = vrot.slane %v19773_v3, %v1662_v1 }
 0x655   :  { %v1667_v32 = vrot.slane %v19773_v3, %v1666_v31 }
 0x656   :  { %14308 = vmatpush3.bf16.msra.mxu0 %v14633_v29  ;;  %v1659_v29 = vrot.slane %v19773_v3, %v1658_v21 }
 0x657   :  { %14330 = vmatpush3.bf16.msra.mxu1 %v14634_v50  ;;  %14309 = vmatprep.subr.bf16.mxu0 %v14635_v19 }
 0x658   :  { %14331 = vmatprep.subr.bf16.mxu1 %v14636_v34 }
 0x65a   :  { %14310 = vmatpush3.bf16.msra.mxu0 %v14637_v35 }
 0x65b   :  { %14332 = vmatpush3.bf16.msra.mxu1 %v14638_v40  ;;  %14311 = vmatprep.subr.bf16.mxu0 %v14639_v62 }
 0x65c   :  { %14333 = vmatprep.subr.bf16.mxu1 %v14640_v30 }
 0x65e   :  { %14312 = vmatpush3.bf16.msra.mxu0 %v14641_v25 }
 0x65f   :  { %14334 = vmatpush3.bf16.msra.mxu1 %v14642_v44  ;;  %14313 = vmatprep.subr.bf16.mxu0 %v14643_v47 }
 0x660   :  { %14335 = vmatprep.subr.bf16.mxu1 %v14644_v56 }
 0x662   :  { %14314 = vmatpush3.bf16.msra.mxu0 %v14645_v18 }
 0x663   :  { %14336 = vmatpush3.bf16.msra.mxu1 %v14646_v0  ;;  %14343 = vmatprep.subr.bf16.mxu0 %v14647_v48 }
 0x664   :  { %14365 = vmatprep.subr.bf16.mxu1 %v14648_v46 }
 0x665   :  { %12464 = vmatmul.mubr.bf16.vlgmr.msra.gmra.mrb[8].mxu0 %v11904_v6 }
 0x666   :  { %12504 = vmatmul.mubr.bf16.vlgmr.msra.gmra.mrb[8].mxu1 %v11906_v10  ;;  %14344 = vmatpush3.bf16.msra.mxu0 %v14649_v23 }
 0x667   :  { %14366 = vmatpush3.bf16.msra.mxu1 %v14650_v7  ;;  %14345 = vmatprep.subr.bf16.mxu0 %v14651_v8 }
 0x668   :  { %14367 = vmatprep.subr.bf16.mxu1 %v14652_v54 }
 0x66a   :  { %14346 = vmatpush3.bf16.msra.mxu0 %v14653_v60 }
 0x66b   :  { %14368 = vmatpush3.bf16.msra.mxu1 %v14654_v11  ;;  %14347 = vmatprep.subr.bf16.mxu0 %v14655_v58 }
 0x66c   :  { %14369 = vmatprep.subr.bf16.mxu1 %v14656_v13  ;;  %v14681_v13 = vmov 6  }
 0x66d   :  { %14589 = vset.pattern.permute.xlu0 %v14681_v13 }
 0x66e   :  { %14348 = vmatpush3.bf16.msra.mxu0 %v14657_v63 }
 0x66f   :  { %14370 = vmatpush3.bf16.msra.mxu1 %v14658_v36  ;;  %14349 = vmatprep.subr.bf16.mxu0 %v14659_v14 }
 0x670   :  { %14371 = vmatprep.subr.bf16.mxu1 %v14660_v16 }
 0x672   :  { %14350 = vmatpush3.bf16.msra.mxu0 %v14661_v17 }
 0x673   :  { %14372 = vmatpush3.bf16.msra.mxu1 %v14662_v51  ;;  %14351 = vmatprep.subr.bf16.mxu0 %v14663_v12 }
 0x674   :  { %14373 = vmatprep.subr.bf16.mxu1 %v14664_v57 }
 0x676   :  { %14352 = vmatpush3.bf16.msra.mxu0 %v14665_v22 }
 0x677   :  { %14374 = vmatpush3.bf16.msra.mxu1 %v14666_v61  ;;  %14353 = vmatprep.subr.bf16.mxu0 %v14667_v5 }
 0x678   :  { %14375 = vmatprep.subr.bf16.mxu1 %v14668_v9 }
 0x67a   :  { %14354 = vmatpush3.bf16.msra.mxu0 %v14669_v55 }
 0x67b   :  { %14376 = vmatpush3.bf16.msra.mxu1 %v14670_v53  ;;  %14355 = vmatprep.subr.bf16.mxu0 %v14671_v2 }
 0x67c   :  { %14377 = vmatprep.subr.bf16.mxu1 %v14672_v20 }
 0x67e   :  { %14356 = vmatpush3.bf16.msra.mxu0 %v14673_v27 }
 0x67f   :  { %14378 = vmatpush3.bf16.msra.mxu1 %v14674_v45  ;;  %14357 = vmatprep.subr.bf16.mxu0 %v14675_v4 }
 0x680   :  { %14379 = vmatprep.subr.bf16.mxu1 %v14676_v59 }
 0x682   :  { %14358 = vmatpush3.bf16.msra.mxu0 %v14677_v24 }
 0x683   :  { %14380 = vmatpush3.bf16.msra.mxu1 %v14678_v26 }
 0x718   :  { %v11356_v50 = vpop.f32.mrb[4].mxu0  ;;  %v11889_v33 = vpop.f32.mrb[4].mxu1 }
 0x719   :  { %v14391_v19 = vadd.f32 %v11356_v50, %v1655_v28  ;;  %v11358_v34 = vpop.f32.mrb[5].mxu0  ;;  %v14393_v35 = vadd.f32 %v11889_v33, %v1663_v49  ;;  %v11891_v40 = vpop.f32.mrb[5].mxu1 }
 0x71a   :  { %v14392_v38 = vadd.f32 %v11358_v34, %v1659_v29  ;;  %v11360_v62 = vpop.f32.mrb[6].mxu0  ;;  %v14394_v30 = vadd.f32 %v11891_v40, %v1667_v32  ;;  %v11893_v25 = vpop.f32.mrb[6].mxu1 }
 0x71b   :  { %v11900_v41 = vmax.f32 %v14391_v19, 0.0  ;;  %v11361_v37 = vpop.f32.mrb[7].mxu0  ;;  %v11902_v42 = vmax.f32 %v14393_v35, 0.0  ;;  %v11894_v47 = vpop.f32.mrb[7].mxu1 }
 0x71c   :  { %v11901_v44 = vmax.f32 %v14392_v38, 0.0  ;;  %v11903_v52 = vmax.f32 %v14394_v30, 0.0 }
 0x71d   :  { %v11908_v18 = vpack.c.bf16 %v11900_v41, %v11900_v41  ;;  %v11910_v3 = vpack.c.bf16 %v11902_v42, %v11902_v42 }
 0x71e   :  { %v11909_v56 = vpack.c.bf16 %v11901_v44, %v11901_v44  ;;  %v11911_v39 = vpack.c.bf16 %v11903_v52, %v11903_v52 }
 0x720   :  { %12543 = vmatprep.mubr.bf16.mxu0 %v11909_v56  ;;  %12583 = vmatprep.mubr.bf16.mxu1 %v11911_v39 }
 0x721   :  { %12544 = vmatmul.mubr.bf16.vlgmr.msra.gmra.mrb[12].mxu0 %v11908_v18  ;;  %12584 = vmatmul.mubr.bf16.vlgmr.msra.gmra.mrb[12].mxu1 %v11910_v3 }
 0x738   :  { %v14315_v0 = vpop.f32.mrb[8].mxu0 }
 0x739   :  { %v14337_v48 = vpop.f32.mrb[8].mxu1  ;;  %v14316_v46 = vpop.f32.mrb[9].mxu0 }
 0x73a   :  { %v14317_v23 = vadd.f32 %v14316_v46, %v14315_v0  ;;  %v14338_v6 = vpop.f32.mrb[9].mxu1  ;;  %v14318_v7 = vpop.f32.mrb[10].mxu0 }
 0x73b   :  { %v14339_v8 = vadd.f32 %v14338_v6, %v14337_v48  ;;  %v14340_v10 = vpop.f32.mrb[10].mxu1  ;;  %v14319_v54 = vpop.f32.mrb[11].mxu0 }
 0x73c   :  { %v12466_v60 = vadd.f32 %v14317_v23, %v14234_v43  ;;  %v14341_v11 = vpop.f32.mrb[11].mxu1 }
 0x73e   :  { %v12506_v58 = vadd.f32 %v14339_v8, %v12466_v60 }
 0x7f4   :  { %v14359_v63 = vpop.f32.mrb[12].mxu0  ;;  %v14381_v36 = vpop.f32.mrb[12].mxu1 }
 0x7f5   :  { %v14360_v14 = vpop.f32.mrb[13].mxu0  ;;  %v14382_v17 = vpop.f32.mrb[13].mxu1 }
 0x7f6   :  { %v14361_v16 = vadd.f32 %v14360_v14, %v14359_v63  ;;  %v14362_v51 = vpop.f32.mrb[14].mxu0  ;;  %v14383_v12 = vadd.f32 %v14382_v17, %v14381_v36  ;;  %v14384_v57 = vpop.f32.mrb[14].mxu1 }
 0x7f7   :  { %v14363_v22 = vpop.f32.mrb[15].mxu0  ;;  %v14385_v5 = vpop.f32.mrb[15].mxu1 }
 0x7f8   :  { %v12546_v61 = vadd.f32 %v14361_v16, %v12506_v58 }
 0x7fa   :  { %v12586_v9 = vadd.f32 %v14383_v12, %v12546_v61 }
 0x7fc   :  { %v12598_v55 = vsel %vm12597_vm0, %v12586_v9, 0.0 }
 0x7fd   :  { %12599 = vadd.xlane.f32.xlu0 %v12598_v55 }
 0x813   :  { %12593 = vperm.xlu0 %14589, %v12586_v9  }
 0x88a   :  { %v12600_v53 = vpop.xlane.xlu0 %12599 }
 0x88b   :  { %v12602_v20 = vmul.f32 0.16666667, %v12600_v53 }
 0x892   :  { %v12594_v2 = vpop.permute.xlu0 %12593 }
 0x893   :  { %v12596_v27 = vadd.f32 %v12594_v2, %v12586_v9 }
 0x895   :  { %v12603_v45 = vsub.f32 %v12596_v27, %v12602_v20 }
 0x897   :  { %12604 = vst.msk [vmem:[%s20012_s5] sm:$0xff] %vm12597_vm0, %v12603_v45 }

</bundles_post_ra>
